<compile_context>
chip_gen: v5e
topology: v5e:2x2
jax: 0.10.0
libtpu: 0.0.40
codegen_flags: <defaults>
</compile_context>

<pallas_src>
import functools

import jax
import jax.numpy as jnp
from jax.experimental import pallas as pl
from jax.experimental.pallas import tpu as pltpu

K = 7          # conv kernel size
PAD = 3        # conv padding


def _round_up(v, m):
    return (v + m - 1) // m * m


def _largest_divisor_leq(n, cap):
    best = 1
    for d in range(1, n + 1):
        if n % d == 0 and d <= cap:
            best = d
    return best


def _is_multi_tensorcore():
    """Best-effort: True for parts with >1 TensorCore per chip (v7x)."""
    try:
        kind = jax.devices()[0].device_kind.lower()
    except Exception:
        return False
    return "v7" in kind


def _pick_blocks(N, C, HW, itemsize, multi_tc):
    """(nb, cb): batch elems / channels per grid step, padded-VMEM aware."""
    budget = 6 << 20                                  # per input buffer (x2 double-buffered)
    hw_pad = _round_up(HW, 128)

    def in_blk_bytes(nb, cb):
        # (8,128)-tiled footprint of the (nb, cb, HW) VMEM block.
        return nb * _round_up(cb, 8) * hw_pad * itemsize

    nb_cap = N
    if multi_tc and N >= 2:
        nb_cap = max(1, N // 2)                       # >= 2 batch blocks so both v7x TCs get work

    nb = 1
    for d in range(1, N + 1):
        if N % d == 0 and d <= nb_cap and in_blk_bytes(d, C) <= budget:
            nb = d

    cb = C
    if in_blk_bytes(nb, C) > budget:
        # Large C: nb=1 + a channel-block grid axis.  cb must be a multiple of 8
        # (or all of C) to satisfy the (8,128) block-shape constraint.
        nb = 1
        valid = [d for d in range(1, C + 1) if C % d == 0 and (d == C or d % 8 == 0)]
        fitting = [d for d in valid if in_blk_bytes(1, d) <= budget]
        cb = max(fitting) if fitting else min(valid)
    return nb, cb


def _spatial_attn_kernel(w_ref, b_ref, x_ref, o_ref,
                         sum_ref, max_ref, pad_ref, shift_ref, *,
                         C, CB, CCH, H, W, NB, WBUF):
    """One (batch-block, channel-block) grid step.

    w_ref:     SMEM f32[2*K*K]                  flattened conv weight (c0=avg, c1=max)
    b_ref:     SMEM f32[1]                      conv bias
    x_ref:     VMEM x.dtype[NB, CB, H*W]        lane-dense input block
    o_ref:     VMEM f32[NB, 1, H*W]             lane-dense output block
    sum_ref:   VMEM f32[NB, H*W]                running channel sum
    max_ref:   VMEM f32[NB, H*W]                running channel max
    pad_ref:   VMEM f32[2, H+2*PAD, WBUF]       zero-haloed avg/max conv planes
    shift_ref: VMEM f32[K-1, 2, H+2*PAD, WBUF]  lane-shifted copies (kj != PAD)
    """
    cb = pl.program_id(1)
    NCH = CB // CCH

    # ---- channel-block reduction on lane-dense (H*W) planes -----------------
    # Chunked so only a (CCH, H*W) f32 value is live at a time; each chunk
    # reduces with jnp.sum/jnp.max (tree), so the serial chain is only NCH long.
    s_list, m_list = [], []
    for b in range(NB):
        blk_s = None
        blk_m = None
        for ci in range(NCH):
            xc = x_ref[b, ci * CCH:(ci + 1) * CCH, :].astype(jnp.float32)
            s = jnp.sum(xc, axis=0)
            m = jnp.max(xc, axis=0)
            if blk_s is None:
                blk_s, blk_m = s, m
            else:
                blk_s = blk_s + s
                blk_m = jnp.maximum(blk_m, m)
        s_list.append(blk_s)
        m_list.append(blk_m)

    @pl.when(cb == 0)
    def _():
        for b in range(NB):
            sum_ref[b, :] = s_list[b]
            max_ref[b, :] = m_list[b]

    @pl.when(cb != 0)
    def _():
        for b in range(NB):
            sum_ref[b, :] = sum_ref[b, :] + s_list[b]
            max_ref[b, :] = jnp.maximum(max_ref[b, :], m_list[b])

    # ---- finalize on the last channel block: mean, 7x7 conv (2->1), sigmoid --
    @pl.when(cb == pl.num_programs(1) - 1)
    def _():
        inv_c = jnp.float32(1.0 / C)
        # SMEM scalar reads hoisted: once per batch block, not per element.
        w_avg = [w_ref[t] for t in range(K * K)]
        w_max = [w_ref[K * K + t] for t in range(K * K)]
        bias_plane = jnp.full((H, WBUF), b_ref[0], dtype=jnp.float32)

        # Zero the haloed planes once; the halo rows and the zero lane tail
        # (columns >= W) stay zero, which the roll-based column shifts rely on
        # to reproduce the conv's zero padding.
        pad_ref[...] = jnp.zeros_like(pad_ref)

        for b in range(NB):
            # Relayout the two reduced flat planes into the 2D conv scratch,
            # one W-wide row at a time (only these 2 tiny planes are relaid).
            for r in range(H):
                pad_ref[0, PAD + r:PAD + r + 1, 0:W] = (
                    sum_ref[b:b + 1, r * W:(r + 1) * W] * inv_c)
                pad_ref[1, PAD + r:PAD + r + 1, 0:W] = (
                    max_ref[b:b + 1, r * W:(r + 1) * W])

            # 6 lane (column) shifts per map via XLU rolls; kj == PAD reads the
            # unshifted pad_ref directly (no extra copy/store).
            for cc in range(2):
                plane = pad_ref[cc]                       # (H + 2*PAD, WBUF)
                for kj in range(K):
                    if kj == PAD:
                        continue
                    sidx = kj if kj < PAD else kj - 1
                    shift_ref[sidx, cc] = pltpu.roll(plane, (PAD - kj) % WBUF, axis=1)

            # 7x7 x 2 tap accumulation, lane-dense over full WBUF; two
            # independent accumulators shorten the VALU dependency chain.
            acc_a = jnp.zeros((H, WBUF), jnp.float32)
            acc_m = jnp.zeros((H, WBUF), jnp.float32)
            for ki in range(K):
                for kj in range(K):
                    if kj == PAD:
                        a_pl = pad_ref[0, ki:ki + H, :]
                        m_pl = pad_ref[1, ki:ki + H, :]
                    else:
                        sidx = kj if kj < PAD else kj - 1
                        a_pl = shift_ref[sidx, 0, ki:ki + H, :]
                        m_pl = shift_ref[sidx, 1, ki:ki + H, :]
                    t = ki * K + kj
                    acc_a = acc_a + a_pl * w_avg[t]
                    acc_m = acc_m + m_pl * w_max[t]

            out2d = jax.nn.sigmoid((bias_plane + acc_a + acc_m)[:, 0:W])   # (H, W)
            # Write the lane-dense output block in flat (H*W) layout.
            for r in range(H):
                o_ref[b, 0:1, r * W:(r + 1) * W] = out2d[r:r + 1, :]


def spatial_attention(x, weight, bias):
    """x: (N, C, H, W) float; weight: (1, 2, 7, 7); bias: (1,). Returns (N, 1, H, W) f32."""
    N, C, H, W = x.shape
    HW = H * W
    Hp = H + 2 * PAD
    # Lane-padded conv-scratch width: >= PAD zero lanes after the data so cyclic
    # lane rolls wrap zeros (== conv zero padding); whole 128-lane vregs.
    Wbuf = _round_up(W + 2 * PAD, 128)

    multi_tc = _is_multi_tensorcore()
    nb, cb = _pick_blocks(N, C, HW, x.dtype.itemsize, multi_tc)
    cch = _largest_divisor_leq(cb, 32)              # channels per in-kernel chunk

    # Lane-dense views: free row-major reshapes; contiguous per-plane DMA.
    x_flat = x.reshape(N, C, HW)                    # caller's dtype, no wrapper cast
    w_flat = weight.reshape(-1).astype(jnp.float32)
    b_flat = bias.reshape(-1).astype(jnp.float32)

    kernel = functools.partial(_spatial_attn_kernel, C=C, CB=cb, CCH=cch,
                               H=H, W=W, NB=nb, WBUF=Wbuf)

    # Padded ((8,128)-tiled) VMEM accounting + explicit scoped-VMEM limit.
    hw_pad = _round_up(HW, 128)
    in_blk = nb * _round_up(cb, 8) * hw_pad * x.dtype.itemsize
    out_blk = nb * 8 * hw_pad * 4
    scratch_bytes = (2 * _round_up(nb, 8) * hw_pad * 4
                     + 2 * _round_up(Hp, 8) * Wbuf * 4
                     + (K - 1) * 2 * _round_up(Hp, 8) * Wbuf * 4)
    needed = 2 * (in_blk + out_blk) + scratch_bytes
    vmem_limit = int(min(max(needed + (8 << 20), 24 << 20), 48 << 20))

    cost = pl.CostEstimate(
        flops=N * H * W * (2 * C + 4 * K * K),
        transcendentals=N * H * W,
        bytes_accessed=N * C * H * W * x.dtype.itemsize + N * H * W * 4)

    out_flat = pl.pallas_call(
        kernel,
        out_shape=jax.ShapeDtypeStruct((N, 1, HW), jnp.float32),
        grid=(N // nb, C // cb),
        in_specs=[
            pl.BlockSpec(memory_space=pltpu.MemorySpace.SMEM),       # conv weight
            pl.BlockSpec(memory_space=pltpu.MemorySpace.SMEM),       # conv bias
            pl.BlockSpec((nb, cb, HW), lambda g, c: (g, c, 0)),      # lane-dense input
        ],
        out_specs=pl.BlockSpec((nb, 1, HW), lambda g, c: (g, 0, 0)),  # lane-dense output
        scratch_shapes=[
            pltpu.VMEM((nb, HW), jnp.float32),                # running channel sum
            pltpu.VMEM((nb, HW), jnp.float32),                # running channel max
            pltpu.VMEM((2, Hp, Wbuf), jnp.float32),           # zero-haloed avg/max planes
            pltpu.VMEM((K - 1, 2, Hp, Wbuf), jnp.float32),    # lane-shifted copies
        ],
        compiler_params=pltpu.CompilerParams(
            dimension_semantics=("parallel", "arbitrary"),
            vmem_limit_bytes=vmem_limit),
        cost_estimate=cost,
    )(w_flat, b_flat, x_flat)

    # TODO(synk): for N == 1 on v7x, add an H-block "parallel" grid axis (with a
    # PAD-row halo in the index_map) so both TensorCores get work.
    return out_flat.reshape(N, 1, H, W)


def _reference(x, weight, bias):
    """Plain-JAX reference with identical semantics (for verification)."""
    avg = jnp.mean(x, axis=1, keepdims=True)
    mx = jnp.max(x, axis=1, keepdims=True)
    feat = jnp.concatenate([avg, mx], axis=1)               # (N,2,H,W)
    feat_pad = jnp.pad(feat, ((0, 0), (0, 0), (PAD, PAD), (PAD, PAD)))
    N, _, H, W = x.shape
    out = jnp.zeros((N, 1, H, W), jnp.float32) + bias[0]
    for ki in range(K):
        for kj in range(K):
            for c in range(2):
                out = out + feat_pad[:, c:c + 1, ki:ki + H, kj:kj + W] * weight[0, c, ki, kj]
    return jax.nn.sigmoid(out)


if __name__ == "__main__":
    key = jax.random.PRNGKey(0)
    kx, kw, kb = jax.random.split(key, 3)

    N, C, H, W = 2, 4, 16, 16
    x = jax.random.normal(kx, (N, C, H, W), dtype=jnp.float32)

    # Deterministic synthetic conv parameters (nn.Conv2d(2, 1, 7, padding=3)).
    fan_in = 2 * K * K
    bound = 1.0 / float(fan_in) ** 0.5
    weight = jax.random.uniform(kw, (1, 2, K, K), jnp.float32, -bound, bound)
    bias = jax.random.uniform(kb, (1,), jnp.float32, -bound, bound)

    out = jax.block_until_ready(spatial_attention(x, weight, bias))

    ref = _reference(x, weight, bias)
    assert out.shape == (N, 1, H, W)
    err = float(jnp.max(jnp.abs(out - ref)))
    assert err < 1e-5, f"mismatch vs reference: {err}"

    print("KERNEL_OK")
</pallas_src>

<mosaic_0001>
module attributes {stable_mosaic.version = 11 : i64} {
  func.func @_spatial_attn_kernel(%arg0: i32, %arg1: i32, %arg2: memref<98xf32, #tpu.memory_space<smem>>, %arg3: memref<1xf32, #tpu.memory_space<smem>>, %arg4: memref<2x4x256xf32, #tpu.memory_space<vmem>>, %arg5: memref<2x1x256xf32, #tpu.memory_space<vmem>>, %arg6: memref<2x256xf32, #tpu.memory_space<vmem>>, %arg7: memref<2x256xf32, #tpu.memory_space<vmem>>, %arg8: memref<2x22x128xf32, #tpu.memory_space<vmem>>, %arg9: memref<6x2x22x128xf32, #tpu.memory_space<vmem>>) attributes {dimension_semantics = [#tpu.dimension_semantics<parallel>, #tpu.dimension_semantics<arbitrary>], iteration_bounds = array<i64: 1, 1>, scalar_prefetch = 0 : i64, scratch_operands = 4 : i64, tpu.core_type = #tpu.core_type<tc>, window_params = [{transform_indices = @transform_0, window_bounds = array<i64: 98>}, {transform_indices = @transform_1, window_bounds = array<i64: 1>}, {transform_indices = @transform_2, window_bounds = array<i64: 2, 4, 256>}, {transform_indices = @transform_3, window_bounds = array<i64: 2, 1, 256>}]} {
    %c0 = arith.constant 0 : index
    %c0_0 = arith.constant 0 : index
    %c0_1 = arith.constant 0 : index
    %0 = vector.load %arg4[%c0, %c0_0, %c0_1] : memref<2x4x256xf32, #tpu.memory_space<vmem>>, vector<1x4x256xf32>
    %1 = vector.shape_cast %0 : vector<1x4x256xf32> to vector<4x256xf32>
    %cst = arith.constant dense<0.000000e+00> : vector<256xf32>
    %2 = vector.multi_reduction <add>, %1, %cst [0] : vector<4x256xf32> to vector<256xf32>
    %cst_2 = arith.constant dense<0xFF800000> : vector<256xf32>
    %3 = vector.multi_reduction <maximumf>, %1, %cst_2 [0] : vector<4x256xf32> to vector<256xf32>
    %c1 = arith.constant 1 : index
    %c0_3 = arith.constant 0 : index
    %c0_4 = arith.constant 0 : index
    %4 = vector.load %arg4[%c1, %c0_3, %c0_4] : memref<2x4x256xf32, #tpu.memory_space<vmem>>, vector<1x4x256xf32>
    %5 = vector.shape_cast %4 : vector<1x4x256xf32> to vector<4x256xf32>
    %cst_5 = arith.constant dense<0.000000e+00> : vector<256xf32>
    %6 = vector.multi_reduction <add>, %5, %cst_5 [0] : vector<4x256xf32> to vector<256xf32>
    %cst_6 = arith.constant dense<0xFF800000> : vector<256xf32>
    %7 = vector.multi_reduction <maximumf>, %5, %cst_6 [0] : vector<4x256xf32> to vector<256xf32>
    %c0_i32 = arith.constant 0 : i32
    %8 = arith.cmpi eq, %arg1, %c0_i32 : i32
    %9 = arith.extui %8 : i1 to i32
    %c0_i32_7 = arith.constant 0 : i32
    %10 = arith.cmpi ne, %9, %c0_i32_7 : i32
    scf.if %10 {
      %c0_12 = arith.constant 0 : index
      %c0_13 = arith.constant 0 : index
      %17 = vector.load %arg6[%c0_12, %c0_13] : memref<2x256xf32, #tpu.memory_space<vmem>>, vector<1x256xf32>
      %18 = vector.shape_cast %17 : vector<1x256xf32> to vector<256xf32>
      %19 = vector.shape_cast %2 : vector<256xf32> to vector<1x256xf32>
      tpu.vector_store %arg6[%c0_12, %c0_13], %19 {strides = array<i32>} : memref<2x256xf32, #tpu.memory_space<vmem>>, vector<1x256xf32>,
      %c0_14 = arith.constant 0 : index
      %c0_15 = arith.constant 0 : index
      %20 = vector.load %arg7[%c0_14, %c0_15] : memref<2x256xf32, #tpu.memory_space<vmem>>, vector<1x256xf32>
      %21 = vector.shape_cast %20 : vector<1x256xf32> to vector<256xf32>
      %22 = vector.shape_cast %3 : vector<256xf32> to vector<1x256xf32>
      tpu.vector_store %arg7[%c0_14, %c0_15], %22 {strides = array<i32>} : memref<2x256xf32, #tpu.memory_space<vmem>>, vector<1x256xf32>,
      %c1_16 = arith.constant 1 : index
      %c0_17 = arith.constant 0 : index
      %23 = vector.load %arg6[%c1_16, %c0_17] : memref<2x256xf32, #tpu.memory_space<vmem>>, vector<1x256xf32>
      %24 = vector.shape_cast %23 : vector<1x256xf32> to vector<256xf32>
      %25 = vector.shape_cast %6 : vector<256xf32> to vector<1x256xf32>
      tpu.vector_store %arg6[%c1_16, %c0_17], %25 {strides = array<i32>} : memref<2x256xf32, #tpu.memory_space<vmem>>, vector<1x256xf32>,
      %c1_18 = arith.constant 1 : index
      %c0_19 = arith.constant 0 : index
      %26 = vector.load %arg7[%c1_18, %c0_19] : memref<2x256xf32, #tpu.memory_space<vmem>>, vector<1x256xf32>
      %27 = vector.shape_cast %26 : vector<1x256xf32> to vector<256xf32>
      %28 = vector.shape_cast %7 : vector<256xf32> to vector<1x256xf32>
      tpu.vector_store %arg7[%c1_18, %c0_19], %28 {strides = array<i32>} : memref<2x256xf32, #tpu.memory_space<vmem>>, vector<1x256xf32>,
    } else {
    }
    %c0_i32_8 = arith.constant 0 : i32
    %11 = arith.cmpi ne, %arg1, %c0_i32_8 : i32
    %12 = arith.extui %11 : i1 to i32
    %c0_i32_9 = arith.constant 0 : i32
    %13 = arith.cmpi ne, %12, %c0_i32_9 : i32
    scf.if %13 {
      %c0_12 = arith.constant 0 : index
      %c0_13 = arith.constant 0 : index
      %17 = vector.load %arg6[%c0_12, %c0_13] : memref<2x256xf32, #tpu.memory_space<vmem>>, vector<1x256xf32>
      %18 = vector.shape_cast %17 : vector<1x256xf32> to vector<256xf32>
      %19 = arith.addf %18, %2 : vector<256xf32>
      %c0_14 = arith.constant 0 : index
      %c0_15 = arith.constant 0 : index
      %20 = vector.load %arg6[%c0_14, %c0_15] : memref<2x256xf32, #tpu.memory_space<vmem>>, vector<1x256xf32>
      %21 = vector.shape_cast %20 : vector<1x256xf32> to vector<256xf32>
      %22 = vector.shape_cast %19 : vector<256xf32> to vector<1x256xf32>
      tpu.vector_store %arg6[%c0_14, %c0_15], %22 {strides = array<i32>} : memref<2x256xf32, #tpu.memory_space<vmem>>, vector<1x256xf32>,
      %c0_16 = arith.constant 0 : index
      %c0_17 = arith.constant 0 : index
      %23 = vector.load %arg7[%c0_16, %c0_17] : memref<2x256xf32, #tpu.memory_space<vmem>>, vector<1x256xf32>
      %24 = vector.shape_cast %23 : vector<1x256xf32> to vector<256xf32>
      %25 = arith.maximumf %24, %3 : vector<256xf32>
      %c0_18 = arith.constant 0 : index
      %c0_19 = arith.constant 0 : index
      %26 = vector.load %arg7[%c0_18, %c0_19] : memref<2x256xf32, #tpu.memory_space<vmem>>, vector<1x256xf32>
      %27 = vector.shape_cast %26 : vector<1x256xf32> to vector<256xf32>
      %28 = vector.shape_cast %25 : vector<256xf32> to vector<1x256xf32>
      tpu.vector_store %arg7[%c0_18, %c0_19], %28 {strides = array<i32>} : memref<2x256xf32, #tpu.memory_space<vmem>>, vector<1x256xf32>,
      %c1_20 = arith.constant 1 : index
      %c0_21 = arith.constant 0 : index
      %29 = vector.load %arg6[%c1_20, %c0_21] : memref<2x256xf32, #tpu.memory_space<vmem>>, vector<1x256xf32>
      %30 = vector.shape_cast %29 : vector<1x256xf32> to vector<256xf32>
      %31 = arith.addf %30, %6 : vector<256xf32>
      %c1_22 = arith.constant 1 : index
      %c0_23 = arith.constant 0 : index
      %32 = vector.load %arg6[%c1_22, %c0_23] : memref<2x256xf32, #tpu.memory_space<vmem>>, vector<1x256xf32>
      %33 = vector.shape_cast %32 : vector<1x256xf32> to vector<256xf32>
      %34 = vector.shape_cast %31 : vector<256xf32> to vector<1x256xf32>
      tpu.vector_store %arg6[%c1_22, %c0_23], %34 {strides = array<i32>} : memref<2x256xf32, #tpu.memory_space<vmem>>, vector<1x256xf32>,
      %c1_24 = arith.constant 1 : index
      %c0_25 = arith.constant 0 : index
      %35 = vector.load %arg7[%c1_24, %c0_25] : memref<2x256xf32, #tpu.memory_space<vmem>>, vector<1x256xf32>
      %36 = vector.shape_cast %35 : vector<1x256xf32> to vector<256xf32>
      %37 = arith.maximumf %36, %7 : vector<256xf32>
      %c1_26 = arith.constant 1 : index
      %c0_27 = arith.constant 0 : index
      %38 = vector.load %arg7[%c1_26, %c0_27] : memref<2x256xf32, #tpu.memory_space<vmem>>, vector<1x256xf32>
      %39 = vector.shape_cast %38 : vector<1x256xf32> to vector<256xf32>
      %40 = vector.shape_cast %37 : vector<256xf32> to vector<1x256xf32>
      tpu.vector_store %arg7[%c1_26, %c0_27], %40 {strides = array<i32>} : memref<2x256xf32, #tpu.memory_space<vmem>>, vector<1x256xf32>,
    } else {
    }
    %c0_i32_10 = arith.constant 0 : i32
    %14 = arith.cmpi eq, %arg1, %c0_i32_10 : i32
    %15 = arith.extui %14 : i1 to i32
    %c0_i32_11 = arith.constant 0 : i32
    %16 = arith.cmpi ne, %15, %c0_i32_11 : i32
    scf.if %16 {
      %c0_12 = arith.constant 0 : index
      %17 = memref.load %arg2[%c0_12] : memref<98xf32, #tpu.memory_space<smem>>
      %c1_13 = arith.constant 1 : index
      %18 = memref.load %arg2[%c1_13] : memref<98xf32, #tpu.memory_space<smem>>
      %c2 = arith.constant 2 : index
      %19 = memref.load %arg2[%c2] : memref<98xf32, #tpu.memory_space<smem>>
      %c3 = arith.constant 3 : index
      %20 = memref.load %arg2[%c3] : memref<98xf32, #tpu.memory_space<smem>>
      %c4 = arith.constant 4 : index
      %21 = memref.load %arg2[%c4] : memref<98xf32, #tpu.memory_space<smem>>
      %c5 = arith.constant 5 : index
      %22 = memref.load %arg2[%c5] : memref<98xf32, #tpu.memory_space<smem>>
      %c6 = arith.constant 6 : index
      %23 = memref.load %arg2[%c6] : memref<98xf32, #tpu.memory_space<smem>>
      %c7 = arith.constant 7 : index
      %24 = memref.load %arg2[%c7] : memref<98xf32, #tpu.memory_space<smem>>
      %c8 = arith.constant 8 : index
      %25 = memref.load %arg2[%c8] : memref<98xf32, #tpu.memory_space<smem>>
      %c9 = arith.constant 9 : index
      %26 = memref.load %arg2[%c9] : memref<98xf32, #tpu.memory_space<smem>>
      %c10 = arith.constant 10 : index
      %27 = memref.load %arg2[%c10] : memref<98xf32, #tpu.memory_space<smem>>
      %c11 = arith.constant 11 : index
      %28 = memref.load %arg2[%c11] : memref<98xf32, #tpu.memory_space<smem>>
      %c12 = arith.constant 12 : index
      %29 = memref.load %arg2[%c12] : memref<98xf32, #tpu.memory_space<smem>>
      %c13 = arith.constant 13 : index
      %30 = memref.load %arg2[%c13] : memref<98xf32, #tpu.memory_space<smem>>
      %c14 = arith.constant 14 : index
      %31 = memref.load %arg2[%c14] : memref<98xf32, #tpu.memory_space<smem>>
      %c15 = arith.constant 15 : index
      %32 = memref.load %arg2[%c15] : memref<98xf32, #tpu.memory_space<smem>>
      %c16 = arith.constant 16 : index
      %33 = memref.load %arg2[%c16] : memref<98xf32, #tpu.memory_space<smem>>
      %c17 = arith.constant 17 : index
      %34 = memref.load %arg2[%c17] : memref<98xf32, #tpu.memory_space<smem>>
      %c18 = arith.constant 18 : index
      %35 = memref.load %arg2[%c18] : memref<98xf32, #tpu.memory_space<smem>>
      %c19 = arith.constant 19 : index
      %36 = memref.load %arg2[%c19] : memref<98xf32, #tpu.memory_space<smem>>
      %c20 = arith.constant 20 : index
      %37 = memref.load %arg2[%c20] : memref<98xf32, #tpu.memory_space<smem>>
      %c21 = arith.constant 21 : index
      %38 = memref.load %arg2[%c21] : memref<98xf32, #tpu.memory_space<smem>>
      %c22 = arith.constant 22 : index
      %39 = memref.load %arg2[%c22] : memref<98xf32, #tpu.memory_space<smem>>
      %c23 = arith.constant 23 : index
      %40 = memref.load %arg2[%c23] : memref<98xf32, #tpu.memory_space<smem>>
      %c24 = arith.constant 24 : index
      %41 = memref.load %arg2[%c24] : memref<98xf32, #tpu.memory_space<smem>>
      %c25 = arith.constant 25 : index
      %42 = memref.load %arg2[%c25] : memref<98xf32, #tpu.memory_space<smem>>
      %c26 = arith.constant 26 : index
      %43 = memref.load %arg2[%c26] : memref<98xf32, #tpu.memory_space<smem>>
      %c27 = arith.constant 27 : index
      %44 = memref.load %arg2[%c27] : memref<98xf32, #tpu.memory_space<smem>>
      %c28 = arith.constant 28 : index
      %45 = memref.load %arg2[%c28] : memref<98xf32, #tpu.memory_space<smem>>
      %c29 = arith.constant 29 : index
      %46 = memref.load %arg2[%c29] : memref<98xf32, #tpu.memory_space<smem>>
      %c30 = arith.constant 30 : index
      %47 = memref.load %arg2[%c30] : memref<98xf32, #tpu.memory_space<smem>>
      %c31 = arith.constant 31 : index
      %48 = memref.load %arg2[%c31] : memref<98xf32, #tpu.memory_space<smem>>
      %c32 = arith.constant 32 : index
      %49 = memref.load %arg2[%c32] : memref<98xf32, #tpu.memory_space<smem>>
      %c33 = arith.constant 33 : index
      %50 = memref.load %arg2[%c33] : memref<98xf32, #tpu.memory_space<smem>>
      %c34 = arith.constant 34 : index
      %51 = memref.load %arg2[%c34] : memref<98xf32, #tpu.memory_space<smem>>
      %c35 = arith.constant 35 : index
      %52 = memref.load %arg2[%c35] : memref<98xf32, #tpu.memory_space<smem>>
      %c36 = arith.constant 36 : index
      %53 = memref.load %arg2[%c36] : memref<98xf32, #tpu.memory_space<smem>>
      %c37 = arith.constant 37 : index
      %54 = memref.load %arg2[%c37] : memref<98xf32, #tpu.memory_space<smem>>
      %c38 = arith.constant 38 : index
      %55 = memref.load %arg2[%c38] : memref<98xf32, #tpu.memory_space<smem>>
      %c39 = arith.constant 39 : index
      %56 = memref.load %arg2[%c39] : memref<98xf32, #tpu.memory_space<smem>>
      %c40 = arith.constant 40 : index
      %57 = memref.load %arg2[%c40] : memref<98xf32, #tpu.memory_space<smem>>
      %c41 = arith.constant 41 : index
      %58 = memref.load %arg2[%c41] : memref<98xf32, #tpu.memory_space<smem>>
      %c42 = arith.constant 42 : index
      %59 = memref.load %arg2[%c42] : memref<98xf32, #tpu.memory_space<smem>>
      %c43 = arith.constant 43 : index
      %60 = memref.load %arg2[%c43] : memref<98xf32, #tpu.memory_space<smem>>
      %c44 = arith.constant 44 : index
      %61 = memref.load %arg2[%c44] : memref<98xf32, #tpu.memory_space<smem>>
      %c45 = arith.constant 45 : index
      %62 = memref.load %arg2[%c45] : memref<98xf32, #tpu.memory_space<smem>>
      %c46 = arith.constant 46 : index
      %63 = memref.load %arg2[%c46] : memref<98xf32, #tpu.memory_space<smem>>
      %c47 = arith.constant 47 : index
      %64 = memref.load %arg2[%c47] : memref<98xf32, #tpu.memory_space<smem>>
      %c48 = arith.constant 48 : index
      %65 = memref.load %arg2[%c48] : memref<98xf32, #tpu.memory_space<smem>>
      %c49 = arith.constant 49 : index
      %66 = memref.load %arg2[%c49] : memref<98xf32, #tpu.memory_space<smem>>
      %c50 = arith.constant 50 : index
      %67 = memref.load %arg2[%c50] : memref<98xf32, #tpu.memory_space<smem>>
      %c51 = arith.constant 51 : index
      %68 = memref.load %arg2[%c51] : memref<98xf32, #tpu.memory_space<smem>>
      %c52 = arith.constant 52 : index
      %69 = memref.load %arg2[%c52] : memref<98xf32, #tpu.memory_space<smem>>
      %c53 = arith.constant 53 : index
      %70 = memref.load %arg2[%c53] : memref<98xf32, #tpu.memory_space<smem>>
      %c54 = arith.constant 54 : index
      %71 = memref.load %arg2[%c54] : memref<98xf32, #tpu.memory_space<smem>>
      %c55 = arith.constant 55 : index
      %72 = memref.load %arg2[%c55] : memref<98xf32, #tpu.memory_space<smem>>
      %c56 = arith.constant 56 : index
      %73 = memref.load %arg2[%c56] : memref<98xf32, #tpu.memory_space<smem>>
      %c57 = arith.constant 57 : index
      %74 = memref.load %arg2[%c57] : memref<98xf32, #tpu.memory_space<smem>>
      %c58 = arith.constant 58 : index
      %75 = memref.load %arg2[%c58] : memref<98xf32, #tpu.memory_space<smem>>
      %c59 = arith.constant 59 : index
      %76 = memref.load %arg2[%c59] : memref<98xf32, #tpu.memory_space<smem>>
      %c60 = arith.constant 60 : index
      %77 = memref.load %arg2[%c60] : memref<98xf32, #tpu.memory_space<smem>>
      %c61 = arith.constant 61 : index
      %78 = memref.load %arg2[%c61] : memref<98xf32, #tpu.memory_space<smem>>
      %c62 = arith.constant 62 : index
      %79 = memref.load %arg2[%c62] : memref<98xf32, #tpu.memory_space<smem>>
      %c63 = arith.constant 63 : index
      %80 = memref.load %arg2[%c63] : memref<98xf32, #tpu.memory_space<smem>>
      %c64 = arith.constant 64 : index
      %81 = memref.load %arg2[%c64] : memref<98xf32, #tpu.memory_space<smem>>
      %c65 = arith.constant 65 : index
      %82 = memref.load %arg2[%c65] : memref<98xf32, #tpu.memory_space<smem>>
      %c66 = arith.constant 66 : index
      %83 = memref.load %arg2[%c66] : memref<98xf32, #tpu.memory_space<smem>>
      %c67 = arith.constant 67 : index
      %84 = memref.load %arg2[%c67] : memref<98xf32, #tpu.memory_space<smem>>
      %c68 = arith.constant 68 : index
      %85 = memref.load %arg2[%c68] : memref<98xf32, #tpu.memory_space<smem>>
      %c69 = arith.constant 69 : index
      %86 = memref.load %arg2[%c69] : memref<98xf32, #tpu.memory_space<smem>>
      %c70 = arith.constant 70 : index
      %87 = memref.load %arg2[%c70] : memref<98xf32, #tpu.memory_space<smem>>
      %c71 = arith.constant 71 : index
      %88 = memref.load %arg2[%c71] : memref<98xf32, #tpu.memory_space<smem>>
      %c72 = arith.constant 72 : index
      %89 = memref.load %arg2[%c72] : memref<98xf32, #tpu.memory_space<smem>>
      %c73 = arith.constant 73 : index
      %90 = memref.load %arg2[%c73] : memref<98xf32, #tpu.memory_space<smem>>
      %c74 = arith.constant 74 : index
      %91 = memref.load %arg2[%c74] : memref<98xf32, #tpu.memory_space<smem>>
      %c75 = arith.constant 75 : index
      %92 = memref.load %arg2[%c75] : memref<98xf32, #tpu.memory_space<smem>>
      %c76 = arith.constant 76 : index
      %93 = memref.load %arg2[%c76] : memref<98xf32, #tpu.memory_space<smem>>
      %c77 = arith.constant 77 : index
      %94 = memref.load %arg2[%c77] : memref<98xf32, #tpu.memory_space<smem>>
      %c78 = arith.constant 78 : index
      %95 = memref.load %arg2[%c78] : memref<98xf32, #tpu.memory_space<smem>>
      %c79 = arith.constant 79 : index
      %96 = memref.load %arg2[%c79] : memref<98xf32, #tpu.memory_space<smem>>
      %c80 = arith.constant 80 : index
      %97 = memref.load %arg2[%c80] : memref<98xf32, #tpu.memory_space<smem>>
      %c81 = arith.constant 81 : index
      %98 = memref.load %arg2[%c81] : memref<98xf32, #tpu.memory_space<smem>>
      %c82 = arith.constant 82 : index
      %99 = memref.load %arg2[%c82] : memref<98xf32, #tpu.memory_space<smem>>
      %c83 = arith.constant 83 : index
      %100 = memref.load %arg2[%c83] : memref<98xf32, #tpu.memory_space<smem>>
      %c84 = arith.constant 84 : index
      %101 = memref.load %arg2[%c84] : memref<98xf32, #tpu.memory_space<smem>>
      %c85 = arith.constant 85 : index
      %102 = memref.load %arg2[%c85] : memref<98xf32, #tpu.memory_space<smem>>
      %c86 = arith.constant 86 : index
      %103 = memref.load %arg2[%c86] : memref<98xf32, #tpu.memory_space<smem>>
      %c87 = arith.constant 87 : index
      %104 = memref.load %arg2[%c87] : memref<98xf32, #tpu.memory_space<smem>>
      %c88 = arith.constant 88 : index
      %105 = memref.load %arg2[%c88] : memref<98xf32, #tpu.memory_space<smem>>
      %c89 = arith.constant 89 : index
      %106 = memref.load %arg2[%c89] : memref<98xf32, #tpu.memory_space<smem>>
      %c90 = arith.constant 90 : index
      %107 = memref.load %arg2[%c90] : memref<98xf32, #tpu.memory_space<smem>>
      %c91 = arith.constant 91 : index
      %108 = memref.load %arg2[%c91] : memref<98xf32, #tpu.memory_space<smem>>
      %c92 = arith.constant 92 : index
      %109 = memref.load %arg2[%c92] : memref<98xf32, #tpu.memory_space<smem>>
      %c93 = arith.constant 93 : index
      %110 = memref.load %arg2[%c93] : memref<98xf32, #tpu.memory_space<smem>>
      %c94 = arith.constant 94 : index
      %111 = memref.load %arg2[%c94] : memref<98xf32, #tpu.memory_space<smem>>
      %c95 = arith.constant 95 : index
      %112 = memref.load %arg2[%c95] : memref<98xf32, #tpu.memory_space<smem>>
      %c96 = arith.constant 96 : index
      %113 = memref.load %arg2[%c96] : memref<98xf32, #tpu.memory_space<smem>>
      %c97 = arith.constant 97 : index
      %114 = memref.load %arg2[%c97] : memref<98xf32, #tpu.memory_space<smem>>
      %c0_14 = arith.constant 0 : index
      %115 = memref.load %arg3[%c0_14] : memref<1xf32, #tpu.memory_space<smem>>
      %116 = vector.broadcast %115 : f32 to vector<16x128xf32>
      %cst_15 = arith.constant 0.000000e+00 : f32
      %117 = vector.broadcast %cst_15 : f32 to vector<2x22x128xf32>
      %c0_16 = arith.constant 0 : index
      %c0_17 = arith.constant 0 : index
      %c0_18 = arith.constant 0 : index
      %118 = vector.load %arg8[%c0_16, %c0_17, %c0_18] : memref<2x22x128xf32, #tpu.memory_space<vmem>>, vector<2x22x128xf32>
      tpu.vector_store %arg8[%c0_16, %c0_17, %c0_18], %117 {strides = array<i32>} : memref<2x22x128xf32, #tpu.memory_space<vmem>>, vector<2x22x128xf32>,
      %c0_19 = arith.constant 0 : index
      %c0_20 = arith.constant 0 : index
      %119 = vector.load %arg6[%c0_19, %c0_20] : memref<2x256xf32, #tpu.memory_space<vmem>>, vector<1x16xf32>
      %cst_21 = arith.constant 2.500000e-01 : f32
      %120 = vector.broadcast %cst_21 : f32 to vector<1x16xf32>
      %121 = arith.mulf %119, %120 : vector<1x16xf32>
      %c0_22 = arith.constant 0 : index
      %c3_23 = arith.constant 3 : index
      %c0_24 = arith.constant 0 : index
      %122 = vector.load %arg8[%c0_22, %c3_23, %c0_24] : memref<2x22x128xf32, #tpu.memory_space<vmem>>, vector<1x1x16xf32>
      %123 = vector.shape_cast %122 : vector<1x1x16xf32> to vector<1x16xf32>
      %124 = vector.shape_cast %121 : vector<1x16xf32> to vector<1x1x16xf32>
      tpu.vector_store %arg8[%c0_22, %c3_23, %c0_24], %124 {strides = array<i32>} : memref<2x22x128xf32, #tpu.memory_space<vmem>>, vector<1x1x16xf32>,
      %c0_25 = arith.constant 0 : index
      %c0_26 = arith.constant 0 : index
      %125 = vector.load %arg7[%c0_25, %c0_26] : memref<2x256xf32, #tpu.memory_space<vmem>>, vector<1x16xf32>
      %c1_27 = arith.constant 1 : index
      %c3_28 = arith.constant 3 : index
      %c0_29 = arith.constant 0 : index
      %126 = vector.load %arg8[%c1_27, %c3_28, %c0_29] : memref<2x22x128xf32, #tpu.memory_space<vmem>>, vector<1x1x16xf32>
      %127 = vector.shape_cast %126 : vector<1x1x16xf32> to vector<1x16xf32>
      %128 = vector.shape_cast %125 : vector<1x16xf32> to vector<1x1x16xf32>
      tpu.vector_store %arg8[%c1_27, %c3_28, %c0_29], %128 {strides = array<i32>} : memref<2x22x128xf32, #tpu.memory_space<vmem>>, vector<1x1x16xf32>,
      %c0_30 = arith.constant 0 : index
      %c16_31 = arith.constant 16 : index
      %129 = vector.load %arg6[%c0_30, %c16_31] : memref<2x256xf32, #tpu.memory_space<vmem>>, vector<1x16xf32>
      %cst_32 = arith.constant 2.500000e-01 : f32
      %130 = vector.broadcast %cst_32 : f32 to vector<1x16xf32>
      %131 = arith.mulf %129, %130 : vector<1x16xf32>
      %c0_33 = arith.constant 0 : index
      %c4_34 = arith.constant 4 : index
      %c0_35 = arith.constant 0 : index
      %132 = vector.load %arg8[%c0_33, %c4_34, %c0_35] : memref<2x22x128xf32, #tpu.memory_space<vmem>>, vector<1x1x16xf32>
      %133 = vector.shape_cast %132 : vector<1x1x16xf32> to vector<1x16xf32>
      %134 = vector.shape_cast %131 : vector<1x16xf32> to vector<1x1x16xf32>
      tpu.vector_store %arg8[%c0_33, %c4_34, %c0_35], %134 {strides = array<i32>} : memref<2x22x128xf32, #tpu.memory_space<vmem>>, vector<1x1x16xf32>,
      %c0_36 = arith.constant 0 : index
      %c16_37 = arith.constant 16 : index
      %135 = vector.load %arg7[%c0_36, %c16_37] : memref<2x256xf32, #tpu.memory_space<vmem>>, vector<1x16xf32>
      %c1_38 = arith.constant 1 : index
      %c4_39 = arith.constant 4 : index
      %c0_40 = arith.constant 0 : index
      %136 = vector.load %arg8[%c1_38, %c4_39, %c0_40] : memref<2x22x128xf32, #tpu.memory_space<vmem>>, vector<1x1x16xf32>
      %137 = vector.shape_cast %136 : vector<1x1x16xf32> to vector<1x16xf32>
      %138 = vector.shape_cast %135 : vector<1x16xf32> to vector<1x1x16xf32>
      tpu.vector_store %arg8[%c1_38, %c4_39, %c0_40], %138 {strides = array<i32>} : memref<2x22x128xf32, #tpu.memory_space<vmem>>, vector<1x1x16xf32>,
      %c0_41 = arith.constant 0 : index
      %c32_42 = arith.constant 32 : index
      %139 = vector.load %arg6[%c0_41, %c32_42] : memref<2x256xf32, #tpu.memory_space<vmem>>, vector<1x16xf32>
      %cst_43 = arith.constant 2.500000e-01 : f32
      %140 = vector.broadcast %cst_43 : f32 to vector<1x16xf32>
      %141 = arith.mulf %139, %140 : vector<1x16xf32>
      %c0_44 = arith.constant 0 : index
      %c5_45 = arith.constant 5 : index
      %c0_46 = arith.constant 0 : index
      %142 = vector.load %arg8[%c0_44, %c5_45, %c0_46] : memref<2x22x128xf32, #tpu.memory_space<vmem>>, vector<1x1x16xf32>
      %143 = vector.shape_cast %142 : vector<1x1x16xf32> to vector<1x16xf32>
      %144 = vector.shape_cast %141 : vector<1x16xf32> to vector<1x1x16xf32>
      tpu.vector_store %arg8[%c0_44, %c5_45, %c0_46], %144 {strides = array<i32>} : memref<2x22x128xf32, #tpu.memory_space<vmem>>, vector<1x1x16xf32>,
      %c0_47 = arith.constant 0 : index
      %c32_48 = arith.constant 32 : index
      %145 = vector.load %arg7[%c0_47, %c32_48] : memref<2x256xf32, #tpu.memory_space<vmem>>, vector<1x16xf32>
      %c1_49 = arith.constant 1 : index
      %c5_50 = arith.constant 5 : index
      %c0_51 = arith.constant 0 : index
      %146 = vector.load %arg8[%c1_49, %c5_50, %c0_51] : memref<2x22x128xf32, #tpu.memory_space<vmem>>, vector<1x1x16xf32>
      %147 = vector.shape_cast %146 : vector<1x1x16xf32> to vector<1x16xf32>
      %148 = vector.shape_cast %145 : vector<1x16xf32> to vector<1x1x16xf32>
      tpu.vector_store %arg8[%c1_49, %c5_50, %c0_51], %148 {strides = array<i32>} : memref<2x22x128xf32, #tpu.memory_space<vmem>>, vector<1x1x16xf32>,
      %c0_52 = arith.constant 0 : index
      %c48_53 = arith.constant 48 : index
      %149 = vector.load %arg6[%c0_52, %c48_53] : memref<2x256xf32, #tpu.memory_space<vmem>>, vector<1x16xf32>
      %cst_54 = arith.constant 2.500000e-01 : f32
      %150 = vector.broadcast %cst_54 : f32 to vector<1x16xf32>
      %151 = arith.mulf %149, %150 : vector<1x16xf32>
      %c0_55 = arith.constant 0 : index
      %c6_56 = arith.constant 6 : index
      %c0_57 = arith.constant 0 : index
      %152 = vector.load %arg8[%c0_55, %c6_56, %c0_57] : memref<2x22x128xf32, #tpu.memory_space<vmem>>, vector<1x1x16xf32>
      %153 = vector.shape_cast %152 : vector<1x1x16xf32> to vector<1x16xf32>
      %154 = vector.shape_cast %151 : vector<1x16xf32> to vector<1x1x16xf32>
      tpu.vector_store %arg8[%c0_55, %c6_56, %c0_57], %154 {strides = array<i32>} : memref<2x22x128xf32, #tpu.memory_space<vmem>>, vector<1x1x16xf32>,
      %c0_58 = arith.constant 0 : index
      %c48_59 = arith.constant 48 : index
      %155 = vector.load %arg7[%c0_58, %c48_59] : memref<2x256xf32, #tpu.memory_space<vmem>>, vector<1x16xf32>
      %c1_60 = arith.constant 1 : index
      %c6_61 = arith.constant 6 : index
      %c0_62 = arith.constant 0 : index
      %156 = vector.load %arg8[%c1_60, %c6_61, %c0_62] : memref<2x22x128xf32, #tpu.memory_space<vmem>>, vector<1x1x16xf32>
      %157 = vector.shape_cast %156 : vector<1x1x16xf32> to vector<1x16xf32>
      %158 = vector.shape_cast %155 : vector<1x16xf32> to vector<1x1x16xf32>
      tpu.vector_store %arg8[%c1_60, %c6_61, %c0_62], %158 {strides = array<i32>} : memref<2x22x128xf32, #tpu.memory_space<vmem>>, vector<1x1x16xf32>,
      %c0_63 = arith.constant 0 : index
      %c64_64 = arith.constant 64 : index
      %159 = vector.load %arg6[%c0_63, %c64_64] : memref<2x256xf32, #tpu.memory_space<vmem>>, vector<1x16xf32>
      %cst_65 = arith.constant 2.500000e-01 : f32
      %160 = vector.broadcast %cst_65 : f32 to vector<1x16xf32>
      %161 = arith.mulf %159, %160 : vector<1x16xf32>
      %c0_66 = arith.constant 0 : index
      %c7_67 = arith.constant 7 : index
      %c0_68 = arith.constant 0 : index
      %162 = vector.load %arg8[%c0_66, %c7_67, %c0_68] : memref<2x22x128xf32, #tpu.memory_space<vmem>>, vector<1x1x16xf32>
      %163 = vector.shape_cast %162 : vector<1x1x16xf32> to vector<1x16xf32>
      %164 = vector.shape_cast %161 : vector<1x16xf32> to vector<1x1x16xf32>
      tpu.vector_store %arg8[%c0_66, %c7_67, %c0_68], %164 {strides = array<i32>} : memref<2x22x128xf32, #tpu.memory_space<vmem>>, vector<1x1x16xf32>,
      %c0_69 = arith.constant 0 : index
      %c64_70 = arith.constant 64 : index
      %165 = vector.load %arg7[%c0_69, %c64_70] : memref<2x256xf32, #tpu.memory_space<vmem>>, vector<1x16xf32>
      %c1_71 = arith.constant 1 : index
      %c7_72 = arith.constant 7 : index
      %c0_73 = arith.constant 0 : index
      %166 = vector.load %arg8[%c1_71, %c7_72, %c0_73] : memref<2x22x128xf32, #tpu.memory_space<vmem>>, vector<1x1x16xf32>
      %167 = vector.shape_cast %166 : vector<1x1x16xf32> to vector<1x16xf32>
      %168 = vector.shape_cast %165 : vector<1x16xf32> to vector<1x1x16xf32>
      tpu.vector_store %arg8[%c1_71, %c7_72, %c0_73], %168 {strides = array<i32>} : memref<2x22x128xf32, #tpu.memory_space<vmem>>, vector<1x1x16xf32>,
      %c0_74 = arith.constant 0 : index
      %c80_75 = arith.constant 80 : index
      %169 = vector.load %arg6[%c0_74, %c80_75] : memref<2x256xf32, #tpu.memory_space<vmem>>, vector<1x16xf32>
      %cst_76 = arith.constant 2.500000e-01 : f32
      %170 = vector.broadcast %cst_76 : f32 to vector<1x16xf32>
      %171 = arith.mulf %169, %170 : vector<1x16xf32>
      %c0_77 = arith.constant 0 : index
      %c8_78 = arith.constant 8 : index
      %c0_79 = arith.constant 0 : index
      %172 = vector.load %arg8[%c0_77, %c8_78, %c0_79] : memref<2x22x128xf32, #tpu.memory_space<vmem>>, vector<1x1x16xf32>
      %173 = vector.shape_cast %172 : vector<1x1x16xf32> to vector<1x16xf32>
      %174 = vector.shape_cast %171 : vector<1x16xf32> to vector<1x1x16xf32>
      tpu.vector_store %arg8[%c0_77, %c8_78, %c0_79], %174 {strides = array<i32>} : memref<2x22x128xf32, #tpu.memory_space<vmem>>, vector<1x1x16xf32>,
      %c0_80 = arith.constant 0 : index
      %c80_81 = arith.constant 80 : index
      %175 = vector.load %arg7[%c0_80, %c80_81] : memref<2x256xf32, #tpu.memory_space<vmem>>, vector<1x16xf32>
      %c1_82 = arith.constant 1 : index
      %c8_83 = arith.constant 8 : index
      %c0_84 = arith.constant 0 : index
      %176 = vector.load %arg8[%c1_82, %c8_83, %c0_84] : memref<2x22x128xf32, #tpu.memory_space<vmem>>, vector<1x1x16xf32>
      %177 = vector.shape_cast %176 : vector<1x1x16xf32> to vector<1x16xf32>
      %178 = vector.shape_cast %175 : vector<1x16xf32> to vector<1x1x16xf32>
      tpu.vector_store %arg8[%c1_82, %c8_83, %c0_84], %178 {strides = array<i32>} : memref<2x22x128xf32, #tpu.memory_space<vmem>>, vector<1x1x16xf32>,
      %c0_85 = arith.constant 0 : index
      %c96_86 = arith.constant 96 : index
      %179 = vector.load %arg6[%c0_85, %c96_86] : memref<2x256xf32, #tpu.memory_space<vmem>>, vector<1x16xf32>
      %cst_87 = arith.constant 2.500000e-01 : f32
      %180 = vector.broadcast %cst_87 : f32 to vector<1x16xf32>
      %181 = arith.mulf %179, %180 : vector<1x16xf32>
      %c0_88 = arith.constant 0 : index
      %c9_89 = arith.constant 9 : index
      %c0_90 = arith.constant 0 : index
      %182 = vector.load %arg8[%c0_88, %c9_89, %c0_90] : memref<2x22x128xf32, #tpu.memory_space<vmem>>, vector<1x1x16xf32>
      %183 = vector.shape_cast %182 : vector<1x1x16xf32> to vector<1x16xf32>
      %184 = vector.shape_cast %181 : vector<1x16xf32> to vector<1x1x16xf32>
      tpu.vector_store %arg8[%c0_88, %c9_89, %c0_90], %184 {strides = array<i32>} : memref<2x22x128xf32, #tpu.memory_space<vmem>>, vector<1x1x16xf32>,
      %c0_91 = arith.constant 0 : index
      %c96_92 = arith.constant 96 : index
      %185 = vector.load %arg7[%c0_91, %c96_92] : memref<2x256xf32, #tpu.memory_space<vmem>>, vector<1x16xf32>
      %c1_93 = arith.constant 1 : index
      %c9_94 = arith.constant 9 : index
      %c0_95 = arith.constant 0 : index
      %186 = vector.load %arg8[%c1_93, %c9_94, %c0_95] : memref<2x22x128xf32, #tpu.memory_space<vmem>>, vector<1x1x16xf32>
      %187 = vector.shape_cast %186 : vector<1x1x16xf32> to vector<1x16xf32>
      %188 = vector.shape_cast %185 : vector<1x16xf32> to vector<1x1x16xf32>
      tpu.vector_store %arg8[%c1_93, %c9_94, %c0_95], %188 {strides = array<i32>} : memref<2x22x128xf32, #tpu.memory_space<vmem>>, vector<1x1x16xf32>,
      %c0_96 = arith.constant 0 : index
      %c112 = arith.constant 112 : index
      %189 = vector.load %arg6[%c0_96, %c112] : memref<2x256xf32, #tpu.memory_space<vmem>>, vector<1x16xf32>
      %cst_97 = arith.constant 2.500000e-01 : f32
      %190 = vector.broadcast %cst_97 : f32 to vector<1x16xf32>
      %191 = arith.mulf %189, %190 : vector<1x16xf32>
      %c0_98 = arith.constant 0 : index
      %c10_99 = arith.constant 10 : index
      %c0_100 = arith.constant 0 : index
      %192 = vector.load %arg8[%c0_98, %c10_99, %c0_100] : memref<2x22x128xf32, #tpu.memory_space<vmem>>, vector<1x1x16xf32>
      %193 = vector.shape_cast %192 : vector<1x1x16xf32> to vector<1x16xf32>
      %194 = vector.shape_cast %191 : vector<1x16xf32> to vector<1x1x16xf32>
      tpu.vector_store %arg8[%c0_98, %c10_99, %c0_100], %194 {strides = array<i32>} : memref<2x22x128xf32, #tpu.memory_space<vmem>>, vector<1x1x16xf32>,
      %c0_101 = arith.constant 0 : index
      %c112_102 = arith.constant 112 : index
      %195 = vector.load %arg7[%c0_101, %c112_102] : memref<2x256xf32, #tpu.memory_space<vmem>>, vector<1x16xf32>
      %c1_103 = arith.constant 1 : index
      %c10_104 = arith.constant 10 : index
      %c0_105 = arith.constant 0 : index
      %196 = vector.load %arg8[%c1_103, %c10_104, %c0_105] : memref<2x22x128xf32, #tpu.memory_space<vmem>>, vector<1x1x16xf32>
      %197 = vector.shape_cast %196 : vector<1x1x16xf32> to vector<1x16xf32>
      %198 = vector.shape_cast %195 : vector<1x16xf32> to vector<1x1x16xf32>
      tpu.vector_store %arg8[%c1_103, %c10_104, %c0_105], %198 {strides = array<i32>} : memref<2x22x128xf32, #tpu.memory_space<vmem>>, vector<1x1x16xf32>,
      %c0_106 = arith.constant 0 : index
      %c128 = arith.constant 128 : index
      %199 = vector.load %arg6[%c0_106, %c128] : memref<2x256xf32, #tpu.memory_space<vmem>>, vector<1x16xf32>
      %cst_107 = arith.constant 2.500000e-01 : f32
      %200 = vector.broadcast %cst_107 : f32 to vector<1x16xf32>
      %201 = arith.mulf %199, %200 : vector<1x16xf32>
      %c0_108 = arith.constant 0 : index
      %c11_109 = arith.constant 11 : index
      %c0_110 = arith.constant 0 : index
      %202 = vector.load %arg8[%c0_108, %c11_109, %c0_110] : memref<2x22x128xf32, #tpu.memory_space<vmem>>, vector<1x1x16xf32>
      %203 = vector.shape_cast %202 : vector<1x1x16xf32> to vector<1x16xf32>
      %204 = vector.shape_cast %201 : vector<1x16xf32> to vector<1x1x16xf32>
      tpu.vector_store %arg8[%c0_108, %c11_109, %c0_110], %204 {strides = array<i32>} : memref<2x22x128xf32, #tpu.memory_space<vmem>>, vector<1x1x16xf32>,
      %c0_111 = arith.constant 0 : index
      %c128_112 = arith.constant 128 : index
      %205 = vector.load %arg7[%c0_111, %c128_112] : memref<2x256xf32, #tpu.memory_space<vmem>>, vector<1x16xf32>
      %c1_113 = arith.constant 1 : index
      %c11_114 = arith.constant 11 : index
      %c0_115 = arith.constant 0 : index
      %206 = vector.load %arg8[%c1_113, %c11_114, %c0_115] : memref<2x22x128xf32, #tpu.memory_space<vmem>>, vector<1x1x16xf32>
      %207 = vector.shape_cast %206 : vector<1x1x16xf32> to vector<1x16xf32>
      %208 = vector.shape_cast %205 : vector<1x16xf32> to vector<1x1x16xf32>
      tpu.vector_store %arg8[%c1_113, %c11_114, %c0_115], %208 {strides = array<i32>} : memref<2x22x128xf32, #tpu.memory_space<vmem>>, vector<1x1x16xf32>,
      %c0_116 = arith.constant 0 : index
      %c144 = arith.constant 144 : index
      %209 = vector.load %arg6[%c0_116, %c144] : memref<2x256xf32, #tpu.memory_space<vmem>>, vector<1x16xf32>
      %cst_117 = arith.constant 2.500000e-01 : f32
      %210 = vector.broadcast %cst_117 : f32 to vector<1x16xf32>
      %211 = arith.mulf %209, %210 : vector<1x16xf32>
      %c0_118 = arith.constant 0 : index
      %c12_119 = arith.constant 12 : index
      %c0_120 = arith.constant 0 : index
      %212 = vector.load %arg8[%c0_118, %c12_119, %c0_120] : memref<2x22x128xf32, #tpu.memory_space<vmem>>, vector<1x1x16xf32>
      %213 = vector.shape_cast %212 : vector<1x1x16xf32> to vector<1x16xf32>
      %214 = vector.shape_cast %211 : vector<1x16xf32> to vector<1x1x16xf32>
      tpu.vector_store %arg8[%c0_118, %c12_119, %c0_120], %214 {strides = array<i32>} : memref<2x22x128xf32, #tpu.memory_space<vmem>>, vector<1x1x16xf32>,
      %c0_121 = arith.constant 0 : index
      %c144_122 = arith.constant 144 : index
      %215 = vector.load %arg7[%c0_121, %c144_122] : memref<2x256xf32, #tpu.memory_space<vmem>>, vector<1x16xf32>
      %c1_123 = arith.constant 1 : index
      %c12_124 = arith.constant 12 : index
      %c0_125 = arith.constant 0 : index
      %216 = vector.load %arg8[%c1_123, %c12_124, %c0_125] : memref<2x22x128xf32, #tpu.memory_space<vmem>>, vector<1x1x16xf32>
      %217 = vector.shape_cast %216 : vector<1x1x16xf32> to vector<1x16xf32>
      %218 = vector.shape_cast %215 : vector<1x16xf32> to vector<1x1x16xf32>
      tpu.vector_store %arg8[%c1_123, %c12_124, %c0_125], %218 {strides = array<i32>} : memref<2x22x128xf32, #tpu.memory_space<vmem>>, vector<1x1x16xf32>,
      %c0_126 = arith.constant 0 : index
      %c160 = arith.constant 160 : index
      %219 = vector.load %arg6[%c0_126, %c160] : memref<2x256xf32, #tpu.memory_space<vmem>>, vector<1x16xf32>
      %cst_127 = arith.constant 2.500000e-01 : f32
      %220 = vector.broadcast %cst_127 : f32 to vector<1x16xf32>
      %221 = arith.mulf %219, %220 : vector<1x16xf32>
      %c0_128 = arith.constant 0 : index
      %c13_129 = arith.constant 13 : index
      %c0_130 = arith.constant 0 : index
      %222 = vector.load %arg8[%c0_128, %c13_129, %c0_130] : memref<2x22x128xf32, #tpu.memory_space<vmem>>, vector<1x1x16xf32>
      %223 = vector.shape_cast %222 : vector<1x1x16xf32> to vector<1x16xf32>
      %224 = vector.shape_cast %221 : vector<1x16xf32> to vector<1x1x16xf32>
      tpu.vector_store %arg8[%c0_128, %c13_129, %c0_130], %224 {strides = array<i32>} : memref<2x22x128xf32, #tpu.memory_space<vmem>>, vector<1x1x16xf32>,
      %c0_131 = arith.constant 0 : index
      %c160_132 = arith.constant 160 : index
      %225 = vector.load %arg7[%c0_131, %c160_132] : memref<2x256xf32, #tpu.memory_space<vmem>>, vector<1x16xf32>
      %c1_133 = arith.constant 1 : index
      %c13_134 = arith.constant 13 : index
      %c0_135 = arith.constant 0 : index
      %226 = vector.load %arg8[%c1_133, %c13_134, %c0_135] : memref<2x22x128xf32, #tpu.memory_space<vmem>>, vector<1x1x16xf32>
      %227 = vector.shape_cast %226 : vector<1x1x16xf32> to vector<1x16xf32>
      %228 = vector.shape_cast %225 : vector<1x16xf32> to vector<1x1x16xf32>
      tpu.vector_store %arg8[%c1_133, %c13_134, %c0_135], %228 {strides = array<i32>} : memref<2x22x128xf32, #tpu.memory_space<vmem>>, vector<1x1x16xf32>,
      %c0_136 = arith.constant 0 : index
      %c176 = arith.constant 176 : index
      %229 = vector.load %arg6[%c0_136, %c176] : memref<2x256xf32, #tpu.memory_space<vmem>>, vector<1x16xf32>
      %cst_137 = arith.constant 2.500000e-01 : f32
      %230 = vector.broadcast %cst_137 : f32 to vector<1x16xf32>
      %231 = arith.mulf %229, %230 : vector<1x16xf32>
      %c0_138 = arith.constant 0 : index
      %c14_139 = arith.constant 14 : index
      %c0_140 = arith.constant 0 : index
      %232 = vector.load %arg8[%c0_138, %c14_139, %c0_140] : memref<2x22x128xf32, #tpu.memory_space<vmem>>, vector<1x1x16xf32>
      %233 = vector.shape_cast %232 : vector<1x1x16xf32> to vector<1x16xf32>
      %234 = vector.shape_cast %231 : vector<1x16xf32> to vector<1x1x16xf32>
      tpu.vector_store %arg8[%c0_138, %c14_139, %c0_140], %234 {strides = array<i32>} : memref<2x22x128xf32, #tpu.memory_space<vmem>>, vector<1x1x16xf32>,
      %c0_141 = arith.constant 0 : index
      %c176_142 = arith.constant 176 : index
      %235 = vector.load %arg7[%c0_141, %c176_142] : memref<2x256xf32, #tpu.memory_space<vmem>>, vector<1x16xf32>
      %c1_143 = arith.constant 1 : index
      %c14_144 = arith.constant 14 : index
      %c0_145 = arith.constant 0 : index
      %236 = vector.load %arg8[%c1_143, %c14_144, %c0_145] : memref<2x22x128xf32, #tpu.memory_space<vmem>>, vector<1x1x16xf32>
      %237 = vector.shape_cast %236 : vector<1x1x16xf32> to vector<1x16xf32>
      %238 = vector.shape_cast %235 : vector<1x16xf32> to vector<1x1x16xf32>
      tpu.vector_store %arg8[%c1_143, %c14_144, %c0_145], %238 {strides = array<i32>} : memref<2x22x128xf32, #tpu.memory_space<vmem>>, vector<1x1x16xf32>,
      %c0_146 = arith.constant 0 : index
      %c192 = arith.constant 192 : index
      %239 = vector.load %arg6[%c0_146, %c192] : memref<2x256xf32, #tpu.memory_space<vmem>>, vector<1x16xf32>
      %cst_147 = arith.constant 2.500000e-01 : f32
      %240 = vector.broadcast %cst_147 : f32 to vector<1x16xf32>
      %241 = arith.mulf %239, %240 : vector<1x16xf32>
      %c0_148 = arith.constant 0 : index
      %c15_149 = arith.constant 15 : index
      %c0_150 = arith.constant 0 : index
      %242 = vector.load %arg8[%c0_148, %c15_149, %c0_150] : memref<2x22x128xf32, #tpu.memory_space<vmem>>, vector<1x1x16xf32>
      %243 = vector.shape_cast %242 : vector<1x1x16xf32> to vector<1x16xf32>
      %244 = vector.shape_cast %241 : vector<1x16xf32> to vector<1x1x16xf32>
      tpu.vector_store %arg8[%c0_148, %c15_149, %c0_150], %244 {strides = array<i32>} : memref<2x22x128xf32, #tpu.memory_space<vmem>>, vector<1x1x16xf32>,
      %c0_151 = arith.constant 0 : index
      %c192_152 = arith.constant 192 : index
      %245 = vector.load %arg7[%c0_151, %c192_152] : memref<2x256xf32, #tpu.memory_space<vmem>>, vector<1x16xf32>
      %c1_153 = arith.constant 1 : index
      %c15_154 = arith.constant 15 : index
      %c0_155 = arith.constant 0 : index
      %246 = vector.load %arg8[%c1_153, %c15_154, %c0_155] : memref<2x22x128xf32, #tpu.memory_space<vmem>>, vector<1x1x16xf32>
      %247 = vector.shape_cast %246 : vector<1x1x16xf32> to vector<1x16xf32>
      %248 = vector.shape_cast %245 : vector<1x16xf32> to vector<1x1x16xf32>
      tpu.vector_store %arg8[%c1_153, %c15_154, %c0_155], %248 {strides = array<i32>} : memref<2x22x128xf32, #tpu.memory_space<vmem>>, vector<1x1x16xf32>,
      %c0_156 = arith.constant 0 : index
      %c208 = arith.constant 208 : index
      %249 = vector.load %arg6[%c0_156, %c208] : memref<2x256xf32, #tpu.memory_space<vmem>>, vector<1x16xf32>
      %cst_157 = arith.constant 2.500000e-01 : f32
      %250 = vector.broadcast %cst_157 : f32 to vector<1x16xf32>
      %251 = arith.mulf %249, %250 : vector<1x16xf32>
      %c0_158 = arith.constant 0 : index
      %c16_159 = arith.constant 16 : index
      %c0_160 = arith.constant 0 : index
      %252 = vector.load %arg8[%c0_158, %c16_159, %c0_160] : memref<2x22x128xf32, #tpu.memory_space<vmem>>, vector<1x1x16xf32>
      %253 = vector.shape_cast %252 : vector<1x1x16xf32> to vector<1x16xf32>
      %254 = vector.shape_cast %251 : vector<1x16xf32> to vector<1x1x16xf32>
      tpu.vector_store %arg8[%c0_158, %c16_159, %c0_160], %254 {strides = array<i32>} : memref<2x22x128xf32, #tpu.memory_space<vmem>>, vector<1x1x16xf32>,
      %c0_161 = arith.constant 0 : index
      %c208_162 = arith.constant 208 : index
      %255 = vector.load %arg7[%c0_161, %c208_162] : memref<2x256xf32, #tpu.memory_space<vmem>>, vector<1x16xf32>
      %c1_163 = arith.constant 1 : index
      %c16_164 = arith.constant 16 : index
      %c0_165 = arith.constant 0 : index
      %256 = vector.load %arg8[%c1_163, %c16_164, %c0_165] : memref<2x22x128xf32, #tpu.memory_space<vmem>>, vector<1x1x16xf32>
      %257 = vector.shape_cast %256 : vector<1x1x16xf32> to vector<1x16xf32>
      %258 = vector.shape_cast %255 : vector<1x16xf32> to vector<1x1x16xf32>
      tpu.vector_store %arg8[%c1_163, %c16_164, %c0_165], %258 {strides = array<i32>} : memref<2x22x128xf32, #tpu.memory_space<vmem>>, vector<1x1x16xf32>,
      %c0_166 = arith.constant 0 : index
      %c224 = arith.constant 224 : index
      %259 = vector.load %arg6[%c0_166, %c224] : memref<2x256xf32, #tpu.memory_space<vmem>>, vector<1x16xf32>
      %cst_167 = arith.constant 2.500000e-01 : f32
      %260 = vector.broadcast %cst_167 : f32 to vector<1x16xf32>
      %261 = arith.mulf %259, %260 : vector<1x16xf32>
      %c0_168 = arith.constant 0 : index
      %c17_169 = arith.constant 17 : index
      %c0_170 = arith.constant 0 : index
      %262 = vector.load %arg8[%c0_168, %c17_169, %c0_170] : memref<2x22x128xf32, #tpu.memory_space<vmem>>, vector<1x1x16xf32>
      %263 = vector.shape_cast %262 : vector<1x1x16xf32> to vector<1x16xf32>
      %264 = vector.shape_cast %261 : vector<1x16xf32> to vector<1x1x16xf32>
      tpu.vector_store %arg8[%c0_168, %c17_169, %c0_170], %264 {strides = array<i32>} : memref<2x22x128xf32, #tpu.memory_space<vmem>>, vector<1x1x16xf32>,
      %c0_171 = arith.constant 0 : index
      %c224_172 = arith.constant 224 : index
      %265 = vector.load %arg7[%c0_171, %c224_172] : memref<2x256xf32, #tpu.memory_space<vmem>>, vector<1x16xf32>
      %c1_173 = arith.constant 1 : index
      %c17_174 = arith.constant 17 : index
      %c0_175 = arith.constant 0 : index
      %266 = vector.load %arg8[%c1_173, %c17_174, %c0_175] : memref<2x22x128xf32, #tpu.memory_space<vmem>>, vector<1x1x16xf32>
      %267 = vector.shape_cast %266 : vector<1x1x16xf32> to vector<1x16xf32>
      %268 = vector.shape_cast %265 : vector<1x16xf32> to vector<1x1x16xf32>
      tpu.vector_store %arg8[%c1_173, %c17_174, %c0_175], %268 {strides = array<i32>} : memref<2x22x128xf32, #tpu.memory_space<vmem>>, vector<1x1x16xf32>,
      %c0_176 = arith.constant 0 : index
      %c240 = arith.constant 240 : index
      %269 = vector.load %arg6[%c0_176, %c240] : memref<2x256xf32, #tpu.memory_space<vmem>>, vector<1x16xf32>
      %cst_177 = arith.constant 2.500000e-01 : f32
      %270 = vector.broadcast %cst_177 : f32 to vector<1x16xf32>
      %271 = arith.mulf %269, %270 : vector<1x16xf32>
      %c0_178 = arith.constant 0 : index
      %c18_179 = arith.constant 18 : index
      %c0_180 = arith.constant 0 : index
      %272 = vector.load %arg8[%c0_178, %c18_179, %c0_180] : memref<2x22x128xf32, #tpu.memory_space<vmem>>, vector<1x1x16xf32>
      %273 = vector.shape_cast %272 : vector<1x1x16xf32> to vector<1x16xf32>
      %274 = vector.shape_cast %271 : vector<1x16xf32> to vector<1x1x16xf32>
      tpu.vector_store %arg8[%c0_178, %c18_179, %c0_180], %274 {strides = array<i32>} : memref<2x22x128xf32, #tpu.memory_space<vmem>>, vector<1x1x16xf32>,
      %c0_181 = arith.constant 0 : index
      %c240_182 = arith.constant 240 : index
      %275 = vector.load %arg7[%c0_181, %c240_182] : memref<2x256xf32, #tpu.memory_space<vmem>>, vector<1x16xf32>
      %c1_183 = arith.constant 1 : index
      %c18_184 = arith.constant 18 : index
      %c0_185 = arith.constant 0 : index
      %276 = vector.load %arg8[%c1_183, %c18_184, %c0_185] : memref<2x22x128xf32, #tpu.memory_space<vmem>>, vector<1x1x16xf32>
      %277 = vector.shape_cast %276 : vector<1x1x16xf32> to vector<1x16xf32>
      %278 = vector.shape_cast %275 : vector<1x16xf32> to vector<1x1x16xf32>
      tpu.vector_store %arg8[%c1_183, %c18_184, %c0_185], %278 {strides = array<i32>} : memref<2x22x128xf32, #tpu.memory_space<vmem>>, vector<1x1x16xf32>,
      %c0_186 = arith.constant 0 : index
      %c0_187 = arith.constant 0 : index
      %c0_188 = arith.constant 0 : index
      %279 = vector.load %arg8[%c0_186, %c0_187, %c0_188] : memref<2x22x128xf32, #tpu.memory_space<vmem>>, vector<1x22x128xf32>
      %280 = vector.shape_cast %279 : vector<1x22x128xf32> to vector<22x128xf32>
      %c3_i32 = arith.constant 3 : i32
      %281 = tpu.dynamic_rotate %280 by %c3_i32 dim 1 : vector<22x128xf32>, i32 -> vector<22x128xf32>
      %c0_189 = arith.constant 0 : index
      %c0_190 = arith.constant 0 : index
      %c0_191 = arith.constant 0 : index
      %c0_192 = arith.constant 0 : index
      %282 = vector.load %arg9[%c0_189, %c0_190, %c0_191, %c0_192] : memref<6x2x22x128xf32, #tpu.memory_space<vmem>>, vector<1x1x22x128xf32>
      %283 = vector.shape_cast %282 : vector<1x1x22x128xf32> to vector<22x128xf32>
      %284 = vector.shape_cast %281 : vector<22x128xf32> to vector<1x1x22x128xf32>
      tpu.vector_store %arg9[%c0_189, %c0_190, %c0_191, %c0_192], %284 {strides = array<i32>} : memref<6x2x22x128xf32, #tpu.memory_space<vmem>>, vector<1x1x22x128xf32>,
      %c2_i32 = arith.constant 2 : i32
      %285 = tpu.dynamic_rotate %280 by %c2_i32 dim 1 : vector<22x128xf32>, i32 -> vector<22x128xf32>
      %c1_193 = arith.constant 1 : index
      %c0_194 = arith.constant 0 : index
      %c0_195 = arith.constant 0 : index
      %c0_196 = arith.constant 0 : index
      %286 = vector.load %arg9[%c1_193, %c0_194, %c0_195, %c0_196] : memref<6x2x22x128xf32, #tpu.memory_space<vmem>>, vector<1x1x22x128xf32>
      %287 = vector.shape_cast %286 : vector<1x1x22x128xf32> to vector<22x128xf32>
      %288 = vector.shape_cast %285 : vector<22x128xf32> to vector<1x1x22x128xf32>
      tpu.vector_store %arg9[%c1_193, %c0_194, %c0_195, %c0_196], %288 {strides = array<i32>} : memref<6x2x22x128xf32, #tpu.memory_space<vmem>>, vector<1x1x22x128xf32>,
      %c1_i32 = arith.constant 1 : i32
      %289 = tpu.dynamic_rotate %280 by %c1_i32 dim 1 : vector<22x128xf32>, i32 -> vector<22x128xf32>
      %c2_197 = arith.constant 2 : index
      %c0_198 = arith.constant 0 : index
      %c0_199 = arith.constant 0 : index
      %c0_200 = arith.constant 0 : index
      %290 = vector.load %arg9[%c2_197, %c0_198, %c0_199, %c0_200] : memref<6x2x22x128xf32, #tpu.memory_space<vmem>>, vector<1x1x22x128xf32>
      %291 = vector.shape_cast %290 : vector<1x1x22x128xf32> to vector<22x128xf32>
      %292 = vector.shape_cast %289 : vector<22x128xf32> to vector<1x1x22x128xf32>
      tpu.vector_store %arg9[%c2_197, %c0_198, %c0_199, %c0_200], %292 {strides = array<i32>} : memref<6x2x22x128xf32, #tpu.memory_space<vmem>>, vector<1x1x22x128xf32>,
      %c127_i32 = arith.constant 127 : i32
      %293 = tpu.dynamic_rotate %280 by %c127_i32 dim 1 : vector<22x128xf32>, i32 -> vector<22x128xf32>
      %c3_201 = arith.constant 3 : index
      %c0_202 = arith.constant 0 : index
      %c0_203 = arith.constant 0 : index
      %c0_204 = arith.constant 0 : index
      %294 = vector.load %arg9[%c3_201, %c0_202, %c0_203, %c0_204] : memref<6x2x22x128xf32, #tpu.memory_space<vmem>>, vector<1x1x22x128xf32>
      %295 = vector.shape_cast %294 : vector<1x1x22x128xf32> to vector<22x128xf32>
      %296 = vector.shape_cast %293 : vector<22x128xf32> to vector<1x1x22x128xf32>
      tpu.vector_store %arg9[%c3_201, %c0_202, %c0_203, %c0_204], %296 {strides = array<i32>} : memref<6x2x22x128xf32, #tpu.memory_space<vmem>>, vector<1x1x22x128xf32>,
      %c126_i32 = arith.constant 126 : i32
      %297 = tpu.dynamic_rotate %280 by %c126_i32 dim 1 : vector<22x128xf32>, i32 -> vector<22x128xf32>
      %c4_205 = arith.constant 4 : index
      %c0_206 = arith.constant 0 : index
      %c0_207 = arith.constant 0 : index
      %c0_208 = arith.constant 0 : index
      %298 = vector.load %arg9[%c4_205, %c0_206, %c0_207, %c0_208] : memref<6x2x22x128xf32, #tpu.memory_space<vmem>>, vector<1x1x22x128xf32>
      %299 = vector.shape_cast %298 : vector<1x1x22x128xf32> to vector<22x128xf32>
      %300 = vector.shape_cast %297 : vector<22x128xf32> to vector<1x1x22x128xf32>
      tpu.vector_store %arg9[%c4_205, %c0_206, %c0_207, %c0_208], %300 {strides = array<i32>} : memref<6x2x22x128xf32, #tpu.memory_space<vmem>>, vector<1x1x22x128xf32>,
      %c125_i32 = arith.constant 125 : i32
      %301 = tpu.dynamic_rotate %280 by %c125_i32 dim 1 : vector<22x128xf32>, i32 -> vector<22x128xf32>
      %c5_209 = arith.constant 5 : index
      %c0_210 = arith.constant 0 : index
      %c0_211 = arith.constant 0 : index
      %c0_212 = arith.constant 0 : index
      %302 = vector.load %arg9[%c5_209, %c0_210, %c0_211, %c0_212] : memref<6x2x22x128xf32, #tpu.memory_space<vmem>>, vector<1x1x22x128xf32>
      %303 = vector.shape_cast %302 : vector<1x1x22x128xf32> to vector<22x128xf32>
      %304 = vector.shape_cast %301 : vector<22x128xf32> to vector<1x1x22x128xf32>
      tpu.vector_store %arg9[%c5_209, %c0_210, %c0_211, %c0_212], %304 {strides = array<i32>} : memref<6x2x22x128xf32, #tpu.memory_space<vmem>>, vector<1x1x22x128xf32>,
      %c1_213 = arith.constant 1 : index
      %c0_214 = arith.constant 0 : index
      %c0_215 = arith.constant 0 : index
      %305 = vector.load %arg8[%c1_213, %c0_214, %c0_215] : memref<2x22x128xf32, #tpu.memory_space<vmem>>, vector<1x22x128xf32>
      %306 = vector.shape_cast %305 : vector<1x22x128xf32> to vector<22x128xf32>
      %c3_i32_216 = arith.constant 3 : i32
      %307 = tpu.dynamic_rotate %306 by %c3_i32_216 dim 1 : vector<22x128xf32>, i32 -> vector<22x128xf32>
      %c0_217 = arith.constant 0 : index
      %c1_218 = arith.constant 1 : index
      %c0_219 = arith.constant 0 : index
      %c0_220 = arith.constant 0 : index
      %308 = vector.load %arg9[%c0_217, %c1_218, %c0_219, %c0_220] : memref<6x2x22x128xf32, #tpu.memory_space<vmem>>, vector<1x1x22x128xf32>
      %309 = vector.shape_cast %308 : vector<1x1x22x128xf32> to vector<22x128xf32>
      %310 = vector.shape_cast %307 : vector<22x128xf32> to vector<1x1x22x128xf32>
      tpu.vector_store %arg9[%c0_217, %c1_218, %c0_219, %c0_220], %310 {strides = array<i32>} : memref<6x2x22x128xf32, #tpu.memory_space<vmem>>, vector<1x1x22x128xf32>,
      %c2_i32_221 = arith.constant 2 : i32
      %311 = tpu.dynamic_rotate %306 by %c2_i32_221 dim 1 : vector<22x128xf32>, i32 -> vector<22x128xf32>
      %c1_222 = arith.constant 1 : index
      %c1_223 = arith.constant 1 : index
      %c0_224 = arith.constant 0 : index
      %c0_225 = arith.constant 0 : index
      %312 = vector.load %arg9[%c1_222, %c1_223, %c0_224, %c0_225] : memref<6x2x22x128xf32, #tpu.memory_space<vmem>>, vector<1x1x22x128xf32>
      %313 = vector.shape_cast %312 : vector<1x1x22x128xf32> to vector<22x128xf32>
      %314 = vector.shape_cast %311 : vector<22x128xf32> to vector<1x1x22x128xf32>
      tpu.vector_store %arg9[%c1_222, %c1_223, %c0_224, %c0_225], %314 {strides = array<i32>} : memref<6x2x22x128xf32, #tpu.memory_space<vmem>>, vector<1x1x22x128xf32>,
      %c1_i32_226 = arith.constant 1 : i32
      %315 = tpu.dynamic_rotate %306 by %c1_i32_226 dim 1 : vector<22x128xf32>, i32 -> vector<22x128xf32>
      %c2_227 = arith.constant 2 : index
      %c1_228 = arith.constant 1 : index
      %c0_229 = arith.constant 0 : index
      %c0_230 = arith.constant 0 : index
      %316 = vector.load %arg9[%c2_227, %c1_228, %c0_229, %c0_230] : memref<6x2x22x128xf32, #tpu.memory_space<vmem>>, vector<1x1x22x128xf32>
      %317 = vector.shape_cast %316 : vector<1x1x22x128xf32> to vector<22x128xf32>
      %318 = vector.shape_cast %315 : vector<22x128xf32> to vector<1x1x22x128xf32>
      tpu.vector_store %arg9[%c2_227, %c1_228, %c0_229, %c0_230], %318 {strides = array<i32>} : memref<6x2x22x128xf32, #tpu.memory_space<vmem>>, vector<1x1x22x128xf32>,
      %c127_i32_231 = arith.constant 127 : i32
      %319 = tpu.dynamic_rotate %306 by %c127_i32_231 dim 1 : vector<22x128xf32>, i32 -> vector<22x128xf32>
      %c3_232 = arith.constant 3 : index
      %c1_233 = arith.constant 1 : index
      %c0_234 = arith.constant 0 : index
      %c0_235 = arith.constant 0 : index
      %320 = vector.load %arg9[%c3_232, %c1_233, %c0_234, %c0_235] : memref<6x2x22x128xf32, #tpu.memory_space<vmem>>, vector<1x1x22x128xf32>
      %321 = vector.shape_cast %320 : vector<1x1x22x128xf32> to vector<22x128xf32>
      %322 = vector.shape_cast %319 : vector<22x128xf32> to vector<1x1x22x128xf32>
      tpu.vector_store %arg9[%c3_232, %c1_233, %c0_234, %c0_235], %322 {strides = array<i32>} : memref<6x2x22x128xf32, #tpu.memory_space<vmem>>, vector<1x1x22x128xf32>,
      %c126_i32_236 = arith.constant 126 : i32
      %323 = tpu.dynamic_rotate %306 by %c126_i32_236 dim 1 : vector<22x128xf32>, i32 -> vector<22x128xf32>
      %c4_237 = arith.constant 4 : index
      %c1_238 = arith.constant 1 : index
      %c0_239 = arith.constant 0 : index
      %c0_240 = arith.constant 0 : index
      %324 = vector.load %arg9[%c4_237, %c1_238, %c0_239, %c0_240] : memref<6x2x22x128xf32, #tpu.memory_space<vmem>>, vector<1x1x22x128xf32>
      %325 = vector.shape_cast %324 : vector<1x1x22x128xf32> to vector<22x128xf32>
      %326 = vector.shape_cast %323 : vector<22x128xf32> to vector<1x1x22x128xf32>
      tpu.vector_store %arg9[%c4_237, %c1_238, %c0_239, %c0_240], %326 {strides = array<i32>} : memref<6x2x22x128xf32, #tpu.memory_space<vmem>>, vector<1x1x22x128xf32>,
      %c125_i32_241 = arith.constant 125 : i32
      %327 = tpu.dynamic_rotate %306 by %c125_i32_241 dim 1 : vector<22x128xf32>, i32 -> vector<22x128xf32>
      %c5_242 = arith.constant 5 : index
      %c1_243 = arith.constant 1 : index
      %c0_244 = arith.constant 0 : index
      %c0_245 = arith.constant 0 : index
      %328 = vector.load %arg9[%c5_242, %c1_243, %c0_244, %c0_245] : memref<6x2x22x128xf32, #tpu.memory_space<vmem>>, vector<1x1x22x128xf32>
      %329 = vector.shape_cast %328 : vector<1x1x22x128xf32> to vector<22x128xf32>
      %330 = vector.shape_cast %327 : vector<22x128xf32> to vector<1x1x22x128xf32>
      tpu.vector_store %arg9[%c5_242, %c1_243, %c0_244, %c0_245], %330 {strides = array<i32>} : memref<6x2x22x128xf32, #tpu.memory_space<vmem>>, vector<1x1x22x128xf32>,
      %cst_246 = arith.constant 0.000000e+00 : f32
      %331 = vector.broadcast %cst_246 : f32 to vector<16x128xf32>
      %cst_247 = arith.constant 0.000000e+00 : f32
      %332 = vector.broadcast %cst_247 : f32 to vector<16x128xf32>
      %c0_248 = arith.constant 0 : index
      %c0_249 = arith.constant 0 : index
      %c0_250 = arith.constant 0 : index
      %c0_251 = arith.constant 0 : index
      %333 = vector.load %arg9[%c0_248, %c0_249, %c0_250, %c0_251] : memref<6x2x22x128xf32, #tpu.memory_space<vmem>>, vector<1x1x16x128xf32>
      %334 = vector.shape_cast %333 : vector<1x1x16x128xf32> to vector<16x128xf32>
      %c0_252 = arith.constant 0 : index
      %c1_253 = arith.constant 1 : index
      %c0_254 = arith.constant 0 : index
      %c0_255 = arith.constant 0 : index
      %335 = vector.load %arg9[%c0_252, %c1_253, %c0_254, %c0_255] : memref<6x2x22x128xf32, #tpu.memory_space<vmem>>, vector<1x1x16x128xf32>
      %336 = vector.shape_cast %335 : vector<1x1x16x128xf32> to vector<16x128xf32>
      %337 = vector.broadcast %17 : f32 to vector<16x128xf32>
      %338 = arith.mulf %334, %337 : vector<16x128xf32>
      %339 = arith.addf %331, %338 : vector<16x128xf32>
      %340 = vector.broadcast %66 : f32 to vector<16x128xf32>
      %341 = arith.mulf %336, %340 : vector<16x128xf32>
      %342 = arith.addf %332, %341 : vector<16x128xf32>
      %c1_256 = arith.constant 1 : index
      %c0_257 = arith.constant 0 : index
      %c0_258 = arith.constant 0 : index
      %c0_259 = arith.constant 0 : index
      %343 = vector.load %arg9[%c1_256, %c0_257, %c0_258, %c0_259] : memref<6x2x22x128xf32, #tpu.memory_space<vmem>>, vector<1x1x16x128xf32>
      %344 = vector.shape_cast %343 : vector<1x1x16x128xf32> to vector<16x128xf32>
      %c1_260 = arith.constant 1 : index
      %c1_261 = arith.constant 1 : index
      %c0_262 = arith.constant 0 : index
      %c0_263 = arith.constant 0 : index
      %345 = vector.load %arg9[%c1_260, %c1_261, %c0_262, %c0_263] : memref<6x2x22x128xf32, #tpu.memory_space<vmem>>, vector<1x1x16x128xf32>
      %346 = vector.shape_cast %345 : vector<1x1x16x128xf32> to vector<16x128xf32>
      %347 = vector.broadcast %18 : f32 to vector<16x128xf32>
      %348 = arith.mulf %344, %347 : vector<16x128xf32>
      %349 = arith.addf %339, %348 : vector<16x128xf32>
      %350 = vector.broadcast %67 : f32 to vector<16x128xf32>
      %351 = arith.mulf %346, %350 : vector<16x128xf32>
      %352 = arith.addf %342, %351 : vector<16x128xf32>
      %c2_264 = arith.constant 2 : index
      %c0_265 = arith.constant 0 : index
      %c0_266 = arith.constant 0 : index
      %c0_267 = arith.constant 0 : index
      %353 = vector.load %arg9[%c2_264, %c0_265, %c0_266, %c0_267] : memref<6x2x22x128xf32, #tpu.memory_space<vmem>>, vector<1x1x16x128xf32>
      %354 = vector.shape_cast %353 : vector<1x1x16x128xf32> to vector<16x128xf32>
      %c2_268 = arith.constant 2 : index
      %c1_269 = arith.constant 1 : index
      %c0_270 = arith.constant 0 : index
      %c0_271 = arith.constant 0 : index
      %355 = vector.load %arg9[%c2_268, %c1_269, %c0_270, %c0_271] : memref<6x2x22x128xf32, #tpu.memory_space<vmem>>, vector<1x1x16x128xf32>
      %356 = vector.shape_cast %355 : vector<1x1x16x128xf32> to vector<16x128xf32>
      %357 = vector.broadcast %19 : f32 to vector<16x128xf32>
      %358 = arith.mulf %354, %357 : vector<16x128xf32>
      %359 = arith.addf %349, %358 : vector<16x128xf32>
      %360 = vector.broadcast %68 : f32 to vector<16x128xf32>
      %361 = arith.mulf %356, %360 : vector<16x128xf32>
      %362 = arith.addf %352, %361 : vector<16x128xf32>
      %c0_272 = arith.constant 0 : index
      %c0_273 = arith.constant 0 : index
      %c0_274 = arith.constant 0 : index
      %363 = vector.load %arg8[%c0_272, %c0_273, %c0_274] : memref<2x22x128xf32, #tpu.memory_space<vmem>>, vector<1x16x128xf32>
      %364 = vector.shape_cast %363 : vector<1x16x128xf32> to vector<16x128xf32>
      %c1_275 = arith.constant 1 : index
      %c0_276 = arith.constant 0 : index
      %c0_277 = arith.constant 0 : index
      %365 = vector.load %arg8[%c1_275, %c0_276, %c0_277] : memref<2x22x128xf32, #tpu.memory_space<vmem>>, vector<1x16x128xf32>
      %366 = vector.shape_cast %365 : vector<1x16x128xf32> to vector<16x128xf32>
      %367 = vector.broadcast %20 : f32 to vector<16x128xf32>
      %368 = arith.mulf %364, %367 : vector<16x128xf32>
      %369 = arith.addf %359, %368 : vector<16x128xf32>
      %370 = vector.broadcast %69 : f32 to vector<16x128xf32>
      %371 = arith.mulf %366, %370 : vector<16x128xf32>
      %372 = arith.addf %362, %371 : vector<16x128xf32>
      %c3_278 = arith.constant 3 : index
      %c0_279 = arith.constant 0 : index
      %c0_280 = arith.constant 0 : index
      %c0_281 = arith.constant 0 : index
      %373 = vector.load %arg9[%c3_278, %c0_279, %c0_280, %c0_281] : memref<6x2x22x128xf32, #tpu.memory_space<vmem>>, vector<1x1x16x128xf32>
      %374 = vector.shape_cast %373 : vector<1x1x16x128xf32> to vector<16x128xf32>
      %c3_282 = arith.constant 3 : index
      %c1_283 = arith.constant 1 : index
      %c0_284 = arith.constant 0 : index
      %c0_285 = arith.constant 0 : index
      %375 = vector.load %arg9[%c3_282, %c1_283, %c0_284, %c0_285] : memref<6x2x22x128xf32, #tpu.memory_space<vmem>>, vector<1x1x16x128xf32>
      %376 = vector.shape_cast %375 : vector<1x1x16x128xf32> to vector<16x128xf32>
      %377 = vector.broadcast %21 : f32 to vector<16x128xf32>
      %378 = arith.mulf %374, %377 : vector<16x128xf32>
      %379 = arith.addf %369, %378 : vector<16x128xf32>
      %380 = vector.broadcast %70 : f32 to vector<16x128xf32>
      %381 = arith.mulf %376, %380 : vector<16x128xf32>
      %382 = arith.addf %372, %381 : vector<16x128xf32>
      %c4_286 = arith.constant 4 : index
      %c0_287 = arith.constant 0 : index
      %c0_288 = arith.constant 0 : index
      %c0_289 = arith.constant 0 : index
      %383 = vector.load %arg9[%c4_286, %c0_287, %c0_288, %c0_289] : memref<6x2x22x128xf32, #tpu.memory_space<vmem>>, vector<1x1x16x128xf32>
      %384 = vector.shape_cast %383 : vector<1x1x16x128xf32> to vector<16x128xf32>
      %c4_290 = arith.constant 4 : index
      %c1_291 = arith.constant 1 : index
      %c0_292 = arith.constant 0 : index
      %c0_293 = arith.constant 0 : index
      %385 = vector.load %arg9[%c4_290, %c1_291, %c0_292, %c0_293] : memref<6x2x22x128xf32, #tpu.memory_space<vmem>>, vector<1x1x16x128xf32>
      %386 = vector.shape_cast %385 : vector<1x1x16x128xf32> to vector<16x128xf32>
      %387 = vector.broadcast %22 : f32 to vector<16x128xf32>
      %388 = arith.mulf %384, %387 : vector<16x128xf32>
      %389 = arith.addf %379, %388 : vector<16x128xf32>
      %390 = vector.broadcast %71 : f32 to vector<16x128xf32>
      %391 = arith.mulf %386, %390 : vector<16x128xf32>
      %392 = arith.addf %382, %391 : vector<16x128xf32>
      %c5_294 = arith.constant 5 : index
      %c0_295 = arith.constant 0 : index
      %c0_296 = arith.constant 0 : index
      %c0_297 = arith.constant 0 : index
      %393 = vector.load %arg9[%c5_294, %c0_295, %c0_296, %c0_297] : memref<6x2x22x128xf32, #tpu.memory_space<vmem>>, vector<1x1x16x128xf32>
      %394 = vector.shape_cast %393 : vector<1x1x16x128xf32> to vector<16x128xf32>
      %c5_298 = arith.constant 5 : index
      %c1_299 = arith.constant 1 : index
      %c0_300 = arith.constant 0 : index
      %c0_301 = arith.constant 0 : index
      %395 = vector.load %arg9[%c5_298, %c1_299, %c0_300, %c0_301] : memref<6x2x22x128xf32, #tpu.memory_space<vmem>>, vector<1x1x16x128xf32>
      %396 = vector.shape_cast %395 : vector<1x1x16x128xf32> to vector<16x128xf32>
      %397 = vector.broadcast %23 : f32 to vector<16x128xf32>
      %398 = arith.mulf %394, %397 : vector<16x128xf32>
      %399 = arith.addf %389, %398 : vector<16x128xf32>
      %400 = vector.broadcast %72 : f32 to vector<16x128xf32>
      %401 = arith.mulf %396, %400 : vector<16x128xf32>
      %402 = arith.addf %392, %401 : vector<16x128xf32>
      %c0_302 = arith.constant 0 : index
      %c0_303 = arith.constant 0 : index
      %c1_304 = arith.constant 1 : index
      %c0_305 = arith.constant 0 : index
      %403 = vector.load %arg9[%c0_302, %c0_303, %c1_304, %c0_305] : memref<6x2x22x128xf32, #tpu.memory_space<vmem>>, vector<1x1x16x128xf32>
      %404 = vector.shape_cast %403 : vector<1x1x16x128xf32> to vector<16x128xf32>
      %c0_306 = arith.constant 0 : index
      %c1_307 = arith.constant 1 : index
      %c1_308 = arith.constant 1 : index
      %c0_309 = arith.constant 0 : index
      %405 = vector.load %arg9[%c0_306, %c1_307, %c1_308, %c0_309] : memref<6x2x22x128xf32, #tpu.memory_space<vmem>>, vector<1x1x16x128xf32>
      %406 = vector.shape_cast %405 : vector<1x1x16x128xf32> to vector<16x128xf32>
      %407 = vector.broadcast %24 : f32 to vector<16x128xf32>
      %408 = arith.mulf %404, %407 : vector<16x128xf32>
      %409 = arith.addf %399, %408 : vector<16x128xf32>
      %410 = vector.broadcast %73 : f32 to vector<16x128xf32>
      %411 = arith.mulf %406, %410 : vector<16x128xf32>
      %412 = arith.addf %402, %411 : vector<16x128xf32>
      %c1_310 = arith.constant 1 : index
      %c0_311 = arith.constant 0 : index
      %c1_312 = arith.constant 1 : index
      %c0_313 = arith.constant 0 : index
      %413 = vector.load %arg9[%c1_310, %c0_311, %c1_312, %c0_313] : memref<6x2x22x128xf32, #tpu.memory_space<vmem>>, vector<1x1x16x128xf32>
      %414 = vector.shape_cast %413 : vector<1x1x16x128xf32> to vector<16x128xf32>
      %c1_314 = arith.constant 1 : index
      %c1_315 = arith.constant 1 : index
      %c1_316 = arith.constant 1 : index
      %c0_317 = arith.constant 0 : index
      %415 = vector.load %arg9[%c1_314, %c1_315, %c1_316, %c0_317] : memref<6x2x22x128xf32, #tpu.memory_space<vmem>>, vector<1x1x16x128xf32>
      %416 = vector.shape_cast %415 : vector<1x1x16x128xf32> to vector<16x128xf32>
      %417 = vector.broadcast %25 : f32 to vector<16x128xf32>
      %418 = arith.mulf %414, %417 : vector<16x128xf32>
      %419 = arith.addf %409, %418 : vector<16x128xf32>
      %420 = vector.broadcast %74 : f32 to vector<16x128xf32>
      %421 = arith.mulf %416, %420 : vector<16x128xf32>
      %422 = arith.addf %412, %421 : vector<16x128xf32>
      %c2_318 = arith.constant 2 : index
      %c0_319 = arith.constant 0 : index
      %c1_320 = arith.constant 1 : index
      %c0_321 = arith.constant 0 : index
      %423 = vector.load %arg9[%c2_318, %c0_319, %c1_320, %c0_321] : memref<6x2x22x128xf32, #tpu.memory_space<vmem>>, vector<1x1x16x128xf32>
      %424 = vector.shape_cast %423 : vector<1x1x16x128xf32> to vector<16x128xf32>
      %c2_322 = arith.constant 2 : index
      %c1_323 = arith.constant 1 : index
      %c1_324 = arith.constant 1 : index
      %c0_325 = arith.constant 0 : index
      %425 = vector.load %arg9[%c2_322, %c1_323, %c1_324, %c0_325] : memref<6x2x22x128xf32, #tpu.memory_space<vmem>>, vector<1x1x16x128xf32>
      %426 = vector.shape_cast %425 : vector<1x1x16x128xf32> to vector<16x128xf32>
      %427 = vector.broadcast %26 : f32 to vector<16x128xf32>
      %428 = arith.mulf %424, %427 : vector<16x128xf32>
      %429 = arith.addf %419, %428 : vector<16x128xf32>
      %430 = vector.broadcast %75 : f32 to vector<16x128xf32>
      %431 = arith.mulf %426, %430 : vector<16x128xf32>
      %432 = arith.addf %422, %431 : vector<16x128xf32>
      %c0_326 = arith.constant 0 : index
      %c1_327 = arith.constant 1 : index
      %c0_328 = arith.constant 0 : index
      %433 = vector.load %arg8[%c0_326, %c1_327, %c0_328] : memref<2x22x128xf32, #tpu.memory_space<vmem>>, vector<1x16x128xf32>
      %434 = vector.shape_cast %433 : vector<1x16x128xf32> to vector<16x128xf32>
      %c1_329 = arith.constant 1 : index
      %c1_330 = arith.constant 1 : index
      %c0_331 = arith.constant 0 : index
      %435 = vector.load %arg8[%c1_329, %c1_330, %c0_331] : memref<2x22x128xf32, #tpu.memory_space<vmem>>, vector<1x16x128xf32>
      %436 = vector.shape_cast %435 : vector<1x16x128xf32> to vector<16x128xf32>
      %437 = vector.broadcast %27 : f32 to vector<16x128xf32>
      %438 = arith.mulf %434, %437 : vector<16x128xf32>
      %439 = arith.addf %429, %438 : vector<16x128xf32>
      %440 = vector.broadcast %76 : f32 to vector<16x128xf32>
      %441 = arith.mulf %436, %440 : vector<16x128xf32>
      %442 = arith.addf %432, %441 : vector<16x128xf32>
      %c3_332 = arith.constant 3 : index
      %c0_333 = arith.constant 0 : index
      %c1_334 = arith.constant 1 : index
      %c0_335 = arith.constant 0 : index
      %443 = vector.load %arg9[%c3_332, %c0_333, %c1_334, %c0_335] : memref<6x2x22x128xf32, #tpu.memory_space<vmem>>, vector<1x1x16x128xf32>
      %444 = vector.shape_cast %443 : vector<1x1x16x128xf32> to vector<16x128xf32>
      %c3_336 = arith.constant 3 : index
      %c1_337 = arith.constant 1 : index
      %c1_338 = arith.constant 1 : index
      %c0_339 = arith.constant 0 : index
      %445 = vector.load %arg9[%c3_336, %c1_337, %c1_338, %c0_339] : memref<6x2x22x128xf32, #tpu.memory_space<vmem>>, vector<1x1x16x128xf32>
      %446 = vector.shape_cast %445 : vector<1x1x16x128xf32> to vector<16x128xf32>
      %447 = vector.broadcast %28 : f32 to vector<16x128xf32>
      %448 = arith.mulf %444, %447 : vector<16x128xf32>
      %449 = arith.addf %439, %448 : vector<16x128xf32>
      %450 = vector.broadcast %77 : f32 to vector<16x128xf32>
      %451 = arith.mulf %446, %450 : vector<16x128xf32>
      %452 = arith.addf %442, %451 : vector<16x128xf32>
      %c4_340 = arith.constant 4 : index
      %c0_341 = arith.constant 0 : index
      %c1_342 = arith.constant 1 : index
      %c0_343 = arith.constant 0 : index
      %453 = vector.load %arg9[%c4_340, %c0_341, %c1_342, %c0_343] : memref<6x2x22x128xf32, #tpu.memory_space<vmem>>, vector<1x1x16x128xf32>
      %454 = vector.shape_cast %453 : vector<1x1x16x128xf32> to vector<16x128xf32>
      %c4_344 = arith.constant 4 : index
      %c1_345 = arith.constant 1 : index
      %c1_346 = arith.constant 1 : index
      %c0_347 = arith.constant 0 : index
      %455 = vector.load %arg9[%c4_344, %c1_345, %c1_346, %c0_347] : memref<6x2x22x128xf32, #tpu.memory_space<vmem>>, vector<1x1x16x128xf32>
      %456 = vector.shape_cast %455 : vector<1x1x16x128xf32> to vector<16x128xf32>
      %457 = vector.broadcast %29 : f32 to vector<16x128xf32>
      %458 = arith.mulf %454, %457 : vector<16x128xf32>
      %459 = arith.addf %449, %458 : vector<16x128xf32>
      %460 = vector.broadcast %78 : f32 to vector<16x128xf32>
      %461 = arith.mulf %456, %460 : vector<16x128xf32>
      %462 = arith.addf %452, %461 : vector<16x128xf32>
      %c5_348 = arith.constant 5 : index
      %c0_349 = arith.constant 0 : index
      %c1_350 = arith.constant 1 : index
      %c0_351 = arith.constant 0 : index
      %463 = vector.load %arg9[%c5_348, %c0_349, %c1_350, %c0_351] : memref<6x2x22x128xf32, #tpu.memory_space<vmem>>, vector<1x1x16x128xf32>
      %464 = vector.shape_cast %463 : vector<1x1x16x128xf32> to vector<16x128xf32>
      %c5_352 = arith.constant 5 : index
      %c1_353 = arith.constant 1 : index
      %c1_354 = arith.constant 1 : index
      %c0_355 = arith.constant 0 : index
      %465 = vector.load %arg9[%c5_352, %c1_353, %c1_354, %c0_355] : memref<6x2x22x128xf32, #tpu.memory_space<vmem>>, vector<1x1x16x128xf32>
      %466 = vector.shape_cast %465 : vector<1x1x16x128xf32> to vector<16x128xf32>
      %467 = vector.broadcast %30 : f32 to vector<16x128xf32>
      %468 = arith.mulf %464, %467 : vector<16x128xf32>
      %469 = arith.addf %459, %468 : vector<16x128xf32>
      %470 = vector.broadcast %79 : f32 to vector<16x128xf32>
      %471 = arith.mulf %466, %470 : vector<16x128xf32>
      %472 = arith.addf %462, %471 : vector<16x128xf32>
      %c0_356 = arith.constant 0 : index
      %c0_357 = arith.constant 0 : index
      %c2_358 = arith.constant 2 : index
      %c0_359 = arith.constant 0 : index
      %473 = vector.load %arg9[%c0_356, %c0_357, %c2_358, %c0_359] : memref<6x2x22x128xf32, #tpu.memory_space<vmem>>, vector<1x1x16x128xf32>
      %474 = vector.shape_cast %473 : vector<1x1x16x128xf32> to vector<16x128xf32>
      %c0_360 = arith.constant 0 : index
      %c1_361 = arith.constant 1 : index
      %c2_362 = arith.constant 2 : index
      %c0_363 = arith.constant 0 : index
      %475 = vector.load %arg9[%c0_360, %c1_361, %c2_362, %c0_363] : memref<6x2x22x128xf32, #tpu.memory_space<vmem>>, vector<1x1x16x128xf32>
      %476 = vector.shape_cast %475 : vector<1x1x16x128xf32> to vector<16x128xf32>
      %477 = vector.broadcast %31 : f32 to vector<16x128xf32>
      %478 = arith.mulf %474, %477 : vector<16x128xf32>
      %479 = arith.addf %469, %478 : vector<16x128xf32>
      %480 = vector.broadcast %80 : f32 to vector<16x128xf32>
      %481 = arith.mulf %476, %480 : vector<16x128xf32>
      %482 = arith.addf %472, %481 : vector<16x128xf32>
      %c1_364 = arith.constant 1 : index
      %c0_365 = arith.constant 0 : index
      %c2_366 = arith.constant 2 : index
      %c0_367 = arith.constant 0 : index
      %483 = vector.load %arg9[%c1_364, %c0_365, %c2_366, %c0_367] : memref<6x2x22x128xf32, #tpu.memory_space<vmem>>, vector<1x1x16x128xf32>
      %484 = vector.shape_cast %483 : vector<1x1x16x128xf32> to vector<16x128xf32>
      %c1_368 = arith.constant 1 : index
      %c1_369 = arith.constant 1 : index
      %c2_370 = arith.constant 2 : index
      %c0_371 = arith.constant 0 : index
      %485 = vector.load %arg9[%c1_368, %c1_369, %c2_370, %c0_371] : memref<6x2x22x128xf32, #tpu.memory_space<vmem>>, vector<1x1x16x128xf32>
      %486 = vector.shape_cast %485 : vector<1x1x16x128xf32> to vector<16x128xf32>
      %487 = vector.broadcast %32 : f32 to vector<16x128xf32>
      %488 = arith.mulf %484, %487 : vector<16x128xf32>
      %489 = arith.addf %479, %488 : vector<16x128xf32>
      %490 = vector.broadcast %81 : f32 to vector<16x128xf32>
      %491 = arith.mulf %486, %490 : vector<16x128xf32>
      %492 = arith.addf %482, %491 : vector<16x128xf32>
      %c2_372 = arith.constant 2 : index
      %c0_373 = arith.constant 0 : index
      %c2_374 = arith.constant 2 : index
      %c0_375 = arith.constant 0 : index
      %493 = vector.load %arg9[%c2_372, %c0_373, %c2_374, %c0_375] : memref<6x2x22x128xf32, #tpu.memory_space<vmem>>, vector<1x1x16x128xf32>
      %494 = vector.shape_cast %493 : vector<1x1x16x128xf32> to vector<16x128xf32>
      %c2_376 = arith.constant 2 : index
      %c1_377 = arith.constant 1 : index
      %c2_378 = arith.constant 2 : index
      %c0_379 = arith.constant 0 : index
      %495 = vector.load %arg9[%c2_376, %c1_377, %c2_378, %c0_379] : memref<6x2x22x128xf32, #tpu.memory_space<vmem>>, vector<1x1x16x128xf32>
      %496 = vector.shape_cast %495 : vector<1x1x16x128xf32> to vector<16x128xf32>
      %497 = vector.broadcast %33 : f32 to vector<16x128xf32>
      %498 = arith.mulf %494, %497 : vector<16x128xf32>
      %499 = arith.addf %489, %498 : vector<16x128xf32>
      %500 = vector.broadcast %82 : f32 to vector<16x128xf32>
      %501 = arith.mulf %496, %500 : vector<16x128xf32>
      %502 = arith.addf %492, %501 : vector<16x128xf32>
      %c0_380 = arith.constant 0 : index
      %c2_381 = arith.constant 2 : index
      %c0_382 = arith.constant 0 : index
      %503 = vector.load %arg8[%c0_380, %c2_381, %c0_382] : memref<2x22x128xf32, #tpu.memory_space<vmem>>, vector<1x16x128xf32>
      %504 = vector.shape_cast %503 : vector<1x16x128xf32> to vector<16x128xf32>
      %c1_383 = arith.constant 1 : index
      %c2_384 = arith.constant 2 : index
      %c0_385 = arith.constant 0 : index
      %505 = vector.load %arg8[%c1_383, %c2_384, %c0_385] : memref<2x22x128xf32, #tpu.memory_space<vmem>>, vector<1x16x128xf32>
      %506 = vector.shape_cast %505 : vector<1x16x128xf32> to vector<16x128xf32>
      %507 = vector.broadcast %34 : f32 to vector<16x128xf32>
      %508 = arith.mulf %504, %507 : vector<16x128xf32>
      %509 = arith.addf %499, %508 : vector<16x128xf32>
      %510 = vector.broadcast %83 : f32 to vector<16x128xf32>
      %511 = arith.mulf %506, %510 : vector<16x128xf32>
      %512 = arith.addf %502, %511 : vector<16x128xf32>
      %c3_386 = arith.constant 3 : index
      %c0_387 = arith.constant 0 : index
      %c2_388 = arith.constant 2 : index
      %c0_389 = arith.constant 0 : index
      %513 = vector.load %arg9[%c3_386, %c0_387, %c2_388, %c0_389] : memref<6x2x22x128xf32, #tpu.memory_space<vmem>>, vector<1x1x16x128xf32>
      %514 = vector.shape_cast %513 : vector<1x1x16x128xf32> to vector<16x128xf32>
      %c3_390 = arith.constant 3 : index
      %c1_391 = arith.constant 1 : index
      %c2_392 = arith.constant 2 : index
      %c0_393 = arith.constant 0 : index
      %515 = vector.load %arg9[%c3_390, %c1_391, %c2_392, %c0_393] : memref<6x2x22x128xf32, #tpu.memory_space<vmem>>, vector<1x1x16x128xf32>
      %516 = vector.shape_cast %515 : vector<1x1x16x128xf32> to vector<16x128xf32>
      %517 = vector.broadcast %35 : f32 to vector<16x128xf32>
      %518 = arith.mulf %514, %517 : vector<16x128xf32>
      %519 = arith.addf %509, %518 : vector<16x128xf32>
      %520 = vector.broadcast %84 : f32 to vector<16x128xf32>
      %521 = arith.mulf %516, %520 : vector<16x128xf32>
      %522 = arith.addf %512, %521 : vector<16x128xf32>
      %c4_394 = arith.constant 4 : index
      %c0_395 = arith.constant 0 : index
      %c2_396 = arith.constant 2 : index
      %c0_397 = arith.constant 0 : index
      %523 = vector.load %arg9[%c4_394, %c0_395, %c2_396, %c0_397] : memref<6x2x22x128xf32, #tpu.memory_space<vmem>>, vector<1x1x16x128xf32>
      %524 = vector.shape_cast %523 : vector<1x1x16x128xf32> to vector<16x128xf32>
      %c4_398 = arith.constant 4 : index
      %c1_399 = arith.constant 1 : index
      %c2_400 = arith.constant 2 : index
      %c0_401 = arith.constant 0 : index
      %525 = vector.load %arg9[%c4_398, %c1_399, %c2_400, %c0_401] : memref<6x2x22x128xf32, #tpu.memory_space<vmem>>, vector<1x1x16x128xf32>
      %526 = vector.shape_cast %525 : vector<1x1x16x128xf32> to vector<16x128xf32>
      %527 = vector.broadcast %36 : f32 to vector<16x128xf32>
      %528 = arith.mulf %524, %527 : vector<16x128xf32>
      %529 = arith.addf %519, %528 : vector<16x128xf32>
      %530 = vector.broadcast %85 : f32 to vector<16x128xf32>
      %531 = arith.mulf %526, %530 : vector<16x128xf32>
      %532 = arith.addf %522, %531 : vector<16x128xf32>
      %c5_402 = arith.constant 5 : index
      %c0_403 = arith.constant 0 : index
      %c2_404 = arith.constant 2 : index
      %c0_405 = arith.constant 0 : index
      %533 = vector.load %arg9[%c5_402, %c0_403, %c2_404, %c0_405] : memref<6x2x22x128xf32, #tpu.memory_space<vmem>>, vector<1x1x16x128xf32>
      %534 = vector.shape_cast %533 : vector<1x1x16x128xf32> to vector<16x128xf32>
      %c5_406 = arith.constant 5 : index
      %c1_407 = arith.constant 1 : index
      %c2_408 = arith.constant 2 : index
      %c0_409 = arith.constant 0 : index
      %535 = vector.load %arg9[%c5_406, %c1_407, %c2_408, %c0_409] : memref<6x2x22x128xf32, #tpu.memory_space<vmem>>, vector<1x1x16x128xf32>
      %536 = vector.shape_cast %535 : vector<1x1x16x128xf32> to vector<16x128xf32>
      %537 = vector.broadcast %37 : f32 to vector<16x128xf32>
      %538 = arith.mulf %534, %537 : vector<16x128xf32>
      %539 = arith.addf %529, %538 : vector<16x128xf32>
      %540 = vector.broadcast %86 : f32 to vector<16x128xf32>
      %541 = arith.mulf %536, %540 : vector<16x128xf32>
      %542 = arith.addf %532, %541 : vector<16x128xf32>
      %c0_410 = arith.constant 0 : index
      %c0_411 = arith.constant 0 : index
      %c3_412 = arith.constant 3 : index
      %c0_413 = arith.constant 0 : index
      %543 = vector.load %arg9[%c0_410, %c0_411, %c3_412, %c0_413] : memref<6x2x22x128xf32, #tpu.memory_space<vmem>>, vector<1x1x16x128xf32>
      %544 = vector.shape_cast %543 : vector<1x1x16x128xf32> to vector<16x128xf32>
      %c0_414 = arith.constant 0 : index
      %c1_415 = arith.constant 1 : index
      %c3_416 = arith.constant 3 : index
      %c0_417 = arith.constant 0 : index
      %545 = vector.load %arg9[%c0_414, %c1_415, %c3_416, %c0_417] : memref<6x2x22x128xf32, #tpu.memory_space<vmem>>, vector<1x1x16x128xf32>
      %546 = vector.shape_cast %545 : vector<1x1x16x128xf32> to vector<16x128xf32>
      %547 = vector.broadcast %38 : f32 to vector<16x128xf32>
      %548 = arith.mulf %544, %547 : vector<16x128xf32>
      %549 = arith.addf %539, %548 : vector<16x128xf32>
      %550 = vector.broadcast %87 : f32 to vector<16x128xf32>
      %551 = arith.mulf %546, %550 : vector<16x128xf32>
      %552 = arith.addf %542, %551 : vector<16x128xf32>
      %c1_418 = arith.constant 1 : index
      %c0_419 = arith.constant 0 : index
      %c3_420 = arith.constant 3 : index
      %c0_421 = arith.constant 0 : index
      %553 = vector.load %arg9[%c1_418, %c0_419, %c3_420, %c0_421] : memref<6x2x22x128xf32, #tpu.memory_space<vmem>>, vector<1x1x16x128xf32>
      %554 = vector.shape_cast %553 : vector<1x1x16x128xf32> to vector<16x128xf32>
      %c1_422 = arith.constant 1 : index
      %c1_423 = arith.constant 1 : index
      %c3_424 = arith.constant 3 : index
      %c0_425 = arith.constant 0 : index
      %555 = vector.load %arg9[%c1_422, %c1_423, %c3_424, %c0_425] : memref<6x2x22x128xf32, #tpu.memory_space<vmem>>, vector<1x1x16x128xf32>
      %556 = vector.shape_cast %555 : vector<1x1x16x128xf32> to vector<16x128xf32>
      %557 = vector.broadcast %39 : f32 to vector<16x128xf32>
      %558 = arith.mulf %554, %557 : vector<16x128xf32>
      %559 = arith.addf %549, %558 : vector<16x128xf32>
      %560 = vector.broadcast %88 : f32 to vector<16x128xf32>
      %561 = arith.mulf %556, %560 : vector<16x128xf32>
      %562 = arith.addf %552, %561 : vector<16x128xf32>
      %c2_426 = arith.constant 2 : index
      %c0_427 = arith.constant 0 : index
      %c3_428 = arith.constant 3 : index
      %c0_429 = arith.constant 0 : index
      %563 = vector.load %arg9[%c2_426, %c0_427, %c3_428, %c0_429] : memref<6x2x22x128xf32, #tpu.memory_space<vmem>>, vector<1x1x16x128xf32>
      %564 = vector.shape_cast %563 : vector<1x1x16x128xf32> to vector<16x128xf32>
      %c2_430 = arith.constant 2 : index
      %c1_431 = arith.constant 1 : index
      %c3_432 = arith.constant 3 : index
      %c0_433 = arith.constant 0 : index
      %565 = vector.load %arg9[%c2_430, %c1_431, %c3_432, %c0_433] : memref<6x2x22x128xf32, #tpu.memory_space<vmem>>, vector<1x1x16x128xf32>
      %566 = vector.shape_cast %565 : vector<1x1x16x128xf32> to vector<16x128xf32>
      %567 = vector.broadcast %40 : f32 to vector<16x128xf32>
      %568 = arith.mulf %564, %567 : vector<16x128xf32>
      %569 = arith.addf %559, %568 : vector<16x128xf32>
      %570 = vector.broadcast %89 : f32 to vector<16x128xf32>
      %571 = arith.mulf %566, %570 : vector<16x128xf32>
      %572 = arith.addf %562, %571 : vector<16x128xf32>
      %c0_434 = arith.constant 0 : index
      %c3_435 = arith.constant 3 : index
      %c0_436 = arith.constant 0 : index
      %573 = vector.load %arg8[%c0_434, %c3_435, %c0_436] : memref<2x22x128xf32, #tpu.memory_space<vmem>>, vector<1x16x128xf32>
      %574 = vector.shape_cast %573 : vector<1x16x128xf32> to vector<16x128xf32>
      %c1_437 = arith.constant 1 : index
      %c3_438 = arith.constant 3 : index
      %c0_439 = arith.constant 0 : index
      %575 = vector.load %arg8[%c1_437, %c3_438, %c0_439] : memref<2x22x128xf32, #tpu.memory_space<vmem>>, vector<1x16x128xf32>
      %576 = vector.shape_cast %575 : vector<1x16x128xf32> to vector<16x128xf32>
      %577 = vector.broadcast %41 : f32 to vector<16x128xf32>
      %578 = arith.mulf %574, %577 : vector<16x128xf32>
      %579 = arith.addf %569, %578 : vector<16x128xf32>
      %580 = vector.broadcast %90 : f32 to vector<16x128xf32>
      %581 = arith.mulf %576, %580 : vector<16x128xf32>
      %582 = arith.addf %572, %581 : vector<16x128xf32>
      %c3_440 = arith.constant 3 : index
      %c0_441 = arith.constant 0 : index
      %c3_442 = arith.constant 3 : index
      %c0_443 = arith.constant 0 : index
      %583 = vector.load %arg9[%c3_440, %c0_441, %c3_442, %c0_443] : memref<6x2x22x128xf32, #tpu.memory_space<vmem>>, vector<1x1x16x128xf32>
      %584 = vector.shape_cast %583 : vector<1x1x16x128xf32> to vector<16x128xf32>
      %c3_444 = arith.constant 3 : index
      %c1_445 = arith.constant 1 : index
      %c3_446 = arith.constant 3 : index
      %c0_447 = arith.constant 0 : index
      %585 = vector.load %arg9[%c3_444, %c1_445, %c3_446, %c0_447] : memref<6x2x22x128xf32, #tpu.memory_space<vmem>>, vector<1x1x16x128xf32>
      %586 = vector.shape_cast %585 : vector<1x1x16x128xf32> to vector<16x128xf32>
      %587 = vector.broadcast %42 : f32 to vector<16x128xf32>
      %588 = arith.mulf %584, %587 : vector<16x128xf32>
      %589 = arith.addf %579, %588 : vector<16x128xf32>
      %590 = vector.broadcast %91 : f32 to vector<16x128xf32>
      %591 = arith.mulf %586, %590 : vector<16x128xf32>
      %592 = arith.addf %582, %591 : vector<16x128xf32>
      %c4_448 = arith.constant 4 : index
      %c0_449 = arith.constant 0 : index
      %c3_450 = arith.constant 3 : index
      %c0_451 = arith.constant 0 : index
      %593 = vector.load %arg9[%c4_448, %c0_449, %c3_450, %c0_451] : memref<6x2x22x128xf32, #tpu.memory_space<vmem>>, vector<1x1x16x128xf32>
      %594 = vector.shape_cast %593 : vector<1x1x16x128xf32> to vector<16x128xf32>
      %c4_452 = arith.constant 4 : index
      %c1_453 = arith.constant 1 : index
      %c3_454 = arith.constant 3 : index
      %c0_455 = arith.constant 0 : index
      %595 = vector.load %arg9[%c4_452, %c1_453, %c3_454, %c0_455] : memref<6x2x22x128xf32, #tpu.memory_space<vmem>>, vector<1x1x16x128xf32>
      %596 = vector.shape_cast %595 : vector<1x1x16x128xf32> to vector<16x128xf32>
      %597 = vector.broadcast %43 : f32 to vector<16x128xf32>
      %598 = arith.mulf %594, %597 : vector<16x128xf32>
      %599 = arith.addf %589, %598 : vector<16x128xf32>
      %600 = vector.broadcast %92 : f32 to vector<16x128xf32>
      %601 = arith.mulf %596, %600 : vector<16x128xf32>
      %602 = arith.addf %592, %601 : vector<16x128xf32>
      %c5_456 = arith.constant 5 : index
      %c0_457 = arith.constant 0 : index
      %c3_458 = arith.constant 3 : index
      %c0_459 = arith.constant 0 : index
      %603 = vector.load %arg9[%c5_456, %c0_457, %c3_458, %c0_459] : memref<6x2x22x128xf32, #tpu.memory_space<vmem>>, vector<1x1x16x128xf32>
      %604 = vector.shape_cast %603 : vector<1x1x16x128xf32> to vector<16x128xf32>
      %c5_460 = arith.constant 5 : index
      %c1_461 = arith.constant 1 : index
      %c3_462 = arith.constant 3 : index
      %c0_463 = arith.constant 0 : index
      %605 = vector.load %arg9[%c5_460, %c1_461, %c3_462, %c0_463] : memref<6x2x22x128xf32, #tpu.memory_space<vmem>>, vector<1x1x16x128xf32>
      %606 = vector.shape_cast %605 : vector<1x1x16x128xf32> to vector<16x128xf32>
      %607 = vector.broadcast %44 : f32 to vector<16x128xf32>
      %608 = arith.mulf %604, %607 : vector<16x128xf32>
      %609 = arith.addf %599, %608 : vector<16x128xf32>
      %610 = vector.broadcast %93 : f32 to vector<16x128xf32>
      %611 = arith.mulf %606, %610 : vector<16x128xf32>
      %612 = arith.addf %602, %611 : vector<16x128xf32>
      %c0_464 = arith.constant 0 : index
      %c0_465 = arith.constant 0 : index
      %c4_466 = arith.constant 4 : index
      %c0_467 = arith.constant 0 : index
      %613 = vector.load %arg9[%c0_464, %c0_465, %c4_466, %c0_467] : memref<6x2x22x128xf32, #tpu.memory_space<vmem>>, vector<1x1x16x128xf32>
      %614 = vector.shape_cast %613 : vector<1x1x16x128xf32> to vector<16x128xf32>
      %c0_468 = arith.constant 0 : index
      %c1_469 = arith.constant 1 : index
      %c4_470 = arith.constant 4 : index
      %c0_471 = arith.constant 0 : index
      %615 = vector.load %arg9[%c0_468, %c1_469, %c4_470, %c0_471] : memref<6x2x22x128xf32, #tpu.memory_space<vmem>>, vector<1x1x16x128xf32>
      %616 = vector.shape_cast %615 : vector<1x1x16x128xf32> to vector<16x128xf32>
      %617 = vector.broadcast %45 : f32 to vector<16x128xf32>
      %618 = arith.mulf %614, %617 : vector<16x128xf32>
      %619 = arith.addf %609, %618 : vector<16x128xf32>
      %620 = vector.broadcast %94 : f32 to vector<16x128xf32>
      %621 = arith.mulf %616, %620 : vector<16x128xf32>
      %622 = arith.addf %612, %621 : vector<16x128xf32>
      %c1_472 = arith.constant 1 : index
      %c0_473 = arith.constant 0 : index
      %c4_474 = arith.constant 4 : index
      %c0_475 = arith.constant 0 : index
      %623 = vector.load %arg9[%c1_472, %c0_473, %c4_474, %c0_475] : memref<6x2x22x128xf32, #tpu.memory_space<vmem>>, vector<1x1x16x128xf32>
      %624 = vector.shape_cast %623 : vector<1x1x16x128xf32> to vector<16x128xf32>
      %c1_476 = arith.constant 1 : index
      %c1_477 = arith.constant 1 : index
      %c4_478 = arith.constant 4 : index
      %c0_479 = arith.constant 0 : index
      %625 = vector.load %arg9[%c1_476, %c1_477, %c4_478, %c0_479] : memref<6x2x22x128xf32, #tpu.memory_space<vmem>>, vector<1x1x16x128xf32>
      %626 = vector.shape_cast %625 : vector<1x1x16x128xf32> to vector<16x128xf32>
      %627 = vector.broadcast %46 : f32 to vector<16x128xf32>
      %628 = arith.mulf %624, %627 : vector<16x128xf32>
      %629 = arith.addf %619, %628 : vector<16x128xf32>
      %630 = vector.broadcast %95 : f32 to vector<16x128xf32>
      %631 = arith.mulf %626, %630 : vector<16x128xf32>
      %632 = arith.addf %622, %631 : vector<16x128xf32>
      %c2_480 = arith.constant 2 : index
      %c0_481 = arith.constant 0 : index
      %c4_482 = arith.constant 4 : index
      %c0_483 = arith.constant 0 : index
      %633 = vector.load %arg9[%c2_480, %c0_481, %c4_482, %c0_483] : memref<6x2x22x128xf32, #tpu.memory_space<vmem>>, vector<1x1x16x128xf32>
      %634 = vector.shape_cast %633 : vector<1x1x16x128xf32> to vector<16x128xf32>
      %c2_484 = arith.constant 2 : index
      %c1_485 = arith.constant 1 : index
      %c4_486 = arith.constant 4 : index
      %c0_487 = arith.constant 0 : index
      %635 = vector.load %arg9[%c2_484, %c1_485, %c4_486, %c0_487] : memref<6x2x22x128xf32, #tpu.memory_space<vmem>>, vector<1x1x16x128xf32>
      %636 = vector.shape_cast %635 : vector<1x1x16x128xf32> to vector<16x128xf32>
      %637 = vector.broadcast %47 : f32 to vector<16x128xf32>
      %638 = arith.mulf %634, %637 : vector<16x128xf32>
      %639 = arith.addf %629, %638 : vector<16x128xf32>
      %640 = vector.broadcast %96 : f32 to vector<16x128xf32>
      %641 = arith.mulf %636, %640 : vector<16x128xf32>
      %642 = arith.addf %632, %641 : vector<16x128xf32>
      %c0_488 = arith.constant 0 : index
      %c4_489 = arith.constant 4 : index
      %c0_490 = arith.constant 0 : index
      %643 = vector.load %arg8[%c0_488, %c4_489, %c0_490] : memref<2x22x128xf32, #tpu.memory_space<vmem>>, vector<1x16x128xf32>
      %644 = vector.shape_cast %643 : vector<1x16x128xf32> to vector<16x128xf32>
      %c1_491 = arith.constant 1 : index
      %c4_492 = arith.constant 4 : index
      %c0_493 = arith.constant 0 : index
      %645 = vector.load %arg8[%c1_491, %c4_492, %c0_493] : memref<2x22x128xf32, #tpu.memory_space<vmem>>, vector<1x16x128xf32>
      %646 = vector.shape_cast %645 : vector<1x16x128xf32> to vector<16x128xf32>
      %647 = vector.broadcast %48 : f32 to vector<16x128xf32>
      %648 = arith.mulf %644, %647 : vector<16x128xf32>
      %649 = arith.addf %639, %648 : vector<16x128xf32>
      %650 = vector.broadcast %97 : f32 to vector<16x128xf32>
      %651 = arith.mulf %646, %650 : vector<16x128xf32>
      %652 = arith.addf %642, %651 : vector<16x128xf32>
      %c3_494 = arith.constant 3 : index
      %c0_495 = arith.constant 0 : index
      %c4_496 = arith.constant 4 : index
      %c0_497 = arith.constant 0 : index
      %653 = vector.load %arg9[%c3_494, %c0_495, %c4_496, %c0_497] : memref<6x2x22x128xf32, #tpu.memory_space<vmem>>, vector<1x1x16x128xf32>
      %654 = vector.shape_cast %653 : vector<1x1x16x128xf32> to vector<16x128xf32>
      %c3_498 = arith.constant 3 : index
      %c1_499 = arith.constant 1 : index
      %c4_500 = arith.constant 4 : index
      %c0_501 = arith.constant 0 : index
      %655 = vector.load %arg9[%c3_498, %c1_499, %c4_500, %c0_501] : memref<6x2x22x128xf32, #tpu.memory_space<vmem>>, vector<1x1x16x128xf32>
      %656 = vector.shape_cast %655 : vector<1x1x16x128xf32> to vector<16x128xf32>
      %657 = vector.broadcast %49 : f32 to vector<16x128xf32>
      %658 = arith.mulf %654, %657 : vector<16x128xf32>
      %659 = arith.addf %649, %658 : vector<16x128xf32>
      %660 = vector.broadcast %98 : f32 to vector<16x128xf32>
      %661 = arith.mulf %656, %660 : vector<16x128xf32>
      %662 = arith.addf %652, %661 : vector<16x128xf32>
      %c4_502 = arith.constant 4 : index
      %c0_503 = arith.constant 0 : index
      %c4_504 = arith.constant 4 : index
      %c0_505 = arith.constant 0 : index
      %663 = vector.load %arg9[%c4_502, %c0_503, %c4_504, %c0_505] : memref<6x2x22x128xf32, #tpu.memory_space<vmem>>, vector<1x1x16x128xf32>
      %664 = vector.shape_cast %663 : vector<1x1x16x128xf32> to vector<16x128xf32>
      %c4_506 = arith.constant 4 : index
      %c1_507 = arith.constant 1 : index
      %c4_508 = arith.constant 4 : index
      %c0_509 = arith.constant 0 : index
      %665 = vector.load %arg9[%c4_506, %c1_507, %c4_508, %c0_509] : memref<6x2x22x128xf32, #tpu.memory_space<vmem>>, vector<1x1x16x128xf32>
      %666 = vector.shape_cast %665 : vector<1x1x16x128xf32> to vector<16x128xf32>
      %667 = vector.broadcast %50 : f32 to vector<16x128xf32>
      %668 = arith.mulf %664, %667 : vector<16x128xf32>
      %669 = arith.addf %659, %668 : vector<16x128xf32>
      %670 = vector.broadcast %99 : f32 to vector<16x128xf32>
      %671 = arith.mulf %666, %670 : vector<16x128xf32>
      %672 = arith.addf %662, %671 : vector<16x128xf32>
      %c5_510 = arith.constant 5 : index
      %c0_511 = arith.constant 0 : index
      %c4_512 = arith.constant 4 : index
      %c0_513 = arith.constant 0 : index
      %673 = vector.load %arg9[%c5_510, %c0_511, %c4_512, %c0_513] : memref<6x2x22x128xf32, #tpu.memory_space<vmem>>, vector<1x1x16x128xf32>
      %674 = vector.shape_cast %673 : vector<1x1x16x128xf32> to vector<16x128xf32>
      %c5_514 = arith.constant 5 : index
      %c1_515 = arith.constant 1 : index
      %c4_516 = arith.constant 4 : index
      %c0_517 = arith.constant 0 : index
      %675 = vector.load %arg9[%c5_514, %c1_515, %c4_516, %c0_517] : memref<6x2x22x128xf32, #tpu.memory_space<vmem>>, vector<1x1x16x128xf32>
      %676 = vector.shape_cast %675 : vector<1x1x16x128xf32> to vector<16x128xf32>
      %677 = vector.broadcast %51 : f32 to vector<16x128xf32>
      %678 = arith.mulf %674, %677 : vector<16x128xf32>
      %679 = arith.addf %669, %678 : vector<16x128xf32>
      %680 = vector.broadcast %100 : f32 to vector<16x128xf32>
      %681 = arith.mulf %676, %680 : vector<16x128xf32>
      %682 = arith.addf %672, %681 : vector<16x128xf32>
      %c0_518 = arith.constant 0 : index
      %c0_519 = arith.constant 0 : index
      %c5_520 = arith.constant 5 : index
      %c0_521 = arith.constant 0 : index
      %683 = vector.load %arg9[%c0_518, %c0_519, %c5_520, %c0_521] : memref<6x2x22x128xf32, #tpu.memory_space<vmem>>, vector<1x1x16x128xf32>
      %684 = vector.shape_cast %683 : vector<1x1x16x128xf32> to vector<16x128xf32>
      %c0_522 = arith.constant 0 : index
      %c1_523 = arith.constant 1 : index
      %c5_524 = arith.constant 5 : index
      %c0_525 = arith.constant 0 : index
      %685 = vector.load %arg9[%c0_522, %c1_523, %c5_524, %c0_525] : memref<6x2x22x128xf32, #tpu.memory_space<vmem>>, vector<1x1x16x128xf32>
      %686 = vector.shape_cast %685 : vector<1x1x16x128xf32> to vector<16x128xf32>
      %687 = vector.broadcast %52 : f32 to vector<16x128xf32>
      %688 = arith.mulf %684, %687 : vector<16x128xf32>
      %689 = arith.addf %679, %688 : vector<16x128xf32>
      %690 = vector.broadcast %101 : f32 to vector<16x128xf32>
      %691 = arith.mulf %686, %690 : vector<16x128xf32>
      %692 = arith.addf %682, %691 : vector<16x128xf32>
      %c1_526 = arith.constant 1 : index
      %c0_527 = arith.constant 0 : index
      %c5_528 = arith.constant 5 : index
      %c0_529 = arith.constant 0 : index
      %693 = vector.load %arg9[%c1_526, %c0_527, %c5_528, %c0_529] : memref<6x2x22x128xf32, #tpu.memory_space<vmem>>, vector<1x1x16x128xf32>
      %694 = vector.shape_cast %693 : vector<1x1x16x128xf32> to vector<16x128xf32>
      %c1_530 = arith.constant 1 : index
      %c1_531 = arith.constant 1 : index
      %c5_532 = arith.constant 5 : index
      %c0_533 = arith.constant 0 : index
      %695 = vector.load %arg9[%c1_530, %c1_531, %c5_532, %c0_533] : memref<6x2x22x128xf32, #tpu.memory_space<vmem>>, vector<1x1x16x128xf32>
      %696 = vector.shape_cast %695 : vector<1x1x16x128xf32> to vector<16x128xf32>
      %697 = vector.broadcast %53 : f32 to vector<16x128xf32>
      %698 = arith.mulf %694, %697 : vector<16x128xf32>
      %699 = arith.addf %689, %698 : vector<16x128xf32>
      %700 = vector.broadcast %102 : f32 to vector<16x128xf32>
      %701 = arith.mulf %696, %700 : vector<16x128xf32>
      %702 = arith.addf %692, %701 : vector<16x128xf32>
      %c2_534 = arith.constant 2 : index
      %c0_535 = arith.constant 0 : index
      %c5_536 = arith.constant 5 : index
      %c0_537 = arith.constant 0 : index
      %703 = vector.load %arg9[%c2_534, %c0_535, %c5_536, %c0_537] : memref<6x2x22x128xf32, #tpu.memory_space<vmem>>, vector<1x1x16x128xf32>
      %704 = vector.shape_cast %703 : vector<1x1x16x128xf32> to vector<16x128xf32>
      %c2_538 = arith.constant 2 : index
      %c1_539 = arith.constant 1 : index
      %c5_540 = arith.constant 5 : index
      %c0_541 = arith.constant 0 : index
      %705 = vector.load %arg9[%c2_538, %c1_539, %c5_540, %c0_541] : memref<6x2x22x128xf32, #tpu.memory_space<vmem>>, vector<1x1x16x128xf32>
      %706 = vector.shape_cast %705 : vector<1x1x16x128xf32> to vector<16x128xf32>
      %707 = vector.broadcast %54 : f32 to vector<16x128xf32>
      %708 = arith.mulf %704, %707 : vector<16x128xf32>
      %709 = arith.addf %699, %708 : vector<16x128xf32>
      %710 = vector.broadcast %103 : f32 to vector<16x128xf32>
      %711 = arith.mulf %706, %710 : vector<16x128xf32>
      %712 = arith.addf %702, %711 : vector<16x128xf32>
      %c0_542 = arith.constant 0 : index
      %c5_543 = arith.constant 5 : index
      %c0_544 = arith.constant 0 : index
      %713 = vector.load %arg8[%c0_542, %c5_543, %c0_544] : memref<2x22x128xf32, #tpu.memory_space<vmem>>, vector<1x16x128xf32>
      %714 = vector.shape_cast %713 : vector<1x16x128xf32> to vector<16x128xf32>
      %c1_545 = arith.constant 1 : index
      %c5_546 = arith.constant 5 : index
      %c0_547 = arith.constant 0 : index
      %715 = vector.load %arg8[%c1_545, %c5_546, %c0_547] : memref<2x22x128xf32, #tpu.memory_space<vmem>>, vector<1x16x128xf32>
      %716 = vector.shape_cast %715 : vector<1x16x128xf32> to vector<16x128xf32>
      %717 = vector.broadcast %55 : f32 to vector<16x128xf32>
      %718 = arith.mulf %714, %717 : vector<16x128xf32>
      %719 = arith.addf %709, %718 : vector<16x128xf32>
      %720 = vector.broadcast %104 : f32 to vector<16x128xf32>
      %721 = arith.mulf %716, %720 : vector<16x128xf32>
      %722 = arith.addf %712, %721 : vector<16x128xf32>
      %c3_548 = arith.constant 3 : index
      %c0_549 = arith.constant 0 : index
      %c5_550 = arith.constant 5 : index
      %c0_551 = arith.constant 0 : index
      %723 = vector.load %arg9[%c3_548, %c0_549, %c5_550, %c0_551] : memref<6x2x22x128xf32, #tpu.memory_space<vmem>>, vector<1x1x16x128xf32>
      %724 = vector.shape_cast %723 : vector<1x1x16x128xf32> to vector<16x128xf32>
      %c3_552 = arith.constant 3 : index
      %c1_553 = arith.constant 1 : index
      %c5_554 = arith.constant 5 : index
      %c0_555 = arith.constant 0 : index
      %725 = vector.load %arg9[%c3_552, %c1_553, %c5_554, %c0_555] : memref<6x2x22x128xf32, #tpu.memory_space<vmem>>, vector<1x1x16x128xf32>
      %726 = vector.shape_cast %725 : vector<1x1x16x128xf32> to vector<16x128xf32>
      %727 = vector.broadcast %56 : f32 to vector<16x128xf32>
      %728 = arith.mulf %724, %727 : vector<16x128xf32>
      %729 = arith.addf %719, %728 : vector<16x128xf32>
      %730 = vector.broadcast %105 : f32 to vector<16x128xf32>
      %731 = arith.mulf %726, %730 : vector<16x128xf32>
      %732 = arith.addf %722, %731 : vector<16x128xf32>
      %c4_556 = arith.constant 4 : index
      %c0_557 = arith.constant 0 : index
      %c5_558 = arith.constant 5 : index
      %c0_559 = arith.constant 0 : index
      %733 = vector.load %arg9[%c4_556, %c0_557, %c5_558, %c0_559] : memref<6x2x22x128xf32, #tpu.memory_space<vmem>>, vector<1x1x16x128xf32>
      %734 = vector.shape_cast %733 : vector<1x1x16x128xf32> to vector<16x128xf32>
      %c4_560 = arith.constant 4 : index
      %c1_561 = arith.constant 1 : index
      %c5_562 = arith.constant 5 : index
      %c0_563 = arith.constant 0 : index
      %735 = vector.load %arg9[%c4_560, %c1_561, %c5_562, %c0_563] : memref<6x2x22x128xf32, #tpu.memory_space<vmem>>, vector<1x1x16x128xf32>
      %736 = vector.shape_cast %735 : vector<1x1x16x128xf32> to vector<16x128xf32>
      %737 = vector.broadcast %57 : f32 to vector<16x128xf32>
      %738 = arith.mulf %734, %737 : vector<16x128xf32>
      %739 = arith.addf %729, %738 : vector<16x128xf32>
      %740 = vector.broadcast %106 : f32 to vector<16x128xf32>
      %741 = arith.mulf %736, %740 : vector<16x128xf32>
      %742 = arith.addf %732, %741 : vector<16x128xf32>
      %c5_564 = arith.constant 5 : index
      %c0_565 = arith.constant 0 : index
      %c5_566 = arith.constant 5 : index
      %c0_567 = arith.constant 0 : index
      %743 = vector.load %arg9[%c5_564, %c0_565, %c5_566, %c0_567] : memref<6x2x22x128xf32, #tpu.memory_space<vmem>>, vector<1x1x16x128xf32>
      %744 = vector.shape_cast %743 : vector<1x1x16x128xf32> to vector<16x128xf32>
      %c5_568 = arith.constant 5 : index
      %c1_569 = arith.constant 1 : index
      %c5_570 = arith.constant 5 : index
      %c0_571 = arith.constant 0 : index
      %745 = vector.load %arg9[%c5_568, %c1_569, %c5_570, %c0_571] : memref<6x2x22x128xf32, #tpu.memory_space<vmem>>, vector<1x1x16x128xf32>
      %746 = vector.shape_cast %745 : vector<1x1x16x128xf32> to vector<16x128xf32>
      %747 = vector.broadcast %58 : f32 to vector<16x128xf32>
      %748 = arith.mulf %744, %747 : vector<16x128xf32>
      %749 = arith.addf %739, %748 : vector<16x128xf32>
      %750 = vector.broadcast %107 : f32 to vector<16x128xf32>
      %751 = arith.mulf %746, %750 : vector<16x128xf32>
      %752 = arith.addf %742, %751 : vector<16x128xf32>
      %c0_572 = arith.constant 0 : index
      %c0_573 = arith.constant 0 : index
      %c6_574 = arith.constant 6 : index
      %c0_575 = arith.constant 0 : index
      %753 = vector.load %arg9[%c0_572, %c0_573, %c6_574, %c0_575] : memref<6x2x22x128xf32, #tpu.memory_space<vmem>>, vector<1x1x16x128xf32>
      %754 = vector.shape_cast %753 : vector<1x1x16x128xf32> to vector<16x128xf32>
      %c0_576 = arith.constant 0 : index
      %c1_577 = arith.constant 1 : index
      %c6_578 = arith.constant 6 : index
      %c0_579 = arith.constant 0 : index
      %755 = vector.load %arg9[%c0_576, %c1_577, %c6_578, %c0_579] : memref<6x2x22x128xf32, #tpu.memory_space<vmem>>, vector<1x1x16x128xf32>
      %756 = vector.shape_cast %755 : vector<1x1x16x128xf32> to vector<16x128xf32>
      %757 = vector.broadcast %59 : f32 to vector<16x128xf32>
      %758 = arith.mulf %754, %757 : vector<16x128xf32>
      %759 = arith.addf %749, %758 : vector<16x128xf32>
      %760 = vector.broadcast %108 : f32 to vector<16x128xf32>
      %761 = arith.mulf %756, %760 : vector<16x128xf32>
      %762 = arith.addf %752, %761 : vector<16x128xf32>
      %c1_580 = arith.constant 1 : index
      %c0_581 = arith.constant 0 : index
      %c6_582 = arith.constant 6 : index
      %c0_583 = arith.constant 0 : index
      %763 = vector.load %arg9[%c1_580, %c0_581, %c6_582, %c0_583] : memref<6x2x22x128xf32, #tpu.memory_space<vmem>>, vector<1x1x16x128xf32>
      %764 = vector.shape_cast %763 : vector<1x1x16x128xf32> to vector<16x128xf32>
      %c1_584 = arith.constant 1 : index
      %c1_585 = arith.constant 1 : index
      %c6_586 = arith.constant 6 : index
      %c0_587 = arith.constant 0 : index
      %765 = vector.load %arg9[%c1_584, %c1_585, %c6_586, %c0_587] : memref<6x2x22x128xf32, #tpu.memory_space<vmem>>, vector<1x1x16x128xf32>
      %766 = vector.shape_cast %765 : vector<1x1x16x128xf32> to vector<16x128xf32>
      %767 = vector.broadcast %60 : f32 to vector<16x128xf32>
      %768 = arith.mulf %764, %767 : vector<16x128xf32>
      %769 = arith.addf %759, %768 : vector<16x128xf32>
      %770 = vector.broadcast %109 : f32 to vector<16x128xf32>
      %771 = arith.mulf %766, %770 : vector<16x128xf32>
      %772 = arith.addf %762, %771 : vector<16x128xf32>
      %c2_588 = arith.constant 2 : index
      %c0_589 = arith.constant 0 : index
      %c6_590 = arith.constant 6 : index
      %c0_591 = arith.constant 0 : index
      %773 = vector.load %arg9[%c2_588, %c0_589, %c6_590, %c0_591] : memref<6x2x22x128xf32, #tpu.memory_space<vmem>>, vector<1x1x16x128xf32>
      %774 = vector.shape_cast %773 : vector<1x1x16x128xf32> to vector<16x128xf32>
      %c2_592 = arith.constant 2 : index
      %c1_593 = arith.constant 1 : index
      %c6_594 = arith.constant 6 : index
      %c0_595 = arith.constant 0 : index
      %775 = vector.load %arg9[%c2_592, %c1_593, %c6_594, %c0_595] : memref<6x2x22x128xf32, #tpu.memory_space<vmem>>, vector<1x1x16x128xf32>
      %776 = vector.shape_cast %775 : vector<1x1x16x128xf32> to vector<16x128xf32>
      %777 = vector.broadcast %61 : f32 to vector<16x128xf32>
      %778 = arith.mulf %774, %777 : vector<16x128xf32>
      %779 = arith.addf %769, %778 : vector<16x128xf32>
      %780 = vector.broadcast %110 : f32 to vector<16x128xf32>
      %781 = arith.mulf %776, %780 : vector<16x128xf32>
      %782 = arith.addf %772, %781 : vector<16x128xf32>
      %c0_596 = arith.constant 0 : index
      %c6_597 = arith.constant 6 : index
      %c0_598 = arith.constant 0 : index
      %783 = vector.load %arg8[%c0_596, %c6_597, %c0_598] : memref<2x22x128xf32, #tpu.memory_space<vmem>>, vector<1x16x128xf32>
      %784 = vector.shape_cast %783 : vector<1x16x128xf32> to vector<16x128xf32>
      %c1_599 = arith.constant 1 : index
      %c6_600 = arith.constant 6 : index
      %c0_601 = arith.constant 0 : index
      %785 = vector.load %arg8[%c1_599, %c6_600, %c0_601] : memref<2x22x128xf32, #tpu.memory_space<vmem>>, vector<1x16x128xf32>
      %786 = vector.shape_cast %785 : vector<1x16x128xf32> to vector<16x128xf32>
      %787 = vector.broadcast %62 : f32 to vector<16x128xf32>
      %788 = arith.mulf %784, %787 : vector<16x128xf32>
      %789 = arith.addf %779, %788 : vector<16x128xf32>
      %790 = vector.broadcast %111 : f32 to vector<16x128xf32>
      %791 = arith.mulf %786, %790 : vector<16x128xf32>
      %792 = arith.addf %782, %791 : vector<16x128xf32>
      %c3_602 = arith.constant 3 : index
      %c0_603 = arith.constant 0 : index
      %c6_604 = arith.constant 6 : index
      %c0_605 = arith.constant 0 : index
      %793 = vector.load %arg9[%c3_602, %c0_603, %c6_604, %c0_605] : memref<6x2x22x128xf32, #tpu.memory_space<vmem>>, vector<1x1x16x128xf32>
      %794 = vector.shape_cast %793 : vector<1x1x16x128xf32> to vector<16x128xf32>
      %c3_606 = arith.constant 3 : index
      %c1_607 = arith.constant 1 : index
      %c6_608 = arith.constant 6 : index
      %c0_609 = arith.constant 0 : index
      %795 = vector.load %arg9[%c3_606, %c1_607, %c6_608, %c0_609] : memref<6x2x22x128xf32, #tpu.memory_space<vmem>>, vector<1x1x16x128xf32>
      %796 = vector.shape_cast %795 : vector<1x1x16x128xf32> to vector<16x128xf32>
      %797 = vector.broadcast %63 : f32 to vector<16x128xf32>
      %798 = arith.mulf %794, %797 : vector<16x128xf32>
      %799 = arith.addf %789, %798 : vector<16x128xf32>
      %800 = vector.broadcast %112 : f32 to vector<16x128xf32>
      %801 = arith.mulf %796, %800 : vector<16x128xf32>
      %802 = arith.addf %792, %801 : vector<16x128xf32>
      %c4_610 = arith.constant 4 : index
      %c0_611 = arith.constant 0 : index
      %c6_612 = arith.constant 6 : index
      %c0_613 = arith.constant 0 : index
      %803 = vector.load %arg9[%c4_610, %c0_611, %c6_612, %c0_613] : memref<6x2x22x128xf32, #tpu.memory_space<vmem>>, vector<1x1x16x128xf32>
      %804 = vector.shape_cast %803 : vector<1x1x16x128xf32> to vector<16x128xf32>
      %c4_614 = arith.constant 4 : index
      %c1_615 = arith.constant 1 : index
      %c6_616 = arith.constant 6 : index
      %c0_617 = arith.constant 0 : index
      %805 = vector.load %arg9[%c4_614, %c1_615, %c6_616, %c0_617] : memref<6x2x22x128xf32, #tpu.memory_space<vmem>>, vector<1x1x16x128xf32>
      %806 = vector.shape_cast %805 : vector<1x1x16x128xf32> to vector<16x128xf32>
      %807 = vector.broadcast %64 : f32 to vector<16x128xf32>
      %808 = arith.mulf %804, %807 : vector<16x128xf32>
      %809 = arith.addf %799, %808 : vector<16x128xf32>
      %810 = vector.broadcast %113 : f32 to vector<16x128xf32>
      %811 = arith.mulf %806, %810 : vector<16x128xf32>
      %812 = arith.addf %802, %811 : vector<16x128xf32>
      %c5_618 = arith.constant 5 : index
      %c0_619 = arith.constant 0 : index
      %c6_620 = arith.constant 6 : index
      %c0_621 = arith.constant 0 : index
      %813 = vector.load %arg9[%c5_618, %c0_619, %c6_620, %c0_621] : memref<6x2x22x128xf32, #tpu.memory_space<vmem>>, vector<1x1x16x128xf32>
      %814 = vector.shape_cast %813 : vector<1x1x16x128xf32> to vector<16x128xf32>
      %c5_622 = arith.constant 5 : index
      %c1_623 = arith.constant 1 : index
      %c6_624 = arith.constant 6 : index
      %c0_625 = arith.constant 0 : index
      %815 = vector.load %arg9[%c5_622, %c1_623, %c6_624, %c0_625] : memref<6x2x22x128xf32, #tpu.memory_space<vmem>>, vector<1x1x16x128xf32>
      %816 = vector.shape_cast %815 : vector<1x1x16x128xf32> to vector<16x128xf32>
      %817 = vector.broadcast %65 : f32 to vector<16x128xf32>
      %818 = arith.mulf %814, %817 : vector<16x128xf32>
      %819 = arith.addf %809, %818 : vector<16x128xf32>
      %820 = vector.broadcast %114 : f32 to vector<16x128xf32>
      %821 = arith.mulf %816, %820 : vector<16x128xf32>
      %822 = arith.addf %812, %821 : vector<16x128xf32>
      %823 = arith.addf %116, %819 : vector<16x128xf32>
      %824 = arith.addf %823, %822 : vector<16x128xf32>
      %825 = vector.extract_strided_slice %824 {offsets = [0, 0], sizes = [16, 16], strides = [1, 1]} : vector<16x128xf32> to vector<16x16xf32>
      %826 = arith.negf %825 : vector<16x16xf32>
      %827 = math.exp %826 : vector<16x16xf32>
      %cst_626 = arith.constant 1.000000e+00 : f32
      %828 = vector.broadcast %cst_626 : f32 to vector<16x16xf32>
      %829 = arith.addf %828, %827 : vector<16x16xf32>
      %830 = arith.divf %828, %829 : vector<16x16xf32>
      %831 = vector.extract_strided_slice %830 {offsets = [0, 0], sizes = [1, 16], strides = [1, 1]} : vector<16x16xf32> to vector<1x16xf32>
      %c0_627 = arith.constant 0 : index
      %c0_628 = arith.constant 0 : index
      %c0_629 = arith.constant 0 : index
      %832 = vector.load %arg5[%c0_627, %c0_628, %c0_629] : memref<2x1x256xf32, #tpu.memory_space<vmem>>, vector<1x1x16xf32>
      %833 = vector.shape_cast %832 : vector<1x1x16xf32> to vector<1x16xf32>
      %834 = vector.shape_cast %831 : vector<1x16xf32> to vector<1x1x16xf32>
      tpu.vector_store %arg5[%c0_627, %c0_628, %c0_629], %834 {strides = array<i32>} : memref<2x1x256xf32, #tpu.memory_space<vmem>>, vector<1x1x16xf32>,
      %835 = vector.extract_strided_slice %830 {offsets = [1, 0], sizes = [1, 16], strides = [1, 1]} : vector<16x16xf32> to vector<1x16xf32>
      %c0_630 = arith.constant 0 : index
      %c0_631 = arith.constant 0 : index
      %c16_632 = arith.constant 16 : index
      %836 = vector.load %arg5[%c0_630, %c0_631, %c16_632] : memref<2x1x256xf32, #tpu.memory_space<vmem>>, vector<1x1x16xf32>
      %837 = vector.shape_cast %836 : vector<1x1x16xf32> to vector<1x16xf32>
      %838 = vector.shape_cast %835 : vector<1x16xf32> to vector<1x1x16xf32>
      tpu.vector_store %arg5[%c0_630, %c0_631, %c16_632], %838 {strides = array<i32>} : memref<2x1x256xf32, #tpu.memory_space<vmem>>, vector<1x1x16xf32>,
      %839 = vector.extract_strided_slice %830 {offsets = [2, 0], sizes = [1, 16], strides = [1, 1]} : vector<16x16xf32> to vector<1x16xf32>
      %c0_633 = arith.constant 0 : index
      %c0_634 = arith.constant 0 : index
      %c32_635 = arith.constant 32 : index
      %840 = vector.load %arg5[%c0_633, %c0_634, %c32_635] : memref<2x1x256xf32, #tpu.memory_space<vmem>>, vector<1x1x16xf32>
      %841 = vector.shape_cast %840 : vector<1x1x16xf32> to vector<1x16xf32>
      %842 = vector.shape_cast %839 : vector<1x16xf32> to vector<1x1x16xf32>
      tpu.vector_store %arg5[%c0_633, %c0_634, %c32_635], %842 {strides = array<i32>} : memref<2x1x256xf32, #tpu.memory_space<vmem>>, vector<1x1x16xf32>,
      %843 = vector.extract_strided_slice %830 {offsets = [3, 0], sizes = [1, 16], strides = [1, 1]} : vector<16x16xf32> to vector<1x16xf32>
      %c0_636 = arith.constant 0 : index
      %c0_637 = arith.constant 0 : index
      %c48_638 = arith.constant 48 : index
      %844 = vector.load %arg5[%c0_636, %c0_637, %c48_638] : memref<2x1x256xf32, #tpu.memory_space<vmem>>, vector<1x1x16xf32>
      %845 = vector.shape_cast %844 : vector<1x1x16xf32> to vector<1x16xf32>
      %846 = vector.shape_cast %843 : vector<1x16xf32> to vector<1x1x16xf32>
      tpu.vector_store %arg5[%c0_636, %c0_637, %c48_638], %846 {strides = array<i32>} : memref<2x1x256xf32, #tpu.memory_space<vmem>>, vector<1x1x16xf32>,
      %847 = vector.extract_strided_slice %830 {offsets = [4, 0], sizes = [1, 16], strides = [1, 1]} : vector<16x16xf32> to vector<1x16xf32>
      %c0_639 = arith.constant 0 : index
      %c0_640 = arith.constant 0 : index
      %c64_641 = arith.constant 64 : index
      %848 = vector.load %arg5[%c0_639, %c0_640, %c64_641] : memref<2x1x256xf32, #tpu.memory_space<vmem>>, vector<1x1x16xf32>
      %849 = vector.shape_cast %848 : vector<1x1x16xf32> to vector<1x16xf32>
      %850 = vector.shape_cast %847 : vector<1x16xf32> to vector<1x1x16xf32>
      tpu.vector_store %arg5[%c0_639, %c0_640, %c64_641], %850 {strides = array<i32>} : memref<2x1x256xf32, #tpu.memory_space<vmem>>, vector<1x1x16xf32>,
      %851 = vector.extract_strided_slice %830 {offsets = [5, 0], sizes = [1, 16], strides = [1, 1]} : vector<16x16xf32> to vector<1x16xf32>
      %c0_642 = arith.constant 0 : index
      %c0_643 = arith.constant 0 : index
      %c80_644 = arith.constant 80 : index
      %852 = vector.load %arg5[%c0_642, %c0_643, %c80_644] : memref<2x1x256xf32, #tpu.memory_space<vmem>>, vector<1x1x16xf32>
      %853 = vector.shape_cast %852 : vector<1x1x16xf32> to vector<1x16xf32>
      %854 = vector.shape_cast %851 : vector<1x16xf32> to vector<1x1x16xf32>
      tpu.vector_store %arg5[%c0_642, %c0_643, %c80_644], %854 {strides = array<i32>} : memref<2x1x256xf32, #tpu.memory_space<vmem>>, vector<1x1x16xf32>,
      %855 = vector.extract_strided_slice %830 {offsets = [6, 0], sizes = [1, 16], strides = [1, 1]} : vector<16x16xf32> to vector<1x16xf32>
      %c0_645 = arith.constant 0 : index
      %c0_646 = arith.constant 0 : index
      %c96_647 = arith.constant 96 : index
      %856 = vector.load %arg5[%c0_645, %c0_646, %c96_647] : memref<2x1x256xf32, #tpu.memory_space<vmem>>, vector<1x1x16xf32>
      %857 = vector.shape_cast %856 : vector<1x1x16xf32> to vector<1x16xf32>
      %858 = vector.shape_cast %855 : vector<1x16xf32> to vector<1x1x16xf32>
      tpu.vector_store %arg5[%c0_645, %c0_646, %c96_647], %858 {strides = array<i32>} : memref<2x1x256xf32, #tpu.memory_space<vmem>>, vector<1x1x16xf32>,
      %859 = vector.extract_strided_slice %830 {offsets = [7, 0], sizes = [1, 16], strides = [1, 1]} : vector<16x16xf32> to vector<1x16xf32>
      %c0_648 = arith.constant 0 : index
      %c0_649 = arith.constant 0 : index
      %c112_650 = arith.constant 112 : index
      %860 = vector.load %arg5[%c0_648, %c0_649, %c112_650] : memref<2x1x256xf32, #tpu.memory_space<vmem>>, vector<1x1x16xf32>
      %861 = vector.shape_cast %860 : vector<1x1x16xf32> to vector<1x16xf32>
      %862 = vector.shape_cast %859 : vector<1x16xf32> to vector<1x1x16xf32>
      tpu.vector_store %arg5[%c0_648, %c0_649, %c112_650], %862 {strides = array<i32>} : memref<2x1x256xf32, #tpu.memory_space<vmem>>, vector<1x1x16xf32>,
      %863 = vector.extract_strided_slice %830 {offsets = [8, 0], sizes = [1, 16], strides = [1, 1]} : vector<16x16xf32> to vector<1x16xf32>
      %c0_651 = arith.constant 0 : index
      %c0_652 = arith.constant 0 : index
      %c128_653 = arith.constant 128 : index
      %864 = vector.load %arg5[%c0_651, %c0_652, %c128_653] : memref<2x1x256xf32, #tpu.memory_space<vmem>>, vector<1x1x16xf32>
      %865 = vector.shape_cast %864 : vector<1x1x16xf32> to vector<1x16xf32>
      %866 = vector.shape_cast %863 : vector<1x16xf32> to vector<1x1x16xf32>
      tpu.vector_store %arg5[%c0_651, %c0_652, %c128_653], %866 {strides = array<i32>} : memref<2x1x256xf32, #tpu.memory_space<vmem>>, vector<1x1x16xf32>,
      %867 = vector.extract_strided_slice %830 {offsets = [9, 0], sizes = [1, 16], strides = [1, 1]} : vector<16x16xf32> to vector<1x16xf32>
      %c0_654 = arith.constant 0 : index
      %c0_655 = arith.constant 0 : index
      %c144_656 = arith.constant 144 : index
      %868 = vector.load %arg5[%c0_654, %c0_655, %c144_656] : memref<2x1x256xf32, #tpu.memory_space<vmem>>, vector<1x1x16xf32>
      %869 = vector.shape_cast %868 : vector<1x1x16xf32> to vector<1x16xf32>
      %870 = vector.shape_cast %867 : vector<1x16xf32> to vector<1x1x16xf32>
      tpu.vector_store %arg5[%c0_654, %c0_655, %c144_656], %870 {strides = array<i32>} : memref<2x1x256xf32, #tpu.memory_space<vmem>>, vector<1x1x16xf32>,
      %871 = vector.extract_strided_slice %830 {offsets = [10, 0], sizes = [1, 16], strides = [1, 1]} : vector<16x16xf32> to vector<1x16xf32>
      %c0_657 = arith.constant 0 : index
      %c0_658 = arith.constant 0 : index
      %c160_659 = arith.constant 160 : index
      %872 = vector.load %arg5[%c0_657, %c0_658, %c160_659] : memref<2x1x256xf32, #tpu.memory_space<vmem>>, vector<1x1x16xf32>
      %873 = vector.shape_cast %872 : vector<1x1x16xf32> to vector<1x16xf32>
      %874 = vector.shape_cast %871 : vector<1x16xf32> to vector<1x1x16xf32>
      tpu.vector_store %arg5[%c0_657, %c0_658, %c160_659], %874 {strides = array<i32>} : memref<2x1x256xf32, #tpu.memory_space<vmem>>, vector<1x1x16xf32>,
      %875 = vector.extract_strided_slice %830 {offsets = [11, 0], sizes = [1, 16], strides = [1, 1]} : vector<16x16xf32> to vector<1x16xf32>
      %c0_660 = arith.constant 0 : index
      %c0_661 = arith.constant 0 : index
      %c176_662 = arith.constant 176 : index
      %876 = vector.load %arg5[%c0_660, %c0_661, %c176_662] : memref<2x1x256xf32, #tpu.memory_space<vmem>>, vector<1x1x16xf32>
      %877 = vector.shape_cast %876 : vector<1x1x16xf32> to vector<1x16xf32>
      %878 = vector.shape_cast %875 : vector<1x16xf32> to vector<1x1x16xf32>
      tpu.vector_store %arg5[%c0_660, %c0_661, %c176_662], %878 {strides = array<i32>} : memref<2x1x256xf32, #tpu.memory_space<vmem>>, vector<1x1x16xf32>,
      %879 = vector.extract_strided_slice %830 {offsets = [12, 0], sizes = [1, 16], strides = [1, 1]} : vector<16x16xf32> to vector<1x16xf32>
      %c0_663 = arith.constant 0 : index
      %c0_664 = arith.constant 0 : index
      %c192_665 = arith.constant 192 : index
      %880 = vector.load %arg5[%c0_663, %c0_664, %c192_665] : memref<2x1x256xf32, #tpu.memory_space<vmem>>, vector<1x1x16xf32>
      %881 = vector.shape_cast %880 : vector<1x1x16xf32> to vector<1x16xf32>
      %882 = vector.shape_cast %879 : vector<1x16xf32> to vector<1x1x16xf32>
      tpu.vector_store %arg5[%c0_663, %c0_664, %c192_665], %882 {strides = array<i32>} : memref<2x1x256xf32, #tpu.memory_space<vmem>>, vector<1x1x16xf32>,
      %883 = vector.extract_strided_slice %830 {offsets = [13, 0], sizes = [1, 16], strides = [1, 1]} : vector<16x16xf32> to vector<1x16xf32>
      %c0_666 = arith.constant 0 : index
      %c0_667 = arith.constant 0 : index
      %c208_668 = arith.constant 208 : index
      %884 = vector.load %arg5[%c0_666, %c0_667, %c208_668] : memref<2x1x256xf32, #tpu.memory_space<vmem>>, vector<1x1x16xf32>
      %885 = vector.shape_cast %884 : vector<1x1x16xf32> to vector<1x16xf32>
      %886 = vector.shape_cast %883 : vector<1x16xf32> to vector<1x1x16xf32>
      tpu.vector_store %arg5[%c0_666, %c0_667, %c208_668], %886 {strides = array<i32>} : memref<2x1x256xf32, #tpu.memory_space<vmem>>, vector<1x1x16xf32>,
      %887 = vector.extract_strided_slice %830 {offsets = [14, 0], sizes = [1, 16], strides = [1, 1]} : vector<16x16xf32> to vector<1x16xf32>
      %c0_669 = arith.constant 0 : index
      %c0_670 = arith.constant 0 : index
      %c224_671 = arith.constant 224 : index
      %888 = vector.load %arg5[%c0_669, %c0_670, %c224_671] : memref<2x1x256xf32, #tpu.memory_space<vmem>>, vector<1x1x16xf32>
      %889 = vector.shape_cast %888 : vector<1x1x16xf32> to vector<1x16xf32>
      %890 = vector.shape_cast %887 : vector<1x16xf32> to vector<1x1x16xf32>
      tpu.vector_store %arg5[%c0_669, %c0_670, %c224_671], %890 {strides = array<i32>} : memref<2x1x256xf32, #tpu.memory_space<vmem>>, vector<1x1x16xf32>,
      %891 = vector.extract_strided_slice %830 {offsets = [15, 0], sizes = [1, 16], strides = [1, 1]} : vector<16x16xf32> to vector<1x16xf32>
      %c0_672 = arith.constant 0 : index
      %c0_673 = arith.constant 0 : index
      %c240_674 = arith.constant 240 : index
      %892 = vector.load %arg5[%c0_672, %c0_673, %c240_674] : memref<2x1x256xf32, #tpu.memory_space<vmem>>, vector<1x1x16xf32>
      %893 = vector.shape_cast %892 : vector<1x1x16xf32> to vector<1x16xf32>
      %894 = vector.shape_cast %891 : vector<1x16xf32> to vector<1x1x16xf32>
      tpu.vector_store %arg5[%c0_672, %c0_673, %c240_674], %894 {strides = array<i32>} : memref<2x1x256xf32, #tpu.memory_space<vmem>>, vector<1x1x16xf32>,
      %c1_675 = arith.constant 1 : index
      %c0_676 = arith.constant 0 : index
      %895 = vector.load %arg6[%c1_675, %c0_676] : memref<2x256xf32, #tpu.memory_space<vmem>>, vector<1x16xf32>
      %cst_677 = arith.constant 2.500000e-01 : f32
      %896 = vector.broadcast %cst_677 : f32 to vector<1x16xf32>
      %897 = arith.mulf %895, %896 : vector<1x16xf32>
      %c0_678 = arith.constant 0 : index
      %c3_679 = arith.constant 3 : index
      %c0_680 = arith.constant 0 : index
      %898 = vector.load %arg8[%c0_678, %c3_679, %c0_680] : memref<2x22x128xf32, #tpu.memory_space<vmem>>, vector<1x1x16xf32>
      %899 = vector.shape_cast %898 : vector<1x1x16xf32> to vector<1x16xf32>
      %900 = vector.shape_cast %897 : vector<1x16xf32> to vector<1x1x16xf32>
      tpu.vector_store %arg8[%c0_678, %c3_679, %c0_680], %900 {strides = array<i32>} : memref<2x22x128xf32, #tpu.memory_space<vmem>>, vector<1x1x16xf32>,
      %c1_681 = arith.constant 1 : index
      %c0_682 = arith.constant 0 : index
      %901 = vector.load %arg7[%c1_681, %c0_682] : memref<2x256xf32, #tpu.memory_space<vmem>>, vector<1x16xf32>
      %c1_683 = arith.constant 1 : index
      %c3_684 = arith.constant 3 : index
      %c0_685 = arith.constant 0 : index
      %902 = vector.load %arg8[%c1_683, %c3_684, %c0_685] : memref<2x22x128xf32, #tpu.memory_space<vmem>>, vector<1x1x16xf32>
      %903 = vector.shape_cast %902 : vector<1x1x16xf32> to vector<1x16xf32>
      %904 = vector.shape_cast %901 : vector<1x16xf32> to vector<1x1x16xf32>
      tpu.vector_store %arg8[%c1_683, %c3_684, %c0_685], %904 {strides = array<i32>} : memref<2x22x128xf32, #tpu.memory_space<vmem>>, vector<1x1x16xf32>,
      %c1_686 = arith.constant 1 : index
      %c16_687 = arith.constant 16 : index
      %905 = vector.load %arg6[%c1_686, %c16_687] : memref<2x256xf32, #tpu.memory_space<vmem>>, vector<1x16xf32>
      %cst_688 = arith.constant 2.500000e-01 : f32
      %906 = vector.broadcast %cst_688 : f32 to vector<1x16xf32>
      %907 = arith.mulf %905, %906 : vector<1x16xf32>
      %c0_689 = arith.constant 0 : index
      %c4_690 = arith.constant 4 : index
      %c0_691 = arith.constant 0 : index
      %908 = vector.load %arg8[%c0_689, %c4_690, %c0_691] : memref<2x22x128xf32, #tpu.memory_space<vmem>>, vector<1x1x16xf32>
      %909 = vector.shape_cast %908 : vector<1x1x16xf32> to vector<1x16xf32>
      %910 = vector.shape_cast %907 : vector<1x16xf32> to vector<1x1x16xf32>
      tpu.vector_store %arg8[%c0_689, %c4_690, %c0_691], %910 {strides = array<i32>} : memref<2x22x128xf32, #tpu.memory_space<vmem>>, vector<1x1x16xf32>,
      %c1_692 = arith.constant 1 : index
      %c16_693 = arith.constant 16 : index
      %911 = vector.load %arg7[%c1_692, %c16_693] : memref<2x256xf32, #tpu.memory_space<vmem>>, vector<1x16xf32>
      %c1_694 = arith.constant 1 : index
      %c4_695 = arith.constant 4 : index
      %c0_696 = arith.constant 0 : index
      %912 = vector.load %arg8[%c1_694, %c4_695, %c0_696] : memref<2x22x128xf32, #tpu.memory_space<vmem>>, vector<1x1x16xf32>
      %913 = vector.shape_cast %912 : vector<1x1x16xf32> to vector<1x16xf32>
      %914 = vector.shape_cast %911 : vector<1x16xf32> to vector<1x1x16xf32>
      tpu.vector_store %arg8[%c1_694, %c4_695, %c0_696], %914 {strides = array<i32>} : memref<2x22x128xf32, #tpu.memory_space<vmem>>, vector<1x1x16xf32>,
      %c1_697 = arith.constant 1 : index
      %c32_698 = arith.constant 32 : index
      %915 = vector.load %arg6[%c1_697, %c32_698] : memref<2x256xf32, #tpu.memory_space<vmem>>, vector<1x16xf32>
      %cst_699 = arith.constant 2.500000e-01 : f32
      %916 = vector.broadcast %cst_699 : f32 to vector<1x16xf32>
      %917 = arith.mulf %915, %916 : vector<1x16xf32>
      %c0_700 = arith.constant 0 : index
      %c5_701 = arith.constant 5 : index
      %c0_702 = arith.constant 0 : index
      %918 = vector.load %arg8[%c0_700, %c5_701, %c0_702] : memref<2x22x128xf32, #tpu.memory_space<vmem>>, vector<1x1x16xf32>
      %919 = vector.shape_cast %918 : vector<1x1x16xf32> to vector<1x16xf32>
      %920 = vector.shape_cast %917 : vector<1x16xf32> to vector<1x1x16xf32>
      tpu.vector_store %arg8[%c0_700, %c5_701, %c0_702], %920 {strides = array<i32>} : memref<2x22x128xf32, #tpu.memory_space<vmem>>, vector<1x1x16xf32>,
      %c1_703 = arith.constant 1 : index
      %c32_704 = arith.constant 32 : index
      %921 = vector.load %arg7[%c1_703, %c32_704] : memref<2x256xf32, #tpu.memory_space<vmem>>, vector<1x16xf32>
      %c1_705 = arith.constant 1 : index
      %c5_706 = arith.constant 5 : index
      %c0_707 = arith.constant 0 : index
      %922 = vector.load %arg8[%c1_705, %c5_706, %c0_707] : memref<2x22x128xf32, #tpu.memory_space<vmem>>, vector<1x1x16xf32>
      %923 = vector.shape_cast %922 : vector<1x1x16xf32> to vector<1x16xf32>
      %924 = vector.shape_cast %921 : vector<1x16xf32> to vector<1x1x16xf32>
      tpu.vector_store %arg8[%c1_705, %c5_706, %c0_707], %924 {strides = array<i32>} : memref<2x22x128xf32, #tpu.memory_space<vmem>>, vector<1x1x16xf32>,
      %c1_708 = arith.constant 1 : index
      %c48_709 = arith.constant 48 : index
      %925 = vector.load %arg6[%c1_708, %c48_709] : memref<2x256xf32, #tpu.memory_space<vmem>>, vector<1x16xf32>
      %cst_710 = arith.constant 2.500000e-01 : f32
      %926 = vector.broadcast %cst_710 : f32 to vector<1x16xf32>
      %927 = arith.mulf %925, %926 : vector<1x16xf32>
      %c0_711 = arith.constant 0 : index
      %c6_712 = arith.constant 6 : index
      %c0_713 = arith.constant 0 : index
      %928 = vector.load %arg8[%c0_711, %c6_712, %c0_713] : memref<2x22x128xf32, #tpu.memory_space<vmem>>, vector<1x1x16xf32>
      %929 = vector.shape_cast %928 : vector<1x1x16xf32> to vector<1x16xf32>
      %930 = vector.shape_cast %927 : vector<1x16xf32> to vector<1x1x16xf32>
      tpu.vector_store %arg8[%c0_711, %c6_712, %c0_713], %930 {strides = array<i32>} : memref<2x22x128xf32, #tpu.memory_space<vmem>>, vector<1x1x16xf32>,
      %c1_714 = arith.constant 1 : index
      %c48_715 = arith.constant 48 : index
      %931 = vector.load %arg7[%c1_714, %c48_715] : memref<2x256xf32, #tpu.memory_space<vmem>>, vector<1x16xf32>
      %c1_716 = arith.constant 1 : index
      %c6_717 = arith.constant 6 : index
      %c0_718 = arith.constant 0 : index
      %932 = vector.load %arg8[%c1_716, %c6_717, %c0_718] : memref<2x22x128xf32, #tpu.memory_space<vmem>>, vector<1x1x16xf32>
      %933 = vector.shape_cast %932 : vector<1x1x16xf32> to vector<1x16xf32>
      %934 = vector.shape_cast %931 : vector<1x16xf32> to vector<1x1x16xf32>
      tpu.vector_store %arg8[%c1_716, %c6_717, %c0_718], %934 {strides = array<i32>} : memref<2x22x128xf32, #tpu.memory_space<vmem>>, vector<1x1x16xf32>,
      %c1_719 = arith.constant 1 : index
      %c64_720 = arith.constant 64 : index
      %935 = vector.load %arg6[%c1_719, %c64_720] : memref<2x256xf32, #tpu.memory_space<vmem>>, vector<1x16xf32>
      %cst_721 = arith.constant 2.500000e-01 : f32
      %936 = vector.broadcast %cst_721 : f32 to vector<1x16xf32>
      %937 = arith.mulf %935, %936 : vector<1x16xf32>
      %c0_722 = arith.constant 0 : index
      %c7_723 = arith.constant 7 : index
      %c0_724 = arith.constant 0 : index
      %938 = vector.load %arg8[%c0_722, %c7_723, %c0_724] : memref<2x22x128xf32, #tpu.memory_space<vmem>>, vector<1x1x16xf32>
      %939 = vector.shape_cast %938 : vector<1x1x16xf32> to vector<1x16xf32>
      %940 = vector.shape_cast %937 : vector<1x16xf32> to vector<1x1x16xf32>
      tpu.vector_store %arg8[%c0_722, %c7_723, %c0_724], %940 {strides = array<i32>} : memref<2x22x128xf32, #tpu.memory_space<vmem>>, vector<1x1x16xf32>,
      %c1_725 = arith.constant 1 : index
      %c64_726 = arith.constant 64 : index
      %941 = vector.load %arg7[%c1_725, %c64_726] : memref<2x256xf32, #tpu.memory_space<vmem>>, vector<1x16xf32>
      %c1_727 = arith.constant 1 : index
      %c7_728 = arith.constant 7 : index
      %c0_729 = arith.constant 0 : index
      %942 = vector.load %arg8[%c1_727, %c7_728, %c0_729] : memref<2x22x128xf32, #tpu.memory_space<vmem>>, vector<1x1x16xf32>
      %943 = vector.shape_cast %942 : vector<1x1x16xf32> to vector<1x16xf32>
      %944 = vector.shape_cast %941 : vector<1x16xf32> to vector<1x1x16xf32>
      tpu.vector_store %arg8[%c1_727, %c7_728, %c0_729], %944 {strides = array<i32>} : memref<2x22x128xf32, #tpu.memory_space<vmem>>, vector<1x1x16xf32>,
      %c1_730 = arith.constant 1 : index
      %c80_731 = arith.constant 80 : index
      %945 = vector.load %arg6[%c1_730, %c80_731] : memref<2x256xf32, #tpu.memory_space<vmem>>, vector<1x16xf32>
      %cst_732 = arith.constant 2.500000e-01 : f32
      %946 = vector.broadcast %cst_732 : f32 to vector<1x16xf32>
      %947 = arith.mulf %945, %946 : vector<1x16xf32>
      %c0_733 = arith.constant 0 : index
      %c8_734 = arith.constant 8 : index
      %c0_735 = arith.constant 0 : index
      %948 = vector.load %arg8[%c0_733, %c8_734, %c0_735] : memref<2x22x128xf32, #tpu.memory_space<vmem>>, vector<1x1x16xf32>
      %949 = vector.shape_cast %948 : vector<1x1x16xf32> to vector<1x16xf32>
      %950 = vector.shape_cast %947 : vector<1x16xf32> to vector<1x1x16xf32>
      tpu.vector_store %arg8[%c0_733, %c8_734, %c0_735], %950 {strides = array<i32>} : memref<2x22x128xf32, #tpu.memory_space<vmem>>, vector<1x1x16xf32>,
      %c1_736 = arith.constant 1 : index
      %c80_737 = arith.constant 80 : index
      %951 = vector.load %arg7[%c1_736, %c80_737] : memref<2x256xf32, #tpu.memory_space<vmem>>, vector<1x16xf32>
      %c1_738 = arith.constant 1 : index
      %c8_739 = arith.constant 8 : index
      %c0_740 = arith.constant 0 : index
      %952 = vector.load %arg8[%c1_738, %c8_739, %c0_740] : memref<2x22x128xf32, #tpu.memory_space<vmem>>, vector<1x1x16xf32>
      %953 = vector.shape_cast %952 : vector<1x1x16xf32> to vector<1x16xf32>
      %954 = vector.shape_cast %951 : vector<1x16xf32> to vector<1x1x16xf32>
      tpu.vector_store %arg8[%c1_738, %c8_739, %c0_740], %954 {strides = array<i32>} : memref<2x22x128xf32, #tpu.memory_space<vmem>>, vector<1x1x16xf32>,
      %c1_741 = arith.constant 1 : index
      %c96_742 = arith.constant 96 : index
      %955 = vector.load %arg6[%c1_741, %c96_742] : memref<2x256xf32, #tpu.memory_space<vmem>>, vector<1x16xf32>
      %cst_743 = arith.constant 2.500000e-01 : f32
      %956 = vector.broadcast %cst_743 : f32 to vector<1x16xf32>
      %957 = arith.mulf %955, %956 : vector<1x16xf32>
      %c0_744 = arith.constant 0 : index
      %c9_745 = arith.constant 9 : index
      %c0_746 = arith.constant 0 : index
      %958 = vector.load %arg8[%c0_744, %c9_745, %c0_746] : memref<2x22x128xf32, #tpu.memory_space<vmem>>, vector<1x1x16xf32>
      %959 = vector.shape_cast %958 : vector<1x1x16xf32> to vector<1x16xf32>
      %960 = vector.shape_cast %957 : vector<1x16xf32> to vector<1x1x16xf32>
      tpu.vector_store %arg8[%c0_744, %c9_745, %c0_746], %960 {strides = array<i32>} : memref<2x22x128xf32, #tpu.memory_space<vmem>>, vector<1x1x16xf32>,
      %c1_747 = arith.constant 1 : index
      %c96_748 = arith.constant 96 : index
      %961 = vector.load %arg7[%c1_747, %c96_748] : memref<2x256xf32, #tpu.memory_space<vmem>>, vector<1x16xf32>
      %c1_749 = arith.constant 1 : index
      %c9_750 = arith.constant 9 : index
      %c0_751 = arith.constant 0 : index
      %962 = vector.load %arg8[%c1_749, %c9_750, %c0_751] : memref<2x22x128xf32, #tpu.memory_space<vmem>>, vector<1x1x16xf32>
      %963 = vector.shape_cast %962 : vector<1x1x16xf32> to vector<1x16xf32>
      %964 = vector.shape_cast %961 : vector<1x16xf32> to vector<1x1x16xf32>
      tpu.vector_store %arg8[%c1_749, %c9_750, %c0_751], %964 {strides = array<i32>} : memref<2x22x128xf32, #tpu.memory_space<vmem>>, vector<1x1x16xf32>,
      %c1_752 = arith.constant 1 : index
      %c112_753 = arith.constant 112 : index
      %965 = vector.load %arg6[%c1_752, %c112_753] : memref<2x256xf32, #tpu.memory_space<vmem>>, vector<1x16xf32>
      %cst_754 = arith.constant 2.500000e-01 : f32
      %966 = vector.broadcast %cst_754 : f32 to vector<1x16xf32>
      %967 = arith.mulf %965, %966 : vector<1x16xf32>
      %c0_755 = arith.constant 0 : index
      %c10_756 = arith.constant 10 : index
      %c0_757 = arith.constant 0 : index
      %968 = vector.load %arg8[%c0_755, %c10_756, %c0_757] : memref<2x22x128xf32, #tpu.memory_space<vmem>>, vector<1x1x16xf32>
      %969 = vector.shape_cast %968 : vector<1x1x16xf32> to vector<1x16xf32>
      %970 = vector.shape_cast %967 : vector<1x16xf32> to vector<1x1x16xf32>
      tpu.vector_store %arg8[%c0_755, %c10_756, %c0_757], %970 {strides = array<i32>} : memref<2x22x128xf32, #tpu.memory_space<vmem>>, vector<1x1x16xf32>,
      %c1_758 = arith.constant 1 : index
      %c112_759 = arith.constant 112 : index
      %971 = vector.load %arg7[%c1_758, %c112_759] : memref<2x256xf32, #tpu.memory_space<vmem>>, vector<1x16xf32>
      %c1_760 = arith.constant 1 : index
      %c10_761 = arith.constant 10 : index
      %c0_762 = arith.constant 0 : index
      %972 = vector.load %arg8[%c1_760, %c10_761, %c0_762] : memref<2x22x128xf32, #tpu.memory_space<vmem>>, vector<1x1x16xf32>
      %973 = vector.shape_cast %972 : vector<1x1x16xf32> to vector<1x16xf32>
      %974 = vector.shape_cast %971 : vector<1x16xf32> to vector<1x1x16xf32>
      tpu.vector_store %arg8[%c1_760, %c10_761, %c0_762], %974 {strides = array<i32>} : memref<2x22x128xf32, #tpu.memory_space<vmem>>, vector<1x1x16xf32>,
      %c1_763 = arith.constant 1 : index
      %c128_764 = arith.constant 128 : index
      %975 = vector.load %arg6[%c1_763, %c128_764] : memref<2x256xf32, #tpu.memory_space<vmem>>, vector<1x16xf32>
      %cst_765 = arith.constant 2.500000e-01 : f32
      %976 = vector.broadcast %cst_765 : f32 to vector<1x16xf32>
      %977 = arith.mulf %975, %976 : vector<1x16xf32>
      %c0_766 = arith.constant 0 : index
      %c11_767 = arith.constant 11 : index
      %c0_768 = arith.constant 0 : index
      %978 = vector.load %arg8[%c0_766, %c11_767, %c0_768] : memref<2x22x128xf32, #tpu.memory_space<vmem>>, vector<1x1x16xf32>
      %979 = vector.shape_cast %978 : vector<1x1x16xf32> to vector<1x16xf32>
      %980 = vector.shape_cast %977 : vector<1x16xf32> to vector<1x1x16xf32>
      tpu.vector_store %arg8[%c0_766, %c11_767, %c0_768], %980 {strides = array<i32>} : memref<2x22x128xf32, #tpu.memory_space<vmem>>, vector<1x1x16xf32>,
      %c1_769 = arith.constant 1 : index
      %c128_770 = arith.constant 128 : index
      %981 = vector.load %arg7[%c1_769, %c128_770] : memref<2x256xf32, #tpu.memory_space<vmem>>, vector<1x16xf32>
      %c1_771 = arith.constant 1 : index
      %c11_772 = arith.constant 11 : index
      %c0_773 = arith.constant 0 : index
      %982 = vector.load %arg8[%c1_771, %c11_772, %c0_773] : memref<2x22x128xf32, #tpu.memory_space<vmem>>, vector<1x1x16xf32>
      %983 = vector.shape_cast %982 : vector<1x1x16xf32> to vector<1x16xf32>
      %984 = vector.shape_cast %981 : vector<1x16xf32> to vector<1x1x16xf32>
      tpu.vector_store %arg8[%c1_771, %c11_772, %c0_773], %984 {strides = array<i32>} : memref<2x22x128xf32, #tpu.memory_space<vmem>>, vector<1x1x16xf32>,
      %c1_774 = arith.constant 1 : index
      %c144_775 = arith.constant 144 : index
      %985 = vector.load %arg6[%c1_774, %c144_775] : memref<2x256xf32, #tpu.memory_space<vmem>>, vector<1x16xf32>
      %cst_776 = arith.constant 2.500000e-01 : f32
      %986 = vector.broadcast %cst_776 : f32 to vector<1x16xf32>
      %987 = arith.mulf %985, %986 : vector<1x16xf32>
      %c0_777 = arith.constant 0 : index
      %c12_778 = arith.constant 12 : index
      %c0_779 = arith.constant 0 : index
      %988 = vector.load %arg8[%c0_777, %c12_778, %c0_779] : memref<2x22x128xf32, #tpu.memory_space<vmem>>, vector<1x1x16xf32>
      %989 = vector.shape_cast %988 : vector<1x1x16xf32> to vector<1x16xf32>
      %990 = vector.shape_cast %987 : vector<1x16xf32> to vector<1x1x16xf32>
      tpu.vector_store %arg8[%c0_777, %c12_778, %c0_779], %990 {strides = array<i32>} : memref<2x22x128xf32, #tpu.memory_space<vmem>>, vector<1x1x16xf32>,
      %c1_780 = arith.constant 1 : index
      %c144_781 = arith.constant 144 : index
      %991 = vector.load %arg7[%c1_780, %c144_781] : memref<2x256xf32, #tpu.memory_space<vmem>>, vector<1x16xf32>
      %c1_782 = arith.constant 1 : index
      %c12_783 = arith.constant 12 : index
      %c0_784 = arith.constant 0 : index
      %992 = vector.load %arg8[%c1_782, %c12_783, %c0_784] : memref<2x22x128xf32, #tpu.memory_space<vmem>>, vector<1x1x16xf32>
      %993 = vector.shape_cast %992 : vector<1x1x16xf32> to vector<1x16xf32>
      %994 = vector.shape_cast %991 : vector<1x16xf32> to vector<1x1x16xf32>
      tpu.vector_store %arg8[%c1_782, %c12_783, %c0_784], %994 {strides = array<i32>} : memref<2x22x128xf32, #tpu.memory_space<vmem>>, vector<1x1x16xf32>,
      %c1_785 = arith.constant 1 : index
      %c160_786 = arith.constant 160 : index
      %995 = vector.load %arg6[%c1_785, %c160_786] : memref<2x256xf32, #tpu.memory_space<vmem>>, vector<1x16xf32>
      %cst_787 = arith.constant 2.500000e-01 : f32
      %996 = vector.broadcast %cst_787 : f32 to vector<1x16xf32>
      %997 = arith.mulf %995, %996 : vector<1x16xf32>
      %c0_788 = arith.constant 0 : index
      %c13_789 = arith.constant 13 : index
      %c0_790 = arith.constant 0 : index
      %998 = vector.load %arg8[%c0_788, %c13_789, %c0_790] : memref<2x22x128xf32, #tpu.memory_space<vmem>>, vector<1x1x16xf32>
      %999 = vector.shape_cast %998 : vector<1x1x16xf32> to vector<1x16xf32>
      %1000 = vector.shape_cast %997 : vector<1x16xf32> to vector<1x1x16xf32>
      tpu.vector_store %arg8[%c0_788, %c13_789, %c0_790], %1000 {strides = array<i32>} : memref<2x22x128xf32, #tpu.memory_space<vmem>>, vector<1x1x16xf32>,
      %c1_791 = arith.constant 1 : index
      %c160_792 = arith.constant 160 : index
      %1001 = vector.load %arg7[%c1_791, %c160_792] : memref<2x256xf32, #tpu.memory_space<vmem>>, vector<1x16xf32>
      %c1_793 = arith.constant 1 : index
      %c13_794 = arith.constant 13 : index
      %c0_795 = arith.constant 0 : index
      %1002 = vector.load %arg8[%c1_793, %c13_794, %c0_795] : memref<2x22x128xf32, #tpu.memory_space<vmem>>, vector<1x1x16xf32>
      %1003 = vector.shape_cast %1002 : vector<1x1x16xf32> to vector<1x16xf32>
      %1004 = vector.shape_cast %1001 : vector<1x16xf32> to vector<1x1x16xf32>
      tpu.vector_store %arg8[%c1_793, %c13_794, %c0_795], %1004 {strides = array<i32>} : memref<2x22x128xf32, #tpu.memory_space<vmem>>, vector<1x1x16xf32>,
      %c1_796 = arith.constant 1 : index
      %c176_797 = arith.constant 176 : index
      %1005 = vector.load %arg6[%c1_796, %c176_797] : memref<2x256xf32, #tpu.memory_space<vmem>>, vector<1x16xf32>
      %cst_798 = arith.constant 2.500000e-01 : f32
      %1006 = vector.broadcast %cst_798 : f32 to vector<1x16xf32>
      %1007 = arith.mulf %1005, %1006 : vector<1x16xf32>
      %c0_799 = arith.constant 0 : index
      %c14_800 = arith.constant 14 : index
      %c0_801 = arith.constant 0 : index
      %1008 = vector.load %arg8[%c0_799, %c14_800, %c0_801] : memref<2x22x128xf32, #tpu.memory_space<vmem>>, vector<1x1x16xf32>
      %1009 = vector.shape_cast %1008 : vector<1x1x16xf32> to vector<1x16xf32>
      %1010 = vector.shape_cast %1007 : vector<1x16xf32> to vector<1x1x16xf32>
      tpu.vector_store %arg8[%c0_799, %c14_800, %c0_801], %1010 {strides = array<i32>} : memref<2x22x128xf32, #tpu.memory_space<vmem>>, vector<1x1x16xf32>,
      %c1_802 = arith.constant 1 : index
      %c176_803 = arith.constant 176 : index
      %1011 = vector.load %arg7[%c1_802, %c176_803] : memref<2x256xf32, #tpu.memory_space<vmem>>, vector<1x16xf32>
      %c1_804 = arith.constant 1 : index
      %c14_805 = arith.constant 14 : index
      %c0_806 = arith.constant 0 : index
      %1012 = vector.load %arg8[%c1_804, %c14_805, %c0_806] : memref<2x22x128xf32, #tpu.memory_space<vmem>>, vector<1x1x16xf32>
      %1013 = vector.shape_cast %1012 : vector<1x1x16xf32> to vector<1x16xf32>
      %1014 = vector.shape_cast %1011 : vector<1x16xf32> to vector<1x1x16xf32>
      tpu.vector_store %arg8[%c1_804, %c14_805, %c0_806], %1014 {strides = array<i32>} : memref<2x22x128xf32, #tpu.memory_space<vmem>>, vector<1x1x16xf32>,
      %c1_807 = arith.constant 1 : index
      %c192_808 = arith.constant 192 : index
      %1015 = vector.load %arg6[%c1_807, %c192_808] : memref<2x256xf32, #tpu.memory_space<vmem>>, vector<1x16xf32>
      %cst_809 = arith.constant 2.500000e-01 : f32
      %1016 = vector.broadcast %cst_809 : f32 to vector<1x16xf32>
      %1017 = arith.mulf %1015, %1016 : vector<1x16xf32>
      %c0_810 = arith.constant 0 : index
      %c15_811 = arith.constant 15 : index
      %c0_812 = arith.constant 0 : index
      %1018 = vector.load %arg8[%c0_810, %c15_811, %c0_812] : memref<2x22x128xf32, #tpu.memory_space<vmem>>, vector<1x1x16xf32>
      %1019 = vector.shape_cast %1018 : vector<1x1x16xf32> to vector<1x16xf32>
      %1020 = vector.shape_cast %1017 : vector<1x16xf32> to vector<1x1x16xf32>
      tpu.vector_store %arg8[%c0_810, %c15_811, %c0_812], %1020 {strides = array<i32>} : memref<2x22x128xf32, #tpu.memory_space<vmem>>, vector<1x1x16xf32>,
      %c1_813 = arith.constant 1 : index
      %c192_814 = arith.constant 192 : index
      %1021 = vector.load %arg7[%c1_813, %c192_814] : memref<2x256xf32, #tpu.memory_space<vmem>>, vector<1x16xf32>
      %c1_815 = arith.constant 1 : index
      %c15_816 = arith.constant 15 : index
      %c0_817 = arith.constant 0 : index
      %1022 = vector.load %arg8[%c1_815, %c15_816, %c0_817] : memref<2x22x128xf32, #tpu.memory_space<vmem>>, vector<1x1x16xf32>
      %1023 = vector.shape_cast %1022 : vector<1x1x16xf32> to vector<1x16xf32>
      %1024 = vector.shape_cast %1021 : vector<1x16xf32> to vector<1x1x16xf32>
      tpu.vector_store %arg8[%c1_815, %c15_816, %c0_817], %1024 {strides = array<i32>} : memref<2x22x128xf32, #tpu.memory_space<vmem>>, vector<1x1x16xf32>,
      %c1_818 = arith.constant 1 : index
      %c208_819 = arith.constant 208 : index
      %1025 = vector.load %arg6[%c1_818, %c208_819] : memref<2x256xf32, #tpu.memory_space<vmem>>, vector<1x16xf32>
      %cst_820 = arith.constant 2.500000e-01 : f32
      %1026 = vector.broadcast %cst_820 : f32 to vector<1x16xf32>
      %1027 = arith.mulf %1025, %1026 : vector<1x16xf32>
      %c0_821 = arith.constant 0 : index
      %c16_822 = arith.constant 16 : index
      %c0_823 = arith.constant 0 : index
      %1028 = vector.load %arg8[%c0_821, %c16_822, %c0_823] : memref<2x22x128xf32, #tpu.memory_space<vmem>>, vector<1x1x16xf32>
      %1029 = vector.shape_cast %1028 : vector<1x1x16xf32> to vector<1x16xf32>
      %1030 = vector.shape_cast %1027 : vector<1x16xf32> to vector<1x1x16xf32>
      tpu.vector_store %arg8[%c0_821, %c16_822, %c0_823], %1030 {strides = array<i32>} : memref<2x22x128xf32, #tpu.memory_space<vmem>>, vector<1x1x16xf32>,
      %c1_824 = arith.constant 1 : index
      %c208_825 = arith.constant 208 : index
      %1031 = vector.load %arg7[%c1_824, %c208_825] : memref<2x256xf32, #tpu.memory_space<vmem>>, vector<1x16xf32>
      %c1_826 = arith.constant 1 : index
      %c16_827 = arith.constant 16 : index
      %c0_828 = arith.constant 0 : index
      %1032 = vector.load %arg8[%c1_826, %c16_827, %c0_828] : memref<2x22x128xf32, #tpu.memory_space<vmem>>, vector<1x1x16xf32>
      %1033 = vector.shape_cast %1032 : vector<1x1x16xf32> to vector<1x16xf32>
      %1034 = vector.shape_cast %1031 : vector<1x16xf32> to vector<1x1x16xf32>
      tpu.vector_store %arg8[%c1_826, %c16_827, %c0_828], %1034 {strides = array<i32>} : memref<2x22x128xf32, #tpu.memory_space<vmem>>, vector<1x1x16xf32>,
      %c1_829 = arith.constant 1 : index
      %c224_830 = arith.constant 224 : index
      %1035 = vector.load %arg6[%c1_829, %c224_830] : memref<2x256xf32, #tpu.memory_space<vmem>>, vector<1x16xf32>
      %cst_831 = arith.constant 2.500000e-01 : f32
      %1036 = vector.broadcast %cst_831 : f32 to vector<1x16xf32>
      %1037 = arith.mulf %1035, %1036 : vector<1x16xf32>
      %c0_832 = arith.constant 0 : index
      %c17_833 = arith.constant 17 : index
      %c0_834 = arith.constant 0 : index
      %1038 = vector.load %arg8[%c0_832, %c17_833, %c0_834] : memref<2x22x128xf32, #tpu.memory_space<vmem>>, vector<1x1x16xf32>
      %1039 = vector.shape_cast %1038 : vector<1x1x16xf32> to vector<1x16xf32>
      %1040 = vector.shape_cast %1037 : vector<1x16xf32> to vector<1x1x16xf32>
      tpu.vector_store %arg8[%c0_832, %c17_833, %c0_834], %1040 {strides = array<i32>} : memref<2x22x128xf32, #tpu.memory_space<vmem>>, vector<1x1x16xf32>,
      %c1_835 = arith.constant 1 : index
      %c224_836 = arith.constant 224 : index
      %1041 = vector.load %arg7[%c1_835, %c224_836] : memref<2x256xf32, #tpu.memory_space<vmem>>, vector<1x16xf32>
      %c1_837 = arith.constant 1 : index
      %c17_838 = arith.constant 17 : index
      %c0_839 = arith.constant 0 : index
      %1042 = vector.load %arg8[%c1_837, %c17_838, %c0_839] : memref<2x22x128xf32, #tpu.memory_space<vmem>>, vector<1x1x16xf32>
      %1043 = vector.shape_cast %1042 : vector<1x1x16xf32> to vector<1x16xf32>
      %1044 = vector.shape_cast %1041 : vector<1x16xf32> to vector<1x1x16xf32>
      tpu.vector_store %arg8[%c1_837, %c17_838, %c0_839], %1044 {strides = array<i32>} : memref<2x22x128xf32, #tpu.memory_space<vmem>>, vector<1x1x16xf32>,
      %c1_840 = arith.constant 1 : index
      %c240_841 = arith.constant 240 : index
      %1045 = vector.load %arg6[%c1_840, %c240_841] : memref<2x256xf32, #tpu.memory_space<vmem>>, vector<1x16xf32>
      %cst_842 = arith.constant 2.500000e-01 : f32
      %1046 = vector.broadcast %cst_842 : f32 to vector<1x16xf32>
      %1047 = arith.mulf %1045, %1046 : vector<1x16xf32>
      %c0_843 = arith.constant 0 : index
      %c18_844 = arith.constant 18 : index
      %c0_845 = arith.constant 0 : index
      %1048 = vector.load %arg8[%c0_843, %c18_844, %c0_845] : memref<2x22x128xf32, #tpu.memory_space<vmem>>, vector<1x1x16xf32>
      %1049 = vector.shape_cast %1048 : vector<1x1x16xf32> to vector<1x16xf32>
      %1050 = vector.shape_cast %1047 : vector<1x16xf32> to vector<1x1x16xf32>
      tpu.vector_store %arg8[%c0_843, %c18_844, %c0_845], %1050 {strides = array<i32>} : memref<2x22x128xf32, #tpu.memory_space<vmem>>, vector<1x1x16xf32>,
      %c1_846 = arith.constant 1 : index
      %c240_847 = arith.constant 240 : index
      %1051 = vector.load %arg7[%c1_846, %c240_847] : memref<2x256xf32, #tpu.memory_space<vmem>>, vector<1x16xf32>
      %c1_848 = arith.constant 1 : index
      %c18_849 = arith.constant 18 : index
      %c0_850 = arith.constant 0 : index
      %1052 = vector.load %arg8[%c1_848, %c18_849, %c0_850] : memref<2x22x128xf32, #tpu.memory_space<vmem>>, vector<1x1x16xf32>
      %1053 = vector.shape_cast %1052 : vector<1x1x16xf32> to vector<1x16xf32>
      %1054 = vector.shape_cast %1051 : vector<1x16xf32> to vector<1x1x16xf32>
      tpu.vector_store %arg8[%c1_848, %c18_849, %c0_850], %1054 {strides = array<i32>} : memref<2x22x128xf32, #tpu.memory_space<vmem>>, vector<1x1x16xf32>,
      %c0_851 = arith.constant 0 : index
      %c0_852 = arith.constant 0 : index
      %c0_853 = arith.constant 0 : index
      %1055 = vector.load %arg8[%c0_851, %c0_852, %c0_853] : memref<2x22x128xf32, #tpu.memory_space<vmem>>, vector<1x22x128xf32>
      %1056 = vector.shape_cast %1055 : vector<1x22x128xf32> to vector<22x128xf32>
      %c3_i32_854 = arith.constant 3 : i32
      %1057 = tpu.dynamic_rotate %1056 by %c3_i32_854 dim 1 : vector<22x128xf32>, i32 -> vector<22x128xf32>
      %c0_855 = arith.constant 0 : index
      %c0_856 = arith.constant 0 : index
      %c0_857 = arith.constant 0 : index
      %c0_858 = arith.constant 0 : index
      %1058 = vector.load %arg9[%c0_855, %c0_856, %c0_857, %c0_858] : memref<6x2x22x128xf32, #tpu.memory_space<vmem>>, vector<1x1x22x128xf32>
      %1059 = vector.shape_cast %1058 : vector<1x1x22x128xf32> to vector<22x128xf32>
      %1060 = vector.shape_cast %1057 : vector<22x128xf32> to vector<1x1x22x128xf32>
      tpu.vector_store %arg9[%c0_855, %c0_856, %c0_857, %c0_858], %1060 {strides = array<i32>} : memref<6x2x22x128xf32, #tpu.memory_space<vmem>>, vector<1x1x22x128xf32>,
      %c2_i32_859 = arith.constant 2 : i32
      %1061 = tpu.dynamic_rotate %1056 by %c2_i32_859 dim 1 : vector<22x128xf32>, i32 -> vector<22x128xf32>
      %c1_860 = arith.constant 1 : index
      %c0_861 = arith.constant 0 : index
      %c0_862 = arith.constant 0 : index
      %c0_863 = arith.constant 0 : index
      %1062 = vector.load %arg9[%c1_860, %c0_861, %c0_862, %c0_863] : memref<6x2x22x128xf32, #tpu.memory_space<vmem>>, vector<1x1x22x128xf32>
      %1063 = vector.shape_cast %1062 : vector<1x1x22x128xf32> to vector<22x128xf32>
      %1064 = vector.shape_cast %1061 : vector<22x128xf32> to vector<1x1x22x128xf32>
      tpu.vector_store %arg9[%c1_860, %c0_861, %c0_862, %c0_863], %1064 {strides = array<i32>} : memref<6x2x22x128xf32, #tpu.memory_space<vmem>>, vector<1x1x22x128xf32>,
      %c1_i32_864 = arith.constant 1 : i32
      %1065 = tpu.dynamic_rotate %1056 by %c1_i32_864 dim 1 : vector<22x128xf32>, i32 -> vector<22x128xf32>
      %c2_865 = arith.constant 2 : index
      %c0_866 = arith.constant 0 : index
      %c0_867 = arith.constant 0 : index
      %c0_868 = arith.constant 0 : index
      %1066 = vector.load %arg9[%c2_865, %c0_866, %c0_867, %c0_868] : memref<6x2x22x128xf32, #tpu.memory_space<vmem>>, vector<1x1x22x128xf32>
      %1067 = vector.shape_cast %1066 : vector<1x1x22x128xf32> to vector<22x128xf32>
      %1068 = vector.shape_cast %1065 : vector<22x128xf32> to vector<1x1x22x128xf32>
      tpu.vector_store %arg9[%c2_865, %c0_866, %c0_867, %c0_868], %1068 {strides = array<i32>} : memref<6x2x22x128xf32, #tpu.memory_space<vmem>>, vector<1x1x22x128xf32>,
      %c127_i32_869 = arith.constant 127 : i32
      %1069 = tpu.dynamic_rotate %1056 by %c127_i32_869 dim 1 : vector<22x128xf32>, i32 -> vector<22x128xf32>
      %c3_870 = arith.constant 3 : index
      %c0_871 = arith.constant 0 : index
      %c0_872 = arith.constant 0 : index
      %c0_873 = arith.constant 0 : index
      %1070 = vector.load %arg9[%c3_870, %c0_871, %c0_872, %c0_873] : memref<6x2x22x128xf32, #tpu.memory_space<vmem>>, vector<1x1x22x128xf32>
      %1071 = vector.shape_cast %1070 : vector<1x1x22x128xf32> to vector<22x128xf32>
      %1072 = vector.shape_cast %1069 : vector<22x128xf32> to vector<1x1x22x128xf32>
      tpu.vector_store %arg9[%c3_870, %c0_871, %c0_872, %c0_873], %1072 {strides = array<i32>} : memref<6x2x22x128xf32, #tpu.memory_space<vmem>>, vector<1x1x22x128xf32>,
      %c126_i32_874 = arith.constant 126 : i32
      %1073 = tpu.dynamic_rotate %1056 by %c126_i32_874 dim 1 : vector<22x128xf32>, i32 -> vector<22x128xf32>
      %c4_875 = arith.constant 4 : index
      %c0_876 = arith.constant 0 : index
      %c0_877 = arith.constant 0 : index
      %c0_878 = arith.constant 0 : index
      %1074 = vector.load %arg9[%c4_875, %c0_876, %c0_877, %c0_878] : memref<6x2x22x128xf32, #tpu.memory_space<vmem>>, vector<1x1x22x128xf32>
      %1075 = vector.shape_cast %1074 : vector<1x1x22x128xf32> to vector<22x128xf32>
      %1076 = vector.shape_cast %1073 : vector<22x128xf32> to vector<1x1x22x128xf32>
      tpu.vector_store %arg9[%c4_875, %c0_876, %c0_877, %c0_878], %1076 {strides = array<i32>} : memref<6x2x22x128xf32, #tpu.memory_space<vmem>>, vector<1x1x22x128xf32>,
      %c125_i32_879 = arith.constant 125 : i32
      %1077 = tpu.dynamic_rotate %1056 by %c125_i32_879 dim 1 : vector<22x128xf32>, i32 -> vector<22x128xf32>
      %c5_880 = arith.constant 5 : index
      %c0_881 = arith.constant 0 : index
      %c0_882 = arith.constant 0 : index
      %c0_883 = arith.constant 0 : index
      %1078 = vector.load %arg9[%c5_880, %c0_881, %c0_882, %c0_883] : memref<6x2x22x128xf32, #tpu.memory_space<vmem>>, vector<1x1x22x128xf32>
      %1079 = vector.shape_cast %1078 : vector<1x1x22x128xf32> to vector<22x128xf32>
      %1080 = vector.shape_cast %1077 : vector<22x128xf32> to vector<1x1x22x128xf32>
      tpu.vector_store %arg9[%c5_880, %c0_881, %c0_882, %c0_883], %1080 {strides = array<i32>} : memref<6x2x22x128xf32, #tpu.memory_space<vmem>>, vector<1x1x22x128xf32>,
      %c1_884 = arith.constant 1 : index
      %c0_885 = arith.constant 0 : index
      %c0_886 = arith.constant 0 : index
      %1081 = vector.load %arg8[%c1_884, %c0_885, %c0_886] : memref<2x22x128xf32, #tpu.memory_space<vmem>>, vector<1x22x128xf32>
      %1082 = vector.shape_cast %1081 : vector<1x22x128xf32> to vector<22x128xf32>
      %c3_i32_887 = arith.constant 3 : i32
      %1083 = tpu.dynamic_rotate %1082 by %c3_i32_887 dim 1 : vector<22x128xf32>, i32 -> vector<22x128xf32>
      %c0_888 = arith.constant 0 : index
      %c1_889 = arith.constant 1 : index
      %c0_890 = arith.constant 0 : index
      %c0_891 = arith.constant 0 : index
      %1084 = vector.load %arg9[%c0_888, %c1_889, %c0_890, %c0_891] : memref<6x2x22x128xf32, #tpu.memory_space<vmem>>, vector<1x1x22x128xf32>
      %1085 = vector.shape_cast %1084 : vector<1x1x22x128xf32> to vector<22x128xf32>
      %1086 = vector.shape_cast %1083 : vector<22x128xf32> to vector<1x1x22x128xf32>
      tpu.vector_store %arg9[%c0_888, %c1_889, %c0_890, %c0_891], %1086 {strides = array<i32>} : memref<6x2x22x128xf32, #tpu.memory_space<vmem>>, vector<1x1x22x128xf32>,
      %c2_i32_892 = arith.constant 2 : i32
      %1087 = tpu.dynamic_rotate %1082 by %c2_i32_892 dim 1 : vector<22x128xf32>, i32 -> vector<22x128xf32>
      %c1_893 = arith.constant 1 : index
      %c1_894 = arith.constant 1 : index
      %c0_895 = arith.constant 0 : index
      %c0_896 = arith.constant 0 : index
      %1088 = vector.load %arg9[%c1_893, %c1_894, %c0_895, %c0_896] : memref<6x2x22x128xf32, #tpu.memory_space<vmem>>, vector<1x1x22x128xf32>
      %1089 = vector.shape_cast %1088 : vector<1x1x22x128xf32> to vector<22x128xf32>
      %1090 = vector.shape_cast %1087 : vector<22x128xf32> to vector<1x1x22x128xf32>
      tpu.vector_store %arg9[%c1_893, %c1_894, %c0_895, %c0_896], %1090 {strides = array<i32>} : memref<6x2x22x128xf32, #tpu.memory_space<vmem>>, vector<1x1x22x128xf32>,
      %c1_i32_897 = arith.constant 1 : i32
      %1091 = tpu.dynamic_rotate %1082 by %c1_i32_897 dim 1 : vector<22x128xf32>, i32 -> vector<22x128xf32>
      %c2_898 = arith.constant 2 : index
      %c1_899 = arith.constant 1 : index
      %c0_900 = arith.constant 0 : index
      %c0_901 = arith.constant 0 : index
      %1092 = vector.load %arg9[%c2_898, %c1_899, %c0_900, %c0_901] : memref<6x2x22x128xf32, #tpu.memory_space<vmem>>, vector<1x1x22x128xf32>
      %1093 = vector.shape_cast %1092 : vector<1x1x22x128xf32> to vector<22x128xf32>
      %1094 = vector.shape_cast %1091 : vector<22x128xf32> to vector<1x1x22x128xf32>
      tpu.vector_store %arg9[%c2_898, %c1_899, %c0_900, %c0_901], %1094 {strides = array<i32>} : memref<6x2x22x128xf32, #tpu.memory_space<vmem>>, vector<1x1x22x128xf32>,
      %c127_i32_902 = arith.constant 127 : i32
      %1095 = tpu.dynamic_rotate %1082 by %c127_i32_902 dim 1 : vector<22x128xf32>, i32 -> vector<22x128xf32>
      %c3_903 = arith.constant 3 : index
      %c1_904 = arith.constant 1 : index
      %c0_905 = arith.constant 0 : index
      %c0_906 = arith.constant 0 : index
      %1096 = vector.load %arg9[%c3_903, %c1_904, %c0_905, %c0_906] : memref<6x2x22x128xf32, #tpu.memory_space<vmem>>, vector<1x1x22x128xf32>
      %1097 = vector.shape_cast %1096 : vector<1x1x22x128xf32> to vector<22x128xf32>
      %1098 = vector.shape_cast %1095 : vector<22x128xf32> to vector<1x1x22x128xf32>
      tpu.vector_store %arg9[%c3_903, %c1_904, %c0_905, %c0_906], %1098 {strides = array<i32>} : memref<6x2x22x128xf32, #tpu.memory_space<vmem>>, vector<1x1x22x128xf32>,
      %c126_i32_907 = arith.constant 126 : i32
      %1099 = tpu.dynamic_rotate %1082 by %c126_i32_907 dim 1 : vector<22x128xf32>, i32 -> vector<22x128xf32>
      %c4_908 = arith.constant 4 : index
      %c1_909 = arith.constant 1 : index
      %c0_910 = arith.constant 0 : index
      %c0_911 = arith.constant 0 : index
      %1100 = vector.load %arg9[%c4_908, %c1_909, %c0_910, %c0_911] : memref<6x2x22x128xf32, #tpu.memory_space<vmem>>, vector<1x1x22x128xf32>
      %1101 = vector.shape_cast %1100 : vector<1x1x22x128xf32> to vector<22x128xf32>
      %1102 = vector.shape_cast %1099 : vector<22x128xf32> to vector<1x1x22x128xf32>
      tpu.vector_store %arg9[%c4_908, %c1_909, %c0_910, %c0_911], %1102 {strides = array<i32>} : memref<6x2x22x128xf32, #tpu.memory_space<vmem>>, vector<1x1x22x128xf32>,
      %c125_i32_912 = arith.constant 125 : i32
      %1103 = tpu.dynamic_rotate %1082 by %c125_i32_912 dim 1 : vector<22x128xf32>, i32 -> vector<22x128xf32>
      %c5_913 = arith.constant 5 : index
      %c1_914 = arith.constant 1 : index
      %c0_915 = arith.constant 0 : index
      %c0_916 = arith.constant 0 : index
      %1104 = vector.load %arg9[%c5_913, %c1_914, %c0_915, %c0_916] : memref<6x2x22x128xf32, #tpu.memory_space<vmem>>, vector<1x1x22x128xf32>
      %1105 = vector.shape_cast %1104 : vector<1x1x22x128xf32> to vector<22x128xf32>
      %1106 = vector.shape_cast %1103 : vector<22x128xf32> to vector<1x1x22x128xf32>
      tpu.vector_store %arg9[%c5_913, %c1_914, %c0_915, %c0_916], %1106 {strides = array<i32>} : memref<6x2x22x128xf32, #tpu.memory_space<vmem>>, vector<1x1x22x128xf32>,
      %cst_917 = arith.constant 0.000000e+00 : f32
      %1107 = vector.broadcast %cst_917 : f32 to vector<16x128xf32>
      %cst_918 = arith.constant 0.000000e+00 : f32
      %1108 = vector.broadcast %cst_918 : f32 to vector<16x128xf32>
      %c0_919 = arith.constant 0 : index
      %c0_920 = arith.constant 0 : index
      %c0_921 = arith.constant 0 : index
      %c0_922 = arith.constant 0 : index
      %1109 = vector.load %arg9[%c0_919, %c0_920, %c0_921, %c0_922] : memref<6x2x22x128xf32, #tpu.memory_space<vmem>>, vector<1x1x16x128xf32>
      %1110 = vector.shape_cast %1109 : vector<1x1x16x128xf32> to vector<16x128xf32>
      %c0_923 = arith.constant 0 : index
      %c1_924 = arith.constant 1 : index
      %c0_925 = arith.constant 0 : index
      %c0_926 = arith.constant 0 : index
      %1111 = vector.load %arg9[%c0_923, %c1_924, %c0_925, %c0_926] : memref<6x2x22x128xf32, #tpu.memory_space<vmem>>, vector<1x1x16x128xf32>
      %1112 = vector.shape_cast %1111 : vector<1x1x16x128xf32> to vector<16x128xf32>
      %1113 = vector.broadcast %17 : f32 to vector<16x128xf32>
      %1114 = arith.mulf %1110, %1113 : vector<16x128xf32>
      %1115 = arith.addf %1107, %1114 : vector<16x128xf32>
      %1116 = vector.broadcast %66 : f32 to vector<16x128xf32>
      %1117 = arith.mulf %1112, %1116 : vector<16x128xf32>
      %1118 = arith.addf %1108, %1117 : vector<16x128xf32>
      %c1_927 = arith.constant 1 : index
      %c0_928 = arith.constant 0 : index
      %c0_929 = arith.constant 0 : index
      %c0_930 = arith.constant 0 : index
      %1119 = vector.load %arg9[%c1_927, %c0_928, %c0_929, %c0_930] : memref<6x2x22x128xf32, #tpu.memory_space<vmem>>, vector<1x1x16x128xf32>
      %1120 = vector.shape_cast %1119 : vector<1x1x16x128xf32> to vector<16x128xf32>
      %c1_931 = arith.constant 1 : index
      %c1_932 = arith.constant 1 : index
      %c0_933 = arith.constant 0 : index
      %c0_934 = arith.constant 0 : index
      %1121 = vector.load %arg9[%c1_931, %c1_932, %c0_933, %c0_934] : memref<6x2x22x128xf32, #tpu.memory_space<vmem>>, vector<1x1x16x128xf32>
      %1122 = vector.shape_cast %1121 : vector<1x1x16x128xf32> to vector<16x128xf32>
      %1123 = vector.broadcast %18 : f32 to vector<16x128xf32>
      %1124 = arith.mulf %1120, %1123 : vector<16x128xf32>
      %1125 = arith.addf %1115, %1124 : vector<16x128xf32>
      %1126 = vector.broadcast %67 : f32 to vector<16x128xf32>
      %1127 = arith.mulf %1122, %1126 : vector<16x128xf32>
      %1128 = arith.addf %1118, %1127 : vector<16x128xf32>
      %c2_935 = arith.constant 2 : index
      %c0_936 = arith.constant 0 : index
      %c0_937 = arith.constant 0 : index
      %c0_938 = arith.constant 0 : index
      %1129 = vector.load %arg9[%c2_935, %c0_936, %c0_937, %c0_938] : memref<6x2x22x128xf32, #tpu.memory_space<vmem>>, vector<1x1x16x128xf32>
      %1130 = vector.shape_cast %1129 : vector<1x1x16x128xf32> to vector<16x128xf32>
      %c2_939 = arith.constant 2 : index
      %c1_940 = arith.constant 1 : index
      %c0_941 = arith.constant 0 : index
      %c0_942 = arith.constant 0 : index
      %1131 = vector.load %arg9[%c2_939, %c1_940, %c0_941, %c0_942] : memref<6x2x22x128xf32, #tpu.memory_space<vmem>>, vector<1x1x16x128xf32>
      %1132 = vector.shape_cast %1131 : vector<1x1x16x128xf32> to vector<16x128xf32>
      %1133 = vector.broadcast %19 : f32 to vector<16x128xf32>
      %1134 = arith.mulf %1130, %1133 : vector<16x128xf32>
      %1135 = arith.addf %1125, %1134 : vector<16x128xf32>
      %1136 = vector.broadcast %68 : f32 to vector<16x128xf32>
      %1137 = arith.mulf %1132, %1136 : vector<16x128xf32>
      %1138 = arith.addf %1128, %1137 : vector<16x128xf32>
      %c0_943 = arith.constant 0 : index
      %c0_944 = arith.constant 0 : index
      %c0_945 = arith.constant 0 : index
      %1139 = vector.load %arg8[%c0_943, %c0_944, %c0_945] : memref<2x22x128xf32, #tpu.memory_space<vmem>>, vector<1x16x128xf32>
      %1140 = vector.shape_cast %1139 : vector<1x16x128xf32> to vector<16x128xf32>
      %c1_946 = arith.constant 1 : index
      %c0_947 = arith.constant 0 : index
      %c0_948 = arith.constant 0 : index
      %1141 = vector.load %arg8[%c1_946, %c0_947, %c0_948] : memref<2x22x128xf32, #tpu.memory_space<vmem>>, vector<1x16x128xf32>
      %1142 = vector.shape_cast %1141 : vector<1x16x128xf32> to vector<16x128xf32>
      %1143 = vector.broadcast %20 : f32 to vector<16x128xf32>
      %1144 = arith.mulf %1140, %1143 : vector<16x128xf32>
      %1145 = arith.addf %1135, %1144 : vector<16x128xf32>
      %1146 = vector.broadcast %69 : f32 to vector<16x128xf32>
      %1147 = arith.mulf %1142, %1146 : vector<16x128xf32>
      %1148 = arith.addf %1138, %1147 : vector<16x128xf32>
      %c3_949 = arith.constant 3 : index
      %c0_950 = arith.constant 0 : index
      %c0_951 = arith.constant 0 : index
      %c0_952 = arith.constant 0 : index
      %1149 = vector.load %arg9[%c3_949, %c0_950, %c0_951, %c0_952] : memref<6x2x22x128xf32, #tpu.memory_space<vmem>>, vector<1x1x16x128xf32>
      %1150 = vector.shape_cast %1149 : vector<1x1x16x128xf32> to vector<16x128xf32>
      %c3_953 = arith.constant 3 : index
      %c1_954 = arith.constant 1 : index
      %c0_955 = arith.constant 0 : index
      %c0_956 = arith.constant 0 : index
      %1151 = vector.load %arg9[%c3_953, %c1_954, %c0_955, %c0_956] : memref<6x2x22x128xf32, #tpu.memory_space<vmem>>, vector<1x1x16x128xf32>
      %1152 = vector.shape_cast %1151 : vector<1x1x16x128xf32> to vector<16x128xf32>
      %1153 = vector.broadcast %21 : f32 to vector<16x128xf32>
      %1154 = arith.mulf %1150, %1153 : vector<16x128xf32>
      %1155 = arith.addf %1145, %1154 : vector<16x128xf32>
      %1156 = vector.broadcast %70 : f32 to vector<16x128xf32>
      %1157 = arith.mulf %1152, %1156 : vector<16x128xf32>
      %1158 = arith.addf %1148, %1157 : vector<16x128xf32>
      %c4_957 = arith.constant 4 : index
      %c0_958 = arith.constant 0 : index
      %c0_959 = arith.constant 0 : index
      %c0_960 = arith.constant 0 : index
      %1159 = vector.load %arg9[%c4_957, %c0_958, %c0_959, %c0_960] : memref<6x2x22x128xf32, #tpu.memory_space<vmem>>, vector<1x1x16x128xf32>
      %1160 = vector.shape_cast %1159 : vector<1x1x16x128xf32> to vector<16x128xf32>
      %c4_961 = arith.constant 4 : index
      %c1_962 = arith.constant 1 : index
      %c0_963 = arith.constant 0 : index
      %c0_964 = arith.constant 0 : index
      %1161 = vector.load %arg9[%c4_961, %c1_962, %c0_963, %c0_964] : memref<6x2x22x128xf32, #tpu.memory_space<vmem>>, vector<1x1x16x128xf32>
      %1162 = vector.shape_cast %1161 : vector<1x1x16x128xf32> to vector<16x128xf32>
      %1163 = vector.broadcast %22 : f32 to vector<16x128xf32>
      %1164 = arith.mulf %1160, %1163 : vector<16x128xf32>
      %1165 = arith.addf %1155, %1164 : vector<16x128xf32>
      %1166 = vector.broadcast %71 : f32 to vector<16x128xf32>
      %1167 = arith.mulf %1162, %1166 : vector<16x128xf32>
      %1168 = arith.addf %1158, %1167 : vector<16x128xf32>
      %c5_965 = arith.constant 5 : index
      %c0_966 = arith.constant 0 : index
      %c0_967 = arith.constant 0 : index
      %c0_968 = arith.constant 0 : index
      %1169 = vector.load %arg9[%c5_965, %c0_966, %c0_967, %c0_968] : memref<6x2x22x128xf32, #tpu.memory_space<vmem>>, vector<1x1x16x128xf32>
      %1170 = vector.shape_cast %1169 : vector<1x1x16x128xf32> to vector<16x128xf32>
      %c5_969 = arith.constant 5 : index
      %c1_970 = arith.constant 1 : index
      %c0_971 = arith.constant 0 : index
      %c0_972 = arith.constant 0 : index
      %1171 = vector.load %arg9[%c5_969, %c1_970, %c0_971, %c0_972] : memref<6x2x22x128xf32, #tpu.memory_space<vmem>>, vector<1x1x16x128xf32>
      %1172 = vector.shape_cast %1171 : vector<1x1x16x128xf32> to vector<16x128xf32>
      %1173 = vector.broadcast %23 : f32 to vector<16x128xf32>
      %1174 = arith.mulf %1170, %1173 : vector<16x128xf32>
      %1175 = arith.addf %1165, %1174 : vector<16x128xf32>
      %1176 = vector.broadcast %72 : f32 to vector<16x128xf32>
      %1177 = arith.mulf %1172, %1176 : vector<16x128xf32>
      %1178 = arith.addf %1168, %1177 : vector<16x128xf32>
      %c0_973 = arith.constant 0 : index
      %c0_974 = arith.constant 0 : index
      %c1_975 = arith.constant 1 : index
      %c0_976 = arith.constant 0 : index
      %1179 = vector.load %arg9[%c0_973, %c0_974, %c1_975, %c0_976] : memref<6x2x22x128xf32, #tpu.memory_space<vmem>>, vector<1x1x16x128xf32>
      %1180 = vector.shape_cast %1179 : vector<1x1x16x128xf32> to vector<16x128xf32>
      %c0_977 = arith.constant 0 : index
      %c1_978 = arith.constant 1 : index
      %c1_979 = arith.constant 1 : index
      %c0_980 = arith.constant 0 : index
      %1181 = vector.load %arg9[%c0_977, %c1_978, %c1_979, %c0_980] : memref<6x2x22x128xf32, #tpu.memory_space<vmem>>, vector<1x1x16x128xf32>
      %1182 = vector.shape_cast %1181 : vector<1x1x16x128xf32> to vector<16x128xf32>
      %1183 = vector.broadcast %24 : f32 to vector<16x128xf32>
      %1184 = arith.mulf %1180, %1183 : vector<16x128xf32>
      %1185 = arith.addf %1175, %1184 : vector<16x128xf32>
      %1186 = vector.broadcast %73 : f32 to vector<16x128xf32>
      %1187 = arith.mulf %1182, %1186 : vector<16x128xf32>
      %1188 = arith.addf %1178, %1187 : vector<16x128xf32>
      %c1_981 = arith.constant 1 : index
      %c0_982 = arith.constant 0 : index
      %c1_983 = arith.constant 1 : index
      %c0_984 = arith.constant 0 : index
      %1189 = vector.load %arg9[%c1_981, %c0_982, %c1_983, %c0_984] : memref<6x2x22x128xf32, #tpu.memory_space<vmem>>, vector<1x1x16x128xf32>
      %1190 = vector.shape_cast %1189 : vector<1x1x16x128xf32> to vector<16x128xf32>
      %c1_985 = arith.constant 1 : index
      %c1_986 = arith.constant 1 : index
      %c1_987 = arith.constant 1 : index
      %c0_988 = arith.constant 0 : index
      %1191 = vector.load %arg9[%c1_985, %c1_986, %c1_987, %c0_988] : memref<6x2x22x128xf32, #tpu.memory_space<vmem>>, vector<1x1x16x128xf32>
      %1192 = vector.shape_cast %1191 : vector<1x1x16x128xf32> to vector<16x128xf32>
      %1193 = vector.broadcast %25 : f32 to vector<16x128xf32>
      %1194 = arith.mulf %1190, %1193 : vector<16x128xf32>
      %1195 = arith.addf %1185, %1194 : vector<16x128xf32>
      %1196 = vector.broadcast %74 : f32 to vector<16x128xf32>
      %1197 = arith.mulf %1192, %1196 : vector<16x128xf32>
      %1198 = arith.addf %1188, %1197 : vector<16x128xf32>
      %c2_989 = arith.constant 2 : index
      %c0_990 = arith.constant 0 : index
      %c1_991 = arith.constant 1 : index
      %c0_992 = arith.constant 0 : index
      %1199 = vector.load %arg9[%c2_989, %c0_990, %c1_991, %c0_992] : memref<6x2x22x128xf32, #tpu.memory_space<vmem>>, vector<1x1x16x128xf32>
      %1200 = vector.shape_cast %1199 : vector<1x1x16x128xf32> to vector<16x128xf32>
      %c2_993 = arith.constant 2 : index
      %c1_994 = arith.constant 1 : index
      %c1_995 = arith.constant 1 : index
      %c0_996 = arith.constant 0 : index
      %1201 = vector.load %arg9[%c2_993, %c1_994, %c1_995, %c0_996] : memref<6x2x22x128xf32, #tpu.memory_space<vmem>>, vector<1x1x16x128xf32>
      %1202 = vector.shape_cast %1201 : vector<1x1x16x128xf32> to vector<16x128xf32>
      %1203 = vector.broadcast %26 : f32 to vector<16x128xf32>
      %1204 = arith.mulf %1200, %1203 : vector<16x128xf32>
      %1205 = arith.addf %1195, %1204 : vector<16x128xf32>
      %1206 = vector.broadcast %75 : f32 to vector<16x128xf32>
      %1207 = arith.mulf %1202, %1206 : vector<16x128xf32>
      %1208 = arith.addf %1198, %1207 : vector<16x128xf32>
      %c0_997 = arith.constant 0 : index
      %c1_998 = arith.constant 1 : index
      %c0_999 = arith.constant 0 : index
      %1209 = vector.load %arg8[%c0_997, %c1_998, %c0_999] : memref<2x22x128xf32, #tpu.memory_space<vmem>>, vector<1x16x128xf32>
      %1210 = vector.shape_cast %1209 : vector<1x16x128xf32> to vector<16x128xf32>
      %c1_1000 = arith.constant 1 : index
      %c1_1001 = arith.constant 1 : index
      %c0_1002 = arith.constant 0 : index
      %1211 = vector.load %arg8[%c1_1000, %c1_1001, %c0_1002] : memref<2x22x128xf32, #tpu.memory_space<vmem>>, vector<1x16x128xf32>
      %1212 = vector.shape_cast %1211 : vector<1x16x128xf32> to vector<16x128xf32>
      %1213 = vector.broadcast %27 : f32 to vector<16x128xf32>
      %1214 = arith.mulf %1210, %1213 : vector<16x128xf32>
      %1215 = arith.addf %1205, %1214 : vector<16x128xf32>
      %1216 = vector.broadcast %76 : f32 to vector<16x128xf32>
      %1217 = arith.mulf %1212, %1216 : vector<16x128xf32>
      %1218 = arith.addf %1208, %1217 : vector<16x128xf32>
      %c3_1003 = arith.constant 3 : index
      %c0_1004 = arith.constant 0 : index
      %c1_1005 = arith.constant 1 : index
      %c0_1006 = arith.constant 0 : index
      %1219 = vector.load %arg9[%c3_1003, %c0_1004, %c1_1005, %c0_1006] : memref<6x2x22x128xf32, #tpu.memory_space<vmem>>, vector<1x1x16x128xf32>
      %1220 = vector.shape_cast %1219 : vector<1x1x16x128xf32> to vector<16x128xf32>
      %c3_1007 = arith.constant 3 : index
      %c1_1008 = arith.constant 1 : index
      %c1_1009 = arith.constant 1 : index
      %c0_1010 = arith.constant 0 : index
      %1221 = vector.load %arg9[%c3_1007, %c1_1008, %c1_1009, %c0_1010] : memref<6x2x22x128xf32, #tpu.memory_space<vmem>>, vector<1x1x16x128xf32>
      %1222 = vector.shape_cast %1221 : vector<1x1x16x128xf32> to vector<16x128xf32>
      %1223 = vector.broadcast %28 : f32 to vector<16x128xf32>
      %1224 = arith.mulf %1220, %1223 : vector<16x128xf32>
      %1225 = arith.addf %1215, %1224 : vector<16x128xf32>
      %1226 = vector.broadcast %77 : f32 to vector<16x128xf32>
      %1227 = arith.mulf %1222, %1226 : vector<16x128xf32>
      %1228 = arith.addf %1218, %1227 : vector<16x128xf32>
      %c4_1011 = arith.constant 4 : index
      %c0_1012 = arith.constant 0 : index
      %c1_1013 = arith.constant 1 : index
      %c0_1014 = arith.constant 0 : index
      %1229 = vector.load %arg9[%c4_1011, %c0_1012, %c1_1013, %c0_1014] : memref<6x2x22x128xf32, #tpu.memory_space<vmem>>, vector<1x1x16x128xf32>
      %1230 = vector.shape_cast %1229 : vector<1x1x16x128xf32> to vector<16x128xf32>
      %c4_1015 = arith.constant 4 : index
      %c1_1016 = arith.constant 1 : index
      %c1_1017 = arith.constant 1 : index
      %c0_1018 = arith.constant 0 : index
      %1231 = vector.load %arg9[%c4_1015, %c1_1016, %c1_1017, %c0_1018] : memref<6x2x22x128xf32, #tpu.memory_space<vmem>>, vector<1x1x16x128xf32>
      %1232 = vector.shape_cast %1231 : vector<1x1x16x128xf32> to vector<16x128xf32>
      %1233 = vector.broadcast %29 : f32 to vector<16x128xf32>
      %1234 = arith.mulf %1230, %1233 : vector<16x128xf32>
      %1235 = arith.addf %1225, %1234 : vector<16x128xf32>
      %1236 = vector.broadcast %78 : f32 to vector<16x128xf32>
      %1237 = arith.mulf %1232, %1236 : vector<16x128xf32>
      %1238 = arith.addf %1228, %1237 : vector<16x128xf32>
      %c5_1019 = arith.constant 5 : index
      %c0_1020 = arith.constant 0 : index
      %c1_1021 = arith.constant 1 : index
      %c0_1022 = arith.constant 0 : index
      %1239 = vector.load %arg9[%c5_1019, %c0_1020, %c1_1021, %c0_1022] : memref<6x2x22x128xf32, #tpu.memory_space<vmem>>, vector<1x1x16x128xf32>
      %1240 = vector.shape_cast %1239 : vector<1x1x16x128xf32> to vector<16x128xf32>
      %c5_1023 = arith.constant 5 : index
      %c1_1024 = arith.constant 1 : index
      %c1_1025 = arith.constant 1 : index
      %c0_1026 = arith.constant 0 : index
      %1241 = vector.load %arg9[%c5_1023, %c1_1024, %c1_1025, %c0_1026] : memref<6x2x22x128xf32, #tpu.memory_space<vmem>>, vector<1x1x16x128xf32>
      %1242 = vector.shape_cast %1241 : vector<1x1x16x128xf32> to vector<16x128xf32>
      %1243 = vector.broadcast %30 : f32 to vector<16x128xf32>
      %1244 = arith.mulf %1240, %1243 : vector<16x128xf32>
      %1245 = arith.addf %1235, %1244 : vector<16x128xf32>
      %1246 = vector.broadcast %79 : f32 to vector<16x128xf32>
      %1247 = arith.mulf %1242, %1246 : vector<16x128xf32>
      %1248 = arith.addf %1238, %1247 : vector<16x128xf32>
      %c0_1027 = arith.constant 0 : index
      %c0_1028 = arith.constant 0 : index
      %c2_1029 = arith.constant 2 : index
      %c0_1030 = arith.constant 0 : index
      %1249 = vector.load %arg9[%c0_1027, %c0_1028, %c2_1029, %c0_1030] : memref<6x2x22x128xf32, #tpu.memory_space<vmem>>, vector<1x1x16x128xf32>
      %1250 = vector.shape_cast %1249 : vector<1x1x16x128xf32> to vector<16x128xf32>
      %c0_1031 = arith.constant 0 : index
      %c1_1032 = arith.constant 1 : index
      %c2_1033 = arith.constant 2 : index
      %c0_1034 = arith.constant 0 : index
      %1251 = vector.load %arg9[%c0_1031, %c1_1032, %c2_1033, %c0_1034] : memref<6x2x22x128xf32, #tpu.memory_space<vmem>>, vector<1x1x16x128xf32>
      %1252 = vector.shape_cast %1251 : vector<1x1x16x128xf32> to vector<16x128xf32>
      %1253 = vector.broadcast %31 : f32 to vector<16x128xf32>
      %1254 = arith.mulf %1250, %1253 : vector<16x128xf32>
      %1255 = arith.addf %1245, %1254 : vector<16x128xf32>
      %1256 = vector.broadcast %80 : f32 to vector<16x128xf32>
      %1257 = arith.mulf %1252, %1256 : vector<16x128xf32>
      %1258 = arith.addf %1248, %1257 : vector<16x128xf32>
      %c1_1035 = arith.constant 1 : index
      %c0_1036 = arith.constant 0 : index
      %c2_1037 = arith.constant 2 : index
      %c0_1038 = arith.constant 0 : index
      %1259 = vector.load %arg9[%c1_1035, %c0_1036, %c2_1037, %c0_1038] : memref<6x2x22x128xf32, #tpu.memory_space<vmem>>, vector<1x1x16x128xf32>
      %1260 = vector.shape_cast %1259 : vector<1x1x16x128xf32> to vector<16x128xf32>
      %c1_1039 = arith.constant 1 : index
      %c1_1040 = arith.constant 1 : index
      %c2_1041 = arith.constant 2 : index
      %c0_1042 = arith.constant 0 : index
      %1261 = vector.load %arg9[%c1_1039, %c1_1040, %c2_1041, %c0_1042] : memref<6x2x22x128xf32, #tpu.memory_space<vmem>>, vector<1x1x16x128xf32>
      %1262 = vector.shape_cast %1261 : vector<1x1x16x128xf32> to vector<16x128xf32>
      %1263 = vector.broadcast %32 : f32 to vector<16x128xf32>
      %1264 = arith.mulf %1260, %1263 : vector<16x128xf32>
      %1265 = arith.addf %1255, %1264 : vector<16x128xf32>
      %1266 = vector.broadcast %81 : f32 to vector<16x128xf32>
      %1267 = arith.mulf %1262, %1266 : vector<16x128xf32>
      %1268 = arith.addf %1258, %1267 : vector<16x128xf32>
      %c2_1043 = arith.constant 2 : index
      %c0_1044 = arith.constant 0 : index
      %c2_1045 = arith.constant 2 : index
      %c0_1046 = arith.constant 0 : index
      %1269 = vector.load %arg9[%c2_1043, %c0_1044, %c2_1045, %c0_1046] : memref<6x2x22x128xf32, #tpu.memory_space<vmem>>, vector<1x1x16x128xf32>
      %1270 = vector.shape_cast %1269 : vector<1x1x16x128xf32> to vector<16x128xf32>
      %c2_1047 = arith.constant 2 : index
      %c1_1048 = arith.constant 1 : index
      %c2_1049 = arith.constant 2 : index
      %c0_1050 = arith.constant 0 : index
      %1271 = vector.load %arg9[%c2_1047, %c1_1048, %c2_1049, %c0_1050] : memref<6x2x22x128xf32, #tpu.memory_space<vmem>>, vector<1x1x16x128xf32>
      %1272 = vector.shape_cast %1271 : vector<1x1x16x128xf32> to vector<16x128xf32>
      %1273 = vector.broadcast %33 : f32 to vector<16x128xf32>
      %1274 = arith.mulf %1270, %1273 : vector<16x128xf32>
      %1275 = arith.addf %1265, %1274 : vector<16x128xf32>
      %1276 = vector.broadcast %82 : f32 to vector<16x128xf32>
      %1277 = arith.mulf %1272, %1276 : vector<16x128xf32>
      %1278 = arith.addf %1268, %1277 : vector<16x128xf32>
      %c0_1051 = arith.constant 0 : index
      %c2_1052 = arith.constant 2 : index
      %c0_1053 = arith.constant 0 : index
      %1279 = vector.load %arg8[%c0_1051, %c2_1052, %c0_1053] : memref<2x22x128xf32, #tpu.memory_space<vmem>>, vector<1x16x128xf32>
      %1280 = vector.shape_cast %1279 : vector<1x16x128xf32> to vector<16x128xf32>
      %c1_1054 = arith.constant 1 : index
      %c2_1055 = arith.constant 2 : index
      %c0_1056 = arith.constant 0 : index
      %1281 = vector.load %arg8[%c1_1054, %c2_1055, %c0_1056] : memref<2x22x128xf32, #tpu.memory_space<vmem>>, vector<1x16x128xf32>
      %1282 = vector.shape_cast %1281 : vector<1x16x128xf32> to vector<16x128xf32>
      %1283 = vector.broadcast %34 : f32 to vector<16x128xf32>
      %1284 = arith.mulf %1280, %1283 : vector<16x128xf32>
      %1285 = arith.addf %1275, %1284 : vector<16x128xf32>
      %1286 = vector.broadcast %83 : f32 to vector<16x128xf32>
      %1287 = arith.mulf %1282, %1286 : vector<16x128xf32>
      %1288 = arith.addf %1278, %1287 : vector<16x128xf32>
      %c3_1057 = arith.constant 3 : index
      %c0_1058 = arith.constant 0 : index
      %c2_1059 = arith.constant 2 : index
      %c0_1060 = arith.constant 0 : index
      %1289 = vector.load %arg9[%c3_1057, %c0_1058, %c2_1059, %c0_1060] : memref<6x2x22x128xf32, #tpu.memory_space<vmem>>, vector<1x1x16x128xf32>
      %1290 = vector.shape_cast %1289 : vector<1x1x16x128xf32> to vector<16x128xf32>
      %c3_1061 = arith.constant 3 : index
      %c1_1062 = arith.constant 1 : index
      %c2_1063 = arith.constant 2 : index
      %c0_1064 = arith.constant 0 : index
      %1291 = vector.load %arg9[%c3_1061, %c1_1062, %c2_1063, %c0_1064] : memref<6x2x22x128xf32, #tpu.memory_space<vmem>>, vector<1x1x16x128xf32>
      %1292 = vector.shape_cast %1291 : vector<1x1x16x128xf32> to vector<16x128xf32>
      %1293 = vector.broadcast %35 : f32 to vector<16x128xf32>
      %1294 = arith.mulf %1290, %1293 : vector<16x128xf32>
      %1295 = arith.addf %1285, %1294 : vector<16x128xf32>
      %1296 = vector.broadcast %84 : f32 to vector<16x128xf32>
      %1297 = arith.mulf %1292, %1296 : vector<16x128xf32>
      %1298 = arith.addf %1288, %1297 : vector<16x128xf32>
      %c4_1065 = arith.constant 4 : index
      %c0_1066 = arith.constant 0 : index
      %c2_1067 = arith.constant 2 : index
      %c0_1068 = arith.constant 0 : index
      %1299 = vector.load %arg9[%c4_1065, %c0_1066, %c2_1067, %c0_1068] : memref<6x2x22x128xf32, #tpu.memory_space<vmem>>, vector<1x1x16x128xf32>
      %1300 = vector.shape_cast %1299 : vector<1x1x16x128xf32> to vector<16x128xf32>
      %c4_1069 = arith.constant 4 : index
      %c1_1070 = arith.constant 1 : index
      %c2_1071 = arith.constant 2 : index
      %c0_1072 = arith.constant 0 : index
      %1301 = vector.load %arg9[%c4_1069, %c1_1070, %c2_1071, %c0_1072] : memref<6x2x22x128xf32, #tpu.memory_space<vmem>>, vector<1x1x16x128xf32>
      %1302 = vector.shape_cast %1301 : vector<1x1x16x128xf32> to vector<16x128xf32>
      %1303 = vector.broadcast %36 : f32 to vector<16x128xf32>
      %1304 = arith.mulf %1300, %1303 : vector<16x128xf32>
      %1305 = arith.addf %1295, %1304 : vector<16x128xf32>
      %1306 = vector.broadcast %85 : f32 to vector<16x128xf32>
      %1307 = arith.mulf %1302, %1306 : vector<16x128xf32>
      %1308 = arith.addf %1298, %1307 : vector<16x128xf32>
      %c5_1073 = arith.constant 5 : index
      %c0_1074 = arith.constant 0 : index
      %c2_1075 = arith.constant 2 : index
      %c0_1076 = arith.constant 0 : index
      %1309 = vector.load %arg9[%c5_1073, %c0_1074, %c2_1075, %c0_1076] : memref<6x2x22x128xf32, #tpu.memory_space<vmem>>, vector<1x1x16x128xf32>
      %1310 = vector.shape_cast %1309 : vector<1x1x16x128xf32> to vector<16x128xf32>
      %c5_1077 = arith.constant 5 : index
      %c1_1078 = arith.constant 1 : index
      %c2_1079 = arith.constant 2 : index
      %c0_1080 = arith.constant 0 : index
      %1311 = vector.load %arg9[%c5_1077, %c1_1078, %c2_1079, %c0_1080] : memref<6x2x22x128xf32, #tpu.memory_space<vmem>>, vector<1x1x16x128xf32>
      %1312 = vector.shape_cast %1311 : vector<1x1x16x128xf32> to vector<16x128xf32>
      %1313 = vector.broadcast %37 : f32 to vector<16x128xf32>
      %1314 = arith.mulf %1310, %1313 : vector<16x128xf32>
      %1315 = arith.addf %1305, %1314 : vector<16x128xf32>
      %1316 = vector.broadcast %86 : f32 to vector<16x128xf32>
      %1317 = arith.mulf %1312, %1316 : vector<16x128xf32>
      %1318 = arith.addf %1308, %1317 : vector<16x128xf32>
      %c0_1081 = arith.constant 0 : index
      %c0_1082 = arith.constant 0 : index
      %c3_1083 = arith.constant 3 : index
      %c0_1084 = arith.constant 0 : index
      %1319 = vector.load %arg9[%c0_1081, %c0_1082, %c3_1083, %c0_1084] : memref<6x2x22x128xf32, #tpu.memory_space<vmem>>, vector<1x1x16x128xf32>
      %1320 = vector.shape_cast %1319 : vector<1x1x16x128xf32> to vector<16x128xf32>
      %c0_1085 = arith.constant 0 : index
      %c1_1086 = arith.constant 1 : index
      %c3_1087 = arith.constant 3 : index
      %c0_1088 = arith.constant 0 : index
      %1321 = vector.load %arg9[%c0_1085, %c1_1086, %c3_1087, %c0_1088] : memref<6x2x22x128xf32, #tpu.memory_space<vmem>>, vector<1x1x16x128xf32>
      %1322 = vector.shape_cast %1321 : vector<1x1x16x128xf32> to vector<16x128xf32>
      %1323 = vector.broadcast %38 : f32 to vector<16x128xf32>
      %1324 = arith.mulf %1320, %1323 : vector<16x128xf32>
      %1325 = arith.addf %1315, %1324 : vector<16x128xf32>
      %1326 = vector.broadcast %87 : f32 to vector<16x128xf32>
      %1327 = arith.mulf %1322, %1326 : vector<16x128xf32>
      %1328 = arith.addf %1318, %1327 : vector<16x128xf32>
      %c1_1089 = arith.constant 1 : index
      %c0_1090 = arith.constant 0 : index
      %c3_1091 = arith.constant 3 : index
      %c0_1092 = arith.constant 0 : index
      %1329 = vector.load %arg9[%c1_1089, %c0_1090, %c3_1091, %c0_1092] : memref<6x2x22x128xf32, #tpu.memory_space<vmem>>, vector<1x1x16x128xf32>
      %1330 = vector.shape_cast %1329 : vector<1x1x16x128xf32> to vector<16x128xf32>
      %c1_1093 = arith.constant 1 : index
      %c1_1094 = arith.constant 1 : index
      %c3_1095 = arith.constant 3 : index
      %c0_1096 = arith.constant 0 : index
      %1331 = vector.load %arg9[%c1_1093, %c1_1094, %c3_1095, %c0_1096] : memref<6x2x22x128xf32, #tpu.memory_space<vmem>>, vector<1x1x16x128xf32>
      %1332 = vector.shape_cast %1331 : vector<1x1x16x128xf32> to vector<16x128xf32>
      %1333 = vector.broadcast %39 : f32 to vector<16x128xf32>
      %1334 = arith.mulf %1330, %1333 : vector<16x128xf32>
      %1335 = arith.addf %1325, %1334 : vector<16x128xf32>
      %1336 = vector.broadcast %88 : f32 to vector<16x128xf32>
      %1337 = arith.mulf %1332, %1336 : vector<16x128xf32>
      %1338 = arith.addf %1328, %1337 : vector<16x128xf32>
      %c2_1097 = arith.constant 2 : index
      %c0_1098 = arith.constant 0 : index
      %c3_1099 = arith.constant 3 : index
      %c0_1100 = arith.constant 0 : index
      %1339 = vector.load %arg9[%c2_1097, %c0_1098, %c3_1099, %c0_1100] : memref<6x2x22x128xf32, #tpu.memory_space<vmem>>, vector<1x1x16x128xf32>
      %1340 = vector.shape_cast %1339 : vector<1x1x16x128xf32> to vector<16x128xf32>
      %c2_1101 = arith.constant 2 : index
      %c1_1102 = arith.constant 1 : index
      %c3_1103 = arith.constant 3 : index
      %c0_1104 = arith.constant 0 : index
      %1341 = vector.load %arg9[%c2_1101, %c1_1102, %c3_1103, %c0_1104] : memref<6x2x22x128xf32, #tpu.memory_space<vmem>>, vector<1x1x16x128xf32>
      %1342 = vector.shape_cast %1341 : vector<1x1x16x128xf32> to vector<16x128xf32>
      %1343 = vector.broadcast %40 : f32 to vector<16x128xf32>
      %1344 = arith.mulf %1340, %1343 : vector<16x128xf32>
      %1345 = arith.addf %1335, %1344 : vector<16x128xf32>
      %1346 = vector.broadcast %89 : f32 to vector<16x128xf32>
      %1347 = arith.mulf %1342, %1346 : vector<16x128xf32>
      %1348 = arith.addf %1338, %1347 : vector<16x128xf32>
      %c0_1105 = arith.constant 0 : index
      %c3_1106 = arith.constant 3 : index
      %c0_1107 = arith.constant 0 : index
      %1349 = vector.load %arg8[%c0_1105, %c3_1106, %c0_1107] : memref<2x22x128xf32, #tpu.memory_space<vmem>>, vector<1x16x128xf32>
      %1350 = vector.shape_cast %1349 : vector<1x16x128xf32> to vector<16x128xf32>
      %c1_1108 = arith.constant 1 : index
      %c3_1109 = arith.constant 3 : index
      %c0_1110 = arith.constant 0 : index
      %1351 = vector.load %arg8[%c1_1108, %c3_1109, %c0_1110] : memref<2x22x128xf32, #tpu.memory_space<vmem>>, vector<1x16x128xf32>
      %1352 = vector.shape_cast %1351 : vector<1x16x128xf32> to vector<16x128xf32>
      %1353 = vector.broadcast %41 : f32 to vector<16x128xf32>
      %1354 = arith.mulf %1350, %1353 : vector<16x128xf32>
      %1355 = arith.addf %1345, %1354 : vector<16x128xf32>
      %1356 = vector.broadcast %90 : f32 to vector<16x128xf32>
      %1357 = arith.mulf %1352, %1356 : vector<16x128xf32>
      %1358 = arith.addf %1348, %1357 : vector<16x128xf32>
      %c3_1111 = arith.constant 3 : index
      %c0_1112 = arith.constant 0 : index
      %c3_1113 = arith.constant 3 : index
      %c0_1114 = arith.constant 0 : index
      %1359 = vector.load %arg9[%c3_1111, %c0_1112, %c3_1113, %c0_1114] : memref<6x2x22x128xf32, #tpu.memory_space<vmem>>, vector<1x1x16x128xf32>
      %1360 = vector.shape_cast %1359 : vector<1x1x16x128xf32> to vector<16x128xf32>
      %c3_1115 = arith.constant 3 : index
      %c1_1116 = arith.constant 1 : index
      %c3_1117 = arith.constant 3 : index
      %c0_1118 = arith.constant 0 : index
      %1361 = vector.load %arg9[%c3_1115, %c1_1116, %c3_1117, %c0_1118] : memref<6x2x22x128xf32, #tpu.memory_space<vmem>>, vector<1x1x16x128xf32>
      %1362 = vector.shape_cast %1361 : vector<1x1x16x128xf32> to vector<16x128xf32>
      %1363 = vector.broadcast %42 : f32 to vector<16x128xf32>
      %1364 = arith.mulf %1360, %1363 : vector<16x128xf32>
      %1365 = arith.addf %1355, %1364 : vector<16x128xf32>
      %1366 = vector.broadcast %91 : f32 to vector<16x128xf32>
      %1367 = arith.mulf %1362, %1366 : vector<16x128xf32>
      %1368 = arith.addf %1358, %1367 : vector<16x128xf32>
      %c4_1119 = arith.constant 4 : index
      %c0_1120 = arith.constant 0 : index
      %c3_1121 = arith.constant 3 : index
      %c0_1122 = arith.constant 0 : index
      %1369 = vector.load %arg9[%c4_1119, %c0_1120, %c3_1121, %c0_1122] : memref<6x2x22x128xf32, #tpu.memory_space<vmem>>, vector<1x1x16x128xf32>
      %1370 = vector.shape_cast %1369 : vector<1x1x16x128xf32> to vector<16x128xf32>
      %c4_1123 = arith.constant 4 : index
      %c1_1124 = arith.constant 1 : index
      %c3_1125 = arith.constant 3 : index
      %c0_1126 = arith.constant 0 : index
      %1371 = vector.load %arg9[%c4_1123, %c1_1124, %c3_1125, %c0_1126] : memref<6x2x22x128xf32, #tpu.memory_space<vmem>>, vector<1x1x16x128xf32>
      %1372 = vector.shape_cast %1371 : vector<1x1x16x128xf32> to vector<16x128xf32>
      %1373 = vector.broadcast %43 : f32 to vector<16x128xf32>
      %1374 = arith.mulf %1370, %1373 : vector<16x128xf32>
      %1375 = arith.addf %1365, %1374 : vector<16x128xf32>
      %1376 = vector.broadcast %92 : f32 to vector<16x128xf32>
      %1377 = arith.mulf %1372, %1376 : vector<16x128xf32>
      %1378 = arith.addf %1368, %1377 : vector<16x128xf32>
      %c5_1127 = arith.constant 5 : index
      %c0_1128 = arith.constant 0 : index
      %c3_1129 = arith.constant 3 : index
      %c0_1130 = arith.constant 0 : index
      %1379 = vector.load %arg9[%c5_1127, %c0_1128, %c3_1129, %c0_1130] : memref<6x2x22x128xf32, #tpu.memory_space<vmem>>, vector<1x1x16x128xf32>
      %1380 = vector.shape_cast %1379 : vector<1x1x16x128xf32> to vector<16x128xf32>
      %c5_1131 = arith.constant 5 : index
      %c1_1132 = arith.constant 1 : index
      %c3_1133 = arith.constant 3 : index
      %c0_1134 = arith.constant 0 : index
      %1381 = vector.load %arg9[%c5_1131, %c1_1132, %c3_1133, %c0_1134] : memref<6x2x22x128xf32, #tpu.memory_space<vmem>>, vector<1x1x16x128xf32>
      %1382 = vector.shape_cast %1381 : vector<1x1x16x128xf32> to vector<16x128xf32>
      %1383 = vector.broadcast %44 : f32 to vector<16x128xf32>
      %1384 = arith.mulf %1380, %1383 : vector<16x128xf32>
      %1385 = arith.addf %1375, %1384 : vector<16x128xf32>
      %1386 = vector.broadcast %93 : f32 to vector<16x128xf32>
      %1387 = arith.mulf %1382, %1386 : vector<16x128xf32>
      %1388 = arith.addf %1378, %1387 : vector<16x128xf32>
      %c0_1135 = arith.constant 0 : index
      %c0_1136 = arith.constant 0 : index
      %c4_1137 = arith.constant 4 : index
      %c0_1138 = arith.constant 0 : index
      %1389 = vector.load %arg9[%c0_1135, %c0_1136, %c4_1137, %c0_1138] : memref<6x2x22x128xf32, #tpu.memory_space<vmem>>, vector<1x1x16x128xf32>
      %1390 = vector.shape_cast %1389 : vector<1x1x16x128xf32> to vector<16x128xf32>
      %c0_1139 = arith.constant 0 : index
      %c1_1140 = arith.constant 1 : index
      %c4_1141 = arith.constant 4 : index
      %c0_1142 = arith.constant 0 : index
      %1391 = vector.load %arg9[%c0_1139, %c1_1140, %c4_1141, %c0_1142] : memref<6x2x22x128xf32, #tpu.memory_space<vmem>>, vector<1x1x16x128xf32>
      %1392 = vector.shape_cast %1391 : vector<1x1x16x128xf32> to vector<16x128xf32>
      %1393 = vector.broadcast %45 : f32 to vector<16x128xf32>
      %1394 = arith.mulf %1390, %1393 : vector<16x128xf32>
      %1395 = arith.addf %1385, %1394 : vector<16x128xf32>
      %1396 = vector.broadcast %94 : f32 to vector<16x128xf32>
      %1397 = arith.mulf %1392, %1396 : vector<16x128xf32>
      %1398 = arith.addf %1388, %1397 : vector<16x128xf32>
      %c1_1143 = arith.constant 1 : index
      %c0_1144 = arith.constant 0 : index
      %c4_1145 = arith.constant 4 : index
      %c0_1146 = arith.constant 0 : index
      %1399 = vector.load %arg9[%c1_1143, %c0_1144, %c4_1145, %c0_1146] : memref<6x2x22x128xf32, #tpu.memory_space<vmem>>, vector<1x1x16x128xf32>
      %1400 = vector.shape_cast %1399 : vector<1x1x16x128xf32> to vector<16x128xf32>
      %c1_1147 = arith.constant 1 : index
      %c1_1148 = arith.constant 1 : index
      %c4_1149 = arith.constant 4 : index
      %c0_1150 = arith.constant 0 : index
      %1401 = vector.load %arg9[%c1_1147, %c1_1148, %c4_1149, %c0_1150] : memref<6x2x22x128xf32, #tpu.memory_space<vmem>>, vector<1x1x16x128xf32>
      %1402 = vector.shape_cast %1401 : vector<1x1x16x128xf32> to vector<16x128xf32>
      %1403 = vector.broadcast %46 : f32 to vector<16x128xf32>
      %1404 = arith.mulf %1400, %1403 : vector<16x128xf32>
      %1405 = arith.addf %1395, %1404 : vector<16x128xf32>
      %1406 = vector.broadcast %95 : f32 to vector<16x128xf32>
      %1407 = arith.mulf %1402, %1406 : vector<16x128xf32>
      %1408 = arith.addf %1398, %1407 : vector<16x128xf32>
      %c2_1151 = arith.constant 2 : index
      %c0_1152 = arith.constant 0 : index
      %c4_1153 = arith.constant 4 : index
      %c0_1154 = arith.constant 0 : index
      %1409 = vector.load %arg9[%c2_1151, %c0_1152, %c4_1153, %c0_1154] : memref<6x2x22x128xf32, #tpu.memory_space<vmem>>, vector<1x1x16x128xf32>
      %1410 = vector.shape_cast %1409 : vector<1x1x16x128xf32> to vector<16x128xf32>
      %c2_1155 = arith.constant 2 : index
      %c1_1156 = arith.constant 1 : index
      %c4_1157 = arith.constant 4 : index
      %c0_1158 = arith.constant 0 : index
      %1411 = vector.load %arg9[%c2_1155, %c1_1156, %c4_1157, %c0_1158] : memref<6x2x22x128xf32, #tpu.memory_space<vmem>>, vector<1x1x16x128xf32>
      %1412 = vector.shape_cast %1411 : vector<1x1x16x128xf32> to vector<16x128xf32>
      %1413 = vector.broadcast %47 : f32 to vector<16x128xf32>
      %1414 = arith.mulf %1410, %1413 : vector<16x128xf32>
      %1415 = arith.addf %1405, %1414 : vector<16x128xf32>
      %1416 = vector.broadcast %96 : f32 to vector<16x128xf32>
      %1417 = arith.mulf %1412, %1416 : vector<16x128xf32>
      %1418 = arith.addf %1408, %1417 : vector<16x128xf32>
      %c0_1159 = arith.constant 0 : index
      %c4_1160 = arith.constant 4 : index
      %c0_1161 = arith.constant 0 : index
      %1419 = vector.load %arg8[%c0_1159, %c4_1160, %c0_1161] : memref<2x22x128xf32, #tpu.memory_space<vmem>>, vector<1x16x128xf32>
      %1420 = vector.shape_cast %1419 : vector<1x16x128xf32> to vector<16x128xf32>
      %c1_1162 = arith.constant 1 : index
      %c4_1163 = arith.constant 4 : index
      %c0_1164 = arith.constant 0 : index
      %1421 = vector.load %arg8[%c1_1162, %c4_1163, %c0_1164] : memref<2x22x128xf32, #tpu.memory_space<vmem>>, vector<1x16x128xf32>
      %1422 = vector.shape_cast %1421 : vector<1x16x128xf32> to vector<16x128xf32>
      %1423 = vector.broadcast %48 : f32 to vector<16x128xf32>
      %1424 = arith.mulf %1420, %1423 : vector<16x128xf32>
      %1425 = arith.addf %1415, %1424 : vector<16x128xf32>
      %1426 = vector.broadcast %97 : f32 to vector<16x128xf32>
      %1427 = arith.mulf %1422, %1426 : vector<16x128xf32>
      %1428 = arith.addf %1418, %1427 : vector<16x128xf32>
      %c3_1165 = arith.constant 3 : index
      %c0_1166 = arith.constant 0 : index
      %c4_1167 = arith.constant 4 : index
      %c0_1168 = arith.constant 0 : index
      %1429 = vector.load %arg9[%c3_1165, %c0_1166, %c4_1167, %c0_1168] : memref<6x2x22x128xf32, #tpu.memory_space<vmem>>, vector<1x1x16x128xf32>
      %1430 = vector.shape_cast %1429 : vector<1x1x16x128xf32> to vector<16x128xf32>
      %c3_1169 = arith.constant 3 : index
      %c1_1170 = arith.constant 1 : index
      %c4_1171 = arith.constant 4 : index
      %c0_1172 = arith.constant 0 : index
      %1431 = vector.load %arg9[%c3_1169, %c1_1170, %c4_1171, %c0_1172] : memref<6x2x22x128xf32, #tpu.memory_space<vmem>>, vector<1x1x16x128xf32>
      %1432 = vector.shape_cast %1431 : vector<1x1x16x128xf32> to vector<16x128xf32>
      %1433 = vector.broadcast %49 : f32 to vector<16x128xf32>
      %1434 = arith.mulf %1430, %1433 : vector<16x128xf32>
      %1435 = arith.addf %1425, %1434 : vector<16x128xf32>
      %1436 = vector.broadcast %98 : f32 to vector<16x128xf32>
      %1437 = arith.mulf %1432, %1436 : vector<16x128xf32>
      %1438 = arith.addf %1428, %1437 : vector<16x128xf32>
      %c4_1173 = arith.constant 4 : index
      %c0_1174 = arith.constant 0 : index
      %c4_1175 = arith.constant 4 : index
      %c0_1176 = arith.constant 0 : index
      %1439 = vector.load %arg9[%c4_1173, %c0_1174, %c4_1175, %c0_1176] : memref<6x2x22x128xf32, #tpu.memory_space<vmem>>, vector<1x1x16x128xf32>
      %1440 = vector.shape_cast %1439 : vector<1x1x16x128xf32> to vector<16x128xf32>
      %c4_1177 = arith.constant 4 : index
      %c1_1178 = arith.constant 1 : index
      %c4_1179 = arith.constant 4 : index
      %c0_1180 = arith.constant 0 : index
      %1441 = vector.load %arg9[%c4_1177, %c1_1178, %c4_1179, %c0_1180] : memref<6x2x22x128xf32, #tpu.memory_space<vmem>>, vector<1x1x16x128xf32>
      %1442 = vector.shape_cast %1441 : vector<1x1x16x128xf32> to vector<16x128xf32>
      %1443 = vector.broadcast %50 : f32 to vector<16x128xf32>
      %1444 = arith.mulf %1440, %1443 : vector<16x128xf32>
      %1445 = arith.addf %1435, %1444 : vector<16x128xf32>
      %1446 = vector.broadcast %99 : f32 to vector<16x128xf32>
      %1447 = arith.mulf %1442, %1446 : vector<16x128xf32>
      %1448 = arith.addf %1438, %1447 : vector<16x128xf32>
      %c5_1181 = arith.constant 5 : index
      %c0_1182 = arith.constant 0 : index
      %c4_1183 = arith.constant 4 : index
      %c0_1184 = arith.constant 0 : index
      %1449 = vector.load %arg9[%c5_1181, %c0_1182, %c4_1183, %c0_1184] : memref<6x2x22x128xf32, #tpu.memory_space<vmem>>, vector<1x1x16x128xf32>
      %1450 = vector.shape_cast %1449 : vector<1x1x16x128xf32> to vector<16x128xf32>
      %c5_1185 = arith.constant 5 : index
      %c1_1186 = arith.constant 1 : index
      %c4_1187 = arith.constant 4 : index
      %c0_1188 = arith.constant 0 : index
      %1451 = vector.load %arg9[%c5_1185, %c1_1186, %c4_1187, %c0_1188] : memref<6x2x22x128xf32, #tpu.memory_space<vmem>>, vector<1x1x16x128xf32>
      %1452 = vector.shape_cast %1451 : vector<1x1x16x128xf32> to vector<16x128xf32>
      %1453 = vector.broadcast %51 : f32 to vector<16x128xf32>
      %1454 = arith.mulf %1450, %1453 : vector<16x128xf32>
      %1455 = arith.addf %1445, %1454 : vector<16x128xf32>
      %1456 = vector.broadcast %100 : f32 to vector<16x128xf32>
      %1457 = arith.mulf %1452, %1456 : vector<16x128xf32>
      %1458 = arith.addf %1448, %1457 : vector<16x128xf32>
      %c0_1189 = arith.constant 0 : index
      %c0_1190 = arith.constant 0 : index
      %c5_1191 = arith.constant 5 : index
      %c0_1192 = arith.constant 0 : index
      %1459 = vector.load %arg9[%c0_1189, %c0_1190, %c5_1191, %c0_1192] : memref<6x2x22x128xf32, #tpu.memory_space<vmem>>, vector<1x1x16x128xf32>
      %1460 = vector.shape_cast %1459 : vector<1x1x16x128xf32> to vector<16x128xf32>
      %c0_1193 = arith.constant 0 : index
      %c1_1194 = arith.constant 1 : index
      %c5_1195 = arith.constant 5 : index
      %c0_1196 = arith.constant 0 : index
      %1461 = vector.load %arg9[%c0_1193, %c1_1194, %c5_1195, %c0_1196] : memref<6x2x22x128xf32, #tpu.memory_space<vmem>>, vector<1x1x16x128xf32>
      %1462 = vector.shape_cast %1461 : vector<1x1x16x128xf32> to vector<16x128xf32>
      %1463 = vector.broadcast %52 : f32 to vector<16x128xf32>
      %1464 = arith.mulf %1460, %1463 : vector<16x128xf32>
      %1465 = arith.addf %1455, %1464 : vector<16x128xf32>
      %1466 = vector.broadcast %101 : f32 to vector<16x128xf32>
      %1467 = arith.mulf %1462, %1466 : vector<16x128xf32>
      %1468 = arith.addf %1458, %1467 : vector<16x128xf32>
      %c1_1197 = arith.constant 1 : index
      %c0_1198 = arith.constant 0 : index
      %c5_1199 = arith.constant 5 : index
      %c0_1200 = arith.constant 0 : index
      %1469 = vector.load %arg9[%c1_1197, %c0_1198, %c5_1199, %c0_1200] : memref<6x2x22x128xf32, #tpu.memory_space<vmem>>, vector<1x1x16x128xf32>
      %1470 = vector.shape_cast %1469 : vector<1x1x16x128xf32> to vector<16x128xf32>
      %c1_1201 = arith.constant 1 : index
      %c1_1202 = arith.constant 1 : index
      %c5_1203 = arith.constant 5 : index
      %c0_1204 = arith.constant 0 : index
      %1471 = vector.load %arg9[%c1_1201, %c1_1202, %c5_1203, %c0_1204] : memref<6x2x22x128xf32, #tpu.memory_space<vmem>>, vector<1x1x16x128xf32>
      %1472 = vector.shape_cast %1471 : vector<1x1x16x128xf32> to vector<16x128xf32>
      %1473 = vector.broadcast %53 : f32 to vector<16x128xf32>
      %1474 = arith.mulf %1470, %1473 : vector<16x128xf32>
      %1475 = arith.addf %1465, %1474 : vector<16x128xf32>
      %1476 = vector.broadcast %102 : f32 to vector<16x128xf32>
      %1477 = arith.mulf %1472, %1476 : vector<16x128xf32>
      %1478 = arith.addf %1468, %1477 : vector<16x128xf32>
      %c2_1205 = arith.constant 2 : index
      %c0_1206 = arith.constant 0 : index
      %c5_1207 = arith.constant 5 : index
      %c0_1208 = arith.constant 0 : index
      %1479 = vector.load %arg9[%c2_1205, %c0_1206, %c5_1207, %c0_1208] : memref<6x2x22x128xf32, #tpu.memory_space<vmem>>, vector<1x1x16x128xf32>
      %1480 = vector.shape_cast %1479 : vector<1x1x16x128xf32> to vector<16x128xf32>
      %c2_1209 = arith.constant 2 : index
      %c1_1210 = arith.constant 1 : index
      %c5_1211 = arith.constant 5 : index
      %c0_1212 = arith.constant 0 : index
      %1481 = vector.load %arg9[%c2_1209, %c1_1210, %c5_1211, %c0_1212] : memref<6x2x22x128xf32, #tpu.memory_space<vmem>>, vector<1x1x16x128xf32>
      %1482 = vector.shape_cast %1481 : vector<1x1x16x128xf32> to vector<16x128xf32>
      %1483 = vector.broadcast %54 : f32 to vector<16x128xf32>
      %1484 = arith.mulf %1480, %1483 : vector<16x128xf32>
      %1485 = arith.addf %1475, %1484 : vector<16x128xf32>
      %1486 = vector.broadcast %103 : f32 to vector<16x128xf32>
      %1487 = arith.mulf %1482, %1486 : vector<16x128xf32>
      %1488 = arith.addf %1478, %1487 : vector<16x128xf32>
      %c0_1213 = arith.constant 0 : index
      %c5_1214 = arith.constant 5 : index
      %c0_1215 = arith.constant 0 : index
      %1489 = vector.load %arg8[%c0_1213, %c5_1214, %c0_1215] : memref<2x22x128xf32, #tpu.memory_space<vmem>>, vector<1x16x128xf32>
      %1490 = vector.shape_cast %1489 : vector<1x16x128xf32> to vector<16x128xf32>
      %c1_1216 = arith.constant 1 : index
      %c5_1217 = arith.constant 5 : index
      %c0_1218 = arith.constant 0 : index
      %1491 = vector.load %arg8[%c1_1216, %c5_1217, %c0_1218] : memref<2x22x128xf32, #tpu.memory_space<vmem>>, vector<1x16x128xf32>
      %1492 = vector.shape_cast %1491 : vector<1x16x128xf32> to vector<16x128xf32>
      %1493 = vector.broadcast %55 : f32 to vector<16x128xf32>
      %1494 = arith.mulf %1490, %1493 : vector<16x128xf32>
      %1495 = arith.addf %1485, %1494 : vector<16x128xf32>
      %1496 = vector.broadcast %104 : f32 to vector<16x128xf32>
      %1497 = arith.mulf %1492, %1496 : vector<16x128xf32>
      %1498 = arith.addf %1488, %1497 : vector<16x128xf32>
      %c3_1219 = arith.constant 3 : index
      %c0_1220 = arith.constant 0 : index
      %c5_1221 = arith.constant 5 : index
      %c0_1222 = arith.constant 0 : index
      %1499 = vector.load %arg9[%c3_1219, %c0_1220, %c5_1221, %c0_1222] : memref<6x2x22x128xf32, #tpu.memory_space<vmem>>, vector<1x1x16x128xf32>
      %1500 = vector.shape_cast %1499 : vector<1x1x16x128xf32> to vector<16x128xf32>
      %c3_1223 = arith.constant 3 : index
      %c1_1224 = arith.constant 1 : index
      %c5_1225 = arith.constant 5 : index
      %c0_1226 = arith.constant 0 : index
      %1501 = vector.load %arg9[%c3_1223, %c1_1224, %c5_1225, %c0_1226] : memref<6x2x22x128xf32, #tpu.memory_space<vmem>>, vector<1x1x16x128xf32>
      %1502 = vector.shape_cast %1501 : vector<1x1x16x128xf32> to vector<16x128xf32>
      %1503 = vector.broadcast %56 : f32 to vector<16x128xf32>
      %1504 = arith.mulf %1500, %1503 : vector<16x128xf32>
      %1505 = arith.addf %1495, %1504 : vector<16x128xf32>
      %1506 = vector.broadcast %105 : f32 to vector<16x128xf32>
      %1507 = arith.mulf %1502, %1506 : vector<16x128xf32>
      %1508 = arith.addf %1498, %1507 : vector<16x128xf32>
      %c4_1227 = arith.constant 4 : index
      %c0_1228 = arith.constant 0 : index
      %c5_1229 = arith.constant 5 : index
      %c0_1230 = arith.constant 0 : index
      %1509 = vector.load %arg9[%c4_1227, %c0_1228, %c5_1229, %c0_1230] : memref<6x2x22x128xf32, #tpu.memory_space<vmem>>, vector<1x1x16x128xf32>
      %1510 = vector.shape_cast %1509 : vector<1x1x16x128xf32> to vector<16x128xf32>
      %c4_1231 = arith.constant 4 : index
      %c1_1232 = arith.constant 1 : index
      %c5_1233 = arith.constant 5 : index
      %c0_1234 = arith.constant 0 : index
      %1511 = vector.load %arg9[%c4_1231, %c1_1232, %c5_1233, %c0_1234] : memref<6x2x22x128xf32, #tpu.memory_space<vmem>>, vector<1x1x16x128xf32>
      %1512 = vector.shape_cast %1511 : vector<1x1x16x128xf32> to vector<16x128xf32>
      %1513 = vector.broadcast %57 : f32 to vector<16x128xf32>
      %1514 = arith.mulf %1510, %1513 : vector<16x128xf32>
      %1515 = arith.addf %1505, %1514 : vector<16x128xf32>
      %1516 = vector.broadcast %106 : f32 to vector<16x128xf32>
      %1517 = arith.mulf %1512, %1516 : vector<16x128xf32>
      %1518 = arith.addf %1508, %1517 : vector<16x128xf32>
      %c5_1235 = arith.constant 5 : index
      %c0_1236 = arith.constant 0 : index
      %c5_1237 = arith.constant 5 : index
      %c0_1238 = arith.constant 0 : index
      %1519 = vector.load %arg9[%c5_1235, %c0_1236, %c5_1237, %c0_1238] : memref<6x2x22x128xf32, #tpu.memory_space<vmem>>, vector<1x1x16x128xf32>
      %1520 = vector.shape_cast %1519 : vector<1x1x16x128xf32> to vector<16x128xf32>
      %c5_1239 = arith.constant 5 : index
      %c1_1240 = arith.constant 1 : index
      %c5_1241 = arith.constant 5 : index
      %c0_1242 = arith.constant 0 : index
      %1521 = vector.load %arg9[%c5_1239, %c1_1240, %c5_1241, %c0_1242] : memref<6x2x22x128xf32, #tpu.memory_space<vmem>>, vector<1x1x16x128xf32>
      %1522 = vector.shape_cast %1521 : vector<1x1x16x128xf32> to vector<16x128xf32>
      %1523 = vector.broadcast %58 : f32 to vector<16x128xf32>
      %1524 = arith.mulf %1520, %1523 : vector<16x128xf32>
      %1525 = arith.addf %1515, %1524 : vector<16x128xf32>
      %1526 = vector.broadcast %107 : f32 to vector<16x128xf32>
      %1527 = arith.mulf %1522, %1526 : vector<16x128xf32>
      %1528 = arith.addf %1518, %1527 : vector<16x128xf32>
      %c0_1243 = arith.constant 0 : index
      %c0_1244 = arith.constant 0 : index
      %c6_1245 = arith.constant 6 : index
      %c0_1246 = arith.constant 0 : index
      %1529 = vector.load %arg9[%c0_1243, %c0_1244, %c6_1245, %c0_1246] : memref<6x2x22x128xf32, #tpu.memory_space<vmem>>, vector<1x1x16x128xf32>
      %1530 = vector.shape_cast %1529 : vector<1x1x16x128xf32> to vector<16x128xf32>
      %c0_1247 = arith.constant 0 : index
      %c1_1248 = arith.constant 1 : index
      %c6_1249 = arith.constant 6 : index
      %c0_1250 = arith.constant 0 : index
      %1531 = vector.load %arg9[%c0_1247, %c1_1248, %c6_1249, %c0_1250] : memref<6x2x22x128xf32, #tpu.memory_space<vmem>>, vector<1x1x16x128xf32>
      %1532 = vector.shape_cast %1531 : vector<1x1x16x128xf32> to vector<16x128xf32>
      %1533 = vector.broadcast %59 : f32 to vector<16x128xf32>
      %1534 = arith.mulf %1530, %1533 : vector<16x128xf32>
      %1535 = arith.addf %1525, %1534 : vector<16x128xf32>
      %1536 = vector.broadcast %108 : f32 to vector<16x128xf32>
      %1537 = arith.mulf %1532, %1536 : vector<16x128xf32>
      %1538 = arith.addf %1528, %1537 : vector<16x128xf32>
      %c1_1251 = arith.constant 1 : index
      %c0_1252 = arith.constant 0 : index
      %c6_1253 = arith.constant 6 : index
      %c0_1254 = arith.constant 0 : index
      %1539 = vector.load %arg9[%c1_1251, %c0_1252, %c6_1253, %c0_1254] : memref<6x2x22x128xf32, #tpu.memory_space<vmem>>, vector<1x1x16x128xf32>
      %1540 = vector.shape_cast %1539 : vector<1x1x16x128xf32> to vector<16x128xf32>
      %c1_1255 = arith.constant 1 : index
      %c1_1256 = arith.constant 1 : index
      %c6_1257 = arith.constant 6 : index
      %c0_1258 = arith.constant 0 : index
      %1541 = vector.load %arg9[%c1_1255, %c1_1256, %c6_1257, %c0_1258] : memref<6x2x22x128xf32, #tpu.memory_space<vmem>>, vector<1x1x16x128xf32>
      %1542 = vector.shape_cast %1541 : vector<1x1x16x128xf32> to vector<16x128xf32>
      %1543 = vector.broadcast %60 : f32 to vector<16x128xf32>
      %1544 = arith.mulf %1540, %1543 : vector<16x128xf32>
      %1545 = arith.addf %1535, %1544 : vector<16x128xf32>
      %1546 = vector.broadcast %109 : f32 to vector<16x128xf32>
      %1547 = arith.mulf %1542, %1546 : vector<16x128xf32>
      %1548 = arith.addf %1538, %1547 : vector<16x128xf32>
      %c2_1259 = arith.constant 2 : index
      %c0_1260 = arith.constant 0 : index
      %c6_1261 = arith.constant 6 : index
      %c0_1262 = arith.constant 0 : index
      %1549 = vector.load %arg9[%c2_1259, %c0_1260, %c6_1261, %c0_1262] : memref<6x2x22x128xf32, #tpu.memory_space<vmem>>, vector<1x1x16x128xf32>
      %1550 = vector.shape_cast %1549 : vector<1x1x16x128xf32> to vector<16x128xf32>
      %c2_1263 = arith.constant 2 : index
      %c1_1264 = arith.constant 1 : index
      %c6_1265 = arith.constant 6 : index
      %c0_1266 = arith.constant 0 : index
      %1551 = vector.load %arg9[%c2_1263, %c1_1264, %c6_1265, %c0_1266] : memref<6x2x22x128xf32, #tpu.memory_space<vmem>>, vector<1x1x16x128xf32>
      %1552 = vector.shape_cast %1551 : vector<1x1x16x128xf32> to vector<16x128xf32>
      %1553 = vector.broadcast %61 : f32 to vector<16x128xf32>
      %1554 = arith.mulf %1550, %1553 : vector<16x128xf32>
      %1555 = arith.addf %1545, %1554 : vector<16x128xf32>
      %1556 = vector.broadcast %110 : f32 to vector<16x128xf32>
      %1557 = arith.mulf %1552, %1556 : vector<16x128xf32>
      %1558 = arith.addf %1548, %1557 : vector<16x128xf32>
      %c0_1267 = arith.constant 0 : index
      %c6_1268 = arith.constant 6 : index
      %c0_1269 = arith.constant 0 : index
      %1559 = vector.load %arg8[%c0_1267, %c6_1268, %c0_1269] : memref<2x22x128xf32, #tpu.memory_space<vmem>>, vector<1x16x128xf32>
      %1560 = vector.shape_cast %1559 : vector<1x16x128xf32> to vector<16x128xf32>
      %c1_1270 = arith.constant 1 : index
      %c6_1271 = arith.constant 6 : index
      %c0_1272 = arith.constant 0 : index
      %1561 = vector.load %arg8[%c1_1270, %c6_1271, %c0_1272] : memref<2x22x128xf32, #tpu.memory_space<vmem>>, vector<1x16x128xf32>
      %1562 = vector.shape_cast %1561 : vector<1x16x128xf32> to vector<16x128xf32>
      %1563 = vector.broadcast %62 : f32 to vector<16x128xf32>
      %1564 = arith.mulf %1560, %1563 : vector<16x128xf32>
      %1565 = arith.addf %1555, %1564 : vector<16x128xf32>
      %1566 = vector.broadcast %111 : f32 to vector<16x128xf32>
      %1567 = arith.mulf %1562, %1566 : vector<16x128xf32>
      %1568 = arith.addf %1558, %1567 : vector<16x128xf32>
      %c3_1273 = arith.constant 3 : index
      %c0_1274 = arith.constant 0 : index
      %c6_1275 = arith.constant 6 : index
      %c0_1276 = arith.constant 0 : index
      %1569 = vector.load %arg9[%c3_1273, %c0_1274, %c6_1275, %c0_1276] : memref<6x2x22x128xf32, #tpu.memory_space<vmem>>, vector<1x1x16x128xf32>
      %1570 = vector.shape_cast %1569 : vector<1x1x16x128xf32> to vector<16x128xf32>
      %c3_1277 = arith.constant 3 : index
      %c1_1278 = arith.constant 1 : index
      %c6_1279 = arith.constant 6 : index
      %c0_1280 = arith.constant 0 : index
      %1571 = vector.load %arg9[%c3_1277, %c1_1278, %c6_1279, %c0_1280] : memref<6x2x22x128xf32, #tpu.memory_space<vmem>>, vector<1x1x16x128xf32>
      %1572 = vector.shape_cast %1571 : vector<1x1x16x128xf32> to vector<16x128xf32>
      %1573 = vector.broadcast %63 : f32 to vector<16x128xf32>
      %1574 = arith.mulf %1570, %1573 : vector<16x128xf32>
      %1575 = arith.addf %1565, %1574 : vector<16x128xf32>
      %1576 = vector.broadcast %112 : f32 to vector<16x128xf32>
      %1577 = arith.mulf %1572, %1576 : vector<16x128xf32>
      %1578 = arith.addf %1568, %1577 : vector<16x128xf32>
      %c4_1281 = arith.constant 4 : index
      %c0_1282 = arith.constant 0 : index
      %c6_1283 = arith.constant 6 : index
      %c0_1284 = arith.constant 0 : index
      %1579 = vector.load %arg9[%c4_1281, %c0_1282, %c6_1283, %c0_1284] : memref<6x2x22x128xf32, #tpu.memory_space<vmem>>, vector<1x1x16x128xf32>
      %1580 = vector.shape_cast %1579 : vector<1x1x16x128xf32> to vector<16x128xf32>
      %c4_1285 = arith.constant 4 : index
      %c1_1286 = arith.constant 1 : index
      %c6_1287 = arith.constant 6 : index
      %c0_1288 = arith.constant 0 : index
      %1581 = vector.load %arg9[%c4_1285, %c1_1286, %c6_1287, %c0_1288] : memref<6x2x22x128xf32, #tpu.memory_space<vmem>>, vector<1x1x16x128xf32>
      %1582 = vector.shape_cast %1581 : vector<1x1x16x128xf32> to vector<16x128xf32>
      %1583 = vector.broadcast %64 : f32 to vector<16x128xf32>
      %1584 = arith.mulf %1580, %1583 : vector<16x128xf32>
      %1585 = arith.addf %1575, %1584 : vector<16x128xf32>
      %1586 = vector.broadcast %113 : f32 to vector<16x128xf32>
      %1587 = arith.mulf %1582, %1586 : vector<16x128xf32>
      %1588 = arith.addf %1578, %1587 : vector<16x128xf32>
      %c5_1289 = arith.constant 5 : index
      %c0_1290 = arith.constant 0 : index
      %c6_1291 = arith.constant 6 : index
      %c0_1292 = arith.constant 0 : index
      %1589 = vector.load %arg9[%c5_1289, %c0_1290, %c6_1291, %c0_1292] : memref<6x2x22x128xf32, #tpu.memory_space<vmem>>, vector<1x1x16x128xf32>
      %1590 = vector.shape_cast %1589 : vector<1x1x16x128xf32> to vector<16x128xf32>
      %c5_1293 = arith.constant 5 : index
      %c1_1294 = arith.constant 1 : index
      %c6_1295 = arith.constant 6 : index
      %c0_1296 = arith.constant 0 : index
      %1591 = vector.load %arg9[%c5_1293, %c1_1294, %c6_1295, %c0_1296] : memref<6x2x22x128xf32, #tpu.memory_space<vmem>>, vector<1x1x16x128xf32>
      %1592 = vector.shape_cast %1591 : vector<1x1x16x128xf32> to vector<16x128xf32>
      %1593 = vector.broadcast %65 : f32 to vector<16x128xf32>
      %1594 = arith.mulf %1590, %1593 : vector<16x128xf32>
      %1595 = arith.addf %1585, %1594 : vector<16x128xf32>
      %1596 = vector.broadcast %114 : f32 to vector<16x128xf32>
      %1597 = arith.mulf %1592, %1596 : vector<16x128xf32>
      %1598 = arith.addf %1588, %1597 : vector<16x128xf32>
      %1599 = arith.addf %116, %1595 : vector<16x128xf32>
      %1600 = arith.addf %1599, %1598 : vector<16x128xf32>
      %1601 = vector.extract_strided_slice %1600 {offsets = [0, 0], sizes = [16, 16], strides = [1, 1]} : vector<16x128xf32> to vector<16x16xf32>
      %1602 = arith.negf %1601 : vector<16x16xf32>
      %1603 = math.exp %1602 : vector<16x16xf32>
      %cst_1297 = arith.constant 1.000000e+00 : f32
      %1604 = vector.broadcast %cst_1297 : f32 to vector<16x16xf32>
      %1605 = arith.addf %1604, %1603 : vector<16x16xf32>
      %1606 = arith.divf %1604, %1605 : vector<16x16xf32>
      %1607 = vector.extract_strided_slice %1606 {offsets = [0, 0], sizes = [1, 16], strides = [1, 1]} : vector<16x16xf32> to vector<1x16xf32>
      %c1_1298 = arith.constant 1 : index
      %c0_1299 = arith.constant 0 : index
      %c0_1300 = arith.constant 0 : index
      %1608 = vector.load %arg5[%c1_1298, %c0_1299, %c0_1300] : memref<2x1x256xf32, #tpu.memory_space<vmem>>, vector<1x1x16xf32>
      %1609 = vector.shape_cast %1608 : vector<1x1x16xf32> to vector<1x16xf32>
      %1610 = vector.shape_cast %1607 : vector<1x16xf32> to vector<1x1x16xf32>
      tpu.vector_store %arg5[%c1_1298, %c0_1299, %c0_1300], %1610 {strides = array<i32>} : memref<2x1x256xf32, #tpu.memory_space<vmem>>, vector<1x1x16xf32>,
      %1611 = vector.extract_strided_slice %1606 {offsets = [1, 0], sizes = [1, 16], strides = [1, 1]} : vector<16x16xf32> to vector<1x16xf32>
      %c1_1301 = arith.constant 1 : index
      %c0_1302 = arith.constant 0 : index
      %c16_1303 = arith.constant 16 : index
      %1612 = vector.load %arg5[%c1_1301, %c0_1302, %c16_1303] : memref<2x1x256xf32, #tpu.memory_space<vmem>>, vector<1x1x16xf32>
      %1613 = vector.shape_cast %1612 : vector<1x1x16xf32> to vector<1x16xf32>
      %1614 = vector.shape_cast %1611 : vector<1x16xf32> to vector<1x1x16xf32>
      tpu.vector_store %arg5[%c1_1301, %c0_1302, %c16_1303], %1614 {strides = array<i32>} : memref<2x1x256xf32, #tpu.memory_space<vmem>>, vector<1x1x16xf32>,
      %1615 = vector.extract_strided_slice %1606 {offsets = [2, 0], sizes = [1, 16], strides = [1, 1]} : vector<16x16xf32> to vector<1x16xf32>
      %c1_1304 = arith.constant 1 : index
      %c0_1305 = arith.constant 0 : index
      %c32_1306 = arith.constant 32 : index
      %1616 = vector.load %arg5[%c1_1304, %c0_1305, %c32_1306] : memref<2x1x256xf32, #tpu.memory_space<vmem>>, vector<1x1x16xf32>
      %1617 = vector.shape_cast %1616 : vector<1x1x16xf32> to vector<1x16xf32>
      %1618 = vector.shape_cast %1615 : vector<1x16xf32> to vector<1x1x16xf32>
      tpu.vector_store %arg5[%c1_1304, %c0_1305, %c32_1306], %1618 {strides = array<i32>} : memref<2x1x256xf32, #tpu.memory_space<vmem>>, vector<1x1x16xf32>,
      %1619 = vector.extract_strided_slice %1606 {offsets = [3, 0], sizes = [1, 16], strides = [1, 1]} : vector<16x16xf32> to vector<1x16xf32>
      %c1_1307 = arith.constant 1 : index
      %c0_1308 = arith.constant 0 : index
      %c48_1309 = arith.constant 48 : index
      %1620 = vector.load %arg5[%c1_1307, %c0_1308, %c48_1309] : memref<2x1x256xf32, #tpu.memory_space<vmem>>, vector<1x1x16xf32>
      %1621 = vector.shape_cast %1620 : vector<1x1x16xf32> to vector<1x16xf32>
      %1622 = vector.shape_cast %1619 : vector<1x16xf32> to vector<1x1x16xf32>
      tpu.vector_store %arg5[%c1_1307, %c0_1308, %c48_1309], %1622 {strides = array<i32>} : memref<2x1x256xf32, #tpu.memory_space<vmem>>, vector<1x1x16xf32>,
      %1623 = vector.extract_strided_slice %1606 {offsets = [4, 0], sizes = [1, 16], strides = [1, 1]} : vector<16x16xf32> to vector<1x16xf32>
      %c1_1310 = arith.constant 1 : index
      %c0_1311 = arith.constant 0 : index
      %c64_1312 = arith.constant 64 : index
      %1624 = vector.load %arg5[%c1_1310, %c0_1311, %c64_1312] : memref<2x1x256xf32, #tpu.memory_space<vmem>>, vector<1x1x16xf32>
      %1625 = vector.shape_cast %1624 : vector<1x1x16xf32> to vector<1x16xf32>
      %1626 = vector.shape_cast %1623 : vector<1x16xf32> to vector<1x1x16xf32>
      tpu.vector_store %arg5[%c1_1310, %c0_1311, %c64_1312], %1626 {strides = array<i32>} : memref<2x1x256xf32, #tpu.memory_space<vmem>>, vector<1x1x16xf32>,
      %1627 = vector.extract_strided_slice %1606 {offsets = [5, 0], sizes = [1, 16], strides = [1, 1]} : vector<16x16xf32> to vector<1x16xf32>
      %c1_1313 = arith.constant 1 : index
      %c0_1314 = arith.constant 0 : index
      %c80_1315 = arith.constant 80 : index
      %1628 = vector.load %arg5[%c1_1313, %c0_1314, %c80_1315] : memref<2x1x256xf32, #tpu.memory_space<vmem>>, vector<1x1x16xf32>
      %1629 = vector.shape_cast %1628 : vector<1x1x16xf32> to vector<1x16xf32>
      %1630 = vector.shape_cast %1627 : vector<1x16xf32> to vector<1x1x16xf32>
      tpu.vector_store %arg5[%c1_1313, %c0_1314, %c80_1315], %1630 {strides = array<i32>} : memref<2x1x256xf32, #tpu.memory_space<vmem>>, vector<1x1x16xf32>,
      %1631 = vector.extract_strided_slice %1606 {offsets = [6, 0], sizes = [1, 16], strides = [1, 1]} : vector<16x16xf32> to vector<1x16xf32>
      %c1_1316 = arith.constant 1 : index
      %c0_1317 = arith.constant 0 : index
      %c96_1318 = arith.constant 96 : index
      %1632 = vector.load %arg5[%c1_1316, %c0_1317, %c96_1318] : memref<2x1x256xf32, #tpu.memory_space<vmem>>, vector<1x1x16xf32>
      %1633 = vector.shape_cast %1632 : vector<1x1x16xf32> to vector<1x16xf32>
      %1634 = vector.shape_cast %1631 : vector<1x16xf32> to vector<1x1x16xf32>
      tpu.vector_store %arg5[%c1_1316, %c0_1317, %c96_1318], %1634 {strides = array<i32>} : memref<2x1x256xf32, #tpu.memory_space<vmem>>, vector<1x1x16xf32>,
      %1635 = vector.extract_strided_slice %1606 {offsets = [7, 0], sizes = [1, 16], strides = [1, 1]} : vector<16x16xf32> to vector<1x16xf32>
      %c1_1319 = arith.constant 1 : index
      %c0_1320 = arith.constant 0 : index
      %c112_1321 = arith.constant 112 : index
      %1636 = vector.load %arg5[%c1_1319, %c0_1320, %c112_1321] : memref<2x1x256xf32, #tpu.memory_space<vmem>>, vector<1x1x16xf32>
      %1637 = vector.shape_cast %1636 : vector<1x1x16xf32> to vector<1x16xf32>
      %1638 = vector.shape_cast %1635 : vector<1x16xf32> to vector<1x1x16xf32>
      tpu.vector_store %arg5[%c1_1319, %c0_1320, %c112_1321], %1638 {strides = array<i32>} : memref<2x1x256xf32, #tpu.memory_space<vmem>>, vector<1x1x16xf32>,
      %1639 = vector.extract_strided_slice %1606 {offsets = [8, 0], sizes = [1, 16], strides = [1, 1]} : vector<16x16xf32> to vector<1x16xf32>
      %c1_1322 = arith.constant 1 : index
      %c0_1323 = arith.constant 0 : index
      %c128_1324 = arith.constant 128 : index
      %1640 = vector.load %arg5[%c1_1322, %c0_1323, %c128_1324] : memref<2x1x256xf32, #tpu.memory_space<vmem>>, vector<1x1x16xf32>
      %1641 = vector.shape_cast %1640 : vector<1x1x16xf32> to vector<1x16xf32>
      %1642 = vector.shape_cast %1639 : vector<1x16xf32> to vector<1x1x16xf32>
      tpu.vector_store %arg5[%c1_1322, %c0_1323, %c128_1324], %1642 {strides = array<i32>} : memref<2x1x256xf32, #tpu.memory_space<vmem>>, vector<1x1x16xf32>,
      %1643 = vector.extract_strided_slice %1606 {offsets = [9, 0], sizes = [1, 16], strides = [1, 1]} : vector<16x16xf32> to vector<1x16xf32>
      %c1_1325 = arith.constant 1 : index
      %c0_1326 = arith.constant 0 : index
      %c144_1327 = arith.constant 144 : index
      %1644 = vector.load %arg5[%c1_1325, %c0_1326, %c144_1327] : memref<2x1x256xf32, #tpu.memory_space<vmem>>, vector<1x1x16xf32>
      %1645 = vector.shape_cast %1644 : vector<1x1x16xf32> to vector<1x16xf32>
      %1646 = vector.shape_cast %1643 : vector<1x16xf32> to vector<1x1x16xf32>
      tpu.vector_store %arg5[%c1_1325, %c0_1326, %c144_1327], %1646 {strides = array<i32>} : memref<2x1x256xf32, #tpu.memory_space<vmem>>, vector<1x1x16xf32>,
      %1647 = vector.extract_strided_slice %1606 {offsets = [10, 0], sizes = [1, 16], strides = [1, 1]} : vector<16x16xf32> to vector<1x16xf32>
      %c1_1328 = arith.constant 1 : index
      %c0_1329 = arith.constant 0 : index
      %c160_1330 = arith.constant 160 : index
      %1648 = vector.load %arg5[%c1_1328, %c0_1329, %c160_1330] : memref<2x1x256xf32, #tpu.memory_space<vmem>>, vector<1x1x16xf32>
      %1649 = vector.shape_cast %1648 : vector<1x1x16xf32> to vector<1x16xf32>
      %1650 = vector.shape_cast %1647 : vector<1x16xf32> to vector<1x1x16xf32>
      tpu.vector_store %arg5[%c1_1328, %c0_1329, %c160_1330], %1650 {strides = array<i32>} : memref<2x1x256xf32, #tpu.memory_space<vmem>>, vector<1x1x16xf32>,
      %1651 = vector.extract_strided_slice %1606 {offsets = [11, 0], sizes = [1, 16], strides = [1, 1]} : vector<16x16xf32> to vector<1x16xf32>
      %c1_1331 = arith.constant 1 : index
      %c0_1332 = arith.constant 0 : index
      %c176_1333 = arith.constant 176 : index
      %1652 = vector.load %arg5[%c1_1331, %c0_1332, %c176_1333] : memref<2x1x256xf32, #tpu.memory_space<vmem>>, vector<1x1x16xf32>
      %1653 = vector.shape_cast %1652 : vector<1x1x16xf32> to vector<1x16xf32>
      %1654 = vector.shape_cast %1651 : vector<1x16xf32> to vector<1x1x16xf32>
      tpu.vector_store %arg5[%c1_1331, %c0_1332, %c176_1333], %1654 {strides = array<i32>} : memref<2x1x256xf32, #tpu.memory_space<vmem>>, vector<1x1x16xf32>,
      %1655 = vector.extract_strided_slice %1606 {offsets = [12, 0], sizes = [1, 16], strides = [1, 1]} : vector<16x16xf32> to vector<1x16xf32>
      %c1_1334 = arith.constant 1 : index
      %c0_1335 = arith.constant 0 : index
      %c192_1336 = arith.constant 192 : index
      %1656 = vector.load %arg5[%c1_1334, %c0_1335, %c192_1336] : memref<2x1x256xf32, #tpu.memory_space<vmem>>, vector<1x1x16xf32>
      %1657 = vector.shape_cast %1656 : vector<1x1x16xf32> to vector<1x16xf32>
      %1658 = vector.shape_cast %1655 : vector<1x16xf32> to vector<1x1x16xf32>
      tpu.vector_store %arg5[%c1_1334, %c0_1335, %c192_1336], %1658 {strides = array<i32>} : memref<2x1x256xf32, #tpu.memory_space<vmem>>, vector<1x1x16xf32>,
      %1659 = vector.extract_strided_slice %1606 {offsets = [13, 0], sizes = [1, 16], strides = [1, 1]} : vector<16x16xf32> to vector<1x16xf32>
      %c1_1337 = arith.constant 1 : index
      %c0_1338 = arith.constant 0 : index
      %c208_1339 = arith.constant 208 : index
      %1660 = vector.load %arg5[%c1_1337, %c0_1338, %c208_1339] : memref<2x1x256xf32, #tpu.memory_space<vmem>>, vector<1x1x16xf32>
      %1661 = vector.shape_cast %1660 : vector<1x1x16xf32> to vector<1x16xf32>
      %1662 = vector.shape_cast %1659 : vector<1x16xf32> to vector<1x1x16xf32>
      tpu.vector_store %arg5[%c1_1337, %c0_1338, %c208_1339], %1662 {strides = array<i32>} : memref<2x1x256xf32, #tpu.memory_space<vmem>>, vector<1x1x16xf32>,
      %1663 = vector.extract_strided_slice %1606 {offsets = [14, 0], sizes = [1, 16], strides = [1, 1]} : vector<16x16xf32> to vector<1x16xf32>
      %c1_1340 = arith.constant 1 : index
      %c0_1341 = arith.constant 0 : index
      %c224_1342 = arith.constant 224 : index
      %1664 = vector.load %arg5[%c1_1340, %c0_1341, %c224_1342] : memref<2x1x256xf32, #tpu.memory_space<vmem>>, vector<1x1x16xf32>
      %1665 = vector.shape_cast %1664 : vector<1x1x16xf32> to vector<1x16xf32>
      %1666 = vector.shape_cast %1663 : vector<1x16xf32> to vector<1x1x16xf32>
      tpu.vector_store %arg5[%c1_1340, %c0_1341, %c224_1342], %1666 {strides = array<i32>} : memref<2x1x256xf32, #tpu.memory_space<vmem>>, vector<1x1x16xf32>,
      %1667 = vector.extract_strided_slice %1606 {offsets = [15, 0], sizes = [1, 16], strides = [1, 1]} : vector<16x16xf32> to vector<1x16xf32>
      %c1_1343 = arith.constant 1 : index
      %c0_1344 = arith.constant 0 : index
      %c240_1345 = arith.constant 240 : index
      %1668 = vector.load %arg5[%c1_1343, %c0_1344, %c240_1345] : memref<2x1x256xf32, #tpu.memory_space<vmem>>, vector<1x1x16xf32>
      %1669 = vector.shape_cast %1668 : vector<1x1x16xf32> to vector<1x16xf32>
      %1670 = vector.shape_cast %1667 : vector<1x16xf32> to vector<1x1x16xf32>
      tpu.vector_store %arg5[%c1_1343, %c0_1344, %c240_1345], %1670 {strides = array<i32>} : memref<2x1x256xf32, #tpu.memory_space<vmem>>, vector<1x1x16xf32>,
    } else {
    }
    return
  }
  func.func @transform_0(%arg0: i32, %arg1: i32) -> i32 {
    %c0_i32 = arith.constant 0 : i32
    %c0_i32_0 = arith.constant 0 : i32
    return %c0_i32 : i32
  }
  func.func @transform_1(%arg0: i32, %arg1: i32) -> i32 {
    %c0_i32 = arith.constant 0 : i32
    %c0_i32_0 = arith.constant 0 : i32
    return %c0_i32 : i32
  }
  func.func @transform_2(%arg0: i32, %arg1: i32) -> (i32, i32, i32) {
    %c0_i32 = arith.constant 0 : i32
    %c0_i32_0 = arith.constant 0 : i32
    return %arg0, %arg1, %c0_i32 : i32, i32, i32
  }
  func.func @transform_3(%arg0: i32, %arg1: i32) -> (i32, i32, i32) {
    %c0_i32 = arith.constant 0 : i32
    %c0_i32_0 = arith.constant 0 : i32
    %c0_i32_1 = arith.constant 0 : i32
    return %arg0, %c0_i32, %c0_i32_0 : i32, i32, i32
  }
}

</mosaic_0001>

<bundles_post_ra>
// kernel: tpu_custom_call.1
= control target key start
LH: loop header
LB: loop body
LE: loop exit
PB: predicated region body
PF: predicated region fallthrough
CT: control target
= control target key end

     0   :  { %9 = vsyncpa [#allocation10], 0  ;;  %s4421_s0 = inlined_call_operand.vmem [shape: f32[98], index: 0, kind: input, shape index: {}]   ;;  %s4422_s1 = inlined_call_operand.<no memory space> [shape: f32[1], index: 1, kind: input, shape index: {}]   ;;  %s4423_s2 = inlined_call_operand.hbm [shape: f32[2,4,256], index: 2, kind: input, shape index: {}]   ;;  %s4424_s3 = inlined_call_operand.hbm [shape: f32[2,1,256], index: 3, kind: output, shape index: {}]  }
   0x1   :  { %10 = vsyncpa [#allocation8], 0 }
   0x2   :  { %11 = vsyncpa [#allocation9], 0  ;;  %s17_s14 = sshll.u32 %s4421_s0, 4  ;;  %s27_s17 = sshll.u32 %s4423_s2, 4  ;;  %s18_s14 = int_to_ptr.vmem [resolvable:$true] %s17_s14  ;;  %s28_s17 = int_to_ptr.hbm [resolvable:$true] %s27_s17 }
   0x3   :  { %s2835_s18 = smov [#allocation7]   ;;  %s2836_s19 = smov [#allocation11]  }
   0x4   :  { %20 = dma.vmem_to_smem %s18_s14, 16, %s2835_s18, [#allocation10]  }
   0x5   :  { %s29_s20 = sshll.u32 %s2836_s19, 4  ;;  %s2837_s21 = smov 128   ;;  %s30_s20 = int_to_ptr.vmem [resolvable:$true] %s29_s20 }
   0x6   :  { %s2838_s22 = smov 8  }
   0x7   :  { %35 = dma.hbm_to_vmem [thread:$0]  %s28_s17, 256, %s30_s20, [#allocation8], %s2837_s21, %s2837_s21, %s2838_s22  }
   0x8   :  { %2829 = dma.done.wait [#allocation10], 16  }
   0x9   :  { %2830 = vsyncadd [#allocation10], 4294967280 }
   0xa   :  { %2831 = dma.done.wait [#allocation8], 256  }
   0xb   :  { %2832 = vsyncadd [#allocation8], 4294967040 }
   0xc   :  { %44 = sfence }
   0xd   :  { %v45_v0 = vld [vmem:[#allocation11] sm:$0xff]  ;;  %vm52_vm0 = vcmask 1043456   ;;  %v4425_v15 = vlaneseq  ;;  %vm134_vm1 = vcmask 1040384   ;;  %v2889_v30 = vld [vmem:[#allocation11 + $0x8] sm:$0xff]  ;;  %s2839_s0 = smov 48   ;;  %s2840_s2 = smov 80  }
   0xe   :  { %47 = vst [vmem:[#allocation1] ss:$2 sm:$0xff] %v45_v0  ;;  %s2841_s23 = smov 112   ;;  %s2842_s24 = smov 64   ;;  %vm316_vm3 = vcmask 122880  }
   0xf   :  { %vm2885_vm2 = vcmp.lt.s32.totalorder %v4425_v15, 256  ;;  %s2843_s25 = smov 96   ;;  %s2844_s26 = smov 16  }
  0x10   :  { %s2845_s27 = smov 32   ;;  %s2847_s28 = smov 1  }
  0x11   :  { %s2848_s29 = smov 2   ;;  %s2849_s30 = smov 3  }
  0x12   :  { %s2850_s4 = smov 126   ;;  %s2851_s5 = smov 127  }
  0x13   :  { %s2852_s6 = smov 125   ;;  %s2603_s7 = sld [smem:[#allocation7 + $0x1]] }
  0x14   :  { %s208_s8 = sld [smem:[#allocation7]] }
  0x15   :  { %v48_v1 = vld.sshfl [vmem:[#allocation1] sm:$0xff pattern:$0x75316420]  ;;  %v49_v2 = vld.sshfl [vmem:[#allocation1 + $0x8] sm:$0xff pattern:$0x75316420] }
  0x16   :  { %v53_v3 = vsel %vm52_vm0, %v48_v1, 0.0  ;;  %v60_v4 = vsel %vm52_vm0, %v49_v2, 0.0  ;;  %67 = vst [vmem:[#allocation1] ss:$2 sm:$0xff] %v45_v0  ;;  %s2604_s9 = sld [smem:[#allocation7 + $0x2]] }
  0x17   :  { %v54_v5 = vrot.slane %v53_v3, 4  ;;  %v61_v6 = vrot.slane %v60_v4, 4  ;;  %s2605_s10 = sld [smem:[#allocation7 + $0x3]] }
  0x18   :  { %s2606_s11 = sld [smem:[#allocation7 + $0x4]] }
  0x19   :  { %v55_v7 = vadd.f32 %v54_v5, %v53_v3  ;;  %v62_v8 = vadd.f32 %v61_v6, %v60_v4  ;;  %s2607_s12 = sld [smem:[#allocation7 + $0x5]] }
  0x1a   :  { %s2608_s13 = sld [smem:[#allocation7 + $0x6]] }
  0x1b   :  { %v56_v9 = vrot.slane %v55_v7, 2  ;;  %v63_v10 = vrot.slane %v62_v8, 2  ;;  %s2609_s14 = sld [smem:[#allocation7 + $0x7]] }
  0x1c   :  { %s2610_s15 = sld [smem:[#allocation7 + $0x8]] }
  0x1d   :  { %v57_v11 = vadd.f32 %v56_v9, %v55_v7  ;;  %v64_v12 = vadd.f32 %v63_v10, %v62_v8  ;;  %v68_v13 = vld.sshfl [vmem:[#allocation1] sm:$0xff pattern:$0x75316420]  ;;  %v69_v14 = vld.sshfl [vmem:[#allocation1 + $0x8] sm:$0xff pattern:$0x75316420] }
  0x1e   :  { %v72_v16 = vsel %vm52_vm0, %v68_v13, -inf  ;;  %v79_v17 = vsel %vm52_vm0, %v69_v14, -inf  ;;  %89 = vst [vmem:[#allocation1] ss:$2 sm:$0xff] %v2889_v30  ;;  %s2611_s16 = sld [smem:[#allocation7 + $0x9]] }
  0x1f   :  { %v58_v18 = vrot.slane %v57_v11, 1  ;;  %v65_v19 = vrot.slane %v64_v12, 1  ;;  %v73_v20 = vrot.slane %v72_v16, 4  ;;  %v80_v21 = vrot.slane %v79_v17, 4  ;;  %s2612_s17 = sld [smem:[#allocation7 + $0xa]] }
  0x20   :  { %s2613_s18 = sld [smem:[#allocation7 + $0xb]] }
  0x21   :  { %v59_v22 = vadd.f32 %v58_v18, %v57_v11  ;;  %v66_v23 = vadd.f32 %v65_v19, %v64_v12  ;;  %v74_v24 = vmax.f32 %v72_v16, %v73_v20  ;;  %v81_v25 = vmax.f32 %v79_v17, %v80_v21  ;;  %s2614_s19 = sld [smem:[#allocation7 + $0xc]] }
  0x22   :  { %v2846_v20 = vmov 0.0   ;;  %s2615_s20 = sld [smem:[#allocation7 + $0xd]] }
  0x23   :  { %v133_v26 = vrot.slane %v66_v23, 7  ;;  %v75_v28 = vrot.slane %v74_v24, 2  ;;  %v82_v29 = vrot.slane %v81_v25, 2  ;;  %308 = vst [vmem:[#allocation4] sm:$0xff] %v2846_v20  ;;  %s2616_s21 = sld [smem:[#allocation7 + $0xe]] }
  0x24   :  { %309 = vst [vmem:[#allocation4 + $0x8] sm:$0xff] %v2846_v20  ;;  %s2617_s22 = sld [smem:[#allocation7 + $0xf]] }
  0x25   :  { %v135_v31 = vsel %vm134_vm1, %v59_v22, %v133_v26  ;;  %v76_v32 = vmax.f32 %v74_v24, %v75_v28  ;;  %v83_v33 = vmax.f32 %v81_v25, %v82_v29  ;;  %311 = vst [vmem:[#allocation4 + $0x18] sm:$0xff] %v2846_v20  ;;  %v91_v29 = vld.sshfl [vmem:[#allocation1 + $0x8] sm:$0xff pattern:$0x75316420] }
  0x26   :  { %141 = vst.msk [vmem:[#allocation2] ss:$2 sm:$0x3] %vm2885_vm2, %v135_v31 }
  0x27   :  { %v84_v34 = vrot.slane %v83_v33, 1  ;;  %v77_v35 = vrot.slane %v76_v32, 1  ;;  %310 = vst [vmem:[#allocation4 + $0x10] sm:$0x3f] %v2846_v20 }
  0x28   :  { %312 = vst [vmem:[#allocation4 + $0x20] sm:$0xff] %v2846_v20 }
  0x29   :  { %v85_v36 = vmax.f32 %v83_v33, %v84_v34  ;;  %v78_v38 = vmax.f32 %v76_v32, %v77_v35  ;;  %313 = vst [vmem:[#allocation4 + $0x28] sm:$0x3f] %v2846_v20  ;;  %v101_v32 = vsel %vm52_vm0, %v91_v29, 0.0  ;;  %v90_v33 = vld.sshfl [vmem:[#allocation1] sm:$0xff pattern:$0x75316420] }
  0x2a   :  { %v102_v34 = vrot.slane %v101_v32, 4  ;;  %v94_v35 = vsel %vm52_vm0, %v90_v33, 0.0  ;;  %108 = vst [vmem:[#allocation1] ss:$2 sm:$0xff] %v2889_v30 }
  0x2b   :  { %v144_v39 = vrot.slane %v85_v36, 7 }
  0x2d   :  { %v381_v37 = vld [vmem:[#allocation2] sm:$0x1]  ;;  %v431_v44 = vld [vmem:[#allocation2 + $0x2] sm:$0x1]  ;;  %v145_v50 = vsel %vm134_vm1, %v78_v38, %v144_v39  ;;  %v103_v38 = vadd.f32 %v102_v34, %v101_v32 }
  0x2e   :  { %v382_v40 = vmul.f32 0.25, %v381_v37  ;;  %v351_v41 = vld [vmem:[#allocation2] sm:$0x1]  ;;  %v432_v52 = vmul.f32 0.25, %v431_v44  ;;  %v476_v57 = vld [vmem:[#allocation2 + $0x2] sm:$0x1] }
  0x2f   :  { %v352_v42 = vmul.f32 0.25, %v351_v41  ;;  %v321_v43 = vld [vmem:[#allocation2] sm:$0x1]  ;;  %147 = vst.msk [vmem:[#allocation3] ss:$2 sm:$0x3] %vm2885_vm2, %v145_v50 }
  0x30   :  { %v384_v45 = vperm.slane %v382_v40, 0  ;;  %v322_v46 = vmul.f32 0.25, %v321_v43  ;;  %v366_v47 = vld [vmem:[#allocation2] sm:$0x1]  ;;  %v434_v55 = vperm.slane %v432_v52, 0  ;;  %v477_v61 = vmul.f32 0.25, %v476_v57 }
  0x31   :  { %v354_v48 = vperm.slane %v352_v42, 0  ;;  %v336_v49 = vld [vmem:[#allocation2] sm:$0x1]  ;;  %v367_v53 = vmul.f32 0.25, %v366_v47  ;;  %v461_v2 = vld [vmem:[#allocation2 + $0x2] sm:$0x1] }
  0x32   :  { %385 = vrot.lane.b32.xlu2 %v384_v45, %s2839_s0  ;;  %v324_v51 = vperm.slane %v322_v46, 0  ;;  %v337_v54 = vmul.f32 0.25, %v336_v49  ;;  %v411_v58 = vld [vmem:[#allocation2] sm:$0x1]  ;;  %v479_v0 = vperm.slane %v477_v61, 0  ;;  %v462_v5 = vmul.f32 0.25, %v461_v2 }
  0x33   :  { %355 = vrot.lane.b32.xlu1 %v354_v48, %s2840_s2  ;;  %v369_v56 = vperm.slane %v367_v53, 0  ;;  %v396_v60 = vld [vmem:[#allocation2] sm:$0x1]  ;;  %v412_v62 = vmul.f32 0.25, %v411_v58  ;;  %v446_v3 = vld [vmem:[#allocation2 + $0x2] sm:$0x1] }
  0x34   :  { %325 = vrot.lane.b32.xlu0 %v324_v51, %s2841_s23  ;;  %v339_v59 = vperm.slane %v337_v54, 0  ;;  %v397_v63 = vmul.f32 0.25, %v396_v60  ;;  %v447_v6 = vmul.f32 0.25, %v446_v3  ;;  %v464_v8 = vperm.slane %v462_v5, 0  ;;  %v426_v17 = vld [vmem:[#allocation2 + $0x2] sm:$0x1] }
  0x35   :  { %v414_v1 = vperm.slane %v412_v62, 0  ;;  %v314_v18 = vld [vmem:[#allocation2] sm:$0x1]  ;;  %v427_v19 = vmul.f32 0.25, %v426_v17  ;;  %v491_v24 = vld [vmem:[#allocation2 + $0x2] sm:$0x1] }
  0x36   :  { %v399_v4 = vperm.slane %v397_v63, 0  ;;  %v2723_v7 = vld [vmem:[#allocation3] ss:$0 sm:$0xff]  ;;  %v449_v9 = vperm.slane %v447_v6, 0  ;;  %v315_v21 = vmul.f32 0.25, %v314_v18  ;;  %v492_v28 = vmul.f32 0.25, %v491_v24 }
  0x37   :  { %v2724_v10 = vld [vmem:[#allocation3] ss:$0 sm:$0xff]  ;;  %v2730_v22 = vld [vmem:[#allocation3 + $0x2] ss:$0 sm:$0xff]  ;;  %v521_v26 = vld [vmem:[#allocation2 + $0x2] sm:$0x1] }
  0x38   :  { %v2725_v11 = vld [vmem:[#allocation3] ss:$0 sm:$0xff]  ;;  %v2731_v23 = vld [vmem:[#allocation3 + $0x2] ss:$0 sm:$0xff]  ;;  %428 = vst.msk [vmem:[#allocation4 + $0xb] sm:$0x1] %vm316_vm3, %v427_v19 }
  0x39   :  { %v2726_v12 = vld [vmem:[#allocation3] ss:$0 sm:$0xff]  ;;  %v2732_v25 = vld [vmem:[#allocation3 + $0x2] ss:$0 sm:$0xff]  ;;  %v522_v31 = vmul.f32 0.25, %v521_v26  ;;  %v494_v36 = vperm.slane %v492_v28, 0 }
  0x3a   :  { %435 = vrot.lane.b32.xlu2 %v434_v55, %s2841_s23  ;;  %v2727_v13 = vld [vmem:[#allocation3] ss:$0 sm:$0xff]  ;;  %317 = vst.msk [vmem:[#allocation4 + $0x3] sm:$0x1] %vm316_vm3, %v315_v21  ;;  %v95_v37 = vrot.slane %v94_v35, 4  ;;  %v104_v42 = vrot.slane %v103_v38, 2 }
  0x3b   :  { %370 = vrot.lane.b32.xlu1 %v369_v56, %s2842_s24  ;;  %v2728_v14 = vld [vmem:[#allocation3] ss:$0 sm:$0xff]  ;;  %v524_v39 = vperm.slane %v522_v31, 0  ;;  %v2733_v40 = vld [vmem:[#allocation3 + $0x2] ss:$0 sm:$0xff] }
  0x3c   :  { %340 = vrot.lane.b32.xlu0 %v339_v59, %s2843_s25  ;;  %v2729_v16 = vld [vmem:[#allocation3] ss:$0 sm:$0xff]  ;;  %v96_v41 = vadd.f32 %v95_v37, %v94_v35  ;;  %v506_v43 = vld [vmem:[#allocation2 + $0x2] sm:$0x1]  ;;  %v105_v45 = vadd.f32 %v104_v42, %v103_v38  ;;  %v2736_v49 = vld [vmem:[#allocation3 + $0x2] ss:$0 sm:$0xff] }
  0x3d   :  { %v507_v46 = vmul.f32 0.25, %v506_v43  ;;  %v110_v30 = vld.sshfl [vmem:[#allocation1 + $0x8] sm:$0xff pattern:$0x75316420] }
  0x3e   :  { %v97_v44 = vrot.slane %v96_v41, 2  ;;  %v106_v48 = vrot.slane %v105_v45, 1  ;;  %v120_v52 = vsel %vm52_vm0, %v110_v30, -inf  ;;  %v2734_v53 = vld [vmem:[#allocation3 + $0x2] ss:$0 sm:$0xff] }
  0x3f   :  { %v109_v54 = vld.sshfl [vmem:[#allocation1] sm:$0xff pattern:$0x75316420]  ;;  %v121_v55 = vrot.slane %v120_v52, 4  ;;  %v509_v56 = vperm.slane %v507_v46, 0 }
  0x40   :  { %v98_v47 = vadd.f32 %v97_v44, %v96_v41  ;;  %v107_v51 = vadd.f32 %v106_v48, %v105_v45  ;;  %v113_v59 = vsel %vm52_vm0, %v109_v54, -inf  ;;  %v2735_v5 = vld [vmem:[#allocation3 + $0x2] ss:$0 sm:$0xff] }
  0x41   :  { %v114_v60 = vrot.slane %v113_v59, 4  ;;  %v122_v61 = vmax.f32 %v120_v52, %v121_v55  ;;  %v429_v31 = vld [vmem:[#allocation3 + $0x2] sm:$0x1] }
  0x42   :  { %480 = vrot.lane.b32.xlu2 %v479_v0, %s2842_s24  ;;  %v99_v50 = vrot.slane %v98_v47, 1  ;;  %v150_v58 = vrot.slane %v107_v51, 7  ;;  %430 = vst.msk [vmem:[#allocation4 + $0x23] sm:$0x1] %vm316_vm3, %v429_v31 }
  0x43   :  { %415 = vrot.lane.b32.xlu1 %v414_v1, %s2844_s26  ;;  %v115_v63 = vmax.f32 %v113_v59, %v114_v60  ;;  %v123_v0 = vrot.slane %v122_v61, 2 }
  0x44   :  { %400 = vrot.lane.b32.xlu0 %v399_v4, %s2845_s27  ;;  %v100_v57 = vadd.f32 %v99_v50, %v98_v47 }
  0x45   :  { %v116_v1 = vrot.slane %v115_v63, 2  ;;  %v124_v2 = vmax.f32 %v122_v61, %v123_v0 }
  0x46   :  { %v151_v62 = vsel %vm134_vm1, %v100_v57, %v150_v58 }
  0x47   :  { %154 = vst.msk [vmem:[#allocation2 + $0x1] ss:$2 sm:$0x3] %vm2885_vm2, %v151_v62  ;;  %v117_v3 = vmax.f32 %v115_v63, %v116_v1  ;;  %v125_v4 = vrot.slane %v124_v2, 1 }
  0x49   :  { %v118_v6 = vrot.slane %v117_v3, 1 }
  0x4a   :  { %332 = vrot.lane.b32.xlu2 %v2723_v7, %s2841_s23  ;;  %v126_v7 = vmax.f32 %v124_v2, %v125_v4 }
  0x4b   :  { %465 = vrot.lane.b32.xlu1 %v464_v8, %s2840_s2 }
  0x4c   :  { %450 = vrot.lane.b32.xlu0 %v449_v9, %s2843_s25 }
  0x4e   :  { %v1536_v8 = vld [vmem:[#allocation2 + $0x1] sm:$0x1] }
  0x4f   :  { %v1521_v9 = vld [vmem:[#allocation2 + $0x1] sm:$0x1] }
  0x50   :  { %v1566_v18 = vld [vmem:[#allocation2 + $0x1] sm:$0x1] }
  0x51   :  { %v1551_v19 = vld [vmem:[#allocation2 + $0x1] sm:$0x1]  ;;  %v1567_v20 = vmul.f32 0.25, %v1566_v18 }
  0x52   :  { %347 = vrot.lane.b32.xlu2 %v2724_v10, %s2843_s25  ;;  %v1537_v10 = vmul.f32 0.25, %v1536_v8  ;;  %v1552_v21 = vmul.f32 0.25, %v1551_v19  ;;  %v1516_v44 = vld [vmem:[#allocation2 + $0x1] sm:$0x1] }
  0x53   :  { %377 = vrot.lane.b32.xlu1 %v2725_v11, %s2842_s24  ;;  %v1522_v11 = vmul.f32 0.25, %v1521_v9  ;;  %v1517_v45 = vmul.f32 0.25, %v1516_v44  ;;  %v1596_v31 = vld [vmem:[#allocation2 + $0x1] sm:$0x1] }
  0x54   :  { %362 = vrot.lane.b32.xlu0 %v2726_v12, %s2840_s2  ;;  %v119_v12 = vmax.f32 %v117_v3, %v118_v6  ;;  %v1554_v24 = vperm.slane %v1552_v21, 0 }
  0x5a   :  { %422 = vrot.lane.b32.xlu2 %v2727_v13, %s2844_s26  ;;  %v157_v13 = vrot.slane %v126_v7, 7 }
  0x5b   :  { %407 = vrot.lane.b32.xlu1 %v2728_v14, %s2845_s27  ;;  %v1539_v14 = vperm.slane %v1537_v10, 0  ;;  %v1626_v10 = vld [vmem:[#allocation2 + $0x3] sm:$0x1] }
  0x5c   :  { %392 = vrot.lane.b32.xlu0 %v2729_v16, %s2839_s0  ;;  %v1524_v16 = vperm.slane %v1522_v11, 0  ;;  %v158_v17 = vsel %vm134_vm1, %v119_v12, %v157_v13 }
  0x5d   :  { %161 = vst.msk [vmem:[#allocation3 + $0x1] ss:$2 sm:$0x3] %vm2885_vm2, %v158_v17 }
  0x62   :  { %472 = vrot.lane.b32.xlu2 %v2730_v22, %s2840_s2 }
  0x63   :  { %457 = vrot.lane.b32.xlu1 %v2731_v23, %s2843_s25  ;;  %v1569_v23 = vperm.slane %v1567_v20, 0 }
  0x64   :  { %442 = vrot.lane.b32.xlu0 %v2732_v25, %s2841_s23  ;;  %v2737_v22 = vld [vmem:[#allocation3 + $0x1] ss:$0 sm:$0xff] }
  0x65   :  { %v2738_v27 = vld [vmem:[#allocation3 + $0x1] ss:$0 sm:$0xff] }
  0x66   :  { %v2739_v26 = vld [vmem:[#allocation3 + $0x1] ss:$0 sm:$0xff] }
  0x67   :  { %v2740_v28 = vld [vmem:[#allocation3 + $0x1] ss:$0 sm:$0xff] }
  0x6a   :  { %495 = vrot.lane.b32.xlu2 %v494_v36, %s2839_s0  ;;  %v318_v36 = vld [vmem:[#allocation3] sm:$0x1] }
  0x6b   :  { %525 = vrot.lane.b32.xlu1 %v524_v39, %s2844_s26  ;;  %320 = vst.msk [vmem:[#allocation4 + $0x1b] sm:$0x1] %vm316_vm3, %v318_v36  ;;  %v1646_v36 = vld [vmem:[#allocation2 + $0x3] sm:$0x1] }
  0x6c   :  { %487 = vrot.lane.b32.xlu0 %v2733_v40, %s2842_s24 }
  0x72   :  { %517 = vrot.lane.b32.xlu2 %v2736_v49, %s2845_s27 }
  0x73   :  { %502 = vrot.lane.b32.xlu1 %v2734_v53, %s2839_s0 }
  0x74   :  { %510 = vrot.lane.b32.xlu0 %v509_v56, %s2845_s27 }
  0x7a   :  { %1540 = vrot.lane.b32.xlu2 %v1539_v14, %s2843_s25  ;;  %v1627_v14 = vmul.f32 0.25, %v1626_v10 }
  0x7b   :  { %1525 = vrot.lane.b32.xlu1 %v1524_v16, %s2841_s23 }
  0x7c   :  { %532 = vrot.lane.b32.xlu0 %v2735_v5, %s2844_s26 }
  0x82   :  { %1532 = vrot.lane.b32.xlu2 %v2737_v22, %s2841_s23 }
  0x83   :  { %1570 = vrot.lane.b32.xlu1 %v1569_v23, %s2842_s24  ;;  %v1629_v23 = vld [vmem:[#allocation3 + $0x3] sm:$0x1] }
  0x84   :  { %1555 = vrot.lane.b32.xlu0 %v1554_v24, %s2840_s2 }
  0x8a   :  { %1577 = vrot.lane.b32.xlu2 %v2738_v27, %s2842_s24 }
  0x8b   :  { %1562 = vrot.lane.b32.xlu1 %v2739_v26, %s2840_s2 }
  0x8c   :  { %v386_v25 = vpop.permute.xlu2 %385  ;;  %1547 = vrot.lane.b32.xlu0 %v2740_v28, %s2843_s25 }
  0x8d   :  { %388 = vst.msk [vmem:[#allocation4 + $0x8] sm:$0x1] %vm316_vm3, %v386_v25 }
  0x94   :  { %v436_v29 = vpop.permute.xlu2 %435 }
  0x95   :  { %438 = vst.msk [vmem:[#allocation4 + $0xc] sm:$0x1] %vm316_vm3, %v436_v29 }
  0x9c   :  { %v481_v32 = vpop.permute.xlu2 %480 }
  0x9d   :  { %483 = vst.msk [vmem:[#allocation4 + $0xf] sm:$0x1] %vm316_vm3, %v481_v32  ;;  %v1597_v32 = vmul.f32 0.25, %v1596_v31  ;;  %v3126_v31 = vstv %s2606_s11  ;;  %s2622_s11 = sld [smem:[#allocation7 + $0x14]] }
  0x9e   :  { %4624 = vst [vmem:[#allocation24_spill] sm:$0xff] %v3126_v31 }
  0xa4   :  { %v333_v33 = vpop.permute.xlu2 %332 }
  0xa5   :  { %335 = vst.msk [vmem:[#allocation4 + $0x1c] sm:$0x1] %vm316_vm3, %v333_v33  ;;  %v356_v34 = vpop.permute.xlu1 %355 }
  0xa6   :  { %358 = vst.msk [vmem:[#allocation4 + $0x6] sm:$0x1] %vm316_vm3, %v356_v34  ;;  %v326_v35 = vpop.permute.xlu0 %325 }
  0xa7   :  { %328 = vst.msk [vmem:[#allocation4 + $0x4] sm:$0x1] %vm316_vm3, %v326_v35  ;;  %v1599_v35 = vperm.slane %v1597_v32, 0 }
  0xac   :  { %v348_v37 = vpop.permute.xlu2 %347 }
  0xad   :  { %350 = vst.msk [vmem:[#allocation4 + $0x1d] sm:$0x1] %vm316_vm3, %v348_v37  ;;  %v371_v38 = vpop.permute.xlu1 %370  ;;  %v1581_v37 = vld [vmem:[#allocation2 + $0x1] sm:$0x1] }
  0xae   :  { %373 = vst.msk [vmem:[#allocation4 + $0x7] sm:$0x1] %vm316_vm3, %v371_v38  ;;  %v341_v39 = vpop.permute.xlu0 %340  ;;  %v1647_v38 = vmul.f32 0.25, %v1646_v36 }
  0xaf   :  { %343 = vst.msk [vmem:[#allocation4 + $0x5] sm:$0x1] %vm316_vm3, %v341_v39  ;;  %v1582_v39 = vmul.f32 0.25, %v1581_v37 }
  0xb4   :  { %v423_v40 = vpop.permute.xlu2 %422 }
  0xb5   :  { %425 = vst.msk [vmem:[#allocation4 + $0x22] sm:$0x1] %vm316_vm3, %v423_v40  ;;  %v416_v41 = vpop.permute.xlu1 %415  ;;  %v1649_v40 = vperm.slane %v1647_v38, 0  ;;  %v2745_v38 = vld [vmem:[#allocation3 + $0x3] ss:$0 sm:$0xff] }
  0xb6   :  { %v2959_v42 = vld [vmem:[#allocation4] sm:$0xff]  ;;  %418 = vst.msk [vmem:[#allocation4 + $0xa] sm:$0x1] %vm316_vm3, %v416_v41  ;;  %v401_v43 = vpop.permute.xlu0 %400  ;;  %v1584_v41 = vperm.slane %v1582_v39, 0  ;;  %v1661_v39 = vld [vmem:[#allocation2 + $0x3] sm:$0x1] }
  0xb7   :  { %403 = vst.msk [vmem:[#allocation4 + $0x9] sm:$0x1] %vm316_vm3, %v401_v43  ;;  %558 = vrot.lane.b32.xlu0 %v2959_v42, %s2847_s28  ;;  %548 = vrot.lane.b32.xlu2 %v2959_v42, %s2848_s29  ;;  %v2970_v48 = vld [vmem:[#allocation4 + $0x1] sm:$0xff]  ;;  %v1631_v43 = vld [vmem:[#allocation2 + $0x3] sm:$0x1] }
  0xb8   :  { %539 = vrot.lane.b32.xlu1 %v2959_v42, %s2849_s30 }
  0xbc   :  { %v473_v46 = vpop.permute.xlu2 %472 }
  0xbd   :  { %475 = vst.msk [vmem:[#allocation4 + $0x26] sm:$0x1] %vm316_vm3, %v473_v46  ;;  %v466_v47 = vpop.permute.xlu1 %465 }
  0xbe   :  { %v2972_v30 = vld [vmem:[#allocation4 + $0x2] sm:$0xff]  ;;  %468 = vst.msk [vmem:[#allocation4 + $0xe] sm:$0x1] %vm316_vm3, %v466_v47  ;;  %v451_v50 = vpop.permute.xlu0 %450  ;;  %v1676_v47 = vld [vmem:[#allocation2 + $0x3] sm:$0x1] }
  0xbf   :  { %v2974_v49 = vld [vmem:[#allocation4 + $0x3] sm:$0xff]  ;;  %578 = vrot.lane.b32.xlu2 %v2959_v42, %s2850_s4  ;;  %453 = vst.msk [vmem:[#allocation4 + $0xd] sm:$0x1] %vm316_vm3, %v451_v50 }
  0xc0   :  { %1518 = vst.msk [vmem:[#allocation4 + $0x3] sm:$0x1] %vm316_vm3, %v1517_v45  ;;  %568 = vrot.lane.b32.xlu1 %v2959_v42, %s2851_s5  ;;  %v3007_v61 = vld [vmem:[#allocation4 + $0x4] sm:$0xff]  ;;  %v1632_v45 = vmul.f32 0.25, %v1631_v43 }
  0xc1   :  { %v3009_v62 = vld [vmem:[#allocation4 + $0x5] sm:$0xff] }
  0xc2   :  { %v1634_v46 = vperm.slane %v1632_v45, 0  ;;  %v3143_v45 = vstv %s2608_s13  ;;  %s2651_s13 = sld [smem:[#allocation7 + $0x31]] }
  0xc3   :  { %4626 = vst [vmem:[#allocation26_spill] sm:$0xff] %v3143_v45 }
  0xc4   :  { %v496_v51 = vpop.permute.xlu2 %495 }
  0xc5   :  { %498 = vst.msk [vmem:[#allocation4 + $0x10] sm:$0x1] %vm316_vm3, %v496_v51  ;;  %v378_v52 = vpop.permute.xlu1 %377  ;;  %v1677_v51 = vmul.f32 0.25, %v1676_v47 }
  0xc6   :  { %380 = vst.msk [vmem:[#allocation4 + $0x1f] sm:$0x1] %vm316_vm3, %v378_v52  ;;  %v363_v53 = vpop.permute.xlu0 %362  ;;  %v2985_v54 = vld [vmem:[#allocation4 + $0x8] sm:$0xff]  ;;  %v1519_v52 = vld [vmem:[#allocation3 + $0x1] sm:$0x1] }
  0xc7   :  { %365 = vst.msk [vmem:[#allocation4 + $0x1e] sm:$0x1] %vm316_vm3, %v363_v53  ;;  %541 = vrot.lane.b32.xlu0 %v2985_v54, %s2849_s30  ;;  %550 = vrot.lane.b32.xlu2 %v2985_v54, %s2848_s29  ;;  %v3040_v16 = vld [vmem:[#allocation4 + $0x6] sm:$0xff]  ;;  %v2741_v53 = vld [vmem:[#allocation3 + $0x1] ss:$0 sm:$0xff] }
  0xc8   :  { %588 = vrot.lane.b32.xlu1 %v2959_v42, %s2852_s6 }
  0xcc   :  { %v518_v55 = vpop.permute.xlu2 %517  ;;  %v3042_v17 = vld [vmem:[#allocation4 + $0x9] sm:$0xff] }
  0xcd   :  { %v408_v56 = vpop.permute.xlu1 %407  ;;  %520 = vst.msk [vmem:[#allocation4 + $0x29] sm:$0x1] %vm316_vm3, %v518_v55  ;;  %v1679_v55 = vperm.slane %v1677_v51, 0 }
  0xce   :  { %410 = vst.msk [vmem:[#allocation4 + $0x21] sm:$0x1] %vm316_vm3, %v408_v56  ;;  %v393_v57 = vpop.permute.xlu0 %392  ;;  %v3002_v60 = vld [vmem:[#allocation4 + $0x18] sm:$0xff] }
  0xcf   :  { %395 = vst.msk [vmem:[#allocation4 + $0x20] sm:$0x1] %vm316_vm3, %v393_v57  ;;  %580 = vrot.lane.b32.xlu2 %v2985_v54, %s2850_s4  ;;  %v2742_v57 = vld [vmem:[#allocation3 + $0x3] ss:$0 sm:$0xff] }
  0xd0   :  { %560 = vrot.lane.b32.xlu1 %v2985_v54, %s2847_s28 }
  0xd4   :  { %v1541_v63 = vpop.permute.xlu2 %1540 }
  0xd5   :  { %v458_v58 = vpop.permute.xlu1 %457  ;;  %1543 = vst.msk [vmem:[#allocation4 + $0x5] sm:$0x1] %vm316_vm3, %v1541_v63 }
  0xd6   :  { %460 = vst.msk [vmem:[#allocation4 + $0x25] sm:$0x1] %vm316_vm3, %v458_v58  ;;  %v443_v59 = vpop.permute.xlu0 %442  ;;  %v3016_v2 = vld [vmem:[#allocation4 + $0x19] sm:$0xff] }
  0xd7   :  { %445 = vst.msk [vmem:[#allocation4 + $0x24] sm:$0x1] %vm316_vm3, %v443_v59  ;;  %611 = vrot.lane.b32.xlu2 %v3002_v60, %s2848_s29  ;;  %v3020_v3 = vld [vmem:[#allocation4 + $0x1a] sm:$0xff]  ;;  %v3105_v59 = vstv %s2603_s7  ;;  %s2618_s7 = sld [smem:[#allocation7 + $0x10]] }
  0xd8   :  { %570 = vrot.lane.b32.xlu1 %v2985_v54, %s2851_s5  ;;  %v3022_v4 = vld [vmem:[#allocation4 + $0x1b] sm:$0xff]  ;;  %4620 = vst [vmem:[#allocation20_spill] sm:$0xff] %v3105_v59 }
  0xd9   :  { %v3024_v5 = vld [vmem:[#allocation4 + $0x1c] sm:$0xff]  ;;  %1520 = vst.msk [vmem:[#allocation4 + $0x1b] sm:$0x1] %vm316_vm3, %v1519_v52 }
  0xda   :  { %v2743_v58 = vld [vmem:[#allocation3 + $0x1] ss:$0 sm:$0xff] }
  0xdc   :  { %v1533_v6 = vpop.permute.xlu2 %1532 }
  0xdd   :  { %v526_v0 = vpop.permute.xlu1 %525  ;;  %1535 = vst.msk [vmem:[#allocation4 + $0x1c] sm:$0x1] %vm316_vm3, %v1533_v6 }
  0xde   :  { %528 = vst.msk [vmem:[#allocation4 + $0x12] sm:$0x1] %vm316_vm3, %v526_v0  ;;  %v488_v1 = vpop.permute.xlu0 %487  ;;  %v3035_v11 = vld [vmem:[#allocation4 + $0x1d] sm:$0xff]  ;;  %v3109_v0 = vstv %s208_s8  ;;  %s2619_s8 = sld [smem:[#allocation7 + $0x11]] }
  0xdf   :  { %490 = vst.msk [vmem:[#allocation4 + $0x27] sm:$0x1] %vm316_vm3, %v488_v1  ;;  %641 = vrot.lane.b32.xlu2 %v3002_v60, %s2850_s4  ;;  %v3037_v12 = vld [vmem:[#allocation4 + $0x1e] sm:$0xff] }
  0xe0   :  { %590 = vrot.lane.b32.xlu1 %v2985_v54, %s2852_s6  ;;  %4616 = vst [vmem:[#allocation16_spill] sm:$0xff] %v3037_v12 }
  0xe1   :  { %4621 = vst [vmem:[#allocation21_spill] sm:$0xff] %v3109_v0 }
  0xe4   :  { %v1578_v13 = vpop.permute.xlu2 %1577 }
  0xe5   :  { %v503_v7 = vpop.permute.xlu1 %502  ;;  %1580 = vst.msk [vmem:[#allocation4 + $0x1f] sm:$0x1] %vm316_vm3, %v1578_v13  ;;  %v2744_v13 = vld [vmem:[#allocation3 + $0x3] ss:$0 sm:$0xff] }
  0xe6   :  { %v3029_v8 = vld [vmem:[#allocation4 + $0x20] sm:$0xff]  ;;  %505 = vst.msk [vmem:[#allocation4 + $0x28] sm:$0x1] %vm316_vm3, %v503_v7  ;;  %v511_v9 = vpop.permute.xlu0 %510  ;;  %v3113_v7 = vstv %s2604_s9  ;;  %s2620_s9 = sld [smem:[#allocation7 + $0x12]] }
  0xe7   :  { %513 = vst.msk [vmem:[#allocation4 + $0x11] sm:$0x1] %vm316_vm3, %v511_v9  ;;  %613 = vrot.lane.b32.xlu2 %v3029_v8, %s2848_s29 }
  0xe8   :  { %4622 = vst [vmem:[#allocation22_spill] sm:$0xff] %v3113_v7 }
  0xed   :  { %v1526_v22 = vpop.permute.xlu1 %1525  ;;  %v3059_v24 = vld [vmem:[#allocation4 + $0x21] sm:$0xff] }
  0xee   :  { %v3044_v18 = vld [vmem:[#allocation4 + $0xa] sm:$0xff]  ;;  %v533_v20 = vpop.permute.xlu0 %532  ;;  %1528 = vst.msk [vmem:[#allocation4 + $0x4] sm:$0x1] %vm316_vm3, %v1526_v22  ;;  %v3061_v25 = vld [vmem:[#allocation4 + $0x22] sm:$0xff] }
  0xef   :  { %v3046_v19 = vld [vmem:[#allocation4 + $0xb] sm:$0xff]  ;;  %535 = vst.msk [vmem:[#allocation4 + $0x2a] sm:$0x1] %vm316_vm3, %v533_v20  ;;  %643 = vrot.lane.b32.xlu2 %v3029_v8, %s2850_s4 }
  0xf0   :  { %1628 = vst.msk [vmem:[#allocation4 + $0xb] sm:$0x1] %vm316_vm3, %v1627_v14  ;;  %v3049_v21 = vld [vmem:[#allocation4 + $0x10] sm:$0x3f]  ;;  %v1611_v14 = vld [vmem:[#allocation2 + $0x1] sm:$0x1] }
  0xf1   :  { %543 = vrot.lane.b32.xlu0 %v3049_v21, %s2849_s30  ;;  %552 = vrot.lane.b32.xlu1 %v3049_v21, %s2848_s29  ;;  %4617 = vst [vmem:[#allocation17_spill] sm:$0xff] %v3059_v24 }
  0xf2   :  { %4618 = vst [vmem:[#allocation18_spill] sm:$0xff] %v3061_v25 }
  0xf5   :  { %v1571_v28 = vpop.permute.xlu1 %1570 }
  0xf6   :  { %v3063_v27 = vld [vmem:[#allocation4 + $0x23] sm:$0xff]  ;;  %1573 = vst.msk [vmem:[#allocation4 + $0x7] sm:$0x1] %vm316_vm3, %v1571_v28  ;;  %v1556_v29 = vpop.permute.xlu0 %1555 }
  0xf7   :  { %4619 = vst [vmem:[#allocation19_spill] sm:$0xff] %v3063_v27  ;;  %v3068_v26 = vld [vmem:[#allocation4 + $0x28] sm:$0x3f] }
  0xf8   :  { %1630 = vst.msk [vmem:[#allocation4 + $0x23] sm:$0x1] %vm316_vm3, %v1629_v23  ;;  %605 = vrot.lane.b32.xlu2 %v3068_v26, %s2849_s30  ;;  %v3119_v23 = vstv %s2605_s10  ;;  %s2621_s10 = sld [smem:[#allocation7 + $0x13]] }
  0xf9   :  { %621 = vrot.lane.b32.xlu0 %v3002_v60, %s2847_s28  ;;  %601 = vrot.lane.b32.xlu1 %v3002_v60, %s2849_s30  ;;  %1558 = vst.msk [vmem:[#allocation4 + $0x6] sm:$0x1] %vm316_vm3, %v1556_v29  ;;  %v1612_v29 = vmul.f32 0.25, %v1611_v14 }
  0xfa   :  { %4623 = vst [vmem:[#allocation23_spill] sm:$0xff] %v3119_v23 }
  0xfd   :  { %v1563_v33 = vpop.permute.xlu1 %1562 }
  0xfe   :  { %1565 = vst.msk [vmem:[#allocation4 + $0x1e] sm:$0x1] %vm316_vm3, %v1563_v33  ;;  %v1548_v34 = vpop.permute.xlu0 %1547  ;;  %v708_v33 = vmul.f32 %v3119_v23, %v2959_v42 }
  0xff   :  { %1550 = vst.msk [vmem:[#allocation4 + $0x1d] sm:$0x1] %vm316_vm3, %v1548_v34 }
 0x100   :  { %625 = vrot.lane.b32.xlu2 %v3068_v26, %s2847_s28  ;;  %v3137_v43 = vld [vmem:[#allocation4] sm:$0xff] }
 0x101   :  { %631 = vrot.lane.b32.xlu0 %v3002_v60, %s2851_s5  ;;  %651 = vrot.lane.b32.xlu1 %v3002_v60, %s2852_s6 }
 0x108   :  { %1600 = vrot.lane.b32.xlu2 %v1599_v35, %s2845_s27  ;;  %v3132_v35 = vstv %s2607_s12  ;;  %s3223_s12 = sld [smem:[#allocation7 + $0x32]] }
 0x109   :  { %603 = vrot.lane.b32.xlu0 %v3029_v8, %s2849_s30  ;;  %615 = vrot.lane.b32.xlu1 %v3068_v26, %s2848_s29  ;;  %4625 = vst [vmem:[#allocation25_spill] sm:$0xff] %v3132_v35 }
 0x110   :  { %1650 = vrot.lane.b32.xlu2 %v1649_v40, %s2843_s25 }
 0x111   :  { %623 = vrot.lane.b32.xlu0 %v3029_v8, %s2847_s28  ;;  %1585 = vrot.lane.b32.xlu1 %v1584_v41, %s2839_s0  ;;  %v549_v44 = vpop.permute.xlu2 %548 }
 0x112   :  { %555 = vst [vmem:[#allocation5 + $0x30] sm:$0xff] %v549_v44  ;;  %v680_v9 = vmul.f32 %v3105_v59, %v549_v44  ;;  %v1662_v44 = vmul.f32 0.25, %v1661_v39  ;;  %v2746_v39 = vld [vmem:[#allocation3 + $0x1] ss:$0 sm:$0xff] }
 0x118   :  { %582 = vrot.lane.b32.xlu2 %v3049_v21, %s2850_s4 }
 0x119   :  { %633 = vrot.lane.b32.xlu0 %v3029_v8, %s2851_s5  ;;  %1635 = vrot.lane.b32.xlu1 %v1634_v46, %s2841_s23  ;;  %v579_v50 = vpop.permute.xlu2 %578 }
 0x11a   :  { %585 = vst [vmem:[#allocation5 + $0xc0] sm:$0xff] %v579_v50  ;;  %v736_v40 = vmul.f32 %v3132_v35, %v579_v50 }
 0x120   :  { %1607 = vrot.lane.b32.xlu2 %v2741_v53, %s2845_s27 }
 0x121   :  { %653 = vrot.lane.b32.xlu0 %v3029_v8, %s2852_s6  ;;  %1680 = vrot.lane.b32.xlu1 %v1679_v55, %s2842_s24  ;;  %v551_v56 = vpop.permute.xlu2 %550  ;;  %v1664_v55 = vperm.slane %v1662_v44, 0 }
 0x122   :  { %556 = vst [vmem:[#allocation5 + $0x38] sm:$0xff] %v551_v56  ;;  %v681_v51 = vmul.f32 %v3105_v59, %v551_v56 }
 0x128   :  { %1657 = vrot.lane.b32.xlu2 %v2742_v57, %s2843_s25 }
 0x129   :  { %562 = vrot.lane.b32.xlu0 %v3049_v21, %s2847_s28  ;;  %1592 = vrot.lane.b32.xlu1 %v2743_v58, %s2839_s0  ;;  %v559_v63 = vpop.permute.xlu0 %558  ;;  %v3111_v1 = vpop.permute.xlu2 %580 }
 0x12a   :  { %565 = vst [vmem:[#allocation5 + $0x60] sm:$0xff] %v559_v63  ;;  %v540_v6 = vpop.permute.xlu1 %539  ;;  %v694_v20 = vmul.f32 %v3113_v7, %v559_v63  ;;  %v3151_v63 = vld [vmem:[#allocation4 + $0x18] sm:$0xff] }
 0x12b   :  { %586 = vst [vmem:[#allocation5 + $0xc8] sm:$0xff] %v3111_v1  ;;  %v666_v10 = vmul.f32 %v3109_v0, %v540_v6 }
 0x12c   :  { %545 = vst [vmem:[#allocation5] sm:$0xff] %v540_v6 }
 0x12d   :  { %v682_v22 = vadd.f32 %v680_v9, %v666_v10  ;;  %v3162_v10 = vstv %s2609_s14  ;;  %s2623_s14 = sld [smem:[#allocation7 + $0x15]] }
 0x12e   :  { %4627 = vst [vmem:[#allocation27_spill] sm:$0xff] %v3162_v10 }
 0x12f   :  { %v696_v28 = vadd.f32 %v694_v20, %v682_v22 }
 0x130   :  { %592 = vrot.lane.b32.xlu2 %v3049_v21, %s2852_s6 }
 0x131   :  { %572 = vrot.lane.b32.xlu0 %v3049_v21, %s2851_s5  ;;  %1642 = vrot.lane.b32.xlu1 %v2744_v13, %s2841_s23  ;;  %v3128_v32 = vpop.permute.xlu2 %611  ;;  %v710_v36 = vadd.f32 %v708_v33, %v696_v28  ;;  %v1614_v21 = vperm.slane %v1612_v29, 0  ;;  %v709_v28 = vmul.f32 %v3119_v23, %v2985_v54  ;;  %v3176_v33 = vstv %s2610_s15  ;;  %s2653_s15 = sld [smem:[#allocation7 + $0x33]] }
 0x132   :  { %v569_v34 = vpop.permute.xlu1 %568  ;;  %618 = vst [vmem:[#allocation5 + $0x48] sm:$0xff] %v3128_v32 }
 0x133   :  { %575 = vst [vmem:[#allocation5 + $0x90] sm:$0xff] %v569_v34  ;;  %v722_v37 = vmul.f32 %v3126_v31, %v569_v34  ;;  %v773_v34 = vld [vmem:[#allocation5 + $0x31] sm:$0xff] }
 0x134   :  { %4628 = vst [vmem:[#allocation28_spill] sm:$0xff] %v3176_v33  ;;  %v778_v54 = vmul.f32 %v3176_v33, %v773_v34 }
 0x135   :  { %v724_v41 = vadd.f32 %v722_v37, %v710_v36  ;;  %v3178_v36 = vstv %s2611_s16  ;;  %s3234_s16 = sld [smem:[#allocation7 + $0x34]] }
 0x136   :  { %4629 = vst [vmem:[#allocation29_spill] sm:$0xff] %v3178_v36 }
 0x137   :  { %v738_v42 = vadd.f32 %v736_v40, %v724_v41  ;;  %v737_v41 = vmul.f32 %v3132_v35, %v3111_v1 }
 0x138   :  { %1739 = vrot.lane.b32.xlu2 %v3137_v43, %s2849_s30 }
 0x139   :  { %1615 = vrot.lane.b32.xlu0 %v1614_v21, %s2844_s26  ;;  %1687 = vrot.lane.b32.xlu1 %v2745_v38, %s2842_s24  ;;  %v542_v46 = vpop.permute.xlu0 %541  ;;  %v3145_v47 = vpop.permute.xlu2 %641 }
 0x13a   :  { %546 = vst [vmem:[#allocation5 + $0x8] sm:$0xff] %v542_v46  ;;  %v667_v50 = vmul.f32 %v3109_v0, %v542_v46  ;;  %v589_v52 = vpop.permute.xlu1 %588 }
 0x13b   :  { %648 = vst [vmem:[#allocation5 + $0xd8] sm:$0xff] %v3145_v47  ;;  %v750_v53 = vmul.f32 %v3143_v45, %v589_v52 }
 0x13c   :  { %v683_v57 = vadd.f32 %v681_v51, %v667_v50  ;;  %595 = vst [vmem:[#allocation5 + $0xf0] sm:$0xff] %v589_v52  ;;  %v3190_v50 = vstv %s2612_s17  ;;  %v3192_v52 = vstv %s2613_s18  ;;  %s2655_s17 = sld [smem:[#allocation7 + $0x35]] }
 0x13d   :  { %v752_v58 = vadd.f32 %v750_v53, %v738_v42  ;;  %4630 = vst [vmem:[#allocation30_spill] sm:$0xff] %v3190_v50  ;;  %s2624_s18 = sld [smem:[#allocation7 + $0x16]] }
 0x13e   :  { %4631 = vst [vmem:[#allocation31_spill] sm:$0xff] %v3192_v52 }
 0x140   :  { %1796 = vrot.lane.b32.xlu2 %v3151_v63, %s2849_s30 }
 0x141   :  { %1665 = vrot.lane.b32.xlu0 %v1664_v55, %s2840_s2  ;;  %655 = vrot.lane.b32.xlu1 %v3068_v26, %s2852_s6  ;;  %v3158_v56 = vpop.permute.xlu2 %613  ;;  %v759_v13 = vld [vmem:[#allocation5 + $0x1] sm:$0xff] }
 0x142   :  { %619 = vst [vmem:[#allocation5 + $0x50] sm:$0xff] %v3158_v56  ;;  %v561_v6 = vpop.permute.xlu1 %560  ;;  %v764_v20 = vmul.f32 %v3162_v10, %v759_v13 }
 0x143   :  { %566 = vst [vmem:[#allocation5 + $0x68] sm:$0xff] %v561_v6  ;;  %v695_v9 = vmul.f32 %v3113_v7, %v561_v6  ;;  %v2747_v6 = vld [vmem:[#allocation3 + $0x3] ss:$0 sm:$0xff]  ;;  %v3267_v15 = vstv %s2624_s18  ;;  %s3340_s18 = sld [smem:[#allocation7 + $0x1f]] }
 0x144   :  { %v766_v40 = vadd.f32 %v764_v20, %v752_v58  ;;  %4649 = vst [vmem:[#allocation49_spill] sm:$0xff] %v3267_v15 }
 0x145   :  { %v697_v14 = vadd.f32 %v695_v9, %v683_v57  ;;  %v806_v9 = vmul.f32 %v3190_v50, %v2970_v48  ;;  %v3207_v48 = vstv %s2615_s20  ;;  %s2625_s20 = sld [smem:[#allocation7 + $0x17]] }
 0x146   :  { %v780_v51 = vadd.f32 %v778_v54, %v766_v40  ;;  %4633 = vst [vmem:[#allocation33_spill] sm:$0xff] %v3207_v48  ;;  %v3213_v54 = vstv %s2617_s22  ;;  %s2627_s22 = sld [smem:[#allocation7 + $0x19]] }
 0x147   :  { %v711_v21 = vadd.f32 %v709_v28, %v697_v14  ;;  %v3200_v28 = vstv %s2614_s19  ;;  %4635 = vst [vmem:[#allocation35_spill] sm:$0xff] %v3213_v54  ;;  %s2656_s19 = sld [smem:[#allocation7 + $0x36]] }
 0x148   :  { %1766 = vrot.lane.b32.xlu2 %v3137_v43, %s2851_s5  ;;  %4632 = vst [vmem:[#allocation32_spill] sm:$0xff] %v3200_v28 }
 0x149   :  { %635 = vrot.lane.b32.xlu0 %v3068_v26, %s2851_s5  ;;  %1757 = vrot.lane.b32.xlu1 %v3137_v43, %s2847_s28  ;;  %v3171_v22 = vpop.permute.xlu2 %643  ;;  %v873_v0 = vld [vmem:[#allocation5 + $0x4a] sm:$0xff] }
 0x14a   :  { %649 = vst [vmem:[#allocation5 + $0xe0] sm:$0xff] %v3171_v22  ;;  %v571_v29 = vpop.permute.xlu1 %570  ;;  %v787_v37 = vld [vmem:[#allocation5 + $0x61] sm:$0xff] }
 0x14b   :  { %576 = vst [vmem:[#allocation5 + $0x98] sm:$0xff] %v571_v29  ;;  %v723_v38 = vmul.f32 %v3126_v31, %v571_v29  ;;  %v792_v44 = vmul.f32 %v3178_v36, %v787_v37  ;;  %v829_v29 = vld [vmem:[#allocation5 + $0xc1] sm:$0xff]  ;;  %v3276_v7 = vstv %s2625_s20  ;;  %s3355_s20 = sld [smem:[#allocation7 + $0x3e]] }
 0x14c   :  { %v834_v37 = vmul.f32 %v3200_v28, %v829_v29  ;;  %4651 = vst [vmem:[#allocation51_spill] sm:$0xff] %v3276_v7 }
 0x14d   :  { %v725_v42 = vadd.f32 %v723_v38, %v711_v21  ;;  %v794_v1 = vadd.f32 %v792_v44, %v780_v51  ;;  %v3210_v38 = vstv %s2616_s21  ;;  %v871_v44 = vld [vmem:[#allocation5 + $0x32] sm:$0xff]  ;;  %s2626_s21 = sld [smem:[#allocation7 + $0x18]]  ;;  %v3274_v23 = vstv %s2656_s19 }
 0x14e   :  { %4634 = vst [vmem:[#allocation34_spill] sm:$0xff] %v3210_v38  ;;  %s3344_s19 = sld [smem:[#allocation7 + $0x3d]] }
 0x14f   :  { %v739_v46 = vadd.f32 %v737_v41, %v725_v42  ;;  %v808_v20 = vadd.f32 %v806_v9, %v794_v1  ;;  %v3216_v1 = vstv %s2618_s7  ;;  %4650 = vst [vmem:[#allocation50_spill] sm:$0xff] %v3274_v23  ;;  %s2628_s7 = sld [smem:[#allocation7 + $0x1a]] }
 0x150   :  { %1784 = vrot.lane.b32.xlu2 %v3137_v43, %s2852_s6  ;;  %4636 = vst [vmem:[#allocation36_spill] sm:$0xff] %v3216_v1 }
 0x151   :  { %1622 = vrot.lane.b32.xlu0 %v2746_v39, %s2844_s26  ;;  %1814 = vrot.lane.b32.xlu1 %v3151_v63, %s2847_s28  ;;  %v857_v39 = vld [vmem:[#allocation5 + $0x2] sm:$0xff] }
 0x152   :  { %v606_v53 = vpop.permute.xlu2 %605  ;;  %v591_v55 = vpop.permute.xlu1 %590  ;;  %v815_v57 = vld [vmem:[#allocation5 + $0x91] sm:$0xff] }
 0x153   :  { %610 = vst [vmem:[#allocation5 + $0x28] sm:$0x3f] %v606_v53  ;;  %v751_v58 = vmul.f32 %v3143_v45, %v591_v55  ;;  %v820_v13 = vmul.f32 %v3192_v52, %v815_v57  ;;  %v885_v53 = vld [vmem:[#allocation5 + $0x62] sm:$0xff] }
 0x154   :  { %596 = vst [vmem:[#allocation5 + $0xf8] sm:$0xff] %v591_v55  ;;  %v876_v55 = vmul.f32 %v3213_v54, %v871_v44  ;;  %v890_v9 = vmul.f32 %v3216_v1, %v885_v53 }
 0x155   :  { %v3198_v14 = vadd.f32 %v751_v58, %v739_v46  ;;  %v822_v34 = vadd.f32 %v820_v13, %v808_v20  ;;  %v862_v46 = vmul.f32 %v3210_v38, %v857_v39  ;;  %v3221_v58 = vstv %s2619_s8  ;;  %s2657_s8 = sld [smem:[#allocation7 + $0x37]] }
 0x156   :  { %4637 = vst [vmem:[#allocation37_spill] sm:$0xff] %v3221_v58  ;;  %v3231_v39 = vstv %s2621_s10  ;;  %s2629_s10 = sld [smem:[#allocation7 + $0x1b]] }
 0x157   :  { %v836_v41 = vadd.f32 %v834_v37, %v822_v34  ;;  %v3226_v34 = vstv %s2620_s9  ;;  %v913_v37 = vld [vmem:[#allocation5 + $0x92] sm:$0xff]  ;;  %4639 = vst [vmem:[#allocation39_spill] sm:$0xff] %v3231_v39  ;;  %s2658_s9 = sld [smem:[#allocation7 + $0x38]] }
 0x158   :  { %1841 = vrot.lane.b32.xlu2 %v3151_v63, %s2852_s6  ;;  %4638 = vst [vmem:[#allocation38_spill] sm:$0xff] %v3226_v34 }
 0x159   :  { %1672 = vrot.lane.b32.xlu0 %v2747_v6, %s2840_s2  ;;  %1823 = vrot.lane.b32.xlu1 %v3151_v63, %s2851_s5 }
 0x15a   :  { %v626_v21 = vpop.permute.xlu2 %625 }
 0x15b   :  { %v843_v40 = vld [vmem:[#allocation5 + $0xf1] sm:$0xff]  ;;  %630 = vst [vmem:[#allocation5 + $0x88] sm:$0x3f] %v626_v21 }
 0x15c   :  { %v848_v42 = vmul.f32 %v3207_v48, %v843_v40  ;;  %v927_v40 = vld [vmem:[#allocation5 + $0xc2] sm:$0xff] }
 0x15d   :  { %v932_v44 = vmul.f32 %v3231_v39, %v927_v40 }
 0x15e   :  { %v850_v51 = vadd.f32 %v848_v42, %v836_v41  ;;  %v918_v41 = vmul.f32 %v3226_v34, %v913_v37  ;;  %v3250_v37 = vstv %s2651_s13  ;;  %s3300_s13 = sld [smem:[#allocation7 + $0x3a]] }
 0x15f   :  { %4644 = vst [vmem:[#allocation44_spill] sm:$0xff] %v3250_v37 }
 0x160   :  { %v864_v57 = vadd.f32 %v862_v46, %v850_v51  ;;  %v941_v51 = vld [vmem:[#allocation5 + $0xf2] sm:$0xff] }
 0x161   :  { %645 = vrot.lane.b32.xlu0 %v3068_v26, %s2850_s4  ;;  %v904_v26 = vmul.f32 %v3221_v58, %v2972_v30  ;;  %v3239_v30 = vstv %s2622_s11  ;;  %s3293_s11 = sld [smem:[#allocation7 + $0x1c]] }
 0x162   :  { %v878_v13 = vadd.f32 %v876_v55, %v864_v57  ;;  %v1601_v20 = vpop.permute.xlu2 %1600  ;;  %4640 = vst [vmem:[#allocation40_spill] sm:$0xff] %v3239_v30  ;;  %v3241_v55 = vld [vmem:[#allocation4 + $0xc] sm:$0xff] }
 0x163   :  { %v544_v6 = vpop.permute.xlu0 %543  ;;  %v553_v29 = vpop.permute.xlu1 %552  ;;  %1603 = vst.msk [vmem:[#allocation4 + $0x9] sm:$0x1] %vm316_vm3, %v1601_v20  ;;  %v3243_v57 = vld [vmem:[#allocation4 + $0xd] sm:$0xff]  ;;  %v3246_v20 = vstv %s3223_s12  ;;  %s2659_s12 = sld [smem:[#allocation7 + $0x39]] }
 0x164   :  { %547 = vst [vmem:[#allocation5 + $0x10] sm:$0x3f] %v544_v6  ;;  %v892_v21 = vadd.f32 %v890_v9, %v878_v13 }
 0x165   :  { %557 = vst [vmem:[#allocation5 + $0x40] sm:$0x3f] %v553_v29  ;;  %v946_v29 = vmul.f32 %v3239_v30, %v941_v51  ;;  %v3263_v51 = vstv %s3234_s16  ;;  %s3321_s16 = sld [smem:[#allocation7 + $0x3c]] }
 0x166   :  { %v906_v42 = vadd.f32 %v904_v26, %v892_v21  ;;  %4641 = vst [vmem:[#allocation41_spill] sm:$0xff] %v3241_v55  ;;  %v3252_v26 = vstv %s2623_s14  ;;  %v955_v21 = vld [vmem:[#allocation5 + $0x3] sm:$0xff]  ;;  %s2631_s14 = sld [smem:[#allocation7 + $0x1d]] }
 0x167   :  { %4642 = vst [vmem:[#allocation42_spill] sm:$0xff] %v3243_v57  ;;  %v969_v57 = vld [vmem:[#allocation5 + $0x33] sm:$0xff] }
 0x168   :  { %v920_v46 = vadd.f32 %v918_v41, %v906_v42  ;;  %4643 = vst [vmem:[#allocation43_spill] sm:$0xff] %v3246_v20  ;;  %v3254_v41 = vstv %s2653_s15  ;;  %v685_v42 = vmul.f32 %v3246_v20, %v3128_v32  ;;  %v974_v31 = vmul.f32 %v3267_v15, %v969_v57  ;;  %s3318_s15 = sld [smem:[#allocation7 + $0x3b]] }
 0x169   :  { %1748 = vrot.lane.b32.xlu0 %v3137_v43, %s2848_s29  ;;  %4645 = vst [vmem:[#allocation45_spill] sm:$0xff] %v3252_v26  ;;  %v3283_v57 = vstv %s2626_s21  ;;  %s3360_s21 = sld [smem:[#allocation7 + $0x20]] }
 0x16a   :  { %v934_v6 = vadd.f32 %v932_v44, %v920_v46  ;;  %v1651_v9 = vpop.permute.xlu2 %1650  ;;  %4646 = vst [vmem:[#allocation46_spill] sm:$0xff] %v3254_v41  ;;  %v960_v46 = vmul.f32 %v3252_v26, %v955_v21 }
 0x16b   :  { %v622_v53 = vpop.permute.xlu0 %621  ;;  %v602_v13 = vpop.permute.xlu1 %601  ;;  %1653 = vst.msk [vmem:[#allocation4 + $0xd] sm:$0x1] %vm316_vm3, %v1651_v9  ;;  %v3265_v9 = vstv %s2655_s17  ;;  %s3326_s17 = sld [smem:[#allocation7 + $0x1e]] }
 0x16c   :  { %628 = vst [vmem:[#allocation5 + $0x78] sm:$0xff] %v622_v53  ;;  %v948_v40 = vadd.f32 %v946_v29, %v934_v6  ;;  %v671_v44 = vmul.f32 %v3250_v37, %v602_v13  ;;  %v699_v6 = vmul.f32 %v3254_v41, %v622_v53  ;;  %v983_v53 = vld [vmem:[#allocation5 + $0x63] sm:$0xff] }
 0x16d   :  { %608 = vst [vmem:[#allocation5 + $0x18] sm:$0xff] %v602_v13  ;;  %v713_v13 = vmul.f32 %v3263_v51, %v3002_v60  ;;  %v741_v60 = vmul.f32 %v3274_v23, %v3145_v47  ;;  %v686_v47 = vmul.f32 %v3246_v20, %v3158_v56  ;;  %v3298_v56 = vstv %s2628_s7  ;;  %s3380_s7 = sld [smem:[#allocation7 + $0x40]] }
 0x16e   :  { %4647 = vst [vmem:[#allocation47_spill] sm:$0xff] %v3263_v51  ;;  %v687_v29 = vadd.f32 %v685_v42, %v671_v44  ;;  %v962_v27 = vadd.f32 %v960_v46, %v948_v40  ;;  %v988_v46 = vmul.f32 %v3276_v7, %v983_v53  ;;  %v3328_v20 = vstv %s2659_s12  ;;  %s3411_s12 = sld [smem:[#allocation7 + $0x43]] }
 0x16f   :  { %4648 = vst [vmem:[#allocation48_spill] sm:$0xff] %v3265_v9 }
 0x170   :  { %v701_v45 = vadd.f32 %v699_v6, %v687_v29  ;;  %v976_v42 = vadd.f32 %v974_v31, %v962_v27  ;;  %4652 = vst [vmem:[#allocation52_spill] sm:$0xff] %v3283_v57 }
 0x171   :  { %1805 = vrot.lane.b32.xlu0 %v3151_v63, %s2848_s29  ;;  %4654 = vst [vmem:[#allocation54_spill] sm:$0xff] %v3298_v56 }
 0x172   :  { %v583_v35 = vpop.permute.xlu2 %582  ;;  %v715_v40 = vadd.f32 %v713_v13, %v701_v45  ;;  %v990_v6 = vadd.f32 %v988_v46, %v976_v42  ;;  %v1011_v13 = vld [vmem:[#allocation5 + $0x93] sm:$0xff]  ;;  %4661 = vst [vmem:[#allocation61_spill] sm:$0xff] %v3328_v20 }
 0x173   :  { %v632_v32 = vpop.permute.xlu0 %631  ;;  %v652_v25 = vpop.permute.xlu1 %651  ;;  %587 = vst [vmem:[#allocation5 + $0xd0] sm:$0x3f] %v583_v35  ;;  %v3304_v46 = vld [vmem:[#allocation4 + $0x25] sm:$0xff] }
 0x174   :  { %638 = vst [vmem:[#allocation5 + $0xa8] sm:$0xff] %v632_v32  ;;  %v727_v21 = vmul.f32 %v3265_v9, %v632_v32  ;;  %v1002_v32 = vmul.f32 %v3283_v57, %v2974_v49  ;;  %v1025_v49 = vld [vmem:[#allocation5 + $0xc3] sm:$0xff] }
 0x175   :  { %658 = vst [vmem:[#allocation5 + $0x108] sm:$0xff] %v652_v25 }
 0x176   :  { %v729_v44 = vadd.f32 %v727_v21, %v715_v40  ;;  %v1004_v21 = vadd.f32 %v1002_v32, %v990_v6  ;;  %4656 = vst [vmem:[#allocation56_spill] sm:$0xff] %v3304_v46  ;;  %v3313_v32 = vstv %s2629_s10  ;;  %s3397_s10 = sld [smem:[#allocation7 + $0x42]] }
 0x177   :  { %4659 = vst [vmem:[#allocation59_spill] sm:$0xff] %v3313_v32 }
 0x178   :  { %v743_v35 = vadd.f32 %v741_v60, %v729_v44  ;;  %v3302_v44 = vld [vmem:[#allocation4 + $0x24] sm:$0xff] }
 0x179   :  { %1775 = vrot.lane.b32.xlu0 %v3137_v43, %s2850_s4  ;;  %v3291_v43 = vstv %s2627_s22  ;;  %4655 = vst [vmem:[#allocation55_spill] sm:$0xff] %v3302_v44  ;;  %s3364_s22 = sld [smem:[#allocation7 + $0x3f]] }
 0x17a   :  { %v1608_v27 = vpop.permute.xlu2 %1607  ;;  %4653 = vst [vmem:[#allocation53_spill] sm:$0xff] %v3291_v43  ;;  %v1016_v40 = vmul.f32 %v3291_v43, %v1011_v13  ;;  %v1039_v13 = vld [vmem:[#allocation5 + $0xf3] sm:$0xff] }
 0x17b   :  { %v604_v29 = vpop.permute.xlu0 %603  ;;  %v616_v31 = vpop.permute.xlu1 %615  ;;  %1610 = vst.msk [vmem:[#allocation4 + $0x21] sm:$0x1] %vm316_vm3, %v1608_v27  ;;  %v3307_v27 = vstv %s2657_s8  ;;  %v1044_v46 = vmul.f32 %v3313_v32, %v1039_v13  ;;  %s3384_s8 = sld [smem:[#allocation7 + $0x21]] }
 0x17c   :  { %609 = vst [vmem:[#allocation5 + $0x20] sm:$0xff] %v604_v29  ;;  %v672_v45 = vmul.f32 %v3250_v37, %v604_v29  ;;  %v1018_v42 = vadd.f32 %v1016_v40, %v1004_v21  ;;  %v755_v40 = vmul.f32 %v3307_v27, %v652_v25  ;;  %v3331_v25 = vstv %s3300_s13  ;;  %s3413_s13 = sld [smem:[#allocation7 + $0x44]] }
 0x17d   :  { %620 = vst [vmem:[#allocation5 + $0x58] sm:$0x3f] %v616_v31 }
 0x17e   :  { %v688_v53 = vadd.f32 %v686_v47, %v672_v45  ;;  %v1030_v45 = vmul.f32 %v3298_v56, %v1025_v49  ;;  %4657 = vst [vmem:[#allocation57_spill] sm:$0xff] %v3307_v27 }
 0x17f   :  { %4662 = vst [vmem:[#allocation62_spill] sm:$0xff] %v3331_v25 }
 0x180   :  { %v1032_v21 = vadd.f32 %v1030_v45, %v1018_v42  ;;  %v775_v42 = vld [vmem:[#allocation5 + $0x49] sm:$0xff] }
 0x181   :  { %1832 = vrot.lane.b32.xlu0 %v3151_v63, %s2850_s4  ;;  %v3309_v63 = vstv %s2658_s9  ;;  %s3393_s9 = sld [smem:[#allocation7 + $0x41]] }
 0x182   :  { %v1658_v6 = vpop.permute.xlu2 %1657  ;;  %4658 = vst [vmem:[#allocation58_spill] sm:$0xff] %v3309_v63 }
 0x183   :  { %v624_v60 = vpop.permute.xlu0 %623  ;;  %v1586_v29 = vpop.permute.xlu1 %1585  ;;  %v761_v31 = vld [vmem:[#allocation5 + $0x19] sm:$0xff]  ;;  %1660 = vst.msk [vmem:[#allocation4 + $0x25] sm:$0x1] %vm316_vm3, %v1658_v6  ;;  %v1053_v6 = vld [vmem:[#allocation5 + $0x4] sm:$0xff] }
 0x184   :  { %629 = vst [vmem:[#allocation5 + $0x80] sm:$0xff] %v624_v60  ;;  %v700_v47 = vmul.f32 %v3254_v41, %v624_v60  ;;  %v769_v49 = vmul.f32 %v3309_v63, %v761_v31  ;;  %v3324_v60 = vstv %s3293_s11  ;;  %v757_v41 = vadd.f32 %v755_v40, %v743_v35  ;;  %s3406_s11 = sld [smem:[#allocation7 + $0x22]]  ;;  %v3428_v24 = vld [vmem:[#allocation5 + $0x1e] sm:$0xff] }
 0x185   :  { %1588 = vst.msk [vmem:[#allocation4 + $0x8] sm:$0x1] %vm316_vm3, %v1586_v29  ;;  %v1046_v29 = vadd.f32 %v1044_v46, %v1032_v21  ;;  %v1058_v59 = vmul.f32 %v3324_v60, %v1053_v6  ;;  %v3337_v40 = vstv %s2631_s14  ;;  %v1067_v46 = vld [vmem:[#allocation5 + $0x34] sm:$0xff]  ;;  %v783_v21 = vmul.f32 %v3328_v20, %v775_v42  ;;  %s3434_s14 = sld [smem:[#allocation7 + $0x23]] }
 0x186   :  { %v702_v44 = vadd.f32 %v700_v47, %v688_v53  ;;  %4660 = vst [vmem:[#allocation60_spill] sm:$0xff] %v3324_v60  ;;  %v771_v37 = vadd.f32 %v769_v49, %v757_v41  ;;  %v714_v53 = vmul.f32 %v3263_v51, %v3029_v8  ;;  %v742_v6 = vmul.f32 %v3274_v23, %v3171_v22 }
 0x187   :  { %4663 = vst [vmem:[#allocation63_spill] sm:$0xff] %v3337_v40  ;;  %v1060_v49 = vadd.f32 %v1058_v59, %v1046_v29  ;;  %v3350_v51 = vstv %s3318_s15  ;;  %v3353_v42 = vstv %s3321_s16  ;;  %s3442_s15 = sld [smem:[#allocation7 + $0x45]] }
 0x188   :  { %v716_v41 = vadd.f32 %v714_v53, %v702_v44  ;;  %4664 = vst [vmem:[#allocation64_spill] sm:$0xff] %v3350_v51  ;;  %v1081_v44 = vld [vmem:[#allocation5 + $0x64] sm:$0xff]  ;;  %s3444_s16 = sld [smem:[#allocation7 + $0x24]] }
 0x189   :  { %4665 = vst [vmem:[#allocation65_spill] sm:$0xff] %v3353_v42 }
 0x18a   :  { %v593_v47 = vpop.permute.xlu2 %592  ;;  %4676 = vst [vmem:[#allocation76_spill] sm:$0xff] %v3428_v24 }
 0x18b   :  { %v789_v45 = vld [vmem:[#allocation5 + $0x79] sm:$0xff]  ;;  %v634_v31 = vpop.permute.xlu0 %633  ;;  %v1636_v13 = vpop.permute.xlu1 %1635  ;;  %597 = vst [vmem:[#allocation5 + $0x100] sm:$0x3f] %v593_v47 }
 0x18c   :  { %639 = vst [vmem:[#allocation5 + $0xb0] sm:$0xff] %v634_v31  ;;  %v728_v35 = vmul.f32 %v3265_v9, %v634_v31  ;;  %v797_v8 = vmul.f32 %v3331_v25, %v789_v45  ;;  %v785_v31 = vadd.f32 %v783_v21, %v771_v37  ;;  %v1072_v9 = vmul.f32 %v3337_v40, %v1067_v46 }
 0x18d   :  { %1638 = vst.msk [vmem:[#allocation4 + $0xc] sm:$0x1] %vm316_vm3, %v1636_v13  ;;  %v3358_v45 = vstv %s3326_s17  ;;  %v3368_v13 = vld [vmem:[#allocation4 + $0xe] sm:$0xff]  ;;  %s3448_s17 = sld [smem:[#allocation7 + $0x46]] }
 0x18e   :  { %v730_v47 = vadd.f32 %v728_v35, %v716_v41  ;;  %4666 = vst [vmem:[#allocation66_spill] sm:$0xff] %v3358_v45  ;;  %v799_v53 = vadd.f32 %v797_v8, %v785_v31  ;;  %v1074_v29 = vadd.f32 %v1072_v9, %v1060_v49  ;;  %v811_v35 = vmul.f32 %v3350_v51, %v3016_v2  ;;  %v3376_v9 = vld [vmem:[#allocation5 + $0x5] sm:$0xff]  ;;  %v3426_v51 = vld [vmem:[#allocation5 + $0x1d] sm:$0xff] }
 0x18f   :  { %4667 = vst [vmem:[#allocation67_spill] sm:$0xff] %v3368_v13  ;;  %v3378_v41 = vld [vmem:[#allocation5 + $0x6] sm:$0xff]  ;;  %v1086_v49 = vmul.f32 %v3358_v45, %v1081_v44  ;;  %v3387_v2 = vstv %s3340_s18  ;;  %v3391_v31 = vstv %s3344_s19  ;;  %v887_v45 = vld [vmem:[#allocation5 + $0x7a] sm:$0xff]  ;;  %s3453_s18 = sld [smem:[#allocation7 + $0x47]] }
 0x190   :  { %v3362_v59 = vadd.f32 %v742_v6, %v730_v47  ;;  %4669 = vst [vmem:[#allocation69_spill] sm:$0xff] %v3387_v2  ;;  %v813_v6 = vadd.f32 %v811_v35, %v799_v53  ;;  %v831_v47 = vld [vmem:[#allocation5 + $0xd9] sm:$0xff]  ;;  %v1100_v44 = vmul.f32 %v3387_v2, %v3007_v61  ;;  %v3404_v53 = vstv %s3360_s21  ;;  %s3460_s19 = sld [smem:[#allocation7 + $0x25]] }
 0x191   :  { %4670 = vst [vmem:[#allocation70_spill] sm:$0xff] %v3391_v31  ;;  %v839_v23 = vmul.f32 %v3391_v31, %v831_v47  ;;  %v1109_v35 = vld [vmem:[#allocation5 + $0x94] sm:$0xff]  ;;  %s3487_s21 = sld [smem:[#allocation7 + $0x49]] }
 0x192   :  { %v3374_v8 = vpop.permute.xlu2 %1739  ;;  %4672 = vst [vmem:[#allocation72_spill] sm:$0xff] %v3404_v53  ;;  %v3415_v47 = vld [vmem:[#allocation5 + $0x1b] sm:$0xff]  ;;  %v1114_v12 = vmul.f32 %v3404_v53, %v1109_v35 }
 0x193   :  { %v817_v22 = vld [vmem:[#allocation5 + $0xa9] sm:$0xff]  ;;  %v3366_v37 = vpop.permute.xlu0 %653  ;;  %v1681_v21 = vpop.permute.xlu1 %1680  ;;  %4668 = vst [vmem:[#allocation68_spill] sm:$0xff] %v3374_v8 }
 0x194   :  { %v825_v46 = vmul.f32 %v3353_v42, %v817_v22  ;;  %659 = vst [vmem:[#allocation5 + $0x110] sm:$0xff] %v3366_v37  ;;  %v1088_v22 = vadd.f32 %v1086_v49, %v1074_v29  ;;  %v760_v29 = vld [vmem:[#allocation5 + $0x9] sm:$0xff]  ;;  %v3409_v49 = vstv %s3364_s22  ;;  %v3424_v42 = vld [vmem:[#allocation5 + $0x1c] sm:$0xff]  ;;  %s3493_s22 = sld [smem:[#allocation7 + $0x26]] }
 0x195   :  { %1683 = vst.msk [vmem:[#allocation4 + $0xf] sm:$0x1] %vm316_vm3, %v1681_v21  ;;  %v3400_v21 = vstv %s3355_s20  ;;  %s3466_s20 = sld [smem:[#allocation7 + $0x48]] }
 0x196   :  { %1745 = vst [vmem:[#allocation5] sm:$0xff] %v3374_v8  ;;  %v827_v13 = vadd.f32 %v825_v46, %v813_v6  ;;  %v1102_v8 = vadd.f32 %v1100_v44, %v1088_v22  ;;  %v859_v46 = vld [vmem:[#allocation5 + $0x1a] sm:$0xff]  ;;  %v3421_v44 = vstv %s3380_s7  ;;  %s3500_s7 = sld [smem:[#allocation7 + $0x4a]] }
 0x197   :  { %4671 = vst [vmem:[#allocation71_spill] sm:$0xff] %v3400_v21 }
 0x198   :  { %4673 = vst [vmem:[#allocation73_spill] sm:$0xff] %v3409_v49  ;;  %v841_v31 = vadd.f32 %v839_v23, %v827_v13  ;;  %v3432_v23 = vstv %s3384_s8  ;;  %v1123_v13 = vld [vmem:[#allocation5 + $0xc4] sm:$0xff]  ;;  %v1116_v53 = vadd.f32 %v1114_v12, %v1102_v8  ;;  %v3456_v12 = vstv %s3406_s11  ;;  %v1137_v8 = vld [vmem:[#allocation5 + $0xf4] sm:$0xff]  ;;  %s3505_s8 = sld [smem:[#allocation7 + $0x4b]] }
 0x199   :  { %4675 = vst [vmem:[#allocation75_spill] sm:$0xff] %v3421_v44  ;;  %s3540_s11 = sld [smem:[#allocation7 + $0x4d]] }
 0x19a   :  { %v3418_v22 = vpop.permute.xlu2 %1796  ;;  %4677 = vst [vmem:[#allocation77_spill] sm:$0xff] %v3432_v23 }
 0x19b   :  { %v845_v61 = vld [vmem:[#allocation5 + $0x109] sm:$0xff]  ;;  %v563_v6 = vpop.permute.xlu0 %562  ;;  %v1593_v55 = vpop.permute.xlu1 %1592  ;;  %4674 = vst [vmem:[#allocation74_spill] sm:$0xff] %v3418_v22 }
 0x19c   :  { %v853_v2 = vmul.f32 %v3400_v21, %v845_v61  ;;  %567 = vst [vmem:[#allocation5 + $0x70] sm:$0x3f] %v563_v6  ;;  %v765_v61 = vmul.f32 %v3162_v10, %v760_v29  ;;  %v867_v6 = vmul.f32 %v3409_v49, %v859_v46  ;;  %v3440_v21 = vstv %s3393_s9  ;;  %v774_v10 = vld [vmem:[#allocation5 + $0x39] sm:$0xff]  ;;  %s3513_s9 = sld [smem:[#allocation7 + $0x27]] }
 0x19d   :  { %1595 = vst.msk [vmem:[#allocation4 + $0x20] sm:$0x1] %vm316_vm3, %v1593_v55  ;;  %v881_v55 = vmul.f32 %v3421_v44, %v873_v0  ;;  %v1128_v29 = vmul.f32 %v3432_v23, %v1123_v13  ;;  %v895_v46 = vmul.f32 %v3440_v21, %v887_v45  ;;  %v3463_v13 = vstv %s3411_s12  ;;  %v3478_v49 = vld [vmem:[#allocation5 + $0x96] sm:$0xff]  ;;  %s3545_s12 = sld [smem:[#allocation7 + $0x4e]] }
 0x19e   :  { %v855_v35 = vadd.f32 %v853_v2, %v841_v31  ;;  %1802 = vst [vmem:[#allocation5 + $0x18] sm:$0xff] %v3418_v22  ;;  %v3451_v2 = vstv %s3397_s10  ;;  %v767_v31 = vadd.f32 %v765_v61, %v3198_v14  ;;  %v779_v44 = vmul.f32 %v3176_v33, %v774_v10  ;;  %v943_v33 = vld [vmem:[#allocation5 + $0x10a] sm:$0xff]  ;;  %s3521_s10 = sld [smem:[#allocation7 + $0x4c]] }
 0x19f   :  { %4678 = vst [vmem:[#allocation78_spill] sm:$0xff] %v3440_v21  ;;  %v1130_v0 = vadd.f32 %v1128_v29, %v1116_v53  ;;  %v909_v14 = vmul.f32 %v3451_v2, %v3020_v3  ;;  %v929_v29 = vld [vmem:[#allocation5 + $0xda] sm:$0xff]  ;;  %v1142_v10 = vmul.f32 %v3456_v12, %v1137_v8  ;;  %v3483_v3 = vstv %s3434_s14  ;;  %s3559_s14 = sld [smem:[#allocation7 + $0x50]] }
 0x1a0   :  { %v869_v24 = vadd.f32 %v867_v6, %v855_v35  ;;  %4679 = vst [vmem:[#allocation79_spill] sm:$0xff] %v3451_v2  ;;  %v915_v6 = vld [vmem:[#allocation5 + $0xaa] sm:$0xff]  ;;  %v3476_v21 = vld [vmem:[#allocation5 + $0x95] sm:$0xff] }
 0x1a1   :  { %4680 = vst [vmem:[#allocation80_spill] sm:$0xff] %v3456_v12 }
 0x1a2   :  { %v883_v22 = vadd.f32 %v881_v55, %v869_v24  ;;  %4681 = vst [vmem:[#allocation81_spill] sm:$0xff] %v3463_v13  ;;  %v3471_v53 = vpop.permute.xlu2 %1766  ;;  %v3474_v55 = vstv %s3413_s13  ;;  %s3549_s13 = sld [smem:[#allocation7 + $0x28]] }
 0x1a3   :  { %v788_v35 = vld [vmem:[#allocation5 + $0x69] sm:$0xff]  ;;  %v573_v23 = vpop.permute.xlu0 %572  ;;  %v1643_v24 = vpop.permute.xlu1 %1642  ;;  %4682 = vst [vmem:[#allocation82_spill] sm:$0xff] %v3474_v55  ;;  %v937_v8 = vmul.f32 %v3474_v55, %v929_v29  ;;  %v807_v29 = vmul.f32 %v3190_v50, %v3042_v17  ;;  %v3517_v55 = vld [vmem:[#allocation5 + $0xf5] sm:$0xff] }
 0x1a4   :  { %v897_v61 = vadd.f32 %v895_v46, %v883_v22  ;;  %v793_v45 = vmul.f32 %v3178_v36, %v788_v35  ;;  %577 = vst [vmem:[#allocation5 + $0xa0] sm:$0x3f] %v573_v23  ;;  %v781_v22 = vadd.f32 %v779_v44, %v767_v31  ;;  %v923_v23 = vmul.f32 %v3463_v13, %v915_v6  ;;  %v1165_v6 = vld [vmem:[#allocation5 + $0x35] sm:$0xff] }
 0x1a5   :  { %1645 = vst.msk [vmem:[#allocation4 + $0x24] sm:$0x1] %vm316_vm3, %v1643_v24  ;;  %v1144_v35 = vadd.f32 %v1142_v10, %v1130_v0  ;;  %v3490_v36 = vstv %s3442_s15  ;;  %v1156_v44 = vmul.f32 %v3483_v3, %v3376_v9  ;;  %v3498_v31 = vstv %s3448_s17  ;;  %s3566_s15 = sld [smem:[#allocation7 + $0x4f]] }
 0x1a6   :  { %4683 = vst [vmem:[#allocation83_spill] sm:$0xff] %v3483_v3  ;;  %v911_v46 = vadd.f32 %v909_v14, %v897_v61  ;;  %v795_v12 = vadd.f32 %v793_v45, %v781_v22  ;;  %v3503_v0 = vstv %s3444_s16  ;;  %v951_v61 = vmul.f32 %v3490_v36, %v943_v33  ;;  %v971_v45 = vld [vmem:[#allocation5 + $0x4b] sm:$0xff]  ;;  %v3515_v3 = vld [vmem:[#allocation4 + $0x26] sm:$0xff]  ;;  %s3568_s16 = sld [smem:[#allocation7 + $0x29]] }
 0x1a7   :  { %1772 = vst [vmem:[#allocation5 + $0x90] sm:$0xff] %v3471_v53  ;;  %v3511_v10 = vstv %s3453_s18  ;;  %v1158_v9 = vadd.f32 %v1156_v44, %v1144_v35  ;;  %v830_v22 = vld [vmem:[#allocation5 + $0xc9] sm:$0xff]  ;;  %v965_v33 = vmul.f32 %v3498_v31, %v3415_v47  ;;  %v1170_v50 = vmul.f32 %v3503_v0, %v1165_v6  ;;  %v985_v47 = vld [vmem:[#allocation5 + $0x7b] sm:$0xff]  ;;  %s3592_s17 = sld [smem:[#allocation7 + $0x51]] }
 0x1a8   :  { %4684 = vst [vmem:[#allocation84_spill] sm:$0xff] %v3490_v36  ;;  %v925_v24 = vadd.f32 %v923_v23, %v911_v46  ;;  %v3531_v36 = vld [vmem:[#allocation5 + $0xf6] sm:$0xff]  ;;  %v3534_v13 = vstv %s3466_s20  ;;  %s3596_s18 = sld [smem:[#allocation7 + $0x2a]] }
 0x1a9   :  { %4685 = vst [vmem:[#allocation85_spill] sm:$0xff] %v3498_v31  ;;  %v844_v31 = vld [vmem:[#allocation5 + $0xf9] sm:$0xff]  ;;  %s3609_s20 = sld [smem:[#allocation7 + $0x2b]] }
 0x1aa   :  { %v939_v14 = vadd.f32 %v937_v8, %v925_v24  ;;  %4686 = vst [vmem:[#allocation86_spill] sm:$0xff] %v3511_v10  ;;  %v809_v8 = vadd.f32 %v807_v29, %v795_v12  ;;  %v3525_v44 = vpop.permute.xlu2 %1784  ;;  %v979_v12 = vmul.f32 %v3511_v10, %v971_v45  ;;  %v993_v45 = vmul.f32 %v3534_v13, %v985_v47 }
 0x1ab   :  { %v816_v23 = vld [vmem:[#allocation5 + $0x99] sm:$0xff]  ;;  %v1616_v46 = vpop.permute.xlu0 %1615  ;;  %4687 = vst [vmem:[#allocation87_spill] sm:$0xff] %v3515_v3  ;;  %v1688_v35 = vpop.permute.xlu1 %1687  ;;  %v3529_v3 = vstv %s3460_s19  ;;  %s3605_s19 = sld [smem:[#allocation7 + $0x52]] }
 0x1ac   :  { %v953_v17 = vadd.f32 %v951_v61, %v939_v14  ;;  %v821_v24 = vmul.f32 %v3192_v52, %v816_v23  ;;  %1618 = vst.msk [vmem:[#allocation4 + $0xa] sm:$0x1] %vm316_vm3, %v1616_v46  ;;  %v1179_v14 = vld [vmem:[#allocation5 + $0x65] sm:$0xff]  ;;  %v835_v61 = vmul.f32 %v3200_v28, %v830_v22  ;;  %v1172_v23 = vadd.f32 %v1170_v50, %v1158_v9  ;;  %v872_v50 = vld [vmem:[#allocation5 + $0x3a] sm:$0xff] }
 0x1ad   :  { %1690 = vst.msk [vmem:[#allocation4 + $0x27] sm:$0x1] %vm316_vm3, %v1688_v35  ;;  %v858_v46 = vld [vmem:[#allocation5 + $0xa] sm:$0xff]  ;;  %v3543_v52 = vstv %s3487_s21  ;;  %v849_v35 = vmul.f32 %v3207_v48, %v844_v31  ;;  %v3556_v9 = vstv %s3500_s7  ;;  %s3618_s21 = sld [smem:[#allocation7 + $0x53]] }
 0x1ae   :  { %v967_v29 = vadd.f32 %v965_v33, %v953_v17  ;;  %v823_v6 = vadd.f32 %v821_v24, %v809_v8  ;;  %1790 = vst [vmem:[#allocation5 + $0xf0] sm:$0xff] %v3525_v44  ;;  %v1184_v33 = vmul.f32 %v3529_v3, %v1179_v14  ;;  %v3553_v17 = vstv %s3493_s22  ;;  %v1013_v8 = vld [vmem:[#allocation5 + $0xab] sm:$0xff]  ;;  %s3622_s22 = sld [smem:[#allocation7 + $0x55]] }
 0x1af   :  { %4688 = vst [vmem:[#allocation88_spill] sm:$0xff] %v3543_v52  ;;  %v863_v24 = vmul.f32 %v3210_v38, %v858_v46  ;;  %v1007_v47 = vmul.f32 %v3543_v52, %v3022_v4  ;;  %v877_v46 = vmul.f32 %v3213_v54, %v872_v50  ;;  %v1021_v38 = vmul.f32 %v3556_v9, %v1013_v8  ;;  %v1041_v4 = vld [vmem:[#allocation5 + $0x10b] sm:$0xff]  ;;  %s3637_s7 = sld [smem:[#allocation7 + $0x54]] }
 0x1b0   :  { %v981_v10 = vadd.f32 %v979_v12, %v967_v29  ;;  %v837_v22 = vadd.f32 %v835_v61, %v823_v6  ;;  %4689 = vst [vmem:[#allocation89_spill] sm:$0xff] %v3553_v17  ;;  %v3564_v61 = vstv %s3505_s8  ;;  %v1027_v29 = vld [vmem:[#allocation5 + $0xdb] sm:$0xff]  ;;  %v1186_v14 = vadd.f32 %v1184_v33, %v1172_v23  ;;  %v886_v6 = vld [vmem:[#allocation5 + $0x6a] sm:$0xff]  ;;  %s3650_s8 = sld [smem:[#allocation7 + $0x2c]] }
 0x1b1   :  { %v1198_v23 = vmul.f32 %v3553_v17, %v3009_v62  ;;  %v3579_v33 = vstv %s3521_s10  ;;  %v3581_v52 = vld [vmem:[#allocation5 + $0x10c] sm:$0xff]  ;;  %v3590_v62 = vstv %s3540_s11  ;;  %v905_v54 = vmul.f32 %v3221_v58, %v3044_v18  ;;  %v914_v17 = vld [vmem:[#allocation5 + $0x9a] sm:$0xff]  ;;  %s3665_s10 = sld [smem:[#allocation7 + $0x2d]] }
 0x1b2   :  { %v995_v31 = vadd.f32 %v993_v45, %v981_v10  ;;  %v851_v12 = vadd.f32 %v849_v35, %v837_v22  ;;  %v1842_v35 = vpop.permute.xlu2 %1841  ;;  %v3574_v22 = vstv %s3513_s9  ;;  %v3583_v50 = vld [vmem:[#allocation5 + $0x10d] sm:$0xff]  ;;  %v1221_v18 = vld [vmem:[#allocation5 + $0xc5] sm:$0xff]  ;;  %s3663_s9 = sld [smem:[#allocation7 + $0x56]] }
 0x1b3   :  { %v1666_v48 = vpop.permute.xlu0 %1665  ;;  %v656_v45 = vpop.permute.xlu1 %655  ;;  %4690 = vst [vmem:[#allocation90_spill] sm:$0xff] %v3574_v22  ;;  %v3585_v8 = vld [vmem:[#allocation5 + $0x10e] sm:$0xff]  ;;  %s3672_s11 = sld [smem:[#allocation7 + $0x57]] }
 0x1b4   :  { %v1009_v28 = vadd.f32 %v1007_v47, %v995_v31  ;;  %v865_v10 = vadd.f32 %v863_v24, %v851_v12  ;;  %1668 = vst.msk [vmem:[#allocation4 + $0xe] sm:$0x1] %vm316_vm3, %v1666_v48  ;;  %v1035_v48 = vmul.f32 %v3564_v61, %v1027_v29  ;;  %v891_v47 = vmul.f32 %v3216_v1, %v886_v6  ;;  %v1069_v29 = vld [vmem:[#allocation5 + $0x4c] sm:$0xff]  ;;  %v942_v1 = vld [vmem:[#allocation5 + $0xfa] sm:$0xff] }
 0x1b5   :  { %660 = vst [vmem:[#allocation5 + $0x118] sm:$0x3f] %v656_v45  ;;  %v1200_v12 = vadd.f32 %v1198_v23, %v1186_v14  ;;  %v3599_v45 = vstv %s3545_s12  ;;  %v1212_v14 = vmul.f32 %v3574_v22, %v3476_v21  ;;  %s3694_s12 = sld [smem:[#allocation7 + $0x58]] }
 0x1b6   :  { %v1023_v24 = vadd.f32 %v1021_v38, %v1009_v28  ;;  %v879_v31 = vadd.f32 %v877_v46, %v865_v10  ;;  %1847 = vst [vmem:[#allocation5 + $0x108] sm:$0xff] %v1842_v35  ;;  %v1049_v38 = vmul.f32 %v3579_v33, %v1041_v4  ;;  %v3603_v46 = vstv %s3549_s13  ;;  %v928_v10 = vld [vmem:[#allocation5 + $0xca] sm:$0xff]  ;;  %s3699_s13 = sld [smem:[#allocation7 + $0x5e]] }
 0x1b7   :  { %4691 = vst [vmem:[#allocation91_spill] sm:$0xff] %v3599_v45  ;;  %v1063_v35 = vmul.f32 %v3590_v62, %v3424_v42  ;;  %v1077_v4 = vmul.f32 %v3599_v45, %v1069_v29  ;;  %v3624_v42 = vld [vmem:[#allocation5 + $0x66] sm:$0xff] }
 0x1b8   :  { %v1037_v28 = vadd.f32 %v1035_v48, %v1023_v24  ;;  %v893_v6 = vadd.f32 %v891_v47, %v879_v31  ;;  %v919_v48 = vmul.f32 %v3226_v34, %v914_v17  ;;  %v1214_v24 = vadd.f32 %v1212_v14, %v1200_v12  ;;  %v1083_v31 = vld [vmem:[#allocation5 + $0x7c] sm:$0xff] }
 0x1b9   :  { %v3616_v47 = vstv %s3566_s15  ;;  %v3640_v14 = vstv %s3559_s14  ;;  %s3706_s14 = sld [smem:[#allocation7 + $0x59]] }
 0x1ba   :  { %v1051_v23 = vadd.f32 %v1049_v38, %v1037_v28  ;;  %v907_v58 = vadd.f32 %v905_v54, %v893_v6  ;;  %4692 = vst [vmem:[#allocation92_spill] sm:$0xff] %v3616_v47  ;;  %v933_v54 = vmul.f32 %v3231_v39, %v928_v10  ;;  %v1226_v28 = vmul.f32 %v3603_v46, %v1221_v18  ;;  %v956_v6 = vld [vmem:[#allocation5 + $0xb] sm:$0xff]  ;;  %s3708_s15 = sld [smem:[#allocation7 + $0x2f]] }
 0x1bb   :  { %v636_v21 = vpop.permute.xlu0 %635  ;;  %v3620_v22 = vld [vmem:[#allocation4 + $0x8] sm:$0xff]  ;;  %v3627_v12 = vpop.permute.xlu1 %1757  ;;  %v3635_v38 = vstv %s3568_s16  ;;  %v947_v10 = vmul.f32 %v3239_v30, %v942_v1  ;;  %v1111_v39 = vld [vmem:[#allocation5 + $0xac] sm:$0xff]  ;;  %v961_v34 = vmul.f32 %v3252_v26, %v956_v6  ;;  %v1721_v30 = vld [vmem:[#allocation2 + $0x3] sm:$0x1]  ;;  %s3721_s16 = sld [smem:[#allocation7 + $0x5a]] }
 0x1bc   :  { %v1065_v17 = vadd.f32 %v1063_v35, %v1051_v23  ;;  %v921_v29 = vadd.f32 %v919_v48, %v907_v58  ;;  %640 = vst [vmem:[#allocation5 + $0xb8] sm:$0x3f] %v636_v21  ;;  %1741 = vrot.lane.b32.xlu1 %v3620_v22, %s2849_s30  ;;  %1750 = vrot.lane.b32.xlu0 %v3620_v22, %s2848_s29  ;;  %v970_v48 = vld [vmem:[#allocation5 + $0x3b] sm:$0xff]  ;;  %v3648_v21 = vstv %s3592_s17  ;;  %s3723_s17 = sld [smem:[#allocation7 + $0x2e]] }
 0x1bd   :  { %4693 = vst [vmem:[#allocation93_spill] sm:$0xff] %v3635_v38  ;;  %v1091_v58 = vmul.f32 %v3616_v47, %v1083_v31  ;;  %1759 = vrot.lane.b32.xlu2 %v3620_v22, %s2847_s28  ;;  %v1228_v18 = vadd.f32 %v1226_v28, %v1214_v24  ;;  %v1105_v31 = vmul.f32 %v3640_v14, %v3024_v5  ;;  %v1125_v24 = vld [vmem:[#allocation5 + $0xdc] sm:$0xff] }
 0x1be   :  { %1763 = vst [vmem:[#allocation5 + $0x60] sm:$0xff] %v3627_v12  ;;  %v1079_v35 = vadd.f32 %v1077_v4, %v1065_v17  ;;  %v935_v23 = vadd.f32 %v933_v54, %v921_v29  ;;  %v3656_v4 = vstv %s3596_s18  ;;  %v3659_v54 = vstv %s3605_s19  ;;  %v984_v29 = vld [vmem:[#allocation5 + $0x6b] sm:$0xff]  ;;  %s3726_s18 = sld [smem:[#allocation7 + $0x5b]] }
 0x1bf   :  { %v1240_v17 = vmul.f32 %v3635_v38, %v3517_v55  ;;  %v975_v28 = vmul.f32 %v3267_v15, %v970_v48  ;;  %v1119_v5 = vmul.f32 %v3648_v21, %v1111_v39  ;;  %v1003_v55 = vmul.f32 %v3283_v57, %v3046_v19  ;;  %v1263_v38 = vld [vmem:[#allocation5 + $0x36] sm:$0xff]  ;;  %v762_v15 = vld [vmem:[#allocation5 + $0x21] sm:$0xff]  ;;  %s3739_s19 = sld [smem:[#allocation7 + $0x5c]] }
 0x1c0   :  { %v1093_v47 = vadd.f32 %v1091_v58, %v1079_v35  ;;  %v949_v1 = vadd.f32 %v947_v10, %v935_v23  ;;  %v3670_v10 = vstv %s3609_s20  ;;  %v3675_v23 = vstv %s3618_s21  ;;  %v1181_v39 = vld [vmem:[#allocation5 + $0x7d] sm:$0xff]  ;;  %s3750_s20 = sld [smem:[#allocation7 + $0x60]] }
 0x1c1   :  { %4694 = vst [vmem:[#allocation94_spill] sm:$0xff] %v3670_v10  ;;  %v1242_v35 = vadd.f32 %v1240_v17, %v1228_v18  ;;  %v1133_v48 = vmul.f32 %v3659_v54, %v1125_v24  ;;  %v989_v18 = vmul.f32 %v3276_v7, %v984_v29  ;;  %v1254_v17 = vmul.f32 %v3656_v4, %v3378_v41  ;;  %v1167_v29 = vld [vmem:[#allocation5 + $0x4d] sm:$0xff]  ;;  %s3759_s21 = sld [smem:[#allocation7 + $0x5d]] }
 0x1c2   :  { %v1107_v6 = vadd.f32 %v1105_v31, %v1093_v47  ;;  %v963_v58 = vadd.f32 %v961_v34, %v949_v1  ;;  %v3680_v47 = vld [vmem:[#allocation5 + $0x7e] sm:$0xff]  ;;  %v3689_v19 = vstv %s3622_s22  ;;  %v3692_v57 = vstv %s3637_s7  ;;  %s3761_s22 = sld [smem:[#allocation7 + $0x30]] }
 0x1c3   :  { %v1623_v26 = vpop.permute.xlu0 %1622  ;;  %v3684_v1 = vpop.permute.xlu1 %1814  ;;  %4695 = vst [vmem:[#allocation95_spill] sm:$0xff] %v3689_v19  ;;  %v756_v24 = vmul.f32 %v3307_v27, %v3366_v37  ;;  %v1147_v41 = vmul.f32 %v3675_v23, %v3581_v52  ;;  %v1268_v37 = vmul.f32 %v3670_v10, %v1263_v38  ;;  %v1256_v7 = vadd.f32 %v1254_v17, %v1242_v35  ;;  %v1040_v35 = vld [vmem:[#allocation5 + $0xfb] sm:$0xff]  ;;  %s3767_s7 = sld [smem:[#allocation7 + $0x5f]] }
 0x1c4   :  { %v1121_v34 = vadd.f32 %v1119_v5, %v1107_v6  ;;  %v977_v31 = vadd.f32 %v975_v28, %v963_v58  ;;  %1625 = vst.msk [vmem:[#allocation4 + $0x22] sm:$0x1] %vm316_vm3, %v1623_v26  ;;  %v1012_v5 = vld [vmem:[#allocation5 + $0x9b] sm:$0xff]  ;;  %v1026_v28 = vld [vmem:[#allocation5 + $0xcb] sm:$0xff]  ;;  %v1722_v58 = vmul.f32 0.25, %v1721_v30  ;;  %v3719_v38 = vstv %s3663_s9 }
 0x1c5   :  { %4696 = vst [vmem:[#allocation96_spill] sm:$0xff] %v3692_v57  ;;  %1768 = vrot.lane.b32.xlu2 %v3620_v22, %s2851_s5  ;;  %v1017_v52 = vmul.f32 %v3291_v43, %v1012_v5  ;;  %v1031_v30 = vmul.f32 %v3298_v56, %v1026_v28  ;;  %v770_v5 = vmul.f32 %v3309_v63, %v762_v15  ;;  %v1209_v43 = vld [vmem:[#allocation5 + $0xad] sm:$0xff]  ;;  %v4711_v63 = vld [vmem:[#allocation66_spill] sm:$0xff] }
 0x1c6   :  { %1820 = vst [vmem:[#allocation5 + $0x78] sm:$0xff] %v3684_v1  ;;  %v1135_v26 = vadd.f32 %v1133_v48, %v1121_v34  ;;  %v991_v6 = vadd.f32 %v989_v18, %v977_v31  ;;  %v1161_v48 = vmul.f32 %v3692_v57, %v3426_v51  ;;  %v1175_v18 = vmul.f32 %v3689_v19, %v1167_v29  ;;  %v3733_v19 = vld [vmem:[#allocation5 + $0xae] sm:$0xff] }
 0x1c7   :  { %v3715_v31 = vstv %s3650_s8  ;;  %4698 = vst [vmem:[#allocation98_spill] sm:$0xff] %v3719_v38  ;;  %v758_v51 = vadd.f32 %v756_v24, %v3362_v59  ;;  %v3730_v29 = vstv %s3672_s11  ;;  %v1189_v56 = vmul.f32 %v3719_v38, %v1181_v39  ;;  %v776_v39 = vld [vmem:[#allocation5 + $0x51] sm:$0xff]  ;;  %s3806_s8 = sld [smem:[#allocation7 + $0x61]] }
 0x1c8   :  { %v1149_v34 = vadd.f32 %v1147_v41, %v1135_v26  ;;  %v1005_v27 = vadd.f32 %v1003_v55, %v991_v6  ;;  %4697 = vst [vmem:[#allocation97_spill] sm:$0xff] %v3715_v31  ;;  %v1724_v26 = vperm.slane %v1722_v58, 0  ;;  %v1270_v41 = vadd.f32 %v1268_v37, %v1256_v7  ;;  %v1054_v6 = vld [vmem:[#allocation5 + $0xc] sm:$0xff] }
 0x1c9   :  { %4699 = vst [vmem:[#allocation99_spill] sm:$0xff] %v3730_v29  ;;  %v1045_v59 = vmul.f32 %v3313_v32, %v1040_v35  ;;  %v1282_v15 = vmul.f32 %v3715_v31, %v3624_v42  ;;  %v3744_v58 = vstv %s3665_s10  ;;  %v3747_v37 = vstv %s3694_s12  ;;  %v1223_v42 = vld [vmem:[#allocation5 + $0xdd] sm:$0xff] }
 0x1ca   :  { %v1163_v17 = vadd.f32 %v1161_v48, %v1149_v34  ;;  %v1019_v55 = vadd.f32 %v1017_v52, %v1005_v27  ;;  %4700 = vst [vmem:[#allocation100_spill] sm:$0xff] %v3744_v58  ;;  %v1203_v48 = vmul.f32 %v3730_v29, %v3035_v11  ;;  %v772_v34 = vadd.f32 %v770_v5, %v758_v51  ;;  %v790_v5 = vld [vmem:[#allocation5 + $0x81] sm:$0xff] }
 0x1cb   :  { %v1673_v28 = vpop.permute.xlu0 %1672  ;;  %v3737_v24 = vpop.permute.xlu1 %1823  ;;  %4701 = vst [vmem:[#allocation101_spill] sm:$0xff] %v3747_v37  ;;  %v1284_v35 = vadd.f32 %v1282_v15, %v1270_v41  ;;  %v784_v11 = vmul.f32 %v3328_v20, %v776_v39  ;;  %v3770_v41 = vstv %s3721_s16  ;;  %v2748_v15 = vld [vmem:[#allocation3 + $0x3] ss:$0 sm:$0xff]  ;;  %v3804_v20 = vstv %s3759_s21 }
 0x1cc   :  { %v1177_v27 = vadd.f32 %v1175_v18, %v1163_v17  ;;  %v1033_v7 = vadd.f32 %v1031_v30, %v1019_v55  ;;  %1675 = vst.msk [vmem:[#allocation4 + $0x26] sm:$0x1] %vm316_vm3, %v1673_v28  ;;  %v3756_v30 = vstv %s3706_s14  ;;  %v1059_v17 = vmul.f32 %v3324_v60, %v1054_v6  ;;  %v1068_v55 = vld [vmem:[#allocation5 + $0x3c] sm:$0xff] }
 0x1cd   :  { %1829 = vst [vmem:[#allocation5 + $0xa8] sm:$0xff] %v3737_v24  ;;  %1725 = vrot.lane.b32.xlu2 %v1724_v26, %s2844_s26  ;;  %v1296_v26 = vmul.f32 %v3744_v58, %v3040_v16  ;;  %v1231_v6 = vmul.f32 %v3756_v30, %v1223_v42  ;;  %v1073_v39 = vmul.f32 %v3337_v40, %v1068_v55  ;;  %v3781_v16 = vstv %s3699_s13 }
 0x1ce   :  { %v1191_v52 = vadd.f32 %v1189_v56, %v1177_v27  ;;  %v1047_v18 = vadd.f32 %v1045_v59, %v1033_v7  ;;  %4702 = vst [vmem:[#allocation102_spill] sm:$0xff] %v3756_v30  ;;  %v1217_v56 = vmul.f32 %v3747_v37, %v1209_v43  ;;  %v3774_v59 = vstv %s3723_s17 }
 0x1cf   :  { %4703 = vst [vmem:[#allocation103_spill] sm:$0xff] %v3770_v41  ;;  %v786_v27 = vadd.f32 %v784_v11, %v772_v34  ;;  %v1298_v43 = vadd.f32 %v1296_v26, %v1284_v35  ;;  %v798_v42 = vmul.f32 %v3331_v25, %v790_v5  ;;  %v1245_v34 = vmul.f32 %v3770_v41, %v3583_v50  ;;  %v1082_v11 = vld [vmem:[#allocation5 + $0x6c] sm:$0xff] }
 0x1d0   :  { %v1205_v51 = vadd.f32 %v1203_v48, %v1191_v52  ;;  %v1061_v28 = vadd.f32 %v1059_v17, %v1047_v18  ;;  %4704 = vst [vmem:[#allocation104_spill] sm:$0xff] %v3774_v59  ;;  %v3778_v48 = vstv %s3726_s18  ;;  %v1691_v18 = vld [vmem:[#allocation2 + $0x3] sm:$0x1]  ;;  %v3793_v35 = vstv %s3708_s15  ;;  %v818_v50 = vld [vmem:[#allocation5 + $0xb1] sm:$0xff] }
 0x1d1   :  { %4705 = vst [vmem:[#allocation105_spill] sm:$0xff] %v3778_v48  ;;  %v3796_v55 = vstv %s3739_s19  ;;  %v1319_v5 = vld [vmem:[#allocation5 + $0xc6] sm:$0xff]  ;;  %v800_v40 = vadd.f32 %v798_v42, %v786_v27  ;;  %v1692_v32 = vmul.f32 0.25, %v1691_v18  ;;  %v4715_v27 = vld [vmem:[#allocation65_spill] sm:$0xff]  ;;  %v3821_v18 = vstv %s3767_s7 }
 0x1d2   :  { %v1219_v7 = vadd.f32 %v1217_v56, %v1205_v51  ;;  %4706 = vst [vmem:[#allocation106_spill] sm:$0xff] %v3781_v16  ;;  %v1265_v56 = vld [vmem:[#allocation5 + $0x4e] sm:$0xff]  ;;  %v1310_v51 = vmul.f32 %v3774_v59, %v3478_v49  ;;  %v1075_v26 = vadd.f32 %v1073_v39, %v1061_v28  ;;  %v1087_v49 = vmul.f32 %v4711_v63, %v1082_v11  ;;  %v4712_v28 = vld [vmem:[#allocation17_spill] sm:$0xff] }
 0x1d3   :  { %v646_v52 = vpop.permute.xlu0 %645  ;;  %v3783_v60 = vld [vmem:[#allocation4 + $0x20] sm:$0xff]  ;;  %4707 = vst [vmem:[#allocation107_spill] sm:$0xff] %v3793_v35  ;;  %v1273_v41 = vmul.f32 %v3796_v55, %v1265_v56  ;;  %v826_v42 = vmul.f32 %v4715_v27, %v818_v50  ;;  %v1287_v11 = vmul.f32 %v3804_v20, %v3680_v47  ;;  %v1706_v56 = vld [vmem:[#allocation2 + $0x3] sm:$0x1]  ;;  %v860_v47 = vld [vmem:[#allocation5 + $0x22] sm:$0xff] }
 0x1d4   :  { %v1233_v17 = vadd.f32 %v1231_v6, %v1219_v7  ;;  %650 = vst [vmem:[#allocation5 + $0xe8] sm:$0x3f] %v646_v52  ;;  %1798 = vrot.lane.b32.xlu1 %v3783_v60, %s2849_s30  ;;  %1807 = vrot.lane.b32.xlu0 %v3783_v60, %s2848_s29  ;;  %v4709_v6 = vld [vmem:[#allocation76_spill] sm:$0xff]  ;;  %v1312_v25 = vadd.f32 %v1310_v51, %v1298_v43  ;;  %v3818_v43 = vstv %s3761_s22 }
 0x1d5   :  { %4708 = vst [vmem:[#allocation108_spill] sm:$0xff] %v3796_v55  ;;  %v1259_v7 = vmul.f32 %v3778_v48, %v4709_v6  ;;  %1702 = vrot.lane.b32.xlu2 %v2748_v15, %s2839_s0  ;;  %v4713_v39 = vld [vmem:[#allocation64_spill] sm:$0xff]  ;;  %v3813_v6 = vstv %s3750_s20  ;;  %v1324_v15 = vmul.f32 %v3793_v35, %v1319_v5  ;;  %v1089_v51 = vadd.f32 %v1087_v49, %v1075_v26  ;;  %v4720_v5 = vld [vmem:[#allocation69_spill] sm:$0xff] }
 0x1d6   :  { %v1247_v52 = vadd.f32 %v1245_v34, %v1233_v17  ;;  %4710 = vst [vmem:[#allocation76_spill] sm:$0xff] %v3804_v20  ;;  %v812_v59 = vmul.f32 %v4713_v39, %v4712_v28  ;;  %v1321_v17 = vld [vmem:[#allocation5 + $0xde] sm:$0xff]  ;;  %v1694_v39 = vperm.slane %v1692_v32, 0  ;;  %v846_v35 = vld [vmem:[#allocation5 + $0x111] sm:$0xff]  ;;  %v1338_v26 = vmul.f32 %v3818_v43, %v3531_v36 }
 0x1d7   :  { %4714 = vst [vmem:[#allocation17_spill] sm:$0xff] %v3813_v6  ;;  %v1329_v55 = vmul.f32 %v3813_v6, %v1321_v17  ;;  %v1326_v48 = vadd.f32 %v1324_v15, %v1312_v25  ;;  %v1315_v25 = vmul.f32 %v3821_v18, %v3733_v19  ;;  %v4722_v17 = vld [vmem:[#allocation21_spill] sm:$0xff]  ;;  %v874_v36 = vld [vmem:[#allocation5 + $0x52] sm:$0xff] }
 0x1d8   :  { %v1261_v34 = vadd.f32 %v1259_v7, %v1247_v52  ;;  %4716 = vst [vmem:[#allocation109_spill] sm:$0xff] %v3818_v43  ;;  %v814_v28 = vadd.f32 %v812_v59, %v800_v40  ;;  %v4718_v7 = vld [vmem:[#allocation16_spill] sm:$0xff]  ;;  %v4719_v52 = vld [vmem:[#allocation41_spill] sm:$0xff]  ;;  %v4721_v59 = vld [vmem:[#allocation70_spill] sm:$0xff] }
 0x1d9   :  { %4717 = vst [vmem:[#allocation110_spill] sm:$0xff] %v3821_v18  ;;  %v1301_v50 = vmul.f32 %v3781_v16, %v4718_v7  ;;  %v1101_v27 = vmul.f32 %v4720_v5, %v4719_v52  ;;  %v1110_v40 = vld [vmem:[#allocation5 + $0x9c] sm:$0xff]  ;;  %v1707_v52 = vmul.f32 0.25, %v1706_v56  ;;  %v3844_v18 = vstv %s3806_s8 }
 0x1da   :  { %v1275_v63 = vadd.f32 %v1273_v41, %v1261_v34  ;;  %v828_v32 = vadd.f32 %v826_v42, %v814_v28  ;;  %v4723_v34 = vld [vmem:[#allocation68_spill] sm:$0xff]  ;;  %4727 = vst [vmem:[#allocation16_spill] sm:$0xff] %v3844_v18  ;;  %v888_v56 = vld [vmem:[#allocation5 + $0x82] sm:$0xff] }
 0x1db   :  { %v832_v30 = vld [vmem:[#allocation5 + $0xe1] sm:$0xff]  ;;  %v1749_v58 = vpop.permute.xlu0 %1748  ;;  %v1854_v15 = vmul.f32 %v4723_v34, %v4722_v17  ;;  %v1103_v7 = vadd.f32 %v1101_v27, %v1089_v51  ;;  %v4725_v28 = vld [vmem:[#allocation20_spill] sm:$0xff]  ;;  %v1124_v51 = vld [vmem:[#allocation5 + $0xcc] sm:$0xff] }
 0x1dc   :  { %v1289_v41 = vadd.f32 %v1287_v11, %v1275_v63  ;;  %v840_v49 = vmul.f32 %v4721_v59, %v832_v30  ;;  %1754 = vst [vmem:[#allocation5 + $0x30] sm:$0xff] %v1749_v58  ;;  %1816 = vrot.lane.b32.xlu1 %v3783_v60, %s2847_s28  ;;  %v4724_v63 = vld [vmem:[#allocation71_spill] sm:$0xff]  ;;  %v1866_v6 = vmul.f32 %v1749_v58, %v4725_v28  ;;  %v4726_v59 = vld [vmem:[#allocation73_spill] sm:$0xff]  ;;  %v4728_v34 = vld [vmem:[#allocation72_spill] sm:$0xff] }
 0x1dd   :  { %v854_v11 = vmul.f32 %v4724_v63, %v846_v35  ;;  %1695 = vrot.lane.b32.xlu0 %v1694_v39, %s2839_s0  ;;  %v1340_v30 = vadd.f32 %v1338_v26, %v1326_v48  ;;  %v868_v19 = vmul.f32 %v4726_v59, %v860_v47  ;;  %v1115_v27 = vmul.f32 %v4728_v34, %v1110_v40  ;;  %v4731_v39 = vld [vmem:[#allocation75_spill] sm:$0xff]  ;;  %v4732_v63 = vld [vmem:[#allocation77_spill] sm:$0xff] }
 0x1de   :  { %v1303_v5 = vadd.f32 %v1301_v50, %v1289_v41  ;;  %v842_v42 = vadd.f32 %v840_v49, %v828_v32  ;;  %1786 = vrot.lane.b32.xlu2 %v3620_v22, %s2852_s6  ;;  %v4729_v41 = vld [vmem:[#allocation22_spill] sm:$0xff]  ;;  %v1868_v58 = vadd.f32 %v1866_v6, %v1854_v15  ;;  %v1886_v49 = vld [vmem:[#allocation4] sm:$0xff]  ;;  %v3854_v48 = vstv %s4422_s1  ;;  %s2853_s1 = smov [#allocation12]  }
 0x1df   :  { %v1878_v35 = vmul.f32 %v3627_v12, %v4729_v41  ;;  %4730 = vst [vmem:[#allocation41_spill] sm:$0xff] %v3854_v48  ;;  %v882_v26 = vmul.f32 %v4731_v39, %v874_v36  ;;  %v1117_v47 = vadd.f32 %v1115_v27, %v1103_v7  ;;  %v1709_v40 = vperm.slane %v1707_v52, 0  ;;  %v4734_v15 = vld [vmem:[#allocation44_spill] sm:$0xff]  ;;  %v4736_v17 = vld [vmem:[#allocation23_spill] sm:$0xff]  ;;  %v1138_v7 = vld [vmem:[#allocation5 + $0xfc] sm:$0xff] }
 0x1e0   :  { %v1317_v50 = vadd.f32 %v1315_v25, %v1303_v5  ;;  %v856_v32 = vadd.f32 %v854_v11, %v842_v42  ;;  %v1343_v59 = vmul.f32 %v3844_v18, %v3585_v8  ;;  %v1129_v12 = vmul.f32 %v4732_v63, %v1124_v51  ;;  %v4733_v11 = vld [vmem:[#allocation78_spill] sm:$0xff]  ;;  %v4737_v27 = vld [vmem:[#allocation43_spill] sm:$0xff]  ;;  %v4742_v63 = vld [vmem:[#allocation81_spill] sm:$0xff] }
 0x1e1   :  { %v1880_v25 = vadd.f32 %v1878_v35, %v1868_v58  ;;  %v896_v6 = vmul.f32 %v4733_v11, %v888_v56  ;;  %v4735_v42 = vld [vmem:[#allocation74_spill] sm:$0xff]  ;;  %v1890_v43 = vmul.f32 %v1886_v49, %v4736_v17  ;;  %v1347_v36 = vadd.f32 %v1340_v30, %v3854_v48  ;;  %v916_v35 = vld [vmem:[#allocation5 + $0xb2] sm:$0xff] }
 0x1e2   :  { %v1331_v34 = vadd.f32 %v1329_v55, %v1317_v50  ;;  %v870_v5 = vadd.f32 %v868_v19, %v856_v32  ;;  %v1858_v41 = vmul.f32 %v4735_v42, %v4734_v15  ;;  %v1131_v19 = vadd.f32 %v1129_v12, %v1117_v47  ;;  %v4738_v50 = vld [vmem:[#allocation24_spill] sm:$0xff]  ;;  %v4739_v56 = vld [vmem:[#allocation18_spill] sm:$0xff] }
 0x1e3   :  { %v1806_v28 = vpop.permute.xlu0 %1805  ;;  %v1902_v51 = vmul.f32 %v3471_v53, %v4738_v50  ;;  %v910_v32 = vmul.f32 %v3451_v2, %v4739_v56  ;;  %v1892_v58 = vadd.f32 %v1890_v43, %v1880_v25  ;;  %v4740_v42 = vld [vmem:[#allocation46_spill] sm:$0xff]  ;;  %v924_v56 = vmul.f32 %v4742_v63, %v916_v35  ;;  %v944_v25 = vld [vmem:[#allocation5 + $0x112] sm:$0xff] }
 0x1e4   :  { %v1345_v52 = vadd.f32 %v1343_v59, %v1331_v34  ;;  %v884_v55 = vadd.f32 %v882_v26, %v870_v5  ;;  %1811 = vst [vmem:[#allocation5 + $0x48] sm:$0xff] %v1806_v28  ;;  %v1870_v8 = vmul.f32 %v1806_v28, %v4737_v27  ;;  %1710 = vrot.lane.b32.xlu1 %v1709_v40, %s2845_s27  ;;  %v4741_v28 = vld [vmem:[#allocation80_spill] sm:$0xff]  ;;  %v930_v47 = vld [vmem:[#allocation5 + $0xe2] sm:$0xff] }
 0x1e5   :  { %v1882_v30 = vmul.f32 %v3684_v1, %v4740_v42  ;;  %1777 = vrot.lane.b32.xlu0 %v3620_v22, %s2850_s4  ;;  %v1143_v26 = vmul.f32 %v4741_v28, %v1138_v7  ;;  %v1904_v53 = vadd.f32 %v1902_v51, %v1892_v58  ;;  %v1152_v5 = vld [vmem:[#allocation5 + $0xd] sm:$0xff]  ;;  %v4743_v1 = vld [vmem:[#allocation82_spill] sm:$0xff] }
 0x1e6   :  { %v1349_v49 = vadd.f32 %v1347_v36, %v1345_v52  ;;  %v898_v59 = vadd.f32 %v896_v6, %v884_v55  ;;  %v1872_v34 = vadd.f32 %v1870_v8, %v1858_v41  ;;  %v938_v6 = vmul.f32 %v4743_v1, %v930_v47  ;;  %v2749_v41 = vld [vmem:[#allocation3 + $0x3] ss:$0 sm:$0xff]  ;;  %v958_v22 = vld [vmem:[#allocation5 + $0x23] sm:$0xff]  ;;  %v4745_v28 = vld [vmem:[#allocation84_spill] sm:$0xff] }
 0x1e7   :  { %v1145_v43 = vadd.f32 %v1143_v26, %v1131_v19  ;;  %v4744_v52 = vld [vmem:[#allocation83_spill] sm:$0xff]  ;;  %v1166_v7 = vld [vmem:[#allocation5 + $0x3d] sm:$0xff]  ;;  %v952_v51 = vmul.f32 %v4745_v28, %v944_v25 }
 0x1e8   :  { %v2700_v12 = vmul.f32 -1.442695, %v1349_v49  ;;  %v912_v2 = vadd.f32 %v910_v32, %v898_v59  ;;  %v1884_v40 = vadd.f32 %v1882_v30, %v1872_v34  ;;  %v1157_v55 = vmul.f32 %v4744_v52, %v1152_v5  ;;  %v4746_v49 = vld [vmem:[#allocation25_spill] sm:$0xff]  ;;  %v2767_v32 = vld [vmem:[#allocation4 + $0x18] sm:$0xff]  ;;  %v972_v59 = vld [vmem:[#allocation5 + $0x53] sm:$0xff] }
 0x1e9   :  { %v4747_v30 = vld [vmem:[#allocation47_spill] sm:$0xff]  ;;  %v4749_v47 = vld [vmem:[#allocation26_spill] sm:$0xff]  ;;  %v1171_v25 = vmul.f32 %v3503_v0, %v1166_v7 }
 0x1ea   :  { %2751 = vpow2.f32 %v2700_v12  ;;  %v926_v36 = vadd.f32 %v924_v56, %v912_v2  ;;  %v1894_v19 = vmul.f32 %v2767_v32, %v4747_v30  ;;  %v1159_v34 = vadd.f32 %v1157_v55, %v1145_v43  ;;  %v4748_v2 = vld [vmem:[#allocation85_spill] sm:$0xff]  ;;  %v1180_v52 = vld [vmem:[#allocation5 + $0x6d] sm:$0xff] }
 0x1eb   :  { %v1776_v8 = vpop.permute.xlu0 %1775  ;;  %v966_v26 = vmul.f32 %v4748_v2, %v958_v22  ;;  %v1926_v5 = vmul.f32 %v3525_v44, %v4749_v47  ;;  %v2750_v2 = vld [vmem:[#allocation3 + $0x3] ss:$0 sm:$0xff]  ;;  %v1185_v7 = vmul.f32 %v3529_v3, %v1180_v52  ;;  %v4753_v47 = vld [vmem:[#allocation88_spill] sm:$0xff]  ;;  %v4755_v52 = vld [vmem:[#allocation42_spill] sm:$0xff] }
 0x1ec   :  { %v940_v58 = vadd.f32 %v938_v6, %v926_v36  ;;  %1781 = vst [vmem:[#allocation5 + $0xc0] sm:$0xff] %v1776_v8  ;;  %v1914_v35 = vmul.f32 %v1776_v8, %v4746_v49  ;;  %1825 = vrot.lane.b32.xlu1 %v3783_v60, %s2851_s5  ;;  %v986_v36 = vld [vmem:[#allocation5 + $0x83] sm:$0xff]  ;;  %v1896_v28 = vadd.f32 %v1894_v19, %v1884_v40 }
 0x1ed   :  { %1717 = vrot.lane.b32.xlu0 %v2749_v41, %s2845_s27  ;;  %v4750_v8 = vld [vmem:[#allocation86_spill] sm:$0xff]  ;;  %v1173_v22 = vadd.f32 %v1171_v25, %v1159_v34  ;;  %v994_v44 = vmul.f32 %v3534_v13, %v986_v36 }
 0x1ee   :  { %v954_v12 = vadd.f32 %v952_v51, %v940_v58  ;;  %v1916_v56 = vadd.f32 %v1914_v35, %v1904_v53  ;;  %v980_v32 = vmul.f32 %v4750_v8, %v972_v59  ;;  %v4751_v51 = vld [vmem:[#allocation48_spill] sm:$0xff]  ;;  %v4752_v59 = vld [vmem:[#allocation19_spill] sm:$0xff]  ;;  %v4754_v19 = vld [vmem:[#allocation50_spill] sm:$0xff] }
 0x1ef   :  { %v1906_v53 = vmul.f32 %v3737_v24, %v4751_v51  ;;  %v1014_v58 = vld [vmem:[#allocation5 + $0xb3] sm:$0xff] }
 0x1f0   :  { %v2752_v6 = vpop.eup %2751  ;;  %v968_v43 = vadd.f32 %v966_v26, %v954_v12  ;;  %v3890_v55 = vadd.f32 %v1926_v5, %v1916_v56  ;;  %v1008_v26 = vmul.f32 %v4753_v47, %v4752_v59  ;;  %v1187_v12 = vadd.f32 %v1185_v7, %v1173_v22  ;;  %v1028_v56 = vld [vmem:[#allocation5 + $0xe3] sm:$0xff] }
 0x1f1   :  { %v1357_v1 = vadd.f32 1.0, %v2752_v6  ;;  %v1908_v40 = vadd.f32 %v1906_v53, %v1896_v28  ;;  %v1022_v24 = vmul.f32 %v3556_v9, %v1014_v58  ;;  %v4756_v6 = vld [vmem:[#allocation89_spill] sm:$0xff]  ;;  %v1036_v53 = vmul.f32 %v3564_v61, %v1028_v56 }
 0x1f2   :  { %v982_v41 = vadd.f32 %v980_v32, %v968_v43  ;;  %v1199_v32 = vmul.f32 %v4756_v6, %v4755_v52  ;;  %v1042_v43 = vld [vmem:[#allocation5 + $0x113] sm:$0xff] }
 0x1f3   :  { %2753 = vrcp.f32 %v1357_v1  ;;  %v1833_v35 = vpop.permute.xlu0 %1832  ;;  %v1050_v58 = vmul.f32 %v3579_v33, %v1042_v43  ;;  %vm1364_vm5 = vweird.f32 %v1357_v1 }
 0x1f4   :  { %v996_v5 = vadd.f32 %v994_v44, %v982_v41  ;;  %1838 = vst [vmem:[#allocation5 + $0xd8] sm:$0xff] %v1833_v35  ;;  %v1918_v34 = vmul.f32 %v1833_v35, %v4754_v19  ;;  %1732 = vrot.lane.b32.xlu1 %v2750_v2, %s2844_s26  ;;  %v1208_v44 = vld [vmem:[#allocation5 + $0x9d] sm:$0xff]  ;;  %v1201_v7 = vadd.f32 %v1199_v32, %v1187_v12  ;;  %v1070_v2 = vld [vmem:[#allocation5 + $0x54] sm:$0xff]  ;;  %v1368_v32 = vand.u32 2147483647, %v1357_v1 }
 0x1f5   :  { %1834 = vrot.lane.b32.xlu0 %v3783_v60, %s2850_s4  ;;  %v1056_v41 = vld [vmem:[#allocation5 + $0x24] sm:$0xff]  ;;  %v1078_v6 = vmul.f32 %v3599_v45, %v1070_v2  ;;  %v4760_v45 = vlaneseq }
 0x1f6   :  { %v1010_v25 = vadd.f32 %v1008_v26, %v996_v5  ;;  %v3901_v36 = vadd.f32 %v1918_v34, %v1908_v40  ;;  %v4757_v26 = vld [vmem:[#allocation90_spill] sm:$0xff]  ;;  %v1222_v40 = vld [vmem:[#allocation5 + $0xcd] sm:$0xff]  ;;  %v1064_v34 = vmul.f32 %v3590_v62, %v1056_v41  ;;  %vm1369_vm7 = vcmp.eq.f32.partialorder %v1368_v32, 8.507059e+37 }
 0x1f7   :  { %v1213_v5 = vmul.f32 %v4757_v26, %v1208_v44  ;;  %v4758_v44 = vld [vmem:[#allocation92_spill] sm:$0xff]  ;;  %vm3919_vm8 = vcmp.lt.s32.totalorder %v4760_v45, 16 }
 0x1f8   :  { %v1024_v28 = vadd.f32 %v1022_v24, %v1010_v25  ;;  %v1084_v24 = vld [vmem:[#allocation5 + $0x84] sm:$0xff]  ;;  %v1370_v25 = vand.u32 2147483648, %v1357_v1 }
 0x1f9   :  { %v2754_v22 = vpop.eup %2753  ;;  %v1215_v56 = vadd.f32 %v1213_v5, %v1201_v7  ;;  %v4759_v7 = vld [vmem:[#allocation55_spill] sm:$0xff] }
 0x1fa   :  { %v1360_v35 = vmul.f32 %v2754_v22, %v1357_v1  ;;  %v1038_v59 = vadd.f32 %v1036_v53, %v1024_v28  ;;  %vm1365_vm4 = vweird.f32 %v2754_v22  ;;  %v1227_v28 = vmul.f32 %v3603_v46, %v1222_v40  ;;  %v1126_v1 = vld [vmem:[#allocation5 + $0xe4] sm:$0xff] }
 0x1fb   :  { %v1092_v53 = vmul.f32 %v4758_v44, %v1084_v24  ;;  %vm1366_vm6 = vmor %vm1364_vm5, %vm1365_vm4  ;;  %v1371_v2 = vor.u32 1.1754944e-38, %v1370_v25  ;;  %v1106_v5 = vmul.f32 %v3640_v14, %v4759_v7  ;;  %v1134_v32 = vmul.f32 %v3659_v54, %v1126_v1 }
 0x1fc   :  { %v1361_v19 = vsub.f32 1.0, %v1360_v35  ;;  %v1052_v52 = vadd.f32 %v1050_v58, %v1038_v59  ;;  %1843 = vrot.lane.b32.xlu1 %v3783_v60, %s2852_s6  ;;  %v1236_v35 = vld [vmem:[#allocation5 + $0xfd] sm:$0xff]  ;;  %v1229_v58 = vadd.f32 %v1227_v28, %v1215_v56  ;;  %v1112_v59 = vld [vmem:[#allocation5 + $0xb4] sm:$0xff] }
 0x1fd   :  { %v1120_v24 = vmul.f32 %v3648_v21, %v1112_v59  ;;  %v1250_v56 = vld [vmem:[#allocation5 + $0xe] sm:$0xff] }
 0x1fe   :  { %v1362_v12 = vmul.f32 %v2754_v22, %v1361_v19  ;;  %v1066_v43 = vadd.f32 %v1064_v34, %v1052_v52  ;;  %v4761_v34 = vmov 0  ;;  %v1255_v28 = vmul.f32 %v3656_v4, %v1250_v56 }
 0x1ff   :  { %v4762_v34 = vsel %vm3919_vm8, 4294967295, %v4761_v34 }
 0x200   :  { %v1363_v26 = vadd.f32 %v2754_v22, %v1362_v12  ;;  %v1080_v41 = vadd.f32 %v1078_v6, %v1066_v43  ;;  %4763 = vst [vmem:[#allocation68_spill] sm:$0xff] %v4762_v34  ;;  %v4764_v6 = vld [vmem:[#allocation93_spill] sm:$0xff]  ;;  %v1140_v12 = vld [vmem:[#allocation5 + $0x114] sm:$0xff]  ;;  %v1154_v43 = vld [vmem:[#allocation5 + $0x25] sm:$0xff] }
 0x201   :  { %v1241_v52 = vmul.f32 %v4764_v6, %v1236_v35  ;;  %v1264_v35 = vld [vmem:[#allocation5 + $0x3e] sm:$0xff]  ;;  %v1162_v59 = vmul.f32 %v3692_v57, %v1154_v43  ;;  %v1280_v57 = vld [vmem:[#allocation5 + $0x86] sm:$0xff] }
 0x202   :  { %v1367_v60 = vsel %vm1366_vm6, %v2754_v22, %v1363_v26  ;;  %v1094_v19 = vadd.f32 %v1092_v53, %v1080_v41  ;;  %v1148_v53 = vmul.f32 %v3675_v23, %v1140_v12  ;;  %v4801_v34 = vld [vmem:[#allocation38_spill] sm:$0xff] }
 0x203   :  { %v3923_v40 = vsel %vm1369_vm7, %v1371_v2, %v1367_v60  ;;  %v1243_v22 = vadd.f32 %v1241_v52, %v1229_v58  ;;  %v1168_v2 = vld [vmem:[#allocation5 + $0x55] sm:$0xff]  ;;  %v1182_v60 = vld [vmem:[#allocation5 + $0x85] sm:$0xff]  ;;  %v1269_v58 = vmul.f32 %v3670_v10, %v1264_v35 }
 0x204   :  { %1395 = vst [vmem:[#allocation1] sm:$0xff] %v3923_v40  ;;  %v1108_v25 = vadd.f32 %v1106_v5, %v1094_v19  ;;  %v4765_v52 = vld [vmem:[#allocation95_spill] sm:$0xff]  ;;  %v1190_v56 = vmul.f32 %v3719_v38, %v1182_v60 }
 0x205   :  { %1393 = vst.msk [vmem:[#allocation12] sm:$0x1] %vm3919_vm8, %v3923_v40  ;;  %v1257_v7 = vadd.f32 %v1255_v28, %v1243_v22  ;;  %v4766_v22 = vld [vmem:[#allocation56_spill] sm:$0xff] }
 0x206   :  { %v1122_v26 = vadd.f32 %v1120_v24, %v1108_v25  ;;  %v1176_v24 = vmul.f32 %v4765_v52, %v1168_v2  ;;  %v1278_v25 = vld [vmem:[#allocation5 + $0x6e] sm:$0xff]  ;;  %v1204_v28 = vmul.f32 %v3730_v29, %v4766_v22 }
 0x207   :  { %v1271_v12 = vadd.f32 %v1269_v58, %v1257_v7  ;;  %v1283_v43 = vmul.f32 %v3715_v31, %v1278_v25  ;;  %v4768_v7 = vld [vmem:[#allocation100_spill] sm:$0xff]  ;;  %v1252_v25 = vld [vmem:[#allocation5 + $0x26] sm:$0xff]  ;;  %v1306_v31 = vld [vmem:[#allocation5 + $0x9e] sm:$0xff] }
 0x208   :  { %v1136_v41 = vadd.f32 %v1134_v32, %v1122_v26  ;;  %v1210_v32 = vld [vmem:[#allocation5 + $0xb5] sm:$0xff] }
 0x209   :  { %v1285_v45 = vadd.f32 %v1283_v43, %v1271_v12  ;;  %v1218_v35 = vmul.f32 %v3747_v37, %v1210_v32  ;;  %v1266_v43 = vld [vmem:[#allocation5 + $0x56] sm:$0xff]  ;;  %v1320_v10 = vld [vmem:[#allocation5 + $0xce] sm:$0xff] }
 0x20a   :  { %v1150_v5 = vadd.f32 %v1148_v53, %v1136_v41  ;;  %v1224_v41 = vld [vmem:[#allocation5 + $0xe5] sm:$0xff]  ;;  %v4771_v32 = vld [vmem:[#allocation105_spill] sm:$0xff] }
 0x20b   :  { %v3935_v19 = vld [vmem:[#allocation1 + $0x1] ss:$9 sm:$0xff] }
 0x20c   :  { %1405 = vst [vmem:[#allocation1] sm:$0xff] %v3923_v40  ;;  %v1164_v1 = vadd.f32 %v1162_v59, %v1150_v5  ;;  %v1238_v59 = vld [vmem:[#allocation5 + $0x115] sm:$0xff]  ;;  %v4767_v5 = vld [vmem:[#allocation67_spill] sm:$0xff] }
 0x20d   :  { %v1297_v60 = vmul.f32 %v4768_v7, %v4767_v5  ;;  %v4773_v5 = vld [vmem:[#allocation108_spill] sm:$0xff] }
 0x20e   :  { %v1178_v26 = vadd.f32 %v1176_v24, %v1164_v1  ;;  %v4769_v24 = vld [vmem:[#allocation102_spill] sm:$0xff] }
 0x20f   :  { %v1232_v1 = vmul.f32 %v4769_v24, %v1224_v41  ;;  %v1299_v22 = vadd.f32 %v1297_v60, %v1285_v45  ;;  %v4774_v45 = vld [vmem:[#allocation107_spill] sm:$0xff] }
 0x210   :  { %v1192_v53 = vadd.f32 %v1190_v56, %v1178_v26  ;;  %v4770_v56 = vld [vmem:[#allocation103_spill] sm:$0xff]  ;;  %v1325_v60 = vmul.f32 %v4774_v45, %v1320_v10  ;;  %v1336_v10 = vld [vmem:[#allocation5 + $0x116] sm:$0xff] }
 0x211   :  { %v1246_v26 = vmul.f32 %v4770_v56, %v1238_v59  ;;  %v1288_v59 = vmul.f32 %v3804_v20, %v1280_v57  ;;  %v4778_v20 = vld [vmem:[#allocation17_spill] sm:$0xff] }
 0x212   :  { %v1206_v2 = vadd.f32 %v1204_v28, %v1192_v53  ;;  %v1260_v28 = vmul.f32 %v4771_v32, %v1252_v25  ;;  %v4772_v53 = vld [vmem:[#allocation104_spill] sm:$0xff] }
 0x213   :  { %v3945_v52 = vld [vmem:[#allocation1 + $0x2] ss:$9 sm:$0xff]  ;;  %v1311_v37 = vmul.f32 %v4772_v53, %v1306_v31 }
 0x214   :  { %1415 = vst [vmem:[#allocation1] sm:$0xff] %v3923_v40  ;;  %v1220_v58 = vadd.f32 %v1218_v35, %v1206_v2  ;;  %v1274_v35 = vmul.f32 %v4773_v5, %v1266_v43  ;;  %v1308_v31 = vld [vmem:[#allocation5 + $0xb6] sm:$0xff]  ;;  %v1322_v53 = vld [vmem:[#allocation5 + $0xe6] sm:$0xff] }
 0x215   :  { %v1313_v2 = vadd.f32 %v1311_v37, %v1299_v22  ;;  %v4776_v43 = vld [vmem:[#allocation109_spill] sm:$0xff] }
 0x216   :  { %v1234_v12 = vadd.f32 %v1232_v1, %v1220_v58  ;;  %v1334_v1 = vld [vmem:[#allocation5 + $0xfe] sm:$0xff] }
 0x217   :  { %v1760_v38 = vpop.permute.xlu2 %1759  ;;  %v1327_v25 = vadd.f32 %v1325_v60, %v1313_v2  ;;  %v1339_v37 = vmul.f32 %v4776_v43, %v1334_v1  ;;  %v1344_v2 = vmul.f32 %v3844_v18, %v1336_v10 }
 0x218   :  { %v1248_v29 = vadd.f32 %v1246_v26, %v1234_v12  ;;  %1764 = vst [vmem:[#allocation5 + $0x68] sm:$0xff] %v1760_v38  ;;  %v4775_v26 = vld [vmem:[#allocation87_spill] sm:$0xff] }
 0x219   :  { %v1302_v12 = vmul.f32 %v3781_v16, %v4775_v26  ;;  %v1341_v57 = vadd.f32 %v1339_v37, %v1327_v25 }
 0x21a   :  { %v1262_v41 = vadd.f32 %v1260_v28, %v1248_v29  ;;  %v4777_v29 = vld [vmem:[#allocation110_spill] sm:$0xff] }
 0x21b   :  { %v3955_v24 = vld [vmem:[#allocation1 + $0x3] ss:$9 sm:$0xff]  ;;  %v1316_v22 = vmul.f32 %v4777_v29, %v1308_v31 }
 0x21c   :  { %1425 = vst [vmem:[#allocation1] sm:$0xff] %v3923_v40  ;;  %v1276_v58 = vadd.f32 %v1274_v35, %v1262_v41  ;;  %v1330_v35 = vmul.f32 %v4778_v20, %v1322_v53 }
 0x21e   :  { %v1290_v32 = vadd.f32 %v1288_v59, %v1276_v58  ;;  %v1348_v58 = vadd.f32 %v1341_v57, %v3854_v48  ;;  %v4781_v57 = vld [vmem:[#allocation22_spill] sm:$0xff] }
 0x21f   :  { %v1769_v5 = vpop.permute.xlu2 %1768 }
 0x220   :  { %v1304_v28 = vadd.f32 %v1302_v12, %v1290_v32  ;;  %1773 = vst [vmem:[#allocation5 + $0x98] sm:$0xff] %v1769_v5  ;;  %v4779_v12 = vld [vmem:[#allocation21_spill] sm:$0xff] }
 0x222   :  { %v1318_v45 = vadd.f32 %v1316_v22, %v1304_v28  ;;  %v4780_v22 = vld [vmem:[#allocation20_spill] sm:$0xff] }
 0x223   :  { %v3965_v41 = vld [vmem:[#allocation1 + $0x4] ss:$9 sm:$0xff] }
 0x224   :  { %1435 = vst [vmem:[#allocation1] sm:$0xff] %v3923_v40  ;;  %v1332_v60 = vadd.f32 %v1330_v35, %v1318_v45  ;;  %v1879_v35 = vmul.f32 %v1760_v38, %v4781_v57 }
 0x226   :  { %v1346_v59 = vadd.f32 %v1344_v2, %v1332_v60  ;;  %v1887_v2 = vld [vmem:[#allocation4 + $0x8] sm:$0xff] }
 0x227   :  { %v1726_v31 = vpop.permute.xlu2 %1725 }
 0x228   :  { %v1350_v1 = vadd.f32 %v1348_v58, %v1346_v59  ;;  %1728 = vst.msk [vmem:[#allocation4 + $0x12] sm:$0x1] %vm316_vm3, %v1726_v31  ;;  %v1891_v31 = vmul.f32 %v1887_v2, %v4736_v17 }
 0x22a   :  { %v2701_v32 = vmul.f32 -1.442695, %v1350_v1 }
 0x22b   :  { %v3971_v26 = vld [vmem:[#allocation1 + $0x5] ss:$9 sm:$0xff] }
 0x22c   :  { %1445 = vst [vmem:[#allocation1] sm:$0xff] %v3923_v40  ;;  %2755 = vpow2.f32 %v2701_v32 }
 0x22e   :  { %v1742_v53 = vpop.permute.xlu1 %1741  ;;  %v1751_v25 = vpop.permute.xlu0 %1750 }
 0x22f   :  { %1746 = vst [vmem:[#allocation5 + $0x8] sm:$0xff] %v1742_v53  ;;  %v1855_v37 = vmul.f32 %v1742_v53, %v4779_v12  ;;  %v1867_v45 = vmul.f32 %v1751_v25, %v4780_v22  ;;  %v1703_v28 = vpop.permute.xlu2 %1702  ;;  %v1903_v53 = vmul.f32 %v1769_v5, %v4738_v50 }
 0x230   :  { %1755 = vst [vmem:[#allocation5 + $0x38] sm:$0xff] %v1751_v25 }
 0x231   :  { %1705 = vst.msk [vmem:[#allocation4 + $0x28] sm:$0x1] %vm316_vm3, %v1703_v28  ;;  %v1869_v10 = vadd.f32 %v1867_v45, %v1855_v37 }
 0x232   :  { %v2756_v60 = vpop.eup %2755 }
 0x233   :  { %v3978_v59 = vld [vmem:[#allocation1 + $0x6] ss:$9 sm:$0xff]  ;;  %v1358_v58 = vadd.f32 1.0, %v2756_v60  ;;  %v1881_v1 = vadd.f32 %v1879_v35, %v1869_v10 }
 0x234   :  { %1455 = vst [vmem:[#allocation1] sm:$0xff] %v3923_v40 }
 0x235   :  { %2757 = vrcp.f32 %v1358_v58  ;;  %v1893_v32 = vadd.f32 %v1891_v31, %v1881_v1  ;;  %v1385_v45 = vand.u32 2147483648, %v1358_v58  ;;  %v1383_v10 = vand.u32 2147483647, %v1358_v58 }
 0x236   :  { %vm1379_vm10 = vweird.f32 %v1358_v58  ;;  %v1934_v31 = vld [vmem:[#allocation5 + $0x1] sm:$0xff] }
 0x237   :  { %v1905_v12 = vadd.f32 %v1903_v53, %v1893_v32  ;;  %v1386_v17 = vor.u32 1.1754944e-38, %v1385_v45  ;;  %vm1384_vm12 = vcmp.eq.f32.partialorder %v1383_v10, 8.507059e+37  ;;  %v4783_v53 = vld [vmem:[#allocation27_spill] sm:$0xff]  ;;  %v4784_v10 = vld [vmem:[#allocation28_spill] sm:$0xff] }
 0x238   :  { %v3983_v25 = vpop.permute.xlu2 %1786 }
 0x239   :  { %4782 = vst [vmem:[#allocation78_spill] sm:$0xff] %v3983_v25 }
 0x23a   :  { %1791 = vst [vmem:[#allocation5 + $0xf8] sm:$0xff] %v3983_v25  ;;  %v4798_v25 = vld [vmem:[#allocation37_spill] sm:$0xff] }
 0x23b   :  { %v2758_v38 = vpop.eup %2757  ;;  %v3986_v35 = vld [vmem:[#allocation1 + $0x7] ss:$9 sm:$0xff] }
 0x23c   :  { %v1375_v37 = vmul.f32 %v2758_v38, %v1358_v58  ;;  %vm1380_vm9 = vweird.f32 %v2758_v38 }
 0x23d   :  { %vm1381_vm11 = vmor %vm1379_vm10, %vm1380_vm9 }
 0x23e   :  { %v1376_v22 = vsub.f32 1.0, %v1375_v37 }
 0x240   :  { %v1377_v28 = vmul.f32 %v2758_v38, %v1376_v22  ;;  %v1946_v22 = vld [vmem:[#allocation5 + $0x31] sm:$0xff] }
 0x242   :  { %v1378_v57 = vadd.f32 %v2758_v38, %v1377_v28 }
 0x244   :  { %v1382_v40 = vsel %vm1381_vm11, %v2758_v38, %v1378_v57  ;;  %v1938_v38 = vmul.f32 %v1934_v31, %v4783_v53  ;;  %v1950_v57 = vmul.f32 %v1946_v22, %v4784_v10  ;;  %v1970_v31 = vld [vmem:[#allocation4 + $0x1] sm:$0xff] }
 0x245   :  { %v3988_v50 = vsel %vm1384_vm12, %v1386_v17, %v1382_v40  ;;  %v1958_v17 = vld [vmem:[#allocation5 + $0x61] sm:$0xff] }
 0x246   :  { %1467 = vst [vmem:[#allocation1] sm:$0xff] %v3988_v50  ;;  %v1799_v5 = vpop.permute.xlu1 %1798  ;;  %v1808_v2 = vpop.permute.xlu0 %1807 }
 0x247   :  { %1803 = vst [vmem:[#allocation5 + $0x20] sm:$0xff] %v1799_v5  ;;  %v1859_v60 = vmul.f32 %v1799_v5, %v4734_v15  ;;  %v1871_v1 = vmul.f32 %v1808_v2, %v4737_v27  ;;  %v1940_v27 = vadd.f32 %v1938_v38, %v3890_v55 }
 0x248   :  { %1812 = vst [vmem:[#allocation5 + $0x50] sm:$0xff] %v1808_v2  ;;  %v4785_v2 = vld [vmem:[#allocation29_spill] sm:$0xff] }
 0x249   :  { %1465 = vst.msk [vmem:[#allocation12 + $0x1] sm:$0x1] %vm3919_vm8, %v3988_v50  ;;  %v1873_v58 = vadd.f32 %v1871_v1, %v1859_v60  ;;  %v1952_v5 = vadd.f32 %v1950_v57, %v1940_v27  ;;  %v1962_v60 = vmul.f32 %v1958_v17, %v4785_v2  ;;  %v4788_v2 = vld [vmem:[#allocation31_spill] sm:$0xff] }
 0x24d   :  { %v3996_v32 = vld [vmem:[#allocation1 + $0x1] ss:$9 sm:$0xff] }
 0x24e   :  { %1474 = vst [vmem:[#allocation1] sm:$0xff] %v3988_v50  ;;  %v1817_v37 = vpop.permute.xlu1 %1816 }
 0x24f   :  { %1821 = vst [vmem:[#allocation5 + $0x80] sm:$0xff] %v1817_v37  ;;  %v1696_v45 = vpop.permute.xlu0 %1695  ;;  %v1883_v15 = vmul.f32 %v1817_v37, %v4740_v42  ;;  %v1964_v37 = vadd.f32 %v1962_v60, %v1952_v5  ;;  %v2006_v5 = vld [vmem:[#allocation5 + $0xf1] sm:$0xff] }
 0x250   :  { %1698 = vst.msk [vmem:[#allocation4 + $0x10] sm:$0x1] %vm316_vm3, %v1696_v45  ;;  %v1889_v45 = vld [vmem:[#allocation4 + $0x20] sm:$0xff] }
 0x251   :  { %v1885_v28 = vadd.f32 %v1883_v15, %v1873_v58  ;;  %v4786_v58 = vld [vmem:[#allocation30_spill] sm:$0xff]  ;;  %v1982_v15 = vld [vmem:[#allocation5 + $0x91] sm:$0xff]  ;;  %v1895_v17 = vmul.f32 %v1889_v45, %v4747_v30  ;;  %v4791_v30 = vld [vmem:[#allocation33_spill] sm:$0xff] }
 0x252   :  { %v1974_v38 = vmul.f32 %v1970_v31, %v4786_v58  ;;  %v2010_v45 = vmul.f32 %v2006_v5, %v4791_v30  ;;  %v2032_v29 = vld [vmem:[#allocation5 + $0x4a] sm:$0xff] }
 0x254   :  { %v1976_v27 = vadd.f32 %v1974_v38, %v1964_v37  ;;  %v2018_v37 = vld [vmem:[#allocation5 + $0x2] sm:$0xff] }
 0x255   :  { %v4004_v40 = vld [vmem:[#allocation1 + $0x2] ss:$9 sm:$0xff] }
 0x256   :  { %1481 = vst [vmem:[#allocation1] sm:$0xff] %v3988_v50  ;;  %v1711_v1 = vpop.permute.xlu1 %1710 }
 0x257   :  { %1713 = vst.msk [vmem:[#allocation4 + $0x11] sm:$0x1] %vm316_vm3, %v1711_v1  ;;  %v1778_v42 = vpop.permute.xlu0 %1777  ;;  %v1986_v1 = vmul.f32 %v1982_v15, %v4788_v2  ;;  %v1936_v15 = vld [vmem:[#allocation5 + $0x19] sm:$0xff] }
 0x258   :  { %1782 = vst [vmem:[#allocation5 + $0xc8] sm:$0xff] %v1778_v42  ;;  %v1915_v55 = vmul.f32 %v1778_v42, %v4746_v49  ;;  %v1897_v42 = vadd.f32 %v1895_v17, %v1885_v28  ;;  %v4792_v28 = vld [vmem:[#allocation34_spill] sm:$0xff] }
 0x259   :  { %v1988_v31 = vadd.f32 %v1986_v1, %v1976_v27  ;;  %v2768_v1 = vld [vmem:[#allocation5 + $0x108] sm:$0xff] }
 0x25a   :  { %v4011_v22 = vadd.f32 %v1915_v55, %v1905_v12  ;;  %v4789_v55 = vld [vmem:[#allocation32_spill] sm:$0xff] }
 0x25c   :  { %4787 = vst [vmem:[#allocation44_spill] sm:$0xff] %v4011_v22 }
 0x25d   :  { %v4013_v57 = vld [vmem:[#allocation1 + $0x3] ss:$9 sm:$0xff] }
 0x25e   :  { %1488 = vst [vmem:[#allocation1] sm:$0xff] %v3988_v50  ;;  %v1826_v10 = vpop.permute.xlu1 %1825  ;;  %v4021_v38 = vld [vmem:[#allocation4 + $0x10] sm:$0x3f] }
 0x25f   :  { %v1994_v60 = vld [vmem:[#allocation5 + $0xc1] sm:$0xff]  ;;  %1830 = vst [vmem:[#allocation5 + $0xb0] sm:$0xff] %v1826_v10  ;;  %v1718_v49 = vpop.permute.xlu0 %1717  ;;  %v1907_v12 = vmul.f32 %v1826_v10, %v4751_v51  ;;  %1752 = vrot.lane.b32.xlu0 %v4021_v38, %s2848_s29  ;;  %1743 = vrot.lane.b32.xlu2 %v4021_v38, %s2849_s30  ;;  %v2030_v51 = vld [vmem:[#allocation5 + $0x32] sm:$0xff]  ;;  %v2022_v10 = vmul.f32 %v2018_v37, %v4792_v28  ;;  %v1948_v28 = vld [vmem:[#allocation5 + $0x49] sm:$0xff] }
 0x260   :  { %v1998_v58 = vmul.f32 %v1994_v60, %v4789_v55  ;;  %1720 = vst.msk [vmem:[#allocation4 + $0x29] sm:$0x1] %vm316_vm3, %v1718_v49  ;;  %v4793_v60 = vld [vmem:[#allocation57_spill] sm:$0xff]  ;;  %v4797_v37 = vld [vmem:[#allocation36_spill] sm:$0xff] }
 0x261   :  { %v4023_v22 = vadd.f32 %v1907_v12, %v1897_v42  ;;  %v1930_v49 = vmul.f32 %v2768_v1, %v4793_v60  ;;  %v2042_v42 = vld [vmem:[#allocation5 + $0x62] sm:$0xff]  ;;  %v1960_v1 = vld [vmem:[#allocation5 + $0x79] sm:$0xff] }
 0x262   :  { %v2000_v2 = vadd.f32 %v1998_v58, %v1988_v31  ;;  %v4794_v12 = vld [vmem:[#allocation58_spill] sm:$0xff]  ;;  %v4795_v58 = vld [vmem:[#allocation35_spill] sm:$0xff] }
 0x263   :  { %4790 = vst [vmem:[#allocation74_spill] sm:$0xff] %v4023_v22  ;;  %v1942_v5 = vmul.f32 %v1936_v15, %v4794_v12  ;;  %v2034_v31 = vmul.f32 %v2030_v51, %v4795_v58  ;;  %v2054_v22 = vld [vmem:[#allocation4 + $0x2] sm:$0xff]  ;;  %v1932_v53 = vadd.f32 %v1930_v49, %v3901_v36  ;;  %v4799_v36 = vld [vmem:[#allocation61_spill] sm:$0xff] }
 0x264   :  { %v2012_v27 = vadd.f32 %v2010_v45, %v2000_v2  ;;  %v2046_v45 = vmul.f32 %v2042_v42, %v4797_v37  ;;  %v2066_v15 = vld [vmem:[#allocation5 + $0x92] sm:$0xff]  ;;  %v2058_v51 = vmul.f32 %v2054_v22, %v4798_v25  ;;  %v2078_v58 = vld [vmem:[#allocation5 + $0xc2] sm:$0xff] }
 0x265   :  { %v4031_v17 = vld [vmem:[#allocation1 + $0x4] ss:$9 sm:$0xff]  ;;  %v1944_v12 = vadd.f32 %v1942_v5, %v1932_v53  ;;  %v2070_v42 = vmul.f32 %v2066_v15, %v4801_v34 }
 0x266   :  { %1495 = vst [vmem:[#allocation1] sm:$0xff] %v3988_v50  ;;  %v2024_v30 = vadd.f32 %v2022_v10, %v2012_v27  ;;  %v1733_v55 = vpop.permute.xlu1 %1732  ;;  %v1954_v27 = vmul.f32 %v1948_v28, %v4799_v36  ;;  %v1972_v53 = vld [vmem:[#allocation4 + $0x19] sm:$0xff]  ;;  %v4805_v34 = vld [vmem:[#allocation64_spill] sm:$0xff] }
 0x267   :  { %1735 = vst.msk [vmem:[#allocation4 + $0x2a] sm:$0x1] %vm316_vm3, %v1733_v55  ;;  %v4039_v2 = vpop.permute.xlu0 %1834  ;;  %1761 = vrot.lane.b32.xlu2 %v4021_v38, %s2847_s28  ;;  %v4800_v55 = vld [vmem:[#allocation62_spill] sm:$0xff] }
 0x268   :  { %4796 = vst [vmem:[#allocation23_spill] sm:$0xff] %v4039_v2  ;;  %v2036_v60 = vadd.f32 %v2034_v31, %v2024_v30  ;;  %v1966_v49 = vmul.f32 %v1960_v1, %v4800_v55  ;;  %v2090_v30 = vld [vmem:[#allocation5 + $0xf2] sm:$0xff]  ;;  %v1956_v31 = vadd.f32 %v1954_v27, %v1944_v12  ;;  %v2102_v28 = vld [vmem:[#allocation5 + $0x3] sm:$0xff]  ;;  %v1978_v55 = vmul.f32 %v1972_v53, %v4805_v34 }
 0x269   :  { %1839 = vst [vmem:[#allocation5 + $0xe0] sm:$0xff] %v4039_v2  ;;  %v4804_v1 = vld [vmem:[#allocation40_spill] sm:$0xff]  ;;  %v4806_v27 = vld [vmem:[#allocation65_spill] sm:$0xff] }
 0x26a   :  { %v2048_v10 = vadd.f32 %v2046_v45, %v2036_v60  ;;  %v4802_v60 = vld [vmem:[#allocation39_spill] sm:$0xff]  ;;  %v1968_v36 = vadd.f32 %v1966_v49, %v1956_v31  ;;  %v2094_v15 = vmul.f32 %v2090_v30, %v4804_v1  ;;  %v2126_v49 = vld [vmem:[#allocation5 + $0x63] sm:$0xff] }
 0x26b   :  { %v2082_v5 = vmul.f32 %v2078_v58, %v4802_v60  ;;  %v1984_v45 = vld [vmem:[#allocation5 + $0xa9] sm:$0xff]  ;;  %v2114_v12 = vld [vmem:[#allocation5 + $0x33] sm:$0xff]  ;;  %v4809_v53 = vld [vmem:[#allocation49_spill] sm:$0xff] }
 0x26c   :  { %v2060_v37 = vadd.f32 %v2058_v51, %v2048_v10  ;;  %v1990_v2 = vmul.f32 %v1984_v45, %v4806_v27  ;;  %v1980_v30 = vadd.f32 %v1978_v55, %v1968_v36  ;;  %v4808_v31 = vld [vmem:[#allocation70_spill] sm:$0xff]  ;;  %v2020_v60 = vld [vmem:[#allocation5 + $0x1a] sm:$0xff] }
 0x26d   :  { %v4049_v48 = vld [vmem:[#allocation1 + $0x5] ss:$9 sm:$0xff] }
 0x26e   :  { %1502 = vst [vmem:[#allocation1] sm:$0xff] %v3988_v50  ;;  %v2072_v22 = vadd.f32 %v2070_v42, %v2060_v37  ;;  %v4053_v25 = vpop.permute.xlu1 %1843  ;;  %v4059_v18 = vld [vmem:[#allocation4 + $0x28] sm:$0x3f] }
 0x26f   :  { %4803 = vst [vmem:[#allocation43_spill] sm:$0xff] %v4053_v25  ;;  %v4807_v37 = vld [vmem:[#allocation45_spill] sm:$0xff]  ;;  %1770 = vrot.lane.b32.xlu2 %v4021_v38, %s2851_s5  ;;  %1809 = vrot.lane.b32.xlu0 %v4059_v18, %s2848_s29  ;;  %v2150_v36 = vld [vmem:[#allocation5 + $0x93] sm:$0xff] }
 0x270   :  { %1848 = vst [vmem:[#allocation5 + $0x110] sm:$0xff] %v4053_v25  ;;  %v2084_v51 = vadd.f32 %v2082_v5, %v2072_v22  ;;  %v1996_v10 = vld [vmem:[#allocation5 + $0xd9] sm:$0xff]  ;;  %v2106_v58 = vmul.f32 %v2102_v28, %v4807_v37  ;;  %1800 = vrot.lane.b32.xlu1 %v4059_v18, %s2849_s30  ;;  %v2118_v5 = vmul.f32 %v2114_v12, %v4809_v53  ;;  %v2162_v53 = vld [vmem:[#allocation5 + $0xc3] sm:$0xff] }
 0x271   :  { %v2002_v22 = vmul.f32 %v1996_v10, %v4808_v31  ;;  %v2138_v28 = vld [vmem:[#allocation4 + $0x3] sm:$0xff] }
 0x272   :  { %v2096_v42 = vadd.f32 %v2094_v15, %v2084_v51  ;;  %v1992_v15 = vadd.f32 %v1990_v2, %v1980_v30  ;;  %v4810_v51 = vld [vmem:[#allocation51_spill] sm:$0xff]  ;;  %v4812_v25 = vld [vmem:[#allocation52_spill] sm:$0xff]  ;;  %v4814_v2 = vld [vmem:[#allocation53_spill] sm:$0xff] }
 0x273   :  { %v2130_v37 = vmul.f32 %v2126_v49, %v4810_v51  ;;  %v4811_v10 = vld [vmem:[#allocation71_spill] sm:$0xff]  ;;  %v2142_v20 = vmul.f32 %v2138_v28, %v4812_v25  ;;  %v2154_v30 = vmul.f32 %v2150_v36, %v4814_v2  ;;  %v2198_v2 = vld [vmem:[#allocation5 + $0x34] sm:$0xff] }
 0x274   :  { %v2108_v45 = vadd.f32 %v2106_v58, %v2096_v42  ;;  %v2004_v55 = vadd.f32 %v2002_v22, %v1992_v15  ;;  %v4813_v58 = vld [vmem:[#allocation73_spill] sm:$0xff]  ;;  %v2174_v49 = vld [vmem:[#allocation5 + $0xf3] sm:$0xff] }
 0x275   :  { %v4070_v1 = vld [vmem:[#allocation1 + $0x6] ss:$9 sm:$0xff]  ;;  %v2026_v42 = vmul.f32 %v2020_v60, %v4813_v58 }
 0x276   :  { %1509 = vst [vmem:[#allocation1] sm:$0xff] %v3988_v50  ;;  %v2120_v27 = vadd.f32 %v2118_v5, %v2108_v45  ;;  %v2044_v50 = vld [vmem:[#allocation5 + $0x7a] sm:$0xff]  ;;  %v2056_v60 = vld [vmem:[#allocation4 + $0x1a] sm:$0xff] }
 0x277   :  { %v2008_v34 = vld [vmem:[#allocation5 + $0x109] sm:$0xff]  ;;  %1788 = vrot.lane.b32.xlu2 %v4021_v38, %s2852_s6  ;;  %1779 = vrot.lane.b32.xlu0 %v4021_v38, %s2850_s4  ;;  %v2080_v51 = vld [vmem:[#allocation5 + $0xda] sm:$0xff] }
 0x278   :  { %v2014_v31 = vmul.f32 %v2008_v34, %v4811_v10  ;;  %v2132_v12 = vadd.f32 %v2130_v37, %v2120_v27  ;;  %v2038_v34 = vmul.f32 %v2032_v29, %v4731_v39  ;;  %1818 = vrot.lane.b32.xlu1 %v4059_v18, %s2847_s28  ;;  %v4815_v37 = vld [vmem:[#allocation54_spill] sm:$0xff]  ;;  %v4816_v28 = vld [vmem:[#allocation59_spill] sm:$0xff] }
 0x279   :  { %v2186_v5 = vld [vmem:[#allocation5 + $0x4] sm:$0xff]  ;;  %v2178_v15 = vmul.f32 %v2174_v49, %v4816_v28  ;;  %v4817_v38 = vld [vmem:[#allocation79_spill] sm:$0xff]  ;;  %v2222_v49 = vld [vmem:[#allocation4 + $0x4] sm:$0xff] }
 0x27a   :  { %v2016_v43 = vadd.f32 %v2014_v31, %v2004_v55  ;;  %v2144_v16 = vadd.f32 %v2142_v20, %v2132_v12  ;;  %v2166_v31 = vmul.f32 %v2162_v53, %v4815_v37  ;;  %v2050_v20 = vmul.f32 %v2044_v50, %v4733_v11  ;;  %v2068_v55 = vld [vmem:[#allocation5 + $0xaa] sm:$0xff]  ;;  %v2128_v28 = vld [vmem:[#allocation5 + $0x7b] sm:$0xff] }
 0x27b   :  { %v2062_v12 = vmul.f32 %v2056_v60, %v4817_v38  ;;  %v2210_v39 = vld [vmem:[#allocation5 + $0x64] sm:$0xff] }
 0x27c   :  { %v2028_v22 = vadd.f32 %v2026_v42, %v2016_v43  ;;  %v2156_v27 = vadd.f32 %v2154_v30, %v2144_v16  ;;  %v4818_v43 = vld [vmem:[#allocation60_spill] sm:$0xff]  ;;  %v2074_v16 = vmul.f32 %v2068_v55, %v4742_v63  ;;  %v4819_v30 = vld [vmem:[#allocation63_spill] sm:$0xff]  ;;  %v4823_v55 = vld [vmem:[#allocation69_spill] sm:$0xff] }
 0x27d   :  { %v2190_v42 = vmul.f32 %v2186_v5, %v4818_v43  ;;  %v2202_v37 = vmul.f32 %v2198_v2, %v4819_v30  ;;  %v2234_v2 = vld [vmem:[#allocation5 + $0x94] sm:$0xff]  ;;  %v2246_v43 = vld [vmem:[#allocation5 + $0xc4] sm:$0xff] }
 0x27e   :  { %v2040_v45 = vadd.f32 %v2038_v34, %v2028_v22  ;;  %v2168_v36 = vadd.f32 %v2166_v31, %v2156_v27  ;;  %v2092_v34 = vld [vmem:[#allocation5 + $0x10a] sm:$0xff]  ;;  %v2258_v63 = vld [vmem:[#allocation5 + $0xf4] sm:$0xff] }
 0x27f   :  { %1398 = vrot.lane.b32.xlu2 %v3935_v19, %s2844_s26  ;;  %1836 = vrot.lane.b32.xlu0 %v4059_v18, %s2850_s4  ;;  %v4820_v22 = vld [vmem:[#allocation82_spill] sm:$0xff]  ;;  %v2226_v19 = vmul.f32 %v2222_v49, %v4823_v55 }
 0x280   :  { %v2052_v29 = vadd.f32 %v2050_v20, %v2040_v45  ;;  %v2180_v25 = vadd.f32 %v2178_v15, %v2168_v36  ;;  %v2086_v60 = vmul.f32 %v2080_v51, %v4820_v22  ;;  %1827 = vrot.lane.b32.xlu1 %v4059_v18, %s2851_s5  ;;  %v4821_v31 = vld [vmem:[#allocation66_spill] sm:$0xff]  ;;  %v2104_v20 = vld [vmem:[#allocation5 + $0x1b] sm:$0xff] }
 0x281   :  { %v2214_v5 = vmul.f32 %v2210_v39, %v4821_v31  ;;  %v4822_v15 = vld [vmem:[#allocation84_spill] sm:$0xff]  ;;  %v2270_v49 = vld [vmem:[#allocation5 + $0x5] sm:$0xff] }
 0x282   :  { %v2064_v53 = vadd.f32 %v2062_v12, %v2052_v29  ;;  %v2192_v50 = vadd.f32 %v2190_v42, %v2180_v25  ;;  %v2098_v36 = vmul.f32 %v2092_v34, %v4822_v15  ;;  %v2116_v12 = vld [vmem:[#allocation5 + $0x4b] sm:$0xff]  ;;  %v4824_v42 = vld [vmem:[#allocation85_spill] sm:$0xff] }
 0x283   :  { %v2110_v30 = vmul.f32 %v2104_v20, %v4824_v42  ;;  %v2122_v39 = vmul.f32 %v2116_v12, %v4750_v8 }
 0x284   :  { %v2076_v27 = vadd.f32 %v2074_v16, %v2064_v53  ;;  %v2204_v45 = vadd.f32 %v2202_v37, %v2192_v50  ;;  %v4825_v16 = vld [vmem:[#allocation72_spill] sm:$0xff]  ;;  %v2140_v50 = vld [vmem:[#allocation4 + $0x1b] sm:$0xff] }
 0x285   :  { %v2238_v53 = vmul.f32 %v2234_v2, %v4825_v16 }
 0x286   :  { %v2088_v25 = vadd.f32 %v2086_v60, %v2076_v27  ;;  %v2216_v29 = vadd.f32 %v2214_v5, %v2204_v45  ;;  %v4826_v27 = vld [vmem:[#allocation77_spill] sm:$0xff]  ;;  %v2134_v5 = vmul.f32 %v2128_v28, %v3534_v13  ;;  %v4827_v45 = vld [vmem:[#allocation80_spill] sm:$0xff] }
 0x287   :  { %v2250_v34 = vmul.f32 %v2246_v43, %v4826_v27  ;;  %1428 = vrot.lane.b32.xlu2 %v3965_v41, %s2842_s24  ;;  %1408 = vrot.lane.b32.xlu0 %v3945_v52, %s2845_s27  ;;  %v2262_v2 = vmul.f32 %v2258_v63, %v4827_v45  ;;  %v2282_v43 = vld [vmem:[#allocation5 + $0x35] sm:$0xff]  ;;  %v2294_v52 = vld [vmem:[#allocation5 + $0x65] sm:$0xff] }
 0x288   :  { %v2100_v51 = vadd.f32 %v2098_v36, %v2088_v25  ;;  %v2228_v22 = vadd.f32 %v2226_v19, %v2216_v29  ;;  %1845 = vrot.lane.b32.xlu1 %v4059_v18, %s2852_s6  ;;  %v2152_v25 = vld [vmem:[#allocation5 + $0xab] sm:$0xff]  ;;  %v2164_v29 = vld [vmem:[#allocation5 + $0xdb] sm:$0xff] }
 0x289   :  { %v4828_v19 = vld [vmem:[#allocation83_spill] sm:$0xff]  ;;  %v2170_v63 = vmul.f32 %v2164_v29, %v3564_v61 }
 0x28a   :  { %v2112_v37 = vadd.f32 %v2110_v30, %v2100_v51  ;;  %v2240_v60 = vadd.f32 %v2238_v53, %v2228_v22  ;;  %v2146_v22 = vmul.f32 %v2140_v50, %v4753_v47  ;;  %v2274_v41 = vmul.f32 %v2270_v49, %v4828_v19  ;;  %v2176_v18 = vld [vmem:[#allocation5 + $0x10b] sm:$0xff]  ;;  %v2318_v49 = vld [vmem:[#allocation5 + $0x95] sm:$0xff] }
 0x28b   :  { %v2158_v51 = vmul.f32 %v2152_v25, %v3556_v9  ;;  %v2286_v53 = vmul.f32 %v2282_v43, %v3503_v0  ;;  %v2298_v50 = vmul.f32 %v2294_v52, %v3529_v3 }
 0x28c   :  { %v2124_v20 = vadd.f32 %v2122_v39, %v2112_v37  ;;  %v2252_v30 = vadd.f32 %v2250_v34, %v2240_v60  ;;  %v2306_v37 = vld [vmem:[#allocation4 + $0x5] sm:$0xff] }
 0x28d   :  { %v2188_v34 = vld [vmem:[#allocation5 + $0x1c] sm:$0xff] }
 0x28e   :  { %v2136_v36 = vadd.f32 %v2134_v5, %v2124_v20  ;;  %v2264_v12 = vadd.f32 %v2262_v2, %v2252_v30  ;;  %v2182_v2 = vmul.f32 %v2176_v18, %v3579_v33  ;;  %v4829_v30 = vld [vmem:[#allocation89_spill] sm:$0xff] }
 0x28f   :  { %1458 = vrot.lane.b32.xlu2 %v3986_v35, %s2841_s23  ;;  %1438 = vrot.lane.b32.xlu0 %v3971_v26, %s2840_s2  ;;  %v2310_v25 = vmul.f32 %v2306_v37, %v4829_v30  ;;  %v2212_v35 = vld [vmem:[#allocation5 + $0x7c] sm:$0xff]  ;;  %v4831_v26 = vld [vmem:[#allocation91_spill] sm:$0xff] }
 0x290   :  { %v2148_v28 = vadd.f32 %v2146_v22, %v2136_v36  ;;  %v2276_v39 = vadd.f32 %v2274_v41, %v2264_v12  ;;  %1418 = vrot.lane.b32.xlu1 %v3955_v24, %s2839_s0  ;;  %v2200_v22 = vld [vmem:[#allocation5 + $0x4c] sm:$0xff]  ;;  %v2194_v36 = vmul.f32 %v2188_v34, %v3590_v62  ;;  %v4830_v12 = vld [vmem:[#allocation90_spill] sm:$0xff] }
 0x291   :  { %v2322_v29 = vmul.f32 %v2318_v49, %v4830_v12 }
 0x292   :  { %v2160_v60 = vadd.f32 %v2158_v51, %v2148_v28  ;;  %v2288_v5 = vadd.f32 %v2286_v53, %v2276_v39  ;;  %v2330_v51 = vld [vmem:[#allocation5 + $0xc5] sm:$0xff]  ;;  %v2206_v28 = vmul.f32 %v2200_v22, %v4831_v26 }
 0x293   :  { %v2224_v39 = vld [vmem:[#allocation4 + $0x1c] sm:$0xff]  ;;  %v2334_v24 = vmul.f32 %v2330_v51, %v3603_v46 }
 0x294   :  { %v2172_v20 = vadd.f32 %v2170_v63, %v2160_v60  ;;  %v2300_v43 = vadd.f32 %v2298_v50, %v2288_v5  ;;  %v2218_v63 = vmul.f32 %v2212_v35, %v4758_v44  ;;  %v2342_v60 = vld [vmem:[#allocation5 + $0xf5] sm:$0xff]  ;;  %v2236_v50 = vld [vmem:[#allocation5 + $0xac] sm:$0xff]  ;;  %v2230_v34 = vmul.f32 %v2224_v39, %v3640_v14 }
 0x296   :  { %v2184_v41 = vadd.f32 %v2182_v2, %v2172_v20  ;;  %v2312_v52 = vadd.f32 %v2310_v25, %v2300_v43  ;;  %v2248_v20 = vld [vmem:[#allocation5 + $0xdc] sm:$0xff]  ;;  %v2346_v2 = vmul.f32 %v2342_v60, %v4764_v6  ;;  %v2242_v25 = vmul.f32 %v2236_v50, %v3648_v21  ;;  %v2354_v43 = vld [vmem:[#allocation5 + $0x6] sm:$0xff] }
 0x297   :  { %1484 = vrot.lane.b32.xlu2 %v4013_v57, %s2839_s0  ;;  %1470 = vrot.lane.b32.xlu0 %v3996_v32, %s2844_s26  ;;  %v2254_v57 = vmul.f32 %v2248_v20, %v3659_v54  ;;  %v2272_v32 = vld [vmem:[#allocation5 + $0x1d] sm:$0xff]  ;;  %v2358_v35 = vmul.f32 %v2354_v43, %v3656_v4  ;;  %v4834_v50 = vld [vmem:[#allocation95_spill] sm:$0xff] }
 0x298   :  { %v2196_v53 = vadd.f32 %v2194_v36, %v2184_v41  ;;  %v2324_v18 = vadd.f32 %v2322_v29, %v2312_v52  ;;  %1448 = vrot.lane.b32.xlu1 %v3978_v59, %s2843_s25  ;;  %v2260_v36 = vld [vmem:[#allocation5 + $0x10c] sm:$0xff] }
 0x299   :  { %v2266_v51 = vmul.f32 %v2260_v36, %v3675_v23  ;;  %v2284_v59 = vld [vmem:[#allocation5 + $0x4d] sm:$0xff] }
 0x29a   :  { %v2208_v37 = vadd.f32 %v2206_v28, %v2196_v53  ;;  %v2336_v5 = vadd.f32 %v2334_v24, %v2324_v18  ;;  %v2366_v28 = vld [vmem:[#allocation5 + $0x36] sm:$0xff]  ;;  %v2378_v20 = vld [vmem:[#allocation5 + $0x66] sm:$0xff] }
 0x29b   :  { %v4832_v53 = vld [vmem:[#allocation96_spill] sm:$0xff]  ;;  %v2296_v24 = vld [vmem:[#allocation5 + $0x7d] sm:$0xff]  ;;  %v4836_v43 = vld [vmem:[#allocation99_spill] sm:$0xff] }
 0x29c   :  { %v2220_v49 = vadd.f32 %v2218_v63, %v2208_v37  ;;  %v2348_v41 = vadd.f32 %v2346_v2, %v2336_v5  ;;  %v2278_v39 = vmul.f32 %v2272_v32, %v4832_v53  ;;  %v4833_v37 = vld [vmem:[#allocation94_spill] sm:$0xff]  ;;  %v2390_v32 = vld [vmem:[#allocation4 + $0x6] sm:$0xff] }
 0x29d   :  { %v2370_v60 = vmul.f32 %v2366_v28, %v4833_v37  ;;  %v4835_v2 = vld [vmem:[#allocation98_spill] sm:$0xff] }
 0x29e   :  { %v2232_v22 = vadd.f32 %v2230_v34, %v2220_v49  ;;  %v2360_v18 = vadd.f32 %v2358_v35, %v2348_v41  ;;  %v2290_v34 = vmul.f32 %v2284_v59, %v4834_v50  ;;  %v2308_v49 = vld [vmem:[#allocation4 + $0x1d] sm:$0xff]  ;;  %v4837_v41 = vld [vmem:[#allocation97_spill] sm:$0xff] }
 0x29f   :  { %1505 = vrot.lane.b32.xlu2 %v4070_v1, %s2843_s25  ;;  %1491 = vrot.lane.b32.xlu0 %v4031_v17, %s2842_s24  ;;  %v2302_v1 = vmul.f32 %v2296_v24, %v4835_v2  ;;  %v2320_v17 = vld [vmem:[#allocation5 + $0xad] sm:$0xff]  ;;  %v2314_v36 = vmul.f32 %v2308_v49, %v4836_v43 }
 0x2a0   :  { %v2244_v29 = vadd.f32 %v2242_v25, %v2232_v22  ;;  %1477 = vrot.lane.b32.xlu1 %v4004_v40, %s2845_s27  ;;  %v2372_v25 = vadd.f32 %v2370_v60, %v2360_v18  ;;  %v2332_v40 = vld [vmem:[#allocation5 + $0xdd] sm:$0xff]  ;;  %v2344_v59 = vld [vmem:[#allocation5 + $0x10d] sm:$0xff] }
 0x2a1   :  { %v4839_v18 = vld [vmem:[#allocation102_spill] sm:$0xff]  ;;  %v2402_v60 = vld [vmem:[#allocation5 + $0x96] sm:$0xff] }
 0x2a2   :  { %v2256_v52 = vadd.f32 %v2254_v57, %v2244_v29  ;;  %v2382_v57 = vmul.f32 %v2378_v20, %v4837_v41  ;;  %v2350_v20 = vmul.f32 %v2344_v59, %v4770_v56  ;;  %v2404_v59 = vld [vmem:[#allocation5 + $0xae] sm:$0xff] }
 0x2a4   :  { %v2268_v63 = vadd.f32 %v2266_v51, %v2256_v52  ;;  %v2384_v35 = vadd.f32 %v2382_v57, %v2372_v25  ;;  %v4838_v52 = vld [vmem:[#allocation101_spill] sm:$0xff]  ;;  %v4840_v25 = vld [vmem:[#allocation104_spill] sm:$0xff] }
 0x2a5   :  { %v2326_v51 = vmul.f32 %v2320_v17, %v4838_v52  ;;  %v4841_v17 = vld [vmem:[#allocation105_spill] sm:$0xff]  ;;  %v4842_v52 = vld [vmem:[#allocation108_spill] sm:$0xff] }
 0x2a6   :  { %v2280_v5 = vadd.f32 %v2278_v39, %v2268_v63  ;;  %v2394_v39 = vmul.f32 %v2390_v32, %v4768_v7  ;;  %v2338_v63 = vmul.f32 %v2332_v40, %v4839_v18  ;;  %v2392_v40 = vld [vmem:[#allocation4 + $0x1e] sm:$0xff] }
 0x2a7   :  { %v4844_v18 = vld [vmem:[#allocation107_spill] sm:$0xff] }
 0x2a8   :  { %v2292_v22 = vadd.f32 %v2290_v34, %v2280_v5  ;;  %1498 = vrot.lane.b32.xlu1 %v4049_v48, %s2840_s2  ;;  %v2356_v34 = vld [vmem:[#allocation5 + $0x1e] sm:$0xff]  ;;  %v2396_v5 = vadd.f32 %v2394_v39, %v2384_v35  ;;  %v2414_v48 = vld [vmem:[#allocation5 + $0xc6] sm:$0xff] }
 0x2a9   :  { %v2418_v35 = vmul.f32 %v2414_v48, %v4844_v18 }
 0x2aa   :  { %v2304_v29 = vadd.f32 %v2302_v1, %v2292_v22  ;;  %v2368_v1 = vld [vmem:[#allocation5 + $0x4e] sm:$0xff]  ;;  %v2406_v22 = vmul.f32 %v2402_v60, %v4840_v25 }
 0x2ab   :  { %v2374_v41 = vmul.f32 %v2368_v1, %v4842_v52 }
 0x2ac   :  { %v2316_v28 = vadd.f32 %v2314_v36, %v2304_v29  ;;  %v2362_v36 = vmul.f32 %v2356_v34, %v4841_v17  ;;  %v2380_v29 = vld [vmem:[#allocation5 + $0x7e] sm:$0xff]  ;;  %v2408_v32 = vadd.f32 %v2406_v22, %v2396_v5  ;;  %v2428_v5 = vld [vmem:[#allocation5 + $0x10e] sm:$0xff] }
 0x2ad   :  { %v2416_v34 = vld [vmem:[#allocation5 + $0xde] sm:$0xff] }
 0x2ae   :  { %v2328_v24 = vadd.f32 %v2326_v51, %v2316_v28  ;;  %v4843_v51 = vld [vmem:[#allocation76_spill] sm:$0xff]  ;;  %v2420_v60 = vadd.f32 %v2418_v35, %v2408_v32  ;;  %v4847_v17 = vld [vmem:[#allocation110_spill] sm:$0xff] }
 0x2af   :  { %v2386_v28 = vmul.f32 %v2380_v29, %v4843_v51  ;;  %v2410_v43 = vmul.f32 %v2404_v59, %v4847_v17 }
 0x2b0   :  { %v2340_v49 = vadd.f32 %v2338_v63, %v2328_v24  ;;  %v2426_v63 = vld [vmem:[#allocation5 + $0xf6] sm:$0xff]  ;;  %v4845_v24 = vld [vmem:[#allocation106_spill] sm:$0xff] }
 0x2b1   :  { %v2398_v56 = vmul.f32 %v2392_v40, %v4845_v24  ;;  %v4850_v40 = vld [vmem:[#allocation41_spill] sm:$0xff] }
 0x2b2   :  { %v2352_v57 = vadd.f32 %v2350_v20, %v2340_v49  ;;  %v4846_v49 = vld [vmem:[#allocation109_spill] sm:$0xff] }
 0x2b3   :  { %v2430_v20 = vmul.f32 %v2426_v63, %v4846_v49  ;;  %v4871_v49 = vld [vmem:[#allocation32_spill] sm:$0xff]  ;;  %v4872_v24 = vld [vmem:[#allocation33_spill] sm:$0xff] }
 0x2b4   :  { %v2364_v7 = vadd.f32 %v2362_v36, %v2352_v57  ;;  %v4848_v36 = vld [vmem:[#allocation17_spill] sm:$0xff] }
 0x2b5   :  { %v2432_v22 = vadd.f32 %v2430_v20, %v2420_v60  ;;  %v2422_v57 = vmul.f32 %v2416_v34, %v4848_v36  ;;  %v4851_v20 = vlaneseq }
 0x2b6   :  { %v2376_v39 = vadd.f32 %v2374_v41, %v2364_v7  ;;  %v4849_v7 = vld [vmem:[#allocation16_spill] sm:$0xff] }
 0x2b7   :  { %v2434_v41 = vmul.f32 %v2428_v5, %v4849_v7  ;;  %v2438_v32 = vadd.f32 %v2432_v22, %v4850_v40  ;;  %vm1401_vm13 = vcmp.ge.s32.totalorder %v4851_v20, 16  ;;  %vm1402_vm14 = vcmp.lt.s32.totalorder %v4851_v20, 32  ;;  %v4866_v40 = vld [vmem:[#allocation57_spill] sm:$0xff] }
 0x2b8   :  { %v2388_v25 = vadd.f32 %v2386_v28, %v2376_v39  ;;  %vm4176_vm0 = vmand %vm1401_vm13, %vm1402_vm14  ;;  %v4852_v22 = vmov 0  ;;  %vm1411_vm4 = vcmp.ge.s32.totalorder %v4851_v20, 32  ;;  %vm1412_vm5 = vcmp.lt.s32.totalorder %v4851_v20, 48 }
 0x2b9   :  { %v1744_v51 = vpop.permute.xlu2 %1743  ;;  %v4853_v22 = vsel %vm4176_vm0, 4294967295, %v4852_v22  ;;  %vm4217_vm6 = vmand %vm1411_vm4, %vm1412_vm5  ;;  %vm4229_vm7 = vcmp.ge.s32.totalorder %v4851_v20, 48  ;;  %vm1422_vm9 = vcmp.lt.s32.totalorder %v4851_v20, 64  ;;  %vm1431_vm10 = vcmp.ge.s32.totalorder %v4851_v20, 64 }
 0x2ba   :  { %v2400_v1 = vadd.f32 %v2398_v56, %v2388_v25  ;;  %1747 = vst [vmem:[#allocation5 + $0x10] sm:$0x3f] %v1744_v51  ;;  %vm1432_vm11 = vcmp.lt.s32.totalorder %v4851_v20, 80  ;;  %vm1441_vm12 = vcmp.ge.s32.totalorder %v4851_v20, 80  ;;  %vm1442_vm13 = vcmp.lt.s32.totalorder %v4851_v20, 96  ;;  %vm4244_vm14 = vmand %vm4229_vm7, %vm1422_vm9 }
 0x2bb   :  { %4854 = vst [vmem:[#allocation24_spill] sm:$0xff] %v4853_v22  ;;  %vm1461_vm4 = vcmp.ge.s32.totalorder %v4851_v20, 112  ;;  %vm1462_vm5 = vcmp.lt.s32.totalorder %v4851_v20, 128 }
 0x2bc   :  { %v2412_v29 = vadd.f32 %v2410_v43, %v2400_v1  ;;  %vm4293_vm9 = vmand %vm1461_vm4, %vm1462_vm5 }
 0x2be   :  { %v2424_v48 = vadd.f32 %v2422_v57, %v2412_v29 }
 0x2c0   :  { %v2436_v18 = vadd.f32 %v2434_v41, %v2424_v48 }
 0x2c1   :  { %v1762_v39 = vpop.permute.xlu2 %1761 }
 0x2c2   :  { %v2440_v28 = vadd.f32 %v2438_v32, %v2436_v18  ;;  %1765 = vst [vmem:[#allocation5 + $0x70] sm:$0x3f] %v1762_v39  ;;  %v1935_v39 = vld [vmem:[#allocation5 + $0x9] sm:$0xff] }
 0x2c4   :  { %v2702_v35 = vmul.f32 -1.442695, %v2440_v28  ;;  %v4862_v28 = vld [vmem:[#allocation29_spill] sm:$0xff] }
 0x2c6   :  { %2759 = vpow2.f32 %v2702_v35  ;;  %v4187_v35 = vld [vmem:[#allocation1 + $0x7] ss:$9 sm:$0xff] }
 0x2c7   :  { %4856 = vst [vmem:[#allocation18_spill] sm:$0xff] %v4187_v35 }
 0x2c9   :  { %v1771_v25 = vpop.permute.xlu2 %1770 }
 0x2ca   :  { %1774 = vst [vmem:[#allocation5 + $0xa0] sm:$0x3f] %v1771_v25  ;;  %v4858_v25 = vld [vmem:[#allocation78_spill] sm:$0xff] }
 0x2cc   :  { %v2760_v63 = vpop.eup %2759 }
 0x2cd   :  { %v2448_v56 = vadd.f32 1.0, %v2760_v63 }
 0x2cf   :  { %2761 = vrcp.f32 %v2448_v56  ;;  %v2461_v18 = vand.u32 2147483648, %v2448_v56  ;;  %v2459_v5 = vand.u32 2147483647, %v2448_v56  ;;  %vm2455_vm1 = vweird.f32 %v2448_v56 }
 0x2d1   :  { %v1753_v43 = vpop.permute.xlu0 %1752  ;;  %v1789_v60 = vpop.permute.xlu2 %1788  ;;  %v2462_v29 = vor.u32 1.1754944e-38, %v2461_v18  ;;  %vm2460_vm3 = vcmp.eq.f32.partialorder %v2459_v5, 8.507059e+37 }
 0x2d2   :  { %1756 = vst [vmem:[#allocation5 + $0x40] sm:$0x3f] %v1753_v43 }
 0x2d3   :  { %1792 = vst [vmem:[#allocation5 + $0x100] sm:$0x3f] %v1789_v60 }
 0x2d5   :  { %v2762_v59 = vpop.eup %2761 }
 0x2d6   :  { %v2451_v34 = vmul.f32 %v2762_v59, %v2448_v56  ;;  %vm2456_vm15 = vweird.f32 %v2762_v59  ;;  %v4857_v56 = vld [vmem:[#allocation26_spill] sm:$0xff] }
 0x2d7   :  { %vm2457_vm2 = vmor %vm2455_vm1, %vm2456_vm15  ;;  %v1927_v43 = vmul.f32 %v4858_v25, %v4857_v56  ;;  %v1971_v25 = vld [vmem:[#allocation4 + $0x9] sm:$0xff] }
 0x2d8   :  { %v2452_v51 = vsub.f32 1.0, %v2451_v34  ;;  %vm4249_vm15 = vmand %vm1431_vm10, %vm1432_vm11 }
 0x2d9   :  { %v1399_v48 = vpop.permute.xlu2 %1398  ;;  %v1947_v63 = vld [vmem:[#allocation5 + $0x39] sm:$0xff]  ;;  %vm4254_vm1 = vmand %vm1441_vm12, %vm1442_vm13 }
 0x2da   :  { %v2453_v1 = vmul.f32 %v2762_v59, %v2452_v51  ;;  %1404 = vst.msk [vmem:[#allocation12] sm:$0x1] %vm4176_vm0, %v1399_v48  ;;  %v4860_v51 = vld [vmem:[#allocation44_spill] sm:$0xff] }
 0x2db   :  { %v1929_v18 = vadd.f32 %v1927_v43, %v4860_v51  ;;  %v4863_v51 = vld [vmem:[#allocation50_spill] sm:$0xff] }
 0x2dc   :  { %v2454_v57 = vadd.f32 %v2762_v59, %v2453_v1  ;;  %v4861_v1 = vld [vmem:[#allocation28_spill] sm:$0xff] }
 0x2dd   :  { %v1951_v5 = vmul.f32 %v1947_v63, %v4861_v1  ;;  %v4864_v63 = vld [vmem:[#allocation23_spill] sm:$0xff] }
 0x2de   :  { %v2458_v41 = vsel %vm2457_vm2, %v2762_v59, %v2454_v57  ;;  %v4859_v59 = vld [vmem:[#allocation27_spill] sm:$0xff]  ;;  %vm4266_vm2 = vcmp.ge.s32.totalorder %v4851_v20, 96 }
 0x2df   :  { %v4182_v32 = vsel %vm2460_vm3, %v2462_v29, %v2458_v41  ;;  %v1939_v60 = vmul.f32 %v1935_v39, %v4859_v59  ;;  %v1959_v41 = vld [vmem:[#allocation5 + $0x69] sm:$0xff]  ;;  %vm4271_vm3 = vcmp.lt.s32.totalorder %v4851_v20, 112 }
 0x2e0   :  { %2481 = vst.msk [vmem:[#allocation12 + $0x2] sm:$0x1] %vm3919_vm8, %v4182_v32  ;;  %v1963_v56 = vmul.f32 %v1959_v41, %v4862_v28  ;;  %v4868_v28 = vld [vmem:[#allocation74_spill] sm:$0xff]  ;;  %vm4288_vm7 = vmand %vm4266_vm2, %vm4271_vm3 }
 0x2e1   :  { %2483 = vst [vmem:[#allocation1] sm:$0xff] %v4182_v32  ;;  %v1810_v34 = vpop.permute.xlu0 %1809  ;;  %v1941_v29 = vadd.f32 %v1939_v60, %v1929_v18  ;;  %v4865_v60 = vld [vmem:[#allocation30_spill] sm:$0xff] }
 0x2e2   :  { %1813 = vst [vmem:[#allocation5 + $0x58] sm:$0x3f] %v1810_v34  ;;  %v1801_v57 = vpop.permute.xlu1 %1800  ;;  %v1919_v34 = vmul.f32 %v4864_v63, %v4863_v51  ;;  %v1975_v18 = vmul.f32 %v1971_v25, %v4865_v60 }
 0x2e3   :  { %1804 = vst [vmem:[#allocation5 + $0x28] sm:$0x3f] %v1801_v57  ;;  %v1953_v35 = vadd.f32 %v1951_v5, %v1941_v29  ;;  %v1983_v57 = vld [vmem:[#allocation5 + $0x99] sm:$0xff]  ;;  %v4869_v29 = vld [vmem:[#allocation58_spill] sm:$0xff] }
 0x2e5   :  { %v1965_v59 = vadd.f32 %v1963_v56, %v1953_v35  ;;  %v1921_v35 = vadd.f32 %v1919_v34, %v4868_v28  ;;  %v4870_v56 = vld [vmem:[#allocation31_spill] sm:$0xff] }
 0x2e7   :  { %v1977_v5 = vadd.f32 %v1975_v18, %v1965_v59  ;;  %v2019_v18 = vld [vmem:[#allocation5 + $0xa] sm:$0xff] }
 0x2e8   :  { %v2485_v48 = vld [vmem:[#allocation1 + $0x1] ss:$9 sm:$0xff] }
 0x2e9   :  { %2486 = vrot.lane.b32.xlu0 %v2485_v48, %s2844_s26  ;;  %2490 = vst [vmem:[#allocation1] sm:$0xff] %v4182_v32  ;;  %v1780_v39 = vpop.permute.xlu0 %1779  ;;  %v4867_v48 = vld [vmem:[#allocation43_spill] sm:$0xff] }
 0x2ea   :  { %1783 = vst [vmem:[#allocation5 + $0xd0] sm:$0x3f] %v1780_v39  ;;  %v1819_v43 = vpop.permute.xlu1 %1818  ;;  %v1937_v1 = vld [vmem:[#allocation5 + $0x21] sm:$0xff]  ;;  %v1931_v7 = vmul.f32 %v4867_v48, %v4866_v40  ;;  %v1987_v39 = vmul.f32 %v1983_v57, %v4870_v56  ;;  %v1949_v60 = vld [vmem:[#allocation5 + $0x51] sm:$0xff] }
 0x2eb   :  { %1822 = vst [vmem:[#allocation5 + $0x88] sm:$0x3f] %v1819_v43  ;;  %v1943_v41 = vmul.f32 %v1937_v1, %v4869_v29  ;;  %v2007_v43 = vld [vmem:[#allocation5 + $0xf9] sm:$0xff] }
 0x2ec   :  { %v1933_v51 = vadd.f32 %v1931_v7, %v1921_v35  ;;  %v1989_v17 = vadd.f32 %v1987_v39, %v1977_v5  ;;  %v2011_v34 = vmul.f32 %v2007_v43, %v4872_v24  ;;  %v2031_v7 = vld [vmem:[#allocation5 + $0x3a] sm:$0xff]  ;;  %v4874_v35 = vld [vmem:[#allocation62_spill] sm:$0xff]  ;;  %v4878_v43 = vld [vmem:[#allocation35_spill] sm:$0xff] }
 0x2ed   :  { %v4873_v1 = vld [vmem:[#allocation61_spill] sm:$0xff] }
 0x2ee   :  { %v1955_v57 = vmul.f32 %v1949_v60, %v4873_v1  ;;  %v2055_v60 = vld [vmem:[#allocation4 + $0xa] sm:$0xff] }
 0x2ef   :  { %v2067_v1 = vld [vmem:[#allocation5 + $0x9a] sm:$0xff] }
 0x2f0   :  { %v2492_v36 = vld [vmem:[#allocation1 + $0x2] ss:$9 sm:$0xff] }
 0x2f1   :  { %2493 = vrot.lane.b32.xlu2 %v2492_v36, %s2845_s27  ;;  %2497 = vst [vmem:[#allocation1] sm:$0xff] %v4182_v32  ;;  %v1995_v63 = vld [vmem:[#allocation5 + $0xc9] sm:$0xff]  ;;  %v1837_v25 = vpop.permute.xlu0 %1836  ;;  %v1945_v36 = vadd.f32 %v1943_v41, %v1933_v51  ;;  %v2035_v51 = vmul.f32 %v2031_v7, %v4878_v43  ;;  %v1429_v43 = vpop.permute.xlu2 %1428 }
 0x2f2   :  { %v1999_v40 = vmul.f32 %v1995_v63, %v4871_v49  ;;  %1840 = vst [vmem:[#allocation5 + $0xe8] sm:$0x3f] %v1837_v25  ;;  %v1828_v59 = vpop.permute.xlu1 %1827  ;;  %v1961_v48 = vld [vmem:[#allocation5 + $0x81] sm:$0xff]  ;;  %v2043_v41 = vld [vmem:[#allocation5 + $0x6a] sm:$0xff] }
 0x2f3   :  { %1831 = vst [vmem:[#allocation5 + $0xb8] sm:$0x3f] %v1828_v59  ;;  %v1967_v5 = vmul.f32 %v1961_v48, %v4874_v35  ;;  %v4875_v49 = vld [vmem:[#allocation34_spill] sm:$0xff]  ;;  %v1957_v24 = vadd.f32 %v1955_v57, %v1945_v36  ;;  %v1973_v25 = vld [vmem:[#allocation4 + $0x21] sm:$0xff] }
 0x2f4   :  { %v2001_v28 = vadd.f32 %v1999_v40, %v1989_v17  ;;  %v2023_v56 = vmul.f32 %v2019_v18, %v4875_v49  ;;  %v4879_v48 = vld [vmem:[#allocation36_spill] sm:$0xff] }
 0x2f5   :  { %v1969_v40 = vadd.f32 %v1967_v5, %v1957_v24  ;;  %v2047_v18 = vmul.f32 %v2043_v41, %v4879_v48  ;;  %v4880_v36 = vld [vmem:[#allocation64_spill] sm:$0xff]  ;;  %v2079_v5 = vld [vmem:[#allocation5 + $0xca] sm:$0xff] }
 0x2f6   :  { %v2013_v39 = vadd.f32 %v2011_v34, %v2001_v28  ;;  %v1979_v57 = vmul.f32 %v1973_v25, %v4880_v36  ;;  %v2115_v41 = vld [vmem:[#allocation5 + $0x3b] sm:$0xff] }
 0x2f8   :  { %v2499_v29 = vld [vmem:[#allocation1 + $0x3] ss:$9 sm:$0xff]  ;;  %v2025_v63 = vadd.f32 %v2023_v56, %v2013_v39  ;;  %v1981_v24 = vadd.f32 %v1979_v57, %v1969_v40 }
 0x2f9   :  { %2500 = vrot.lane.b32.xlu1 %v2499_v29, %s2839_s0  ;;  %2504 = vst [vmem:[#allocation1] sm:$0xff] %v4182_v32  ;;  %v1409_v59 = vpop.permute.xlu0 %1408  ;;  %v4881_v29 = vld [vmem:[#allocation37_spill] sm:$0xff] }
 0x2fa   :  { %v2037_v34 = vadd.f32 %v2035_v51, %v2025_v63  ;;  %1414 = vst.msk [vmem:[#allocation12] sm:$0x1] %vm4217_vm6, %v1409_v59  ;;  %v1846_v28 = vpop.permute.xlu1 %1845  ;;  %v1985_v35 = vld [vmem:[#allocation5 + $0xb1] sm:$0xff]  ;;  %v2059_v49 = vmul.f32 %v2055_v60, %v4881_v29  ;;  %v4882_v56 = vld [vmem:[#allocation65_spill] sm:$0xff]  ;;  %v4885_v51 = vld [vmem:[#allocation38_spill] sm:$0xff] }
 0x2fb   :  { %1849 = vst [vmem:[#allocation5 + $0x118] sm:$0x3f] %v1846_v28  ;;  %v1991_v39 = vmul.f32 %v1985_v35, %v4882_v56  ;;  %v2071_v63 = vmul.f32 %v2067_v1, %v4885_v51  ;;  %v1997_v59 = vld [vmem:[#allocation5 + $0xe1] sm:$0xff]  ;;  %v4892_v29 = vld [vmem:[#allocation40_spill] sm:$0xff] }
 0x2fc   :  { %v2049_v7 = vadd.f32 %v2047_v18, %v2037_v34  ;;  %v2091_v60 = vld [vmem:[#allocation5 + $0xfa] sm:$0xff]  ;;  %v4886_v18 = vld [vmem:[#allocation39_spill] sm:$0xff]  ;;  %v4889_v1 = vld [vmem:[#allocation70_spill] sm:$0xff] }
 0x2fd   :  { %v1993_v40 = vadd.f32 %v1991_v39, %v1981_v24  ;;  %v2083_v34 = vmul.f32 %v2079_v5, %v4886_v18  ;;  %v2003_v36 = vmul.f32 %v1997_v59, %v4889_v1  ;;  %v2127_v18 = vld [vmem:[#allocation5 + $0x6b] sm:$0xff] }
 0x2fe   :  { %v2061_v25 = vadd.f32 %v2059_v49, %v2049_v7  ;;  %v2095_v49 = vmul.f32 %v2091_v60, %v4892_v29  ;;  %v2021_v7 = vld [vmem:[#allocation5 + $0x22] sm:$0xff]  ;;  %v2033_v1 = vld [vmem:[#allocation5 + $0x52] sm:$0xff] }
 0x2ff   :  { %v2005_v51 = vadd.f32 %v2003_v36, %v1993_v40 }
 0x300   :  { %v2506_v52 = vld [vmem:[#allocation1 + $0x4] ss:$9 sm:$0xff]  ;;  %v2073_v48 = vadd.f32 %v2071_v63, %v2061_v25 }
 0x301   :  { %2507 = vrot.lane.b32.xlu0 %v2506_v52, %s2842_s24  ;;  %2511 = vst [vmem:[#allocation1] sm:$0xff] %v4182_v32  ;;  %v2103_v52 = vld [vmem:[#allocation5 + $0xb] sm:$0xff]  ;;  %v1439_v57 = vpop.permute.xlu0 %1438  ;;  %v4895_v25 = vld [vmem:[#allocation45_spill] sm:$0xff] }
 0x302   :  { %v2085_v56 = vadd.f32 %v2083_v34, %v2073_v48  ;;  %v2009_v39 = vld [vmem:[#allocation5 + $0x111] sm:$0xff]  ;;  %v1419_v5 = vpop.permute.xlu1 %1418  ;;  %v2107_v59 = vmul.f32 %v2103_v52, %v4895_v25  ;;  %v2027_v48 = vmul.f32 %v2021_v7, %v4813_v58  ;;  %v4900_v52 = vld [vmem:[#allocation49_spill] sm:$0xff] }
 0x303   :  { %v2015_v63 = vmul.f32 %v2009_v39, %v4811_v10  ;;  %1424 = vst.msk [vmem:[#allocation12] sm:$0x1] %vm4244_vm14, %v1419_v5  ;;  %v2119_v36 = vmul.f32 %v2115_v41, %v4900_v52  ;;  %v2139_v58 = vld [vmem:[#allocation4 + $0xb] sm:$0xff]  ;;  %v4901_v7 = vld [vmem:[#allocation75_spill] sm:$0xff]  ;;  %v1459_v39 = vpop.permute.xlu2 %1458 }
 0x304   :  { %v2097_v60 = vadd.f32 %v2095_v49, %v2085_v56  ;;  %1434 = vst.msk [vmem:[#allocation12] sm:$0x1] %vm4249_vm15, %v1429_v43  ;;  %v2045_v49 = vld [vmem:[#allocation5 + $0x82] sm:$0xff]  ;;  %v2039_v56 = vmul.f32 %v2033_v1, %v4901_v7  ;;  %v4905_v1 = vmov 0  ;;  %v2069_v52 = vld [vmem:[#allocation5 + $0xb2] sm:$0xff] }
 0x305   :  { %v2017_v34 = vadd.f32 %v2015_v63, %v2005_v51  ;;  %1444 = vst.msk [vmem:[#allocation12] sm:$0x1] %vm4254_vm1, %v1439_v57  ;;  %v2057_v51 = vld [vmem:[#allocation4 + $0x22] sm:$0xff]  ;;  %v2051_v20 = vmul.f32 %v2045_v49, %v4733_v11  ;;  %v4906_v1 = vsel %vm4293_vm9, 4294967295, %v4905_v1  ;;  %v4909_v11 = vld [vmem:[#allocation53_spill] sm:$0xff] }
 0x306   :  { %v2109_v43 = vadd.f32 %v2107_v59, %v2097_v60  ;;  %v4902_v63 = vld [vmem:[#allocation51_spill] sm:$0xff]  ;;  %v2151_v59 = vld [vmem:[#allocation5 + $0x9b] sm:$0xff]  ;;  %4907 = vst [vmem:[#allocation46_spill] sm:$0xff] %v4906_v1  ;;  %v2063_v10 = vmul.f32 %v2057_v51, %v4817_v38 }
 0x307   :  { %v2029_v5 = vadd.f32 %v2027_v48, %v2017_v34  ;;  %v2131_v57 = vmul.f32 %v2127_v18, %v4902_v63  ;;  %v4908_v48 = vld [vmem:[#allocation52_spill] sm:$0xff]  ;;  %v2155_v49 = vmul.f32 %v2151_v59, %v4909_v11  ;;  %v4912_v59 = vld [vmem:[#allocation82_spill] sm:$0xff]  ;;  %v2199_v1 = vld [vmem:[#allocation5 + $0x3c] sm:$0xff] }
 0x308   :  { %v2513_v29 = vld [vmem:[#allocation1 + $0x5] ss:$9 sm:$0xff]  ;;  %v2121_v25 = vadd.f32 %v2119_v36, %v2109_v43  ;;  %v2143_v18 = vmul.f32 %v2139_v58, %v4908_v48 }
 0x309   :  { %2514 = vrot.lane.b32.xlu2 %v2513_v29, %s2840_s2  ;;  %2518 = vst [vmem:[#allocation1] sm:$0xff] %v4182_v32  ;;  %v2041_v60 = vadd.f32 %v2039_v56, %v2029_v5  ;;  %v1471_v29 = vpop.permute.xlu0 %1470  ;;  %v2163_v36 = vld [vmem:[#allocation5 + $0xcb] sm:$0xff]  ;;  %v2081_v56 = vld [vmem:[#allocation5 + $0xe2] sm:$0xff] }
 0x30a   :  { %v2133_v34 = vadd.f32 %v2131_v57, %v2121_v25  ;;  %1473 = vst.msk [vmem:[#allocation12 + $0x1] sm:$0x1] %vm4176_vm0, %v1471_v29  ;;  %v1449_v40 = vpop.permute.xlu1 %1448  ;;  %v2175_v58 = vld [vmem:[#allocation5 + $0xfb] sm:$0xff]  ;;  %v4911_v48 = vld [vmem:[#allocation54_spill] sm:$0xff]  ;;  %v2093_v51 = vld [vmem:[#allocation5 + $0x112] sm:$0xff] }
 0x30b   :  { %v2053_v43 = vadd.f32 %v2051_v20, %v2041_v60  ;;  %1454 = vst.msk [vmem:[#allocation12] sm:$0x1] %vm4288_vm7, %v1449_v40  ;;  %v4910_v5 = vld [vmem:[#allocation81_spill] sm:$0xff]  ;;  %v2167_v38 = vmul.f32 %v2163_v36, %v4911_v48  ;;  %v2187_v20 = vld [vmem:[#allocation5 + $0xc] sm:$0xff]  ;;  %v2087_v60 = vmul.f32 %v2081_v56, %v4912_v59 }
 0x30c   :  { %v2145_v7 = vadd.f32 %v2143_v18, %v2133_v34  ;;  %1464 = vst.msk [vmem:[#allocation12] sm:$0x1] %vm4293_vm9, %v1459_v39  ;;  %v2075_v63 = vmul.f32 %v2069_v52, %v4910_v5  ;;  %v4913_v34 = vld [vmem:[#allocation59_spill] sm:$0xff]  ;;  %v2105_v39 = vld [vmem:[#allocation5 + $0x23] sm:$0xff]  ;;  %v1485_v52 = vpop.permute.xlu2 %1484 }
 0x30d   :  { %v2065_v57 = vadd.f32 %v2063_v10, %v2053_v43  ;;  %v2179_v40 = vmul.f32 %v2175_v58, %v4913_v34  ;;  %v2099_v43 = vmul.f32 %v2093_v51, %v4822_v15  ;;  %v2211_v48 = vld [vmem:[#allocation5 + $0x6c] sm:$0xff]  ;;  %v2223_v15 = vld [vmem:[#allocation4 + $0xc] sm:$0xff] }
 0x30e   :  { %v2157_v29 = vadd.f32 %v2155_v49, %v2145_v7  ;;  %v4914_v49 = vld [vmem:[#allocation60_spill] sm:$0xff]  ;;  %v4915_v56 = vld [vmem:[#allocation63_spill] sm:$0xff]  ;;  %v2227_v34 = vmul.f32 %v2223_v15, %v4823_v55 }
 0x30f   :  { %v2077_v18 = vadd.f32 %v2075_v63, %v2065_v57  ;;  %v2191_v36 = vmul.f32 %v2187_v20, %v4914_v49  ;;  %v2117_v7 = vld [vmem:[#allocation5 + $0x53] sm:$0xff]  ;;  %v2203_v58 = vmul.f32 %v2199_v1, %v4915_v56  ;;  %v2129_v57 = vld [vmem:[#allocation5 + $0x83] sm:$0xff]  ;;  %v2215_v20 = vmul.f32 %v2211_v48, %v4821_v31 }
 0x310   :  { %v2520_v25 = vld [vmem:[#allocation1 + $0x6] ss:$9 sm:$0xff]  ;;  %v2169_v11 = vadd.f32 %v2167_v38, %v2157_v29  ;;  %v2123_v38 = vmul.f32 %v2117_v7, %v4750_v8  ;;  %v2135_v1 = vmul.f32 %v2129_v57, %v3534_v13 }
 0x311   :  { %2521 = vrot.lane.b32.xlu1 %v2520_v25, %s2843_s25  ;;  %2525 = vst [vmem:[#allocation1] sm:$0xff] %v4182_v32  ;;  %v2089_v10 = vadd.f32 %v2087_v60, %v2077_v18  ;;  %v2111_v32 = vmul.f32 %v2105_v39, %v4824_v42  ;;  %v1492_v29 = vpop.permute.xlu0 %1491  ;;  %v2141_v42 = vld [vmem:[#allocation4 + $0x23] sm:$0xff]  ;;  %v2235_v60 = vld [vmem:[#allocation5 + $0x9c] sm:$0xff]  ;;  %v2189_v56 = vld [vmem:[#allocation5 + $0x24] sm:$0xff] }
 0x312   :  { %v2181_v5 = vadd.f32 %v2179_v40, %v2169_v11  ;;  %v1478_v25 = vpop.permute.xlu1 %1477  ;;  %v2153_v39 = vld [vmem:[#allocation5 + $0xb3] sm:$0xff]  ;;  %v2147_v11 = vmul.f32 %v2141_v42, %v4753_v47 }
 0x313   :  { %v2101_v22 = vadd.f32 %v2099_v43, %v2089_v10  ;;  %1480 = vst.msk [vmem:[#allocation12 + $0x1] sm:$0x1] %vm4217_vm6, %v1478_v25  ;;  %v2165_v43 = vld [vmem:[#allocation5 + $0xe3] sm:$0xff]  ;;  %v2159_v31 = vmul.f32 %v2153_v39, %v3556_v9  ;;  %v2177_v25 = vld [vmem:[#allocation5 + $0x113] sm:$0xff] }
 0x314   :  { %v2193_v63 = vadd.f32 %v2191_v36, %v2181_v5  ;;  %1487 = vst.msk [vmem:[#allocation12 + $0x1] sm:$0x1] %vm4244_vm14, %v1485_v52  ;;  %v2247_v52 = vld [vmem:[#allocation5 + $0xcc] sm:$0xff]  ;;  %v2259_v36 = vld [vmem:[#allocation5 + $0xfc] sm:$0xff]  ;;  %v1506_v5 = vpop.permute.xlu2 %1505  ;;  %v2183_v57 = vmul.f32 %v2177_v25, %v3579_v33  ;;  %v2201_v15 = vld [vmem:[#allocation5 + $0x54] sm:$0xff] }
 0x315   :  { %v2113_v51 = vadd.f32 %v2111_v32, %v2101_v22  ;;  %1494 = vst.msk [vmem:[#allocation12 + $0x1] sm:$0x1] %vm4249_vm15, %v1492_v29  ;;  %v2239_v22 = vmul.f32 %v2235_v60, %v4825_v16  ;;  %v2251_v55 = vmul.f32 %v2247_v52, %v4826_v27  ;;  %v2271_v47 = vld [vmem:[#allocation5 + $0xd] sm:$0xff]  ;;  %v2171_v16 = vmul.f32 %v2165_v43, %v3564_v61  ;;  %v2307_v60 = vld [vmem:[#allocation4 + $0xd] sm:$0xff] }
 0x316   :  { %v2205_v59 = vadd.f32 %v2203_v58, %v2193_v63  ;;  %v2263_v32 = vmul.f32 %v2259_v36, %v4827_v45  ;;  %v2283_v58 = vld [vmem:[#allocation5 + $0x3d] sm:$0xff]  ;;  %v2275_v29 = vmul.f32 %v2271_v47, %v4828_v19  ;;  %v2207_v45 = vmul.f32 %v2201_v15, %v4831_v26  ;;  %v2237_v52 = vld [vmem:[#allocation5 + $0xb4] sm:$0xff] }
 0x317   :  { %v2125_v18 = vadd.f32 %v2123_v38, %v2113_v51  ;;  %v2295_v38 = vld [vmem:[#allocation5 + $0x6d] sm:$0xff]  ;;  %v2195_v51 = vmul.f32 %v2189_v56, %v3590_v62  ;;  %v2249_v43 = vld [vmem:[#allocation5 + $0xe4] sm:$0xff] }
 0x318   :  { %v2217_v40 = vadd.f32 %v2215_v20, %v2205_v59  ;;  %v2287_v20 = vmul.f32 %v2283_v58, %v3503_v0  ;;  %v2213_v59 = vld [vmem:[#allocation5 + $0x84] sm:$0xff] }
 0x319   :  { %v2137_v8 = vadd.f32 %v2135_v1, %v2125_v18  ;;  %v2225_v18 = vld [vmem:[#allocation4 + $0x24] sm:$0xff]  ;;  %v2219_v19 = vmul.f32 %v2213_v59, %v4758_v44  ;;  %v2297_v58 = vld [vmem:[#allocation5 + $0x85] sm:$0xff] }
 0x31a   :  { %v2229_v10 = vadd.f32 %v2227_v34, %v2217_v40  ;;  %v1499_v49 = vpop.permute.xlu1 %1498  ;;  %v2299_v34 = vmul.f32 %v2295_v38, %v3529_v3  ;;  %v2319_v40 = vld [vmem:[#allocation5 + $0x9d] sm:$0xff]  ;;  %v2231_v0 = vmul.f32 %v2225_v18, %v3640_v14  ;;  %v2243_v3 = vmul.f32 %v2237_v52, %v3648_v21  ;;  %v2285_v21 = vld [vmem:[#allocation5 + $0x55] sm:$0xff]  ;;  %v4916_v38 = vld [vmem:[#allocation99_spill] sm:$0xff] }
 0x31b   :  { %v2149_v7 = vadd.f32 %v2147_v11, %v2137_v8  ;;  %1501 = vst.msk [vmem:[#allocation12 + $0x1] sm:$0x1] %vm4254_vm1, %v1499_v49  ;;  %v2311_v11 = vmul.f32 %v2307_v60, %v4829_v30  ;;  %v2331_v8 = vld [vmem:[#allocation5 + $0xcd] sm:$0xff]  ;;  %v2343_v49 = vld [vmem:[#allocation5 + $0xfd] sm:$0xff]  ;;  %v2255_v30 = vmul.f32 %v2249_v43, %v3659_v54  ;;  %v2333_v59 = vld [vmem:[#allocation5 + $0xe5] sm:$0xff] }
 0x31c   :  { %v2241_v13 = vadd.f32 %v2239_v22, %v2229_v10  ;;  %1508 = vst.msk [vmem:[#allocation12 + $0x1] sm:$0x1] %vm4288_vm7, %v1506_v5  ;;  %v2323_v10 = vmul.f32 %v2319_v40, %v4830_v12  ;;  %v2335_v44 = vmul.f32 %v2331_v8, %v3603_v46  ;;  %v2355_v5 = vld [vmem:[#allocation5 + $0xe] sm:$0xff]  ;;  %v2347_v14 = vmul.f32 %v2343_v49, %v4764_v6  ;;  %v2369_v8 = vld [vmem:[#allocation5 + $0x56] sm:$0xff] }
 0x31d   :  { %v2161_v48 = vadd.f32 %v2159_v31, %v2149_v7  ;;  %v2261_v7 = vld [vmem:[#allocation5 + $0x114] sm:$0xff]  ;;  %v4921_v52 = vld [vmem:[#allocation103_spill] sm:$0xff] }
 0x31e   :  { %v2253_v9 = vadd.f32 %v2251_v55, %v2241_v13  ;;  %v2273_v55 = vld [vmem:[#allocation5 + $0x25] sm:$0xff]  ;;  %v2267_v12 = vmul.f32 %v2261_v7, %v3675_v23  ;;  %v2303_v23 = vmul.f32 %v2297_v58, %v4835_v2  ;;  %v4919_v18 = vld [vmem:[#allocation100_spill] sm:$0xff] }
 0x31f   :  { %v2173_v63 = vadd.f32 %v2171_v16, %v2161_v48  ;;  %v2359_v16 = vmul.f32 %v2355_v5, %v3656_v4  ;;  %v2367_v48 = vld [vmem:[#allocation5 + $0x3e] sm:$0xff]  ;;  %v2279_v56 = vmul.f32 %v2273_v55, %v4832_v53  ;;  %v2321_v4 = vld [vmem:[#allocation5 + $0xb5] sm:$0xff] }
 0x320   :  { %v2265_v27 = vadd.f32 %v2263_v32, %v2253_v9  ;;  %v2371_v54 = vmul.f32 %v2367_v48, %v4833_v37  ;;  %v2403_v2 = vld [vmem:[#allocation5 + $0x9e] sm:$0xff]  ;;  %v4926_v55 = vld [vmem:[#allocation76_spill] sm:$0xff] }
 0x321   :  { %v2185_v42 = vadd.f32 %v2183_v57, %v2173_v63  ;;  %v2291_v63 = vmul.f32 %v2285_v21, %v4834_v50  ;;  %v2309_v57 = vld [vmem:[#allocation4 + $0x25] sm:$0xff]  ;;  %v4927_v48 = vld [vmem:[#allocation106_spill] sm:$0xff] }
 0x322   :  { %v2277_v61 = vadd.f32 %v2275_v29, %v2265_v27  ;;  %v2379_v29 = vld [vmem:[#allocation5 + $0x6e] sm:$0xff] }
 0x323   :  { %v2197_v1 = vadd.f32 %v2195_v51, %v2185_v42  ;;  %v2315_v51 = vmul.f32 %v2309_v57, %v4916_v38  ;;  %v4917_v42 = vld [vmem:[#allocation97_spill] sm:$0xff]  ;;  %v4931_v38 = vld [vmem:[#allocation16_spill] sm:$0xff] }
 0x324   :  { %v2289_v33 = vadd.f32 %v2287_v20, %v2277_v61  ;;  %v2383_v20 = vmul.f32 %v2379_v29, %v4917_v42  ;;  %v2391_v61 = vld [vmem:[#allocation4 + $0xe] sm:$0xff]  ;;  %v2345_v50 = vld [vmem:[#allocation5 + $0x115] sm:$0xff] }
 0x325   :  { %v2209_v39 = vadd.f32 %v2207_v45, %v2197_v1  ;;  %v4918_v45 = vld [vmem:[#allocation101_spill] sm:$0xff] }
 0x326   :  { %v2301_v62 = vadd.f32 %v2299_v34, %v2289_v33  ;;  %v2327_v37 = vmul.f32 %v2321_v4, %v4918_v45  ;;  %v2395_v34 = vmul.f32 %v2391_v61, %v4919_v18  ;;  %v4920_v33 = vld [vmem:[#allocation102_spill] sm:$0xff]  ;;  %v2429_v57 = vld [vmem:[#allocation5 + $0x116] sm:$0xff] }
 0x327   :  { %v2221_v22 = vadd.f32 %v2219_v19, %v2209_v39  ;;  %v2339_v40 = vmul.f32 %v2333_v59, %v4920_v33  ;;  %v2357_v39 = vld [vmem:[#allocation5 + $0x26] sm:$0xff] }
 0x328   :  { %v2313_v26 = vadd.f32 %v2311_v11, %v2301_v62 }
 0x329   :  { %v2233_v36 = vadd.f32 %v2231_v0, %v2221_v22  ;;  %v2351_v0 = vmul.f32 %v2345_v50, %v4921_v52  ;;  %v4922_v22 = vld [vmem:[#allocation104_spill] sm:$0xff] }
 0x32a   :  { %v2325_v31 = vadd.f32 %v2323_v10, %v2313_v26  ;;  %v2407_v10 = vmul.f32 %v2403_v2, %v4922_v22  ;;  %v4923_v26 = vld [vmem:[#allocation105_spill] sm:$0xff] }
 0x32b   :  { %v2245_v13 = vadd.f32 %v2243_v3, %v2233_v36  ;;  %v2363_v43 = vmul.f32 %v2357_v39, %v4923_v26  ;;  %v2415_v3 = vld [vmem:[#allocation5 + $0xce] sm:$0xff]  ;;  %v2381_v36 = vld [vmem:[#allocation5 + $0x86] sm:$0xff] }
 0x32c   :  { %v2337_v25 = vadd.f32 %v2335_v44, %v2325_v31  ;;  %v4924_v31 = vld [vmem:[#allocation108_spill] sm:$0xff] }
 0x32d   :  { %v2257_v47 = vadd.f32 %v2255_v30, %v2245_v13  ;;  %v2375_v44 = vmul.f32 %v2369_v8, %v4924_v31  ;;  %v2393_v30 = vld [vmem:[#allocation4 + $0x26] sm:$0xff]  ;;  %v4925_v13 = vld [vmem:[#allocation107_spill] sm:$0xff] }
 0x32e   :  { %v2349_v32 = vadd.f32 %v2347_v14, %v2337_v25  ;;  %v2419_v14 = vmul.f32 %v2415_v3, %v4925_v13  ;;  %v2387_v25 = vmul.f32 %v2381_v36, %v4926_v55  ;;  %v2399_v21 = vmul.f32 %v2393_v30, %v4927_v48  ;;  %v2527_v22 = vld [vmem:[#allocation1 + $0x7] ss:$9 sm:$0xff] }
 0x32f   :  { %v2269_v46 = vadd.f32 %v2267_v12, %v2257_v47  ;;  %v2427_v12 = vld [vmem:[#allocation5 + $0xfe] sm:$0xff] }
 0x330   :  { %v2361_v9 = vadd.f32 %v2359_v16, %v2349_v32  ;;  %v2405_v16 = vld [vmem:[#allocation5 + $0xb6] sm:$0xff] }
 0x331   :  { %v2281_v6 = vadd.f32 %v2279_v56, %v2269_v46  ;;  %v2417_v46 = vld [vmem:[#allocation5 + $0xe6] sm:$0xff] }
 0x332   :  { %v2373_v15 = vadd.f32 %v2371_v54, %v2361_v9  ;;  %v4928_v9 = vld [vmem:[#allocation109_spill] sm:$0xff]  ;;  %v4929_v54 = vld [vmem:[#allocation110_spill] sm:$0xff] }
 0x333   :  { %v2293_v27 = vadd.f32 %v2291_v63, %v2281_v6  ;;  %v2431_v58 = vmul.f32 %v2427_v12, %v4928_v9  ;;  %v2411_v63 = vmul.f32 %v2405_v16, %v4929_v54 }
 0x334   :  { %v2385_v60 = vadd.f32 %v2383_v20, %v2373_v15  ;;  %v4930_v15 = vld [vmem:[#allocation17_spill] sm:$0xff] }
 0x335   :  { %v2305_v53 = vadd.f32 %v2303_v23, %v2293_v27  ;;  %v2423_v23 = vmul.f32 %v2417_v46, %v4930_v15  ;;  %v4932_v20 = vld [vmem:[#allocation41_spill] sm:$0xff] }
 0x336   :  { %v2397_v11 = vadd.f32 %v2395_v34, %v2385_v60 }
 0x337   :  { %v2317_v1 = vadd.f32 %v2315_v51, %v2305_v53  ;;  %v2435_v51 = vmul.f32 %v2429_v57, %v4931_v38 }
 0x338   :  { %v2409_v7 = vadd.f32 %v2407_v10, %v2397_v11 }
 0x339   :  { %v2329_v19 = vadd.f32 %v2327_v37, %v2317_v1 }
 0x33a   :  { %v2421_v32 = vadd.f32 %v2419_v14, %v2409_v7 }
 0x33b   :  { %v2341_v62 = vadd.f32 %v2339_v40, %v2329_v19 }
 0x33c   :  { %v2433_v29 = vadd.f32 %v2431_v58, %v2421_v32 }
 0x33d   :  { %v2353_v49 = vadd.f32 %v2351_v0, %v2341_v62 }
 0x33e   :  { %v2439_v53 = vadd.f32 %v2433_v29, %v4932_v20 }
 0x33f   :  { %v2365_v5 = vadd.f32 %v2363_v43, %v2353_v49 }
 0x341   :  { %v2377_v47 = vadd.f32 %v2375_v44, %v2365_v5  ;;  %v4935_v5 = vld [vmem:[#allocation18_spill] sm:$0xff] }
 0x343   :  { %v2389_v56 = vadd.f32 %v2387_v25, %v2377_v47 }
 0x345   :  { %v2401_v6 = vadd.f32 %v2399_v21, %v2389_v56 }
 0x347   :  { %v2413_v27 = vadd.f32 %v2411_v63, %v2401_v6 }
 0x349   :  { %v2425_v4 = vadd.f32 %v2423_v23, %v2413_v27 }
 0x34b   :  { %v2437_v42 = vadd.f32 %v2435_v51, %v2425_v4  ;;  %v2494_v1 = vpop.permute.xlu2 %2493 }
 0x34d   :  { %v2441_v61 = vadd.f32 %v2439_v53, %v2437_v42 }
 0x34f   :  { %v2703_v59 = vmul.f32 -1.442695, %v2441_v61 }
 0x351   :  { %2763 = vpow2.f32 %v2703_v59 }
 0x357   :  { %v2764_v60 = vpop.eup %2763 }
 0x358   :  { %v2449_v37 = vadd.f32 1.0, %v2764_v60 }
 0x35a   :  { %2765 = vrcp.f32 %v2449_v37  ;;  %v2476_v40 = vand.u32 2147483648, %v2449_v37  ;;  %v2474_v2 = vand.u32 2147483647, %v2449_v37  ;;  %vm2470_vm11 = vweird.f32 %v2449_v37 }
 0x35b   :  { %v2487_v45 = vpop.permute.xlu0 %2486 }
 0x35c   :  { %2489 = vst.msk [vmem:[#allocation12 + $0x2] sm:$0x1] %vm4176_vm0, %v2487_v45  ;;  %v2477_v11 = vor.u32 1.1754944e-38, %v2476_v40  ;;  %vm2475_vm13 = vcmp.eq.f32.partialorder %v2474_v2, 8.507059e+37 }
 0x35d   :  { %2496 = vst.msk [vmem:[#allocation12 + $0x2] sm:$0x1] %vm4217_vm6, %v2494_v1 }
 0x360   :  { %v2766_v18 = vpop.eup %2765 }
 0x361   :  { %v2466_v34 = vmul.f32 %v2766_v18, %v2449_v37  ;;  %vm2471_vm10 = vweird.f32 %v2766_v18 }
 0x362   :  { %vm2472_vm12 = vmor %vm2470_vm11, %vm2471_vm10 }
 0x363   :  { %v2467_v33 = vsub.f32 1.0, %v2466_v34  ;;  %v2515_v26 = vpop.permute.xlu2 %2514 }
 0x365   :  { %v2468_v19 = vmul.f32 %v2766_v18, %v2467_v33 }
 0x367   :  { %v2469_v39 = vadd.f32 %v2766_v18, %v2468_v19 }
 0x369   :  { %v2473_v52 = vsel %vm2472_vm12, %v2766_v18, %v2469_v39 }
 0x36a   :  { %v2478_v0 = vsel %vm2475_vm13, %v2477_v11, %v2473_v52 }
 0x36b   :  { %v2501_v62 = vpop.permute.xlu1 %2500  ;;  %2532 = vst.msk [vmem:[#allocation12 + $0x3] sm:$0x1] %vm3919_vm8, %v2478_v0 }
 0x36c   :  { %2503 = vst.msk [vmem:[#allocation12 + $0x2] sm:$0x1] %vm4244_vm14, %v2501_v62 }
 0x36d   :  { %2534 = vst [vmem:[#allocation1] sm:$0xff] %v2478_v0 }
 0x373   :  { %v2508_v10 = vpop.permute.xlu0 %2507 }
 0x374   :  { %2510 = vst.msk [vmem:[#allocation12 + $0x2] sm:$0x1] %vm4249_vm15, %v2508_v10  ;;  %v2536_v43 = vld [vmem:[#allocation1 + $0x1] ss:$9 sm:$0xff] }
 0x375   :  { %2517 = vst.msk [vmem:[#allocation12 + $0x2] sm:$0x1] %vm4254_vm1, %v2515_v26  ;;  %2537 = vrot.lane.b32.xlu1 %v2536_v43, %s2844_s26 }
 0x376   :  { %2541 = vst [vmem:[#allocation1] sm:$0xff] %v2478_v0 }
 0x37d   :  { %v2543_v49 = vld [vmem:[#allocation1 + $0x2] ss:$9 sm:$0xff] }
 0x37e   :  { %2544 = vrot.lane.b32.xlu0 %v2543_v49, %s2845_s27  ;;  %2548 = vst [vmem:[#allocation1] sm:$0xff] %v2478_v0 }
 0x383   :  { %v2522_v3 = vpop.permute.xlu1 %2521 }
 0x384   :  { %2524 = vst.msk [vmem:[#allocation12 + $0x2] sm:$0x1] %vm4288_vm7, %v2522_v3 }
 0x385   :  { %v2550_v36 = vld [vmem:[#allocation1 + $0x3] ss:$9 sm:$0xff] }
 0x386   :  { %2551 = vrot.lane.b32.xlu2 %v2550_v36, %s2839_s0  ;;  %2555 = vst [vmem:[#allocation1] sm:$0xff] %v2478_v0  ;;  %s2587_s0 = sshll.u32 %s2853_s1, 4  ;;  %s2588_s0 = int_to_ptr.vmem [resolvable:$true] %s2587_s0 }
 0x38d   :  { %v2557_v31 = vld [vmem:[#allocation1 + $0x4] ss:$9 sm:$0xff] }
 0x38e   :  { %2558 = vrot.lane.b32.xlu1 %v2557_v31, %s2842_s24  ;;  %2562 = vst [vmem:[#allocation1] sm:$0xff] %v2478_v0  ;;  %s2589_s24 = sshll.u32 %s4424_s3, 4  ;;  %s2590_s24 = int_to_ptr.hbm [resolvable:$true] %s2589_s24 }
 0x395   :  { %v2564_v44 = vld [vmem:[#allocation1 + $0x5] ss:$9 sm:$0xff] }
 0x396   :  { %2528 = vrot.lane.b32.xlu1 %v2527_v22, %s2841_s23  ;;  %2565 = vrot.lane.b32.xlu0 %v2564_v44, %s2840_s2  ;;  %2569 = vst [vmem:[#allocation1] sm:$0xff] %v2478_v0 }
 0x39d   :  { %v2571_v7 = vld [vmem:[#allocation1 + $0x6] ss:$9 sm:$0xff] }
 0x39e   :  { %1512 = vrot.lane.b32.xlu0 %v4935_v5, %s2841_s23  ;;  %2572 = vrot.lane.b32.xlu2 %v2571_v7, %s2843_s25  ;;  %2576 = vst [vmem:[#allocation1] sm:$0xff] %v2478_v0 }
 0x3a5   :  { %v2578_v30 = vld [vmem:[#allocation1 + $0x7] ss:$9 sm:$0xff] }
 0x3a6   :  { %2579 = vrot.lane.b32.xlu2 %v2578_v30, %s2841_s23 }
 0x3e0   :  { %v2552_v55 = vpop.permute.xlu2 %2551 }
 0x3e7   :  { %v2538_v13 = vpop.permute.xlu1 %2537 }
 0x3e8   :  { %2540 = vst.msk [vmem:[#allocation12 + $0x3] sm:$0x1] %vm4176_vm0, %v2538_v13 }
 0x3f0   :  { %v2545_v14 = vpop.permute.xlu0 %2544 }
 0x3f1   :  { %2547 = vst.msk [vmem:[#allocation12 + $0x3] sm:$0x1] %vm4217_vm6, %v2545_v14 }
 0x3f2   :  { %2554 = vst.msk [vmem:[#allocation12 + $0x3] sm:$0x1] %vm4244_vm14, %v2552_v55 }
 0x3f8   :  { %v2573_v47 = vpop.permute.xlu2 %2572 }
 0x400   :  { %v2559_v25 = vpop.permute.xlu1 %2558  ;;  %v2580_v21 = vpop.permute.xlu2 %2579 }
 0x401   :  { %2561 = vst.msk [vmem:[#allocation12 + $0x3] sm:$0x1] %vm4249_vm15, %v2559_v25 }
 0x408   :  { %v2529_v12 = vpop.permute.xlu1 %2528  ;;  %v2566_v16 = vpop.permute.xlu0 %2565 }
 0x409   :  { %2531 = vst.msk [vmem:[#allocation12 + $0x2] sm:$0x1] %vm4293_vm9, %v2529_v12 }
 0x40a   :  { %2568 = vst.msk [vmem:[#allocation12 + $0x3] sm:$0x1] %vm4254_vm1, %v2566_v16 }
 0x40b   :  { %2575 = vst.msk [vmem:[#allocation12 + $0x3] sm:$0x1] %vm4288_vm7, %v2573_v47 }
 0x40c   :  { %2582 = vst.msk [vmem:[#allocation12 + $0x3] sm:$0x1] %vm4293_vm9, %v2580_v21 }
 0x410   :  { %v1513_v17 = vpop.permute.xlu0 %1512 }
 0x411   :  { %1515 = vst.msk [vmem:[#allocation12 + $0x1] sm:$0x1] %vm4293_vm9, %v1513_v17 }
 0x412   :  { %2595 = dma.vmem_to_hbm [thread:$0]  %s2588_s0, 64, %s2590_s24, [#allocation9], %s2845_s27, %s2845_s27, %s2848_s29  }
 0x413   :  { %2833 = dma.done.wait [#allocation9], 64  }
 0x414   :  { %2834 = vsyncadd [#allocation9], 4294967232 }
 0x415   :  { %2600 = vsyncpa [#allocation8], 1 }
 0x416   :  { %2601 = vsyncpa [#allocation9], 1 }
 0x417   :  { %2602 = vsyncpa [#allocation10], 1 }

</bundles_post_ra>
